<compile_context>
chip_gen: v7x
topology: tpu7x:2x2x1
jax: 0.10.0
libtpu: 0.0.40
codegen_flags: <defaults>
</compile_context>

<pallas_src>
import math

import jax
import jax.numpy as jnp
from jax.experimental import pallas as pl
from jax.experimental.pallas import tpu as pltpu

# ----------------------------- configuration --------------------------------
BATCH = 2        # batch
IN_CH = 4        # in_channels
OUT_CH = 4       # out_channels
IMG = 16         # spatial extent (H = W)
PATCH = 2        # patch_size
SPATIAL = 2      # number of spatial dims
HID = 32         # hid_channels
MOD = 32         # mod_features
BLOCKS = 2       # hid_blocks
FFN = 4 * HID    # ffn_factor * hid_channels
EPS = 1e-5

HP = IMG // PATCH
L = HP * HP                       # tokens per batch element (64)
BL = BATCH * L                    # folded rows (128)
PATCH_DIM = IN_CH * PATCH * PATCH          # 16
OUT_PATCH_DIM = OUT_CH * PATCH * PATCH     # 16
OUT_PAD = 128                     # out_proj padded to a lane-dense store

assert FFN == 128, "bias packing assumes FFN == 128"

# static offsets into the per-block weight slab (width = 2*FFN + 6*HID = 448)
W1_OFF = 0
W2T_OFF = FFN
QKV_OFF = 2 * FFN
WY_OFF = 2 * FFN + 5 * HID
WTOT = 2 * FFN + 6 * HID


# ----------------------------- fused Pallas kernel ---------------------------
def fused_vit_kernel(tok_ref, abcd_ref, pecs_ref, bias_ref,
                     in_w_ref, out_w_ref, wblk_ref, o_ref):
    f32, bf16 = jnp.float32, jnp.bfloat16
    C = HID

    in_b = bias_ref[0:1, 0:C]           # (1, 32)
    out_b = bias_ref[1:2, :]            # (1, 128) (zero beyond OUT_PATCH_DIM)
    pe = pecs_ref[0]                    # (BL, C)

    # ---------------- in_proj + positional embedding ------------------------
    skip = jnp.dot(tok_ref[...].astype(bf16), in_w_ref[...],
                   preferred_element_type=f32) + in_b          # (BL, C)
    x = skip + pe

    # ---------------- ViT blocks (unrolled, activations stay in VMEM) -------
    for bi in range(BLOCKS):
        # precomputed adaLN row slabs (already broadcast over tokens)
        a = abcd_ref[4 * bi + 0]
        b_ = abcd_ref[4 * bi + 1]
        c = abcd_ref[4 * bi + 2]
        d = abcd_ref[4 * bi + 3]
        cos = pecs_ref[1 + 2 * bi]
        sin = pecs_ref[2 + 2 * bi]

        by = bias_ref[2 + bi:3 + bi, 0:C]
        b2 = bias_ref[2 + BLOCKS + bi:3 + BLOCKS + bi, 0:C]
        b1 = bias_ref[2 + 2 * BLOCKS + bi:3 + 2 * BLOCKS + bi, :]

        w1 = wblk_ref[bi, :, W1_OFF:W1_OFF + FFN]
        w2t = wblk_ref[bi, :, W2T_OFF:W2T_OFF + FFN]        # stored transposed
        wq = wblk_ref[bi, :, QKV_OFF + 0 * C:QKV_OFF + 1 * C]
        wk = wblk_ref[bi, :, QKV_OFF + 1 * C:QKV_OFF + 2 * C]
        wv = wblk_ref[bi, :, QKV_OFF + 2 * C:QKV_OFF + 3 * C]
        wqp = wblk_ref[bi, :, QKV_OFF + 3 * C:QKV_OFF + 4 * C]   # Wq @ P
        wkp = wblk_ref[bi, :, QKV_OFF + 4 * C:QKV_OFF + 5 * C]   # Wk @ P
        wy = wblk_ref[bi, :, WY_OFF:WY_OFF + C]

        # LayerNorm (no affine, eps=1e-5) + adaLN modulation
        mu = jnp.mean(x, axis=-1, keepdims=True)
        xc = x - mu
        var = jnp.mean(xc * xc, axis=-1, keepdims=True)
        y = (a + 1.0) * (xc * jax.lax.rsqrt(var + EPS)) + b_

        # separate small dots (no lane-slicing of a wide activation)
        yb = y.astype(bf16)
        q = jnp.dot(yb, wq, preferred_element_type=f32)
        k = jnp.dot(yb, wk, preferred_element_type=f32)
        v = jnp.dot(yb, wv, preferred_element_type=f32)
        qp = jnp.dot(yb, wqp, preferred_element_type=f32)   # pre-rotated q
        kp = jnp.dot(yb, wkp, preferred_element_type=f32)   # pre-rotated k

        # QK RMS-norm with pre-rotation statistics: the RoPE pair rotation is
        # orthogonal, so the per-row scaling commutes with it (do NOT "fix").
        inv_q = jax.lax.rsqrt(jnp.mean(q * q, axis=-1, keepdims=True) + EPS)
        inv_k = jax.lax.rsqrt(jnp.mean(k * k, axis=-1, keepdims=True) + EPS)
        q = (q * cos + qp * sin) * inv_q
        k = (k * cos + kp * sin) * inv_k

        # block-diagonal attention: one (L, L) pass per batch element,
        # no mask / no -1e30 bias needed (dropout = 0).
        qb16 = q.astype(bf16)
        kb16 = k.astype(bf16)
        vb16 = v.astype(bf16)
        scale = 1.0 / math.sqrt(C)
        att_parts = []
        for b in range(BATCH):
            lo = b * L
            qb = qb16[lo:lo + L, :]
            kb = kb16[lo:lo + L, :]
            vb = vb16[lo:lo + L, :]
            # q @ k^T without materializing a transpose (contract last dims)
            s = jax.lax.dot_general(qb, kb, (((1,), (1,)), ((), ())),
                                    preferred_element_type=f32) * scale
            s = s - jnp.max(s, axis=-1, keepdims=True)
            p = jnp.exp(s)
            p = p * pl.reciprocal(jnp.sum(p, axis=-1, keepdims=True),
                                  approx=True)
            att_parts.append(jnp.dot(p.astype(bf16), vb,
                                     preferred_element_type=f32))
        att = jnp.concatenate(att_parts, axis=0)             # (BL, C)

        y = y + jnp.dot(att.astype(bf16), wy,
                        preferred_element_type=f32) + by

        # FFN: Linear -> SiLU -> Linear  (w2 stored transposed)
        h = jnp.dot(y.astype(bf16), w1, preferred_element_type=f32) + b1
        h = h * jax.nn.sigmoid(h)
        f = jax.lax.dot_general(h.astype(bf16), w2t, (((1,), (1,)), ((), ())),
                                preferred_element_type=f32) + b2

        # residual rescale + skip merge
        x = (x + c * f) * jax.lax.rsqrt(1.0 + c * c)
        x = (x + d * skip) * jax.lax.rsqrt(1.0 + d * d)

    # ---------------- out_proj (lane-dense padded store) --------------------
    o_ref[...] = jnp.dot(x.astype(bf16), out_w_ref[...],
                         preferred_element_type=f32) + out_b


def fused_vit_pallas(tok2d, abcd_slab, bufs):
    vmem = lambda: pl.BlockSpec(memory_space=pltpu.MemorySpace.VMEM)
    out = pl.pallas_call(
        fused_vit_kernel,
        out_shape=jax.ShapeDtypeStruct((BL, OUT_PAD), jnp.float32),
        in_specs=[vmem() for _ in range(7)],
        out_specs=vmem(),
    )(tok2d, abcd_slab, bufs["pecs"], bufs["bias"],
      bufs["in_w"], bufs["out_w"], bufs["wblk"])
    return out[:, :OUT_PATCH_DIM]


# ----------------------------- helpers / params ------------------------------
def sine_encoding(x, features, omega=1000.0):
    freqs = omega ** (-jnp.linspace(0.0, 1.0, features // 2, dtype=jnp.float32))
    xf = x[..., None] * freqs
    return jnp.concatenate([jnp.sin(xf), jnp.cos(xf)], axis=-1)


def _linear_init(key, fan_in, fan_out, bias=True, wscale=None):
    kw, kb = jax.random.split(key)
    s = 1.0 / math.sqrt(fan_in)
    w = jax.random.uniform(kw, (fan_in, fan_out), jnp.float32, -s, s)
    if wscale is not None:
        w = w * wscale
    b = jax.random.uniform(kb, (fan_out,), jnp.float32, -s, s) if bias else None
    return w, b


def init_params(key):
    ks = jax.random.split(key, 8 + BLOCKS)
    p = {}
    p["in_w"], p["in_b"] = _linear_init(ks[0], PATCH_DIM, HID)
    p["out_w"], p["out_b"] = _linear_init(ks[1], HID, OUT_PATCH_DIM)
    p["pos_w"], p["pos_b"] = _linear_init(ks[2], SPATIAL * HID, HID)
    p["te_w1"], p["te_b1"] = _linear_init(ks[3], MOD, MOD)
    p["te_w2"], p["te_b2"] = _linear_init(ks[4], MOD, MOD)
    p["map_w1"], p["map_b1"] = _linear_init(ks[5], MOD, MOD)
    p["map_w2"], p["map_b2"] = _linear_init(ks[6], MOD, MOD)

    blocks = []
    for bi in range(BLOCKS):
        kb = jax.random.split(ks[8 + bi], 8)
        blk = {}
        blk["ada_w1"], blk["ada_b1"] = _linear_init(kb[0], MOD, MOD)
        # final adaLN linear has its weight scaled by 0.01 in __init__
        blk["ada_w2"], blk["ada_b2"] = _linear_init(kb[1], MOD, 4 * HID, wscale=0.01)
        blk["wqkv"], _ = _linear_init(kb[2], HID, 3 * HID, bias=False)
        blk["wy"], blk["by"] = _linear_init(kb[3], HID, HID)
        blk["w1"], blk["b1"] = _linear_init(kb[4], HID, FFN)
        blk["w2"], blk["b2"] = _linear_init(kb[5], FFN, HID)
        # theta = amplitude * direction, direction column-normalized
        amplitude = 100.0 ** (-jax.random.uniform(kb[6], (HID // 2,), jnp.float32))
        direction = jax.random.normal(kb[7], (SPATIAL, HID // 2), jnp.float32)
        direction = direction / jnp.linalg.norm(direction, axis=0, keepdims=True)
        blk["theta"] = amplitude * direction
        blocks.append(blk)
    p["blocks"] = blocks
    return p


def _coo():
    ii, jj = jnp.meshgrid(jnp.arange(HP), jnp.arange(HP), indexing="ij")
    return jnp.stack([ii, jj], axis=-1).reshape(L, SPATIAL).astype(jnp.float32)


def make_pallas_buffers(params):
    """Sigma-independent derived buffers, precomputed once at init."""
    coo = _coo()

    # positional embedding: SineEncoding -> flatten -> Linear, tiled over batch
    pe = sine_encoding(coo, HID).reshape(L, SPATIAL * HID)
    pe = pe @ params["pos_w"] + params["pos_b"]                  # (L, HID)
    pe_rows = jnp.tile(pe, (BATCH, 1))                           # (BL, HID)

    # RoPE pair-swap matrix P:  (q @ P)[2i] = -q[2i+1], (q @ P)[2i+1] = q[2i]
    P = jnp.zeros((HID, HID), jnp.float32)
    even = jnp.arange(0, HID, 2)
    odd = even + 1
    P = P.at[odd, even].set(-1.0).at[even, odd].set(1.0)

    pecs = [pe_rows]
    wblk_l = []
    for blk in params["blocks"]:
        theta = coo @ blk["theta"]                               # (L, HID//2)
        cos2 = jnp.repeat(jnp.cos(theta), 2, axis=-1)            # interleaved
        sin2 = jnp.repeat(jnp.sin(theta), 2, axis=-1)
        pecs.append(jnp.tile(cos2, (BATCH, 1)))                  # cos_bi
        pecs.append(jnp.tile(sin2, (BATCH, 1)))                  # sin_bi

        wq = blk["wqkv"][:, :HID]
        wk = blk["wqkv"][:, HID:2 * HID]
        wqkv_ext = jnp.concatenate([blk["wqkv"], wq @ P, wk @ P], axis=1)
        # per-block weight slab: [w1 | w2^T | Wq|Wk|Wv|Wq@P|Wk@P | wy]
        slab = jnp.concatenate([blk["w1"], blk["w2"].T, wqkv_ext, blk["wy"]],
                               axis=1)                           # (HID, WTOT)
        wblk_l.append(slab.astype(jnp.bfloat16))

    def padrow(v):
        return jnp.pad(v, (0, 128 - v.shape[0]))[None, :]

    out_b_pad = jnp.pad(params["out_b"], (0, OUT_PAD - OUT_PATCH_DIM))
    bias_rows = [padrow(params["in_b"]), padrow(out_b_pad)]
    bias_rows += [padrow(blk["by"]) for blk in params["blocks"]]
    bias_rows += [padrow(blk["b2"]) for blk in params["blocks"]]
    bias_rows += [padrow(blk["b1"]) for blk in params["blocks"]]

    out_w_pad = jnp.pad(params["out_w"],
                        ((0, 0), (0, OUT_PAD - OUT_PATCH_DIM)))

    return {
        "pecs": jnp.stack(pecs),                      # (1+2*BLOCKS, BL, HID) f32
        "bias": jnp.concatenate(bias_rows, axis=0),   # (2+3*BLOCKS, 128)     f32
        "in_w": params["in_w"].astype(jnp.bfloat16),  # (PATCH_DIM, HID)      bf16
        "out_w": out_w_pad.astype(jnp.bfloat16),      # (HID, 128)            bf16
        "wblk": jnp.stack(wblk_l),                    # (BLOCKS, HID, 448)    bf16
    }


# ------------------------ conditioning glue (plain JAX) ----------------------
def conditioning(params, sigma):
    c_noise = jnp.log(sigma) / 4.0
    te = sine_encoding(c_noise[:, None], MOD)                    # (B,1,MOD)
    te = jax.nn.silu(te @ params["te_w1"] + params["te_b1"]) @ params["te_w2"] + params["te_b2"]
    mc = jnp.zeros_like(te)                                      # mapping_cond=None
    m_in = te + jnp.mean(mc, axis=1, keepdims=True)
    m_out = jax.nn.silu(m_in @ params["map_w1"] + params["map_b1"]) @ params["map_w2"] + params["map_b2"]
    return m_out[:, 0, :]                                        # (B, MOD)


# ------------------------------- forward (Pallas) ----------------------------
def vit_forward_pallas(params, bufs, x_img, sigma):
    Bn = x_img.shape[0]

    # Patchify (channel_last): '... C (H h) (W w) -> ... H W (C h w)'
    xp = x_img.reshape(Bn, IN_CH, HP, PATCH, HP, PATCH)
    xp = jnp.transpose(xp, (0, 2, 4, 1, 3, 5)).reshape(Bn * L, PATCH_DIM)

    # timestep embedding + mapping -> per-block adaLN params (tiny glue MLPs),
    # broadcast to per-row slabs here (removes iota/select work in the kernel).
    mod_vec = conditioning(params, sigma)                        # (B, MOD)
    abcd = []
    for blk in params["blocks"]:
        h = jax.nn.silu(mod_vec @ blk["ada_w1"] + blk["ada_b1"])
        abcd.append((h @ blk["ada_w2"] + blk["ada_b2"]).reshape(Bn, 4, HID))
    abcd = jnp.stack(abcd, axis=0)                               # (BLOCKS, B, 4, HID)
    abcd = jnp.transpose(abcd, (0, 2, 1, 3))                     # (BLOCKS, 4, B, HID)
    abcd = jnp.broadcast_to(abcd[:, :, :, None, :],
                            (BLOCKS, 4, Bn, L, HID))
    abcd_slab = abcd.reshape(BLOCKS * 4, Bn * L, HID)            # (8, BL, HID)

    out = fused_vit_pallas(xp, abcd_slab, bufs)                  # (B*L, OUT_PATCH_DIM)

    # Unpatchify: '... H W (C h w) -> ... C (H h) (W w)'
    out = out.reshape(Bn, HP, HP, OUT_CH, PATCH, PATCH)
    out = jnp.transpose(out, (0, 3, 1, 4, 2, 5)).reshape(Bn, OUT_CH, IMG, IMG)
    return out


# ------------------------- pure-JAX f32 reference ----------------------------
def _block_ref(x, skip, abcd, theta, wqkv, wy, by, w1, b1, w2, b2):
    a, b, c, d = (abcd[:, i:i + 1, :] for i in range(4))
    mu = x.mean(-1, keepdims=True)
    var = ((x - mu) ** 2).mean(-1, keepdims=True)
    y = (a + 1.0) * ((x - mu) / jnp.sqrt(var + EPS)) + b
    qkv = y @ wqkv
    q, k, v = qkv[..., :HID], qkv[..., HID:2 * HID], qkv[..., 2 * HID:]
    q = q / jnp.sqrt((q ** 2).mean(-1, keepdims=True) + EPS)
    k = k / jnp.sqrt((k ** 2).mean(-1, keepdims=True) + EPS)
    cos, sin = jnp.cos(theta), jnp.sin(theta)

    def rope(t):
        t2 = t.reshape(t.shape[:-1] + (HID // 2, 2))
        r0 = t2[..., 0] * cos - t2[..., 1] * sin
        r1 = t2[..., 0] * sin + t2[..., 1] * cos
        return jnp.stack([r0, r1], -1).reshape(t.shape)

    q, k = rope(q), rope(k)
    s = q @ jnp.swapaxes(k, -1, -2) / math.sqrt(HID)
    att = jax.nn.softmax(s, axis=-1) @ v
    y = y + (att @ wy + by)
    f = jax.nn.silu(y @ w1 + b1) @ w2 + b2
    out = (x + c * f) * jax.lax.rsqrt(1.0 + c * c)
    out = (out + d * skip) * jax.lax.rsqrt(1.0 + d * d)
    return out


def vit_forward_ref(params, x_img, sigma):
    Bn = x_img.shape[0]
    xp = x_img.reshape(Bn, IN_CH, HP, PATCH, HP, PATCH)
    xp = jnp.transpose(xp, (0, 2, 4, 1, 3, 5)).reshape(Bn, L, PATCH_DIM)
    tok = xp @ params["in_w"] + params["in_b"]
    skip = tok
    coo = _coo()
    pe = sine_encoding(coo, HID).reshape(L, SPATIAL * HID) @ params["pos_w"] + params["pos_b"]
    x = skip + pe[None]
    mod_vec = conditioning(params, sigma)
    for blk in params["blocks"]:
        h = jax.nn.silu(mod_vec @ blk["ada_w1"] + blk["ada_b1"])
        abcd = (h @ blk["ada_w2"] + blk["ada_b2"]).reshape(Bn, 4, HID)
        theta = coo @ blk["theta"]
        x = _block_ref(x, skip, abcd, theta, blk["wqkv"], blk["wy"], blk["by"],
                       blk["w1"], blk["b1"], blk["w2"], blk["b2"])
    out = x @ params["out_w"] + params["out_b"]
    out = out.reshape(Bn, HP, HP, OUT_CH, PATCH, PATCH)
    out = jnp.transpose(out, (0, 3, 1, 4, 2, 5)).reshape(Bn, OUT_CH, IMG, IMG)
    return out


# --------------------------------- main --------------------------------------
if __name__ == "__main__":
    key = jax.random.PRNGKey(0)
    kp, kx, ks = jax.random.split(key, 3)
    params = init_params(kp)
    bufs = make_pallas_buffers(params)

    x_img = jax.random.normal(kx, (BATCH, IN_CH, IMG, IMG), jnp.float32)   # NCHW
    sigma = jax.random.uniform(ks, (BATCH,), jnp.float32, 0.5, 2.0)

    fwd = jax.jit(vit_forward_pallas)
    out = jax.block_until_ready(fwd(params, bufs, x_img, sigma))

    # silent correctness check against a pure-JAX f32 reference.
    # MXU operands are bf16 (f32 accumulation) and the softmax denominator
    # uses an approximate reciprocal, so the tolerance is relaxed vs f32.
    ref = vit_forward_ref(params, x_img, sigma)
    err = float(jnp.max(jnp.abs(out - ref)))
    assert out.shape == (BATCH, OUT_CH, IMG, IMG), out.shape
    assert err < 5e-2, f"mismatch vs reference: {err}"

    print("KERNEL_OK")
</pallas_src>

<mosaic_0001>
module attributes {stable_mosaic.version = 11 : i64} {
  func.func @fused_vit_kernel(%arg0: memref<128x16xf32, #tpu.memory_space<vmem>>, %arg1: memref<8x128x32xf32, #tpu.memory_space<vmem>>, %arg2: memref<5x128x32xf32, #tpu.memory_space<vmem>>, %arg3: memref<8x128xf32, #tpu.memory_space<vmem>>, %arg4: memref<16x32xbf16, #tpu.memory_space<vmem>>, %arg5: memref<32x128xbf16, #tpu.memory_space<vmem>>, %arg6: memref<2x32x448xbf16, #tpu.memory_space<vmem>>, %arg7: memref<128x128xf32, #tpu.memory_space<vmem>>) attributes {dimension_semantics = [], scalar_prefetch = 0 : i64, scratch_operands = 0 : i64, tpu.core_type = #tpu.core_type<tc>} {
    %c0 = arith.constant 0 : index
    %c0_0 = arith.constant 0 : index
    %0 = vector.load %arg3[%c0, %c0_0] : memref<8x128xf32, #tpu.memory_space<vmem>>, vector<1x32xf32>
    %c1 = arith.constant 1 : index
    %c0_1 = arith.constant 0 : index
    %1 = vector.load %arg3[%c1, %c0_1] : memref<8x128xf32, #tpu.memory_space<vmem>>, vector<1x128xf32>
    %c0_2 = arith.constant 0 : index
    %c0_3 = arith.constant 0 : index
    %c0_4 = arith.constant 0 : index
    %2 = vector.load %arg2[%c0_2, %c0_3, %c0_4] : memref<5x128x32xf32, #tpu.memory_space<vmem>>, vector<1x128x32xf32>
    %3 = vector.shape_cast %2 : vector<1x128x32xf32> to vector<128x32xf32>
    %c0_5 = arith.constant 0 : index
    %c0_6 = arith.constant 0 : index
    %4 = vector.load %arg0[%c0_5, %c0_6] : memref<128x16xf32, #tpu.memory_space<vmem>>, vector<128x16xf32>
    %5 = arith.truncf %4 : vector<128x16xf32> to vector<128x16xbf16>
    %c0_7 = arith.constant 0 : index
    %c0_8 = arith.constant 0 : index
    %6 = vector.load %arg4[%c0_7, %c0_8] : memref<16x32xbf16, #tpu.memory_space<vmem>>, vector<16x32xbf16>
    %cst = arith.constant dense<0.000000e+00> : vector<128x32xf32>
    %7 = tpu.matmul %5, %6, %cst {dimension_numbers = #tpu.dot_dimension_numbers<[1], [0], [0], [1], [0, 0, 1, 1], [], []>} : vector<128x16xbf16>, vector<16x32xbf16>, vector<128x32xf32> -> vector<128x32xf32>
    %8 = vector.broadcast %0 : vector<1x32xf32> to vector<128x32xf32>
    %9 = arith.addf %7, %8 : vector<128x32xf32>
    %10 = arith.addf %9, %3 : vector<128x32xf32>
    %c0_9 = arith.constant 0 : index
    %c0_10 = arith.constant 0 : index
    %c0_11 = arith.constant 0 : index
    %11 = vector.load %arg1[%c0_9, %c0_10, %c0_11] : memref<8x128x32xf32, #tpu.memory_space<vmem>>, vector<1x128x32xf32>
    %12 = vector.shape_cast %11 : vector<1x128x32xf32> to vector<128x32xf32>
    %c1_12 = arith.constant 1 : index
    %c0_13 = arith.constant 0 : index
    %c0_14 = arith.constant 0 : index
    %13 = vector.load %arg1[%c1_12, %c0_13, %c0_14] : memref<8x128x32xf32, #tpu.memory_space<vmem>>, vector<1x128x32xf32>
    %14 = vector.shape_cast %13 : vector<1x128x32xf32> to vector<128x32xf32>
    %c2 = arith.constant 2 : index
    %c0_15 = arith.constant 0 : index
    %c0_16 = arith.constant 0 : index
    %15 = vector.load %arg1[%c2, %c0_15, %c0_16] : memref<8x128x32xf32, #tpu.memory_space<vmem>>, vector<1x128x32xf32>
    %16 = vector.shape_cast %15 : vector<1x128x32xf32> to vector<128x32xf32>
    %c3 = arith.constant 3 : index
    %c0_17 = arith.constant 0 : index
    %c0_18 = arith.constant 0 : index
    %17 = vector.load %arg1[%c3, %c0_17, %c0_18] : memref<8x128x32xf32, #tpu.memory_space<vmem>>, vector<1x128x32xf32>
    %18 = vector.shape_cast %17 : vector<1x128x32xf32> to vector<128x32xf32>
    %c1_19 = arith.constant 1 : index
    %c0_20 = arith.constant 0 : index
    %c0_21 = arith.constant 0 : index
    %19 = vector.load %arg2[%c1_19, %c0_20, %c0_21] : memref<5x128x32xf32, #tpu.memory_space<vmem>>, vector<1x128x32xf32>
    %20 = vector.shape_cast %19 : vector<1x128x32xf32> to vector<128x32xf32>
    %c2_22 = arith.constant 2 : index
    %c0_23 = arith.constant 0 : index
    %c0_24 = arith.constant 0 : index
    %21 = vector.load %arg2[%c2_22, %c0_23, %c0_24] : memref<5x128x32xf32, #tpu.memory_space<vmem>>, vector<1x128x32xf32>
    %22 = vector.shape_cast %21 : vector<1x128x32xf32> to vector<128x32xf32>
    %c2_25 = arith.constant 2 : index
    %c0_26 = arith.constant 0 : index
    %23 = vector.load %arg3[%c2_25, %c0_26] : memref<8x128xf32, #tpu.memory_space<vmem>>, vector<1x32xf32>
    %c4 = arith.constant 4 : index
    %c0_27 = arith.constant 0 : index
    %24 = vector.load %arg3[%c4, %c0_27] : memref<8x128xf32, #tpu.memory_space<vmem>>, vector<1x32xf32>
    %c6 = arith.constant 6 : index
    %c0_28 = arith.constant 0 : index
    %25 = vector.load %arg3[%c6, %c0_28] : memref<8x128xf32, #tpu.memory_space<vmem>>, vector<1x128xf32>
    %c0_29 = arith.constant 0 : index
    %c0_30 = arith.constant 0 : index
    %c0_31 = arith.constant 0 : index
    %26 = vector.load %arg6[%c0_29, %c0_30, %c0_31] : memref<2x32x448xbf16, #tpu.memory_space<vmem>>, vector<1x32x128xbf16>
    %27 = vector.shape_cast %26 : vector<1x32x128xbf16> to vector<32x128xbf16>
    %c0_32 = arith.constant 0 : index
    %c0_33 = arith.constant 0 : index
    %c128 = arith.constant 128 : index
    %28 = vector.load %arg6[%c0_32, %c0_33, %c128] : memref<2x32x448xbf16, #tpu.memory_space<vmem>>, vector<1x32x128xbf16>
    %29 = vector.shape_cast %28 : vector<1x32x128xbf16> to vector<32x128xbf16>
    %c0_34 = arith.constant 0 : index
    %c0_35 = arith.constant 0 : index
    %c256 = arith.constant 256 : index
    %30 = vector.load %arg6[%c0_34, %c0_35, %c256] : memref<2x32x448xbf16, #tpu.memory_space<vmem>>, vector<1x32x32xbf16>
    %31 = vector.shape_cast %30 : vector<1x32x32xbf16> to vector<32x32xbf16>
    %c0_36 = arith.constant 0 : index
    %c0_37 = arith.constant 0 : index
    %c288 = arith.constant 288 : index
    %32 = vector.load %arg6[%c0_36, %c0_37, %c288] : memref<2x32x448xbf16, #tpu.memory_space<vmem>>, vector<1x32x32xbf16>
    %33 = vector.shape_cast %32 : vector<1x32x32xbf16> to vector<32x32xbf16>
    %c0_38 = arith.constant 0 : index
    %c0_39 = arith.constant 0 : index
    %c320 = arith.constant 320 : index
    %34 = vector.load %arg6[%c0_38, %c0_39, %c320] : memref<2x32x448xbf16, #tpu.memory_space<vmem>>, vector<1x32x32xbf16>
    %35 = vector.shape_cast %34 : vector<1x32x32xbf16> to vector<32x32xbf16>
    %c0_40 = arith.constant 0 : index
    %c0_41 = arith.constant 0 : index
    %c352 = arith.constant 352 : index
    %36 = vector.load %arg6[%c0_40, %c0_41, %c352] : memref<2x32x448xbf16, #tpu.memory_space<vmem>>, vector<1x32x32xbf16>
    %37 = vector.shape_cast %36 : vector<1x32x32xbf16> to vector<32x32xbf16>
    %c0_42 = arith.constant 0 : index
    %c0_43 = arith.constant 0 : index
    %c384 = arith.constant 384 : index
    %38 = vector.load %arg6[%c0_42, %c0_43, %c384] : memref<2x32x448xbf16, #tpu.memory_space<vmem>>, vector<1x32x32xbf16>
    %39 = vector.shape_cast %38 : vector<1x32x32xbf16> to vector<32x32xbf16>
    %c0_44 = arith.constant 0 : index
    %c0_45 = arith.constant 0 : index
    %c416 = arith.constant 416 : index
    %40 = vector.load %arg6[%c0_44, %c0_45, %c416] : memref<2x32x448xbf16, #tpu.memory_space<vmem>>, vector<1x32x32xbf16>
    %41 = vector.shape_cast %40 : vector<1x32x32xbf16> to vector<32x32xbf16>
    %cst_46 = arith.constant dense<0.000000e+00> : vector<128xf32>
    %42 = vector.multi_reduction <add>, %10, %cst_46 [1] : vector<128x32xf32> to vector<128xf32>
    %43 = vector.shape_cast %42 : vector<128xf32> to vector<128x1xf32>
    %cst_47 = arith.constant 3.200000e+01 : f32
    %44 = vector.broadcast %cst_47 : f32 to vector<128x1xf32>
    %45 = arith.divf %43, %44 : vector<128x1xf32>
    %46 = vector.broadcast %45 : vector<128x1xf32> to vector<128x32xf32>
    %47 = arith.subf %10, %46 : vector<128x32xf32>
    %48 = arith.mulf %47, %47 : vector<128x32xf32>
    %cst_48 = arith.constant dense<0.000000e+00> : vector<128xf32>
    %49 = vector.multi_reduction <add>, %48, %cst_48 [1] : vector<128x32xf32> to vector<128xf32>
    %50 = vector.shape_cast %49 : vector<128xf32> to vector<128x1xf32>
    %cst_49 = arith.constant 3.200000e+01 : f32
    %51 = vector.broadcast %cst_49 : f32 to vector<128x1xf32>
    %52 = arith.divf %50, %51 : vector<128x1xf32>
    %cst_50 = arith.constant 1.000000e+00 : f32
    %53 = vector.broadcast %cst_50 : f32 to vector<128x32xf32>
    %54 = arith.addf %12, %53 : vector<128x32xf32>
    %cst_51 = arith.constant 9.99999974E-6 : f32
    %55 = vector.broadcast %cst_51 : f32 to vector<128x1xf32>
    %56 = arith.addf %52, %55 : vector<128x1xf32>
    %57 = math.rsqrt %56 : vector<128x1xf32>
    %58 = vector.broadcast %57 : vector<128x1xf32> to vector<128x32xf32>
    %59 = arith.mulf %47, %58 : vector<128x32xf32>
    %60 = arith.mulf %54, %59 : vector<128x32xf32>
    %61 = arith.addf %60, %14 : vector<128x32xf32>
    %62 = arith.truncf %61 : vector<128x32xf32> to vector<128x32xbf16>
    %cst_52 = arith.constant dense<0.000000e+00> : vector<128x32xf32>
    %63 = tpu.matmul %62, %31, %cst_52 {dimension_numbers = #tpu.dot_dimension_numbers<[1], [0], [0], [1], [0, 0, 1, 1], [], []>} : vector<128x32xbf16>, vector<32x32xbf16>, vector<128x32xf32> -> vector<128x32xf32>
    %cst_53 = arith.constant dense<0.000000e+00> : vector<128x32xf32>
    %64 = tpu.matmul %62, %33, %cst_53 {dimension_numbers = #tpu.dot_dimension_numbers<[1], [0], [0], [1], [0, 0, 1, 1], [], []>} : vector<128x32xbf16>, vector<32x32xbf16>, vector<128x32xf32> -> vector<128x32xf32>
    %cst_54 = arith.constant dense<0.000000e+00> : vector<128x32xf32>
    %65 = tpu.matmul %62, %35, %cst_54 {dimension_numbers = #tpu.dot_dimension_numbers<[1], [0], [0], [1], [0, 0, 1, 1], [], []>} : vector<128x32xbf16>, vector<32x32xbf16>, vector<128x32xf32> -> vector<128x32xf32>
    %cst_55 = arith.constant dense<0.000000e+00> : vector<128x32xf32>
    %66 = tpu.matmul %62, %37, %cst_55 {dimension_numbers = #tpu.dot_dimension_numbers<[1], [0], [0], [1], [0, 0, 1, 1], [], []>} : vector<128x32xbf16>, vector<32x32xbf16>, vector<128x32xf32> -> vector<128x32xf32>
    %cst_56 = arith.constant dense<0.000000e+00> : vector<128x32xf32>
    %67 = tpu.matmul %62, %39, %cst_56 {dimension_numbers = #tpu.dot_dimension_numbers<[1], [0], [0], [1], [0, 0, 1, 1], [], []>} : vector<128x32xbf16>, vector<32x32xbf16>, vector<128x32xf32> -> vector<128x32xf32>
    %68 = arith.mulf %63, %63 : vector<128x32xf32>
    %cst_57 = arith.constant dense<0.000000e+00> : vector<128xf32>
    %69 = vector.multi_reduction <add>, %68, %cst_57 [1] : vector<128x32xf32> to vector<128xf32>
    %70 = vector.shape_cast %69 : vector<128xf32> to vector<128x1xf32>
    %cst_58 = arith.constant 3.200000e+01 : f32
    %71 = vector.broadcast %cst_58 : f32 to vector<128x1xf32>
    %72 = arith.divf %70, %71 : vector<128x1xf32>
    %cst_59 = arith.constant 9.99999974E-6 : f32
    %73 = vector.broadcast %cst_59 : f32 to vector<128x1xf32>
    %74 = arith.addf %72, %73 : vector<128x1xf32>
    %75 = math.rsqrt %74 : vector<128x1xf32>
    %76 = arith.mulf %64, %64 : vector<128x32xf32>
    %cst_60 = arith.constant dense<0.000000e+00> : vector<128xf32>
    %77 = vector.multi_reduction <add>, %76, %cst_60 [1] : vector<128x32xf32> to vector<128xf32>
    %78 = vector.shape_cast %77 : vector<128xf32> to vector<128x1xf32>
    %cst_61 = arith.constant 3.200000e+01 : f32
    %79 = vector.broadcast %cst_61 : f32 to vector<128x1xf32>
    %80 = arith.divf %78, %79 : vector<128x1xf32>
    %cst_62 = arith.constant 9.99999974E-6 : f32
    %81 = vector.broadcast %cst_62 : f32 to vector<128x1xf32>
    %82 = arith.addf %80, %81 : vector<128x1xf32>
    %83 = math.rsqrt %82 : vector<128x1xf32>
    %84 = arith.mulf %63, %20 : vector<128x32xf32>
    %85 = arith.mulf %66, %22 : vector<128x32xf32>
    %86 = arith.addf %84, %85 : vector<128x32xf32>
    %87 = vector.broadcast %75 : vector<128x1xf32> to vector<128x32xf32>
    %88 = arith.mulf %86, %87 : vector<128x32xf32>
    %89 = arith.mulf %64, %20 : vector<128x32xf32>
    %90 = arith.mulf %67, %22 : vector<128x32xf32>
    %91 = arith.addf %89, %90 : vector<128x32xf32>
    %92 = vector.broadcast %83 : vector<128x1xf32> to vector<128x32xf32>
    %93 = arith.mulf %91, %92 : vector<128x32xf32>
    %94 = arith.truncf %88 : vector<128x32xf32> to vector<128x32xbf16>
    %95 = arith.truncf %93 : vector<128x32xf32> to vector<128x32xbf16>
    %96 = arith.truncf %65 : vector<128x32xf32> to vector<128x32xbf16>
    %97 = vector.extract_strided_slice %94 {offsets = [0, 0], sizes = [64, 32], strides = [1, 1]} : vector<128x32xbf16> to vector<64x32xbf16>
    %98 = vector.extract_strided_slice %95 {offsets = [0, 0], sizes = [64, 32], strides = [1, 1]} : vector<128x32xbf16> to vector<64x32xbf16>
    %99 = vector.extract_strided_slice %96 {offsets = [0, 0], sizes = [64, 32], strides = [1, 1]} : vector<128x32xbf16> to vector<64x32xbf16>
    %cst_63 = arith.constant dense<0.000000e+00> : vector<64x64xf32>
    %100 = tpu.matmul %97, %98, %cst_63 {dimension_numbers = #tpu.dot_dimension_numbers<[1], [1], [0], [0], [0, 0, 1, 0], [], []>} : vector<64x32xbf16>, vector<64x32xbf16>, vector<64x64xf32> -> vector<64x64xf32>
    %cst_64 = arith.constant 0.176776692 : f32
    %101 = vector.broadcast %cst_64 : f32 to vector<64x64xf32>
    %102 = arith.mulf %100, %101 : vector<64x64xf32>
    %cst_65 = arith.constant dense<0xFF800000> : vector<64xf32>
    %103 = vector.multi_reduction <maximumf>, %102, %cst_65 [1] : vector<64x64xf32> to vector<64xf32>
    %104 = vector.shape_cast %103 : vector<64xf32> to vector<64x1xf32>
    %105 = vector.broadcast %104 : vector<64x1xf32> to vector<64x64xf32>
    %106 = arith.subf %102, %105 : vector<64x64xf32>
    %107 = math.exp %106 : vector<64x64xf32>
    %cst_66 = arith.constant dense<0.000000e+00> : vector<64xf32>
    %108 = vector.multi_reduction <add>, %107, %cst_66 [1] : vector<64x64xf32> to vector<64xf32>
    %109 = vector.shape_cast %108 : vector<64xf32> to vector<64x1xf32>
    %110 = tpu.reciprocal %109 {approx = true} : vector<64x1xf32> -> vector<64x1xf32>
    %111 = vector.broadcast %110 : vector<64x1xf32> to vector<64x64xf32>
    %112 = arith.mulf %107, %111 : vector<64x64xf32>
    %113 = arith.truncf %112 : vector<64x64xf32> to vector<64x64xbf16>
    %cst_67 = arith.constant dense<0.000000e+00> : vector<64x32xf32>
    %114 = tpu.matmul %113, %99, %cst_67 {dimension_numbers = #tpu.dot_dimension_numbers<[1], [0], [0], [1], [0, 0, 1, 1], [], []>} : vector<64x64xbf16>, vector<64x32xbf16>, vector<64x32xf32> -> vector<64x32xf32>
    %115 = vector.extract_strided_slice %94 {offsets = [64, 0], sizes = [64, 32], strides = [1, 1]} : vector<128x32xbf16> to vector<64x32xbf16>
    %116 = vector.extract_strided_slice %95 {offsets = [64, 0], sizes = [64, 32], strides = [1, 1]} : vector<128x32xbf16> to vector<64x32xbf16>
    %117 = vector.extract_strided_slice %96 {offsets = [64, 0], sizes = [64, 32], strides = [1, 1]} : vector<128x32xbf16> to vector<64x32xbf16>
    %cst_68 = arith.constant dense<0.000000e+00> : vector<64x64xf32>
    %118 = tpu.matmul %115, %116, %cst_68 {dimension_numbers = #tpu.dot_dimension_numbers<[1], [1], [0], [0], [0, 0, 1, 0], [], []>} : vector<64x32xbf16>, vector<64x32xbf16>, vector<64x64xf32> -> vector<64x64xf32>
    %cst_69 = arith.constant 0.176776692 : f32
    %119 = vector.broadcast %cst_69 : f32 to vector<64x64xf32>
    %120 = arith.mulf %118, %119 : vector<64x64xf32>
    %cst_70 = arith.constant dense<0xFF800000> : vector<64xf32>
    %121 = vector.multi_reduction <maximumf>, %120, %cst_70 [1] : vector<64x64xf32> to vector<64xf32>
    %122 = vector.shape_cast %121 : vector<64xf32> to vector<64x1xf32>
    %123 = vector.broadcast %122 : vector<64x1xf32> to vector<64x64xf32>
    %124 = arith.subf %120, %123 : vector<64x64xf32>
    %125 = math.exp %124 : vector<64x64xf32>
    %cst_71 = arith.constant dense<0.000000e+00> : vector<64xf32>
    %126 = vector.multi_reduction <add>, %125, %cst_71 [1] : vector<64x64xf32> to vector<64xf32>
    %127 = vector.shape_cast %126 : vector<64xf32> to vector<64x1xf32>
    %128 = tpu.reciprocal %127 {approx = true} : vector<64x1xf32> -> vector<64x1xf32>
    %129 = vector.broadcast %128 : vector<64x1xf32> to vector<64x64xf32>
    %130 = arith.mulf %125, %129 : vector<64x64xf32>
    %131 = arith.truncf %130 : vector<64x64xf32> to vector<64x64xbf16>
    %cst_72 = arith.constant dense<0.000000e+00> : vector<64x32xf32>
    %132 = tpu.matmul %131, %117, %cst_72 {dimension_numbers = #tpu.dot_dimension_numbers<[1], [0], [0], [1], [0, 0, 1, 1], [], []>} : vector<64x64xbf16>, vector<64x32xbf16>, vector<64x32xf32> -> vector<64x32xf32>
    %133 = tpu.concatenate %114, %132 in 0 : vector<64x32xf32>, vector<64x32xf32> -> vector<128x32xf32>
    %134 = arith.truncf %133 : vector<128x32xf32> to vector<128x32xbf16>
    %cst_73 = arith.constant dense<0.000000e+00> : vector<128x32xf32>
    %135 = tpu.matmul %134, %41, %cst_73 {dimension_numbers = #tpu.dot_dimension_numbers<[1], [0], [0], [1], [0, 0, 1, 1], [], []>} : vector<128x32xbf16>, vector<32x32xbf16>, vector<128x32xf32> -> vector<128x32xf32>
    %136 = arith.addf %61, %135 : vector<128x32xf32>
    %137 = vector.broadcast %23 : vector<1x32xf32> to vector<128x32xf32>
    %138 = arith.addf %136, %137 : vector<128x32xf32>
    %139 = arith.truncf %138 : vector<128x32xf32> to vector<128x32xbf16>
    %cst_74 = arith.constant dense<0.000000e+00> : vector<128x128xf32>
    %140 = tpu.matmul %139, %27, %cst_74 {dimension_numbers = #tpu.dot_dimension_numbers<[1], [0], [0], [1], [0, 0, 1, 1], [], []>} : vector<128x32xbf16>, vector<32x128xbf16>, vector<128x128xf32> -> vector<128x128xf32>
    %141 = vector.broadcast %25 : vector<1x128xf32> to vector<128x128xf32>
    %142 = arith.addf %140, %141 : vector<128x128xf32>
    %143 = arith.negf %142 : vector<128x128xf32>
    %144 = math.exp %143 : vector<128x128xf32>
    %cst_75 = arith.constant 1.000000e+00 : f32
    %145 = vector.broadcast %cst_75 : f32 to vector<128x128xf32>
    %146 = arith.addf %145, %144 : vector<128x128xf32>
    %147 = arith.divf %145, %146 : vector<128x128xf32>
    %148 = arith.mulf %142, %147 : vector<128x128xf32>
    %149 = arith.truncf %148 : vector<128x128xf32> to vector<128x128xbf16>
    %cst_76 = arith.constant dense<0.000000e+00> : vector<128x32xf32>
    %150 = tpu.matmul %149, %29, %cst_76 {dimension_numbers = #tpu.dot_dimension_numbers<[1], [1], [0], [0], [0, 0, 1, 0], [], []>} : vector<128x128xbf16>, vector<32x128xbf16>, vector<128x32xf32> -> vector<128x32xf32>
    %151 = vector.broadcast %24 : vector<1x32xf32> to vector<128x32xf32>
    %152 = arith.addf %150, %151 : vector<128x32xf32>
    %153 = arith.mulf %16, %152 : vector<128x32xf32>
    %154 = arith.addf %10, %153 : vector<128x32xf32>
    %155 = arith.mulf %16, %16 : vector<128x32xf32>
    %cst_77 = arith.constant 1.000000e+00 : f32
    %156 = vector.broadcast %cst_77 : f32 to vector<128x32xf32>
    %157 = arith.addf %156, %155 : vector<128x32xf32>
    %158 = math.rsqrt %157 : vector<128x32xf32>
    %159 = arith.mulf %154, %158 : vector<128x32xf32>
    %160 = arith.mulf %18, %9 : vector<128x32xf32>
    %161 = arith.addf %159, %160 : vector<128x32xf32>
    %162 = arith.mulf %18, %18 : vector<128x32xf32>
    %cst_78 = arith.constant 1.000000e+00 : f32
    %163 = vector.broadcast %cst_78 : f32 to vector<128x32xf32>
    %164 = arith.addf %163, %162 : vector<128x32xf32>
    %165 = math.rsqrt %164 : vector<128x32xf32>
    %166 = arith.mulf %161, %165 : vector<128x32xf32>
    %c4_79 = arith.constant 4 : index
    %c0_80 = arith.constant 0 : index
    %c0_81 = arith.constant 0 : index
    %167 = vector.load %arg1[%c4_79, %c0_80, %c0_81] : memref<8x128x32xf32, #tpu.memory_space<vmem>>, vector<1x128x32xf32>
    %168 = vector.shape_cast %167 : vector<1x128x32xf32> to vector<128x32xf32>
    %c5 = arith.constant 5 : index
    %c0_82 = arith.constant 0 : index
    %c0_83 = arith.constant 0 : index
    %169 = vector.load %arg1[%c5, %c0_82, %c0_83] : memref<8x128x32xf32, #tpu.memory_space<vmem>>, vector<1x128x32xf32>
    %170 = vector.shape_cast %169 : vector<1x128x32xf32> to vector<128x32xf32>
    %c6_84 = arith.constant 6 : index
    %c0_85 = arith.constant 0 : index
    %c0_86 = arith.constant 0 : index
    %171 = vector.load %arg1[%c6_84, %c0_85, %c0_86] : memref<8x128x32xf32, #tpu.memory_space<vmem>>, vector<1x128x32xf32>
    %172 = vector.shape_cast %171 : vector<1x128x32xf32> to vector<128x32xf32>
    %c7 = arith.constant 7 : index
    %c0_87 = arith.constant 0 : index
    %c0_88 = arith.constant 0 : index
    %173 = vector.load %arg1[%c7, %c0_87, %c0_88] : memref<8x128x32xf32, #tpu.memory_space<vmem>>, vector<1x128x32xf32>
    %174 = vector.shape_cast %173 : vector<1x128x32xf32> to vector<128x32xf32>
    %c3_89 = arith.constant 3 : index
    %c0_90 = arith.constant 0 : index
    %c0_91 = arith.constant 0 : index
    %175 = vector.load %arg2[%c3_89, %c0_90, %c0_91] : memref<5x128x32xf32, #tpu.memory_space<vmem>>, vector<1x128x32xf32>
    %176 = vector.shape_cast %175 : vector<1x128x32xf32> to vector<128x32xf32>
    %c4_92 = arith.constant 4 : index
    %c0_93 = arith.constant 0 : index
    %c0_94 = arith.constant 0 : index
    %177 = vector.load %arg2[%c4_92, %c0_93, %c0_94] : memref<5x128x32xf32, #tpu.memory_space<vmem>>, vector<1x128x32xf32>
    %178 = vector.shape_cast %177 : vector<1x128x32xf32> to vector<128x32xf32>
    %c3_95 = arith.constant 3 : index
    %c0_96 = arith.constant 0 : index
    %179 = vector.load %arg3[%c3_95, %c0_96] : memref<8x128xf32, #tpu.memory_space<vmem>>, vector<1x32xf32>
    %c5_97 = arith.constant 5 : index
    %c0_98 = arith.constant 0 : index
    %180 = vector.load %arg3[%c5_97, %c0_98] : memref<8x128xf32, #tpu.memory_space<vmem>>, vector<1x32xf32>
    %c7_99 = arith.constant 7 : index
    %c0_100 = arith.constant 0 : index
    %181 = vector.load %arg3[%c7_99, %c0_100] : memref<8x128xf32, #tpu.memory_space<vmem>>, vector<1x128xf32>
    %c1_101 = arith.constant 1 : index
    %c0_102 = arith.constant 0 : index
    %c0_103 = arith.constant 0 : index
    %182 = vector.load %arg6[%c1_101, %c0_102, %c0_103] : memref<2x32x448xbf16, #tpu.memory_space<vmem>>, vector<1x32x128xbf16>
    %183 = vector.shape_cast %182 : vector<1x32x128xbf16> to vector<32x128xbf16>
    %c1_104 = arith.constant 1 : index
    %c0_105 = arith.constant 0 : index
    %c128_106 = arith.constant 128 : index
    %184 = vector.load %arg6[%c1_104, %c0_105, %c128_106] : memref<2x32x448xbf16, #tpu.memory_space<vmem>>, vector<1x32x128xbf16>
    %185 = vector.shape_cast %184 : vector<1x32x128xbf16> to vector<32x128xbf16>
    %c1_107 = arith.constant 1 : index
    %c0_108 = arith.constant 0 : index
    %c256_109 = arith.constant 256 : index
    %186 = vector.load %arg6[%c1_107, %c0_108, %c256_109] : memref<2x32x448xbf16, #tpu.memory_space<vmem>>, vector<1x32x32xbf16>
    %187 = vector.shape_cast %186 : vector<1x32x32xbf16> to vector<32x32xbf16>
    %c1_110 = arith.constant 1 : index
    %c0_111 = arith.constant 0 : index
    %c288_112 = arith.constant 288 : index
    %188 = vector.load %arg6[%c1_110, %c0_111, %c288_112] : memref<2x32x448xbf16, #tpu.memory_space<vmem>>, vector<1x32x32xbf16>
    %189 = vector.shape_cast %188 : vector<1x32x32xbf16> to vector<32x32xbf16>
    %c1_113 = arith.constant 1 : index
    %c0_114 = arith.constant 0 : index
    %c320_115 = arith.constant 320 : index
    %190 = vector.load %arg6[%c1_113, %c0_114, %c320_115] : memref<2x32x448xbf16, #tpu.memory_space<vmem>>, vector<1x32x32xbf16>
    %191 = vector.shape_cast %190 : vector<1x32x32xbf16> to vector<32x32xbf16>
    %c1_116 = arith.constant 1 : index
    %c0_117 = arith.constant 0 : index
    %c352_118 = arith.constant 352 : index
    %192 = vector.load %arg6[%c1_116, %c0_117, %c352_118] : memref<2x32x448xbf16, #tpu.memory_space<vmem>>, vector<1x32x32xbf16>
    %193 = vector.shape_cast %192 : vector<1x32x32xbf16> to vector<32x32xbf16>
    %c1_119 = arith.constant 1 : index
    %c0_120 = arith.constant 0 : index
    %c384_121 = arith.constant 384 : index
    %194 = vector.load %arg6[%c1_119, %c0_120, %c384_121] : memref<2x32x448xbf16, #tpu.memory_space<vmem>>, vector<1x32x32xbf16>
    %195 = vector.shape_cast %194 : vector<1x32x32xbf16> to vector<32x32xbf16>
    %c1_122 = arith.constant 1 : index
    %c0_123 = arith.constant 0 : index
    %c416_124 = arith.constant 416 : index
    %196 = vector.load %arg6[%c1_122, %c0_123, %c416_124] : memref<2x32x448xbf16, #tpu.memory_space<vmem>>, vector<1x32x32xbf16>
    %197 = vector.shape_cast %196 : vector<1x32x32xbf16> to vector<32x32xbf16>
    %cst_125 = arith.constant dense<0.000000e+00> : vector<128xf32>
    %198 = vector.multi_reduction <add>, %166, %cst_125 [1] : vector<128x32xf32> to vector<128xf32>
    %199 = vector.shape_cast %198 : vector<128xf32> to vector<128x1xf32>
    %cst_126 = arith.constant 3.200000e+01 : f32
    %200 = vector.broadcast %cst_126 : f32 to vector<128x1xf32>
    %201 = arith.divf %199, %200 : vector<128x1xf32>
    %202 = vector.broadcast %201 : vector<128x1xf32> to vector<128x32xf32>
    %203 = arith.subf %166, %202 : vector<128x32xf32>
    %204 = arith.mulf %203, %203 : vector<128x32xf32>
    %cst_127 = arith.constant dense<0.000000e+00> : vector<128xf32>
    %205 = vector.multi_reduction <add>, %204, %cst_127 [1] : vector<128x32xf32> to vector<128xf32>
    %206 = vector.shape_cast %205 : vector<128xf32> to vector<128x1xf32>
    %cst_128 = arith.constant 3.200000e+01 : f32
    %207 = vector.broadcast %cst_128 : f32 to vector<128x1xf32>
    %208 = arith.divf %206, %207 : vector<128x1xf32>
    %cst_129 = arith.constant 1.000000e+00 : f32
    %209 = vector.broadcast %cst_129 : f32 to vector<128x32xf32>
    %210 = arith.addf %168, %209 : vector<128x32xf32>
    %cst_130 = arith.constant 9.99999974E-6 : f32
    %211 = vector.broadcast %cst_130 : f32 to vector<128x1xf32>
    %212 = arith.addf %208, %211 : vector<128x1xf32>
    %213 = math.rsqrt %212 : vector<128x1xf32>
    %214 = vector.broadcast %213 : vector<128x1xf32> to vector<128x32xf32>
    %215 = arith.mulf %203, %214 : vector<128x32xf32>
    %216 = arith.mulf %210, %215 : vector<128x32xf32>
    %217 = arith.addf %216, %170 : vector<128x32xf32>
    %218 = arith.truncf %217 : vector<128x32xf32> to vector<128x32xbf16>
    %cst_131 = arith.constant dense<0.000000e+00> : vector<128x32xf32>
    %219 = tpu.matmul %218, %187, %cst_131 {dimension_numbers = #tpu.dot_dimension_numbers<[1], [0], [0], [1], [0, 0, 1, 1], [], []>} : vector<128x32xbf16>, vector<32x32xbf16>, vector<128x32xf32> -> vector<128x32xf32>
    %cst_132 = arith.constant dense<0.000000e+00> : vector<128x32xf32>
    %220 = tpu.matmul %218, %189, %cst_132 {dimension_numbers = #tpu.dot_dimension_numbers<[1], [0], [0], [1], [0, 0, 1, 1], [], []>} : vector<128x32xbf16>, vector<32x32xbf16>, vector<128x32xf32> -> vector<128x32xf32>
    %cst_133 = arith.constant dense<0.000000e+00> : vector<128x32xf32>
    %221 = tpu.matmul %218, %191, %cst_133 {dimension_numbers = #tpu.dot_dimension_numbers<[1], [0], [0], [1], [0, 0, 1, 1], [], []>} : vector<128x32xbf16>, vector<32x32xbf16>, vector<128x32xf32> -> vector<128x32xf32>
    %cst_134 = arith.constant dense<0.000000e+00> : vector<128x32xf32>
    %222 = tpu.matmul %218, %193, %cst_134 {dimension_numbers = #tpu.dot_dimension_numbers<[1], [0], [0], [1], [0, 0, 1, 1], [], []>} : vector<128x32xbf16>, vector<32x32xbf16>, vector<128x32xf32> -> vector<128x32xf32>
    %cst_135 = arith.constant dense<0.000000e+00> : vector<128x32xf32>
    %223 = tpu.matmul %218, %195, %cst_135 {dimension_numbers = #tpu.dot_dimension_numbers<[1], [0], [0], [1], [0, 0, 1, 1], [], []>} : vector<128x32xbf16>, vector<32x32xbf16>, vector<128x32xf32> -> vector<128x32xf32>
    %224 = arith.mulf %219, %219 : vector<128x32xf32>
    %cst_136 = arith.constant dense<0.000000e+00> : vector<128xf32>
    %225 = vector.multi_reduction <add>, %224, %cst_136 [1] : vector<128x32xf32> to vector<128xf32>
    %226 = vector.shape_cast %225 : vector<128xf32> to vector<128x1xf32>
    %cst_137 = arith.constant 3.200000e+01 : f32
    %227 = vector.broadcast %cst_137 : f32 to vector<128x1xf32>
    %228 = arith.divf %226, %227 : vector<128x1xf32>
    %cst_138 = arith.constant 9.99999974E-6 : f32
    %229 = vector.broadcast %cst_138 : f32 to vector<128x1xf32>
    %230 = arith.addf %228, %229 : vector<128x1xf32>
    %231 = math.rsqrt %230 : vector<128x1xf32>
    %232 = arith.mulf %220, %220 : vector<128x32xf32>
    %cst_139 = arith.constant dense<0.000000e+00> : vector<128xf32>
    %233 = vector.multi_reduction <add>, %232, %cst_139 [1] : vector<128x32xf32> to vector<128xf32>
    %234 = vector.shape_cast %233 : vector<128xf32> to vector<128x1xf32>
    %cst_140 = arith.constant 3.200000e+01 : f32
    %235 = vector.broadcast %cst_140 : f32 to vector<128x1xf32>
    %236 = arith.divf %234, %235 : vector<128x1xf32>
    %cst_141 = arith.constant 9.99999974E-6 : f32
    %237 = vector.broadcast %cst_141 : f32 to vector<128x1xf32>
    %238 = arith.addf %236, %237 : vector<128x1xf32>
    %239 = math.rsqrt %238 : vector<128x1xf32>
    %240 = arith.mulf %219, %176 : vector<128x32xf32>
    %241 = arith.mulf %222, %178 : vector<128x32xf32>
    %242 = arith.addf %240, %241 : vector<128x32xf32>
    %243 = vector.broadcast %231 : vector<128x1xf32> to vector<128x32xf32>
    %244 = arith.mulf %242, %243 : vector<128x32xf32>
    %245 = arith.mulf %220, %176 : vector<128x32xf32>
    %246 = arith.mulf %223, %178 : vector<128x32xf32>
    %247 = arith.addf %245, %246 : vector<128x32xf32>
    %248 = vector.broadcast %239 : vector<128x1xf32> to vector<128x32xf32>
    %249 = arith.mulf %247, %248 : vector<128x32xf32>
    %250 = arith.truncf %244 : vector<128x32xf32> to vector<128x32xbf16>
    %251 = arith.truncf %249 : vector<128x32xf32> to vector<128x32xbf16>
    %252 = arith.truncf %221 : vector<128x32xf32> to vector<128x32xbf16>
    %253 = vector.extract_strided_slice %250 {offsets = [0, 0], sizes = [64, 32], strides = [1, 1]} : vector<128x32xbf16> to vector<64x32xbf16>
    %254 = vector.extract_strided_slice %251 {offsets = [0, 0], sizes = [64, 32], strides = [1, 1]} : vector<128x32xbf16> to vector<64x32xbf16>
    %255 = vector.extract_strided_slice %252 {offsets = [0, 0], sizes = [64, 32], strides = [1, 1]} : vector<128x32xbf16> to vector<64x32xbf16>
    %cst_142 = arith.constant dense<0.000000e+00> : vector<64x64xf32>
    %256 = tpu.matmul %253, %254, %cst_142 {dimension_numbers = #tpu.dot_dimension_numbers<[1], [1], [0], [0], [0, 0, 1, 0], [], []>} : vector<64x32xbf16>, vector<64x32xbf16>, vector<64x64xf32> -> vector<64x64xf32>
    %cst_143 = arith.constant 0.176776692 : f32
    %257 = vector.broadcast %cst_143 : f32 to vector<64x64xf32>
    %258 = arith.mulf %256, %257 : vector<64x64xf32>
    %cst_144 = arith.constant dense<0xFF800000> : vector<64xf32>
    %259 = vector.multi_reduction <maximumf>, %258, %cst_144 [1] : vector<64x64xf32> to vector<64xf32>
    %260 = vector.shape_cast %259 : vector<64xf32> to vector<64x1xf32>
    %261 = vector.broadcast %260 : vector<64x1xf32> to vector<64x64xf32>
    %262 = arith.subf %258, %261 : vector<64x64xf32>
    %263 = math.exp %262 : vector<64x64xf32>
    %cst_145 = arith.constant dense<0.000000e+00> : vector<64xf32>
    %264 = vector.multi_reduction <add>, %263, %cst_145 [1] : vector<64x64xf32> to vector<64xf32>
    %265 = vector.shape_cast %264 : vector<64xf32> to vector<64x1xf32>
    %266 = tpu.reciprocal %265 {approx = true} : vector<64x1xf32> -> vector<64x1xf32>
    %267 = vector.broadcast %266 : vector<64x1xf32> to vector<64x64xf32>
    %268 = arith.mulf %263, %267 : vector<64x64xf32>
    %269 = arith.truncf %268 : vector<64x64xf32> to vector<64x64xbf16>
    %cst_146 = arith.constant dense<0.000000e+00> : vector<64x32xf32>
    %270 = tpu.matmul %269, %255, %cst_146 {dimension_numbers = #tpu.dot_dimension_numbers<[1], [0], [0], [1], [0, 0, 1, 1], [], []>} : vector<64x64xbf16>, vector<64x32xbf16>, vector<64x32xf32> -> vector<64x32xf32>
    %271 = vector.extract_strided_slice %250 {offsets = [64, 0], sizes = [64, 32], strides = [1, 1]} : vector<128x32xbf16> to vector<64x32xbf16>
    %272 = vector.extract_strided_slice %251 {offsets = [64, 0], sizes = [64, 32], strides = [1, 1]} : vector<128x32xbf16> to vector<64x32xbf16>
    %273 = vector.extract_strided_slice %252 {offsets = [64, 0], sizes = [64, 32], strides = [1, 1]} : vector<128x32xbf16> to vector<64x32xbf16>
    %cst_147 = arith.constant dense<0.000000e+00> : vector<64x64xf32>
    %274 = tpu.matmul %271, %272, %cst_147 {dimension_numbers = #tpu.dot_dimension_numbers<[1], [1], [0], [0], [0, 0, 1, 0], [], []>} : vector<64x32xbf16>, vector<64x32xbf16>, vector<64x64xf32> -> vector<64x64xf32>
    %cst_148 = arith.constant 0.176776692 : f32
    %275 = vector.broadcast %cst_148 : f32 to vector<64x64xf32>
    %276 = arith.mulf %274, %275 : vector<64x64xf32>
    %cst_149 = arith.constant dense<0xFF800000> : vector<64xf32>
    %277 = vector.multi_reduction <maximumf>, %276, %cst_149 [1] : vector<64x64xf32> to vector<64xf32>
    %278 = vector.shape_cast %277 : vector<64xf32> to vector<64x1xf32>
    %279 = vector.broadcast %278 : vector<64x1xf32> to vector<64x64xf32>
    %280 = arith.subf %276, %279 : vector<64x64xf32>
    %281 = math.exp %280 : vector<64x64xf32>
    %cst_150 = arith.constant dense<0.000000e+00> : vector<64xf32>
    %282 = vector.multi_reduction <add>, %281, %cst_150 [1] : vector<64x64xf32> to vector<64xf32>
    %283 = vector.shape_cast %282 : vector<64xf32> to vector<64x1xf32>
    %284 = tpu.reciprocal %283 {approx = true} : vector<64x1xf32> -> vector<64x1xf32>
    %285 = vector.broadcast %284 : vector<64x1xf32> to vector<64x64xf32>
    %286 = arith.mulf %281, %285 : vector<64x64xf32>
    %287 = arith.truncf %286 : vector<64x64xf32> to vector<64x64xbf16>
    %cst_151 = arith.constant dense<0.000000e+00> : vector<64x32xf32>
    %288 = tpu.matmul %287, %273, %cst_151 {dimension_numbers = #tpu.dot_dimension_numbers<[1], [0], [0], [1], [0, 0, 1, 1], [], []>} : vector<64x64xbf16>, vector<64x32xbf16>, vector<64x32xf32> -> vector<64x32xf32>
    %289 = tpu.concatenate %270, %288 in 0 : vector<64x32xf32>, vector<64x32xf32> -> vector<128x32xf32>
    %290 = arith.truncf %289 : vector<128x32xf32> to vector<128x32xbf16>
    %cst_152 = arith.constant dense<0.000000e+00> : vector<128x32xf32>
    %291 = tpu.matmul %290, %197, %cst_152 {dimension_numbers = #tpu.dot_dimension_numbers<[1], [0], [0], [1], [0, 0, 1, 1], [], []>} : vector<128x32xbf16>, vector<32x32xbf16>, vector<128x32xf32> -> vector<128x32xf32>
    %292 = arith.addf %217, %291 : vector<128x32xf32>
    %293 = vector.broadcast %179 : vector<1x32xf32> to vector<128x32xf32>
    %294 = arith.addf %292, %293 : vector<128x32xf32>
    %295 = arith.truncf %294 : vector<128x32xf32> to vector<128x32xbf16>
    %cst_153 = arith.constant dense<0.000000e+00> : vector<128x128xf32>
    %296 = tpu.matmul %295, %183, %cst_153 {dimension_numbers = #tpu.dot_dimension_numbers<[1], [0], [0], [1], [0, 0, 1, 1], [], []>} : vector<128x32xbf16>, vector<32x128xbf16>, vector<128x128xf32> -> vector<128x128xf32>
    %297 = vector.broadcast %181 : vector<1x128xf32> to vector<128x128xf32>
    %298 = arith.addf %296, %297 : vector<128x128xf32>
    %299 = arith.negf %298 : vector<128x128xf32>
    %300 = math.exp %299 : vector<128x128xf32>
    %cst_154 = arith.constant 1.000000e+00 : f32
    %301 = vector.broadcast %cst_154 : f32 to vector<128x128xf32>
    %302 = arith.addf %301, %300 : vector<128x128xf32>
    %303 = arith.divf %301, %302 : vector<128x128xf32>
    %304 = arith.mulf %298, %303 : vector<128x128xf32>
    %305 = arith.truncf %304 : vector<128x128xf32> to vector<128x128xbf16>
    %cst_155 = arith.constant dense<0.000000e+00> : vector<128x32xf32>
    %306 = tpu.matmul %305, %185, %cst_155 {dimension_numbers = #tpu.dot_dimension_numbers<[1], [1], [0], [0], [0, 0, 1, 0], [], []>} : vector<128x128xbf16>, vector<32x128xbf16>, vector<128x32xf32> -> vector<128x32xf32>
    %307 = vector.broadcast %180 : vector<1x32xf32> to vector<128x32xf32>
    %308 = arith.addf %306, %307 : vector<128x32xf32>
    %309 = arith.mulf %172, %308 : vector<128x32xf32>
    %310 = arith.addf %166, %309 : vector<128x32xf32>
    %311 = arith.mulf %172, %172 : vector<128x32xf32>
    %cst_156 = arith.constant 1.000000e+00 : f32
    %312 = vector.broadcast %cst_156 : f32 to vector<128x32xf32>
    %313 = arith.addf %312, %311 : vector<128x32xf32>
    %314 = math.rsqrt %313 : vector<128x32xf32>
    %315 = arith.mulf %310, %314 : vector<128x32xf32>
    %316 = arith.mulf %174, %9 : vector<128x32xf32>
    %317 = arith.addf %315, %316 : vector<128x32xf32>
    %318 = arith.mulf %174, %174 : vector<128x32xf32>
    %cst_157 = arith.constant 1.000000e+00 : f32
    %319 = vector.broadcast %cst_157 : f32 to vector<128x32xf32>
    %320 = arith.addf %319, %318 : vector<128x32xf32>
    %321 = math.rsqrt %320 : vector<128x32xf32>
    %322 = arith.mulf %317, %321 : vector<128x32xf32>
    %323 = arith.truncf %322 : vector<128x32xf32> to vector<128x32xbf16>
    %c0_158 = arith.constant 0 : index
    %c0_159 = arith.constant 0 : index
    %324 = vector.load %arg5[%c0_158, %c0_159] : memref<32x128xbf16, #tpu.memory_space<vmem>>, vector<32x128xbf16>
    %cst_160 = arith.constant dense<0.000000e+00> : vector<128x128xf32>
    %325 = tpu.matmul %323, %324, %cst_160 {dimension_numbers = #tpu.dot_dimension_numbers<[1], [0], [0], [1], [0, 0, 1, 1], [], []>} : vector<128x32xbf16>, vector<32x128xbf16>, vector<128x128xf32> -> vector<128x128xf32>
    %326 = vector.broadcast %1 : vector<1x128xf32> to vector<128x128xf32>
    %327 = arith.addf %325, %326 : vector<128x128xf32>
    %c0_161 = arith.constant 0 : index
    %c0_162 = arith.constant 0 : index
    %328 = vector.load %arg7[%c0_161, %c0_162] : memref<128x128xf32, #tpu.memory_space<vmem>>, vector<128x128xf32>
    tpu.vector_store %arg7[%c0_161, %c0_162], %327 {strides = array<i32>} : memref<128x128xf32, #tpu.memory_space<vmem>>, vector<128x128xf32>,
    return
  }
}

</mosaic_0001>

<bundles_post_ra>
// kernel: vit_forward_pallas.1
= control target key start
LH: loop header
LB: loop body
LE: loop exit
PB: predicated region body
PF: predicated region fallthrough
CT: control target
= control target key end

     0   :  { %vm81_vm0 = vcmask 130048   ;;  %vm339_vm1 = vcmask 261120   ;;  %s7319_s22 = smov 96   ;;  %s7320_s23 = smov 64   ;;  %vm1629_vm2 = vcmask 523264   ;;  %s10670_s4 = inlined_call_operand.vmem [shape: bf16[16,32], index: 4, kind: input, shape index: {}]   ;;  %s10671_s0 = inlined_call_operand.vmem [shape: f32[128,16], index: 0, kind: input, shape index: {}]   ;;  %s10672_s3 = inlined_call_operand.vmem [shape: f32[8,128], index: 3, kind: input, shape index: {}]   ;;  %s10673_s2 = inlined_call_operand.vmem [shape: f32[5,128,32], index: 2, kind: input, shape index: {}]   ;;  %s10674_s6 = inlined_call_operand.vmem [shape: bf16[2,32,448], index: 6, kind: input, shape index: {}]   ;;  %s10675_s1 = inlined_call_operand.vmem [shape: f32[8,128,32], index: 1, kind: input, shape index: {}]   ;;  %s10676_s5 = inlined_call_operand.vmem [shape: bf16[32,128], index: 5, kind: input, shape index: {}]   ;;  %s10677_s7 = inlined_call_operand.vmem [shape: f32[128,128], index: 7, kind: output, shape index: {}]  }
   0x1   :  { %v6720_v0 = vld [vmem:[%s10670_s4] sm:$0xff]   ;;  %v46_v2 = vld [vmem:[%s10671_s0 + $0x8] sm:$0xff]  ;;  %v47_v3 = vld [vmem:[%s10671_s0 + $0x10] sm:$0xff]  ;;  %s7321_s24 = smov 32  }
   0x2   :  { %v45_v1 = vld [vmem:[%s10671_s0] sm:$0xff]  ;;  %6215 = vmatprep.subr.bf16.mxu0 %v6720_v0  ;;  %v48_v5 = vld [vmem:[%s10671_s0 + $0x18] sm:$0xff]  ;;  %v50_v7 = vld [vmem:[%s10671_s0 + $0x28] sm:$0xff] }
   0x3   :  { %v61_v4 = vpack.c.bf16 %v46_v2, %v45_v1  ;;  %v49_v6 = vld [vmem:[%s10671_s0 + $0x20] sm:$0xff]  ;;  %6216 = vmatpush3.bf16.msra.mxu0 %v6720_v0  ;;  %v62_v8 = vpack.c.bf16 %v48_v5, %v47_v3  ;;  %v51_v10 = vld [vmem:[%s10671_s0 + $0x30] sm:$0xff]  ;;  %v52_v11 = vld [vmem:[%s10671_s0 + $0x38] sm:$0xff] }
   0x4   :  { %v63_v9 = vpack.c.bf16 %v50_v7, %v49_v6  ;;  %v53_v12 = vld [vmem:[%s10671_s0 + $0x40] sm:$0xff]  ;;  %v54_v13 = vld [vmem:[%s10671_s0 + $0x48] sm:$0xff]  ;;  %v64_v14 = vpack.c.bf16 %v52_v11, %v51_v10  ;;  %v55_v16 = vld [vmem:[%s10671_s0 + $0x50] sm:$0xff] }
   0x5   :  { %6217 = vmatprep.mubr.msk.bf16.mxu0 %vm81_vm0, %v61_v4  ;;  %v65_v15 = vpack.c.bf16 %v54_v13, %v53_v12  ;;  %v56_v17 = vld [vmem:[%s10671_s0 + $0x58] sm:$0xff]  ;;  %v57_v18 = vld [vmem:[%s10671_s0 + $0x60] sm:$0xff]  ;;  %v58_v19 = vld [vmem:[%s10671_s0 + $0x68] sm:$0xff] }
   0x6   :  { %6218 = vmatmul.mubr.msk.bf16.vlgmr.msra.gmra.mrb[0].mxu0 %vm81_vm0, %v62_v8  ;;  %v66_v20 = vpack.c.bf16 %v56_v17, %v55_v16  ;;  %v67_v21 = vpack.c.bf16 %v58_v19, %v57_v18  ;;  %v59_v22 = vld [vmem:[%s10671_s0 + $0x70] sm:$0xff]  ;;  %v60_v23 = vld [vmem:[%s10671_s0 + $0x78] sm:$0xff]  ;;  %v7424_v25 = vld [vmem:[%s10672_s3] ss:$0 sm:$0xff] }
   0x7   :  { %6221 = vmatprep.mubr.msk.bf16.mxu0 %vm81_vm0, %v63_v9  ;;  %v68_v24 = vpack.c.bf16 %v60_v23, %v59_v22  ;;  %v31_v27 = vld [vmem:[%s10673_s2 + $0x10] sm:$0xff]  ;;  %v29_v30 = vld [vmem:[%s10673_s2] sm:$0xff]  ;;  %v32_v33 = vld [vmem:[%s10673_s2 + $0x18] sm:$0xff] }
   0x8   :  { %v30_v37 = vld [vmem:[%s10673_s2 + $0x8] sm:$0xff]  ;;  %v33_v47 = vld [vmem:[%s10673_s2 + $0x20] sm:$0xff]  ;;  %v35_v54 = vld [vmem:[%s10673_s2 + $0x30] sm:$0xff] }
   0x9   :  { %v34_v53 = vld [vmem:[%s10673_s2 + $0x28] sm:$0xff]  ;;  %v36_v58 = vld [vmem:[%s10673_s2 + $0x38] sm:$0xff]  ;;  %v37_v2 = vld [vmem:[%s10673_s2 + $0x40] sm:$0xff] }
   0xa   :  { %v40_v7 = vld [vmem:[%s10673_s2 + $0x58] sm:$0xff]  ;;  %v39_v10 = vld [vmem:[%s10673_s2 + $0x50] sm:$0xff]  ;;  %v41_v23 = vld [vmem:[%s10673_s2 + $0x60] sm:$0xff] }
   0xe   :  { %6222 = vmatmul.mubr.msk.bf16.gmra.mrb[4].mxu0 %vm81_vm0, %v64_v14 }
   0xf   :  { %6225 = vmatprep.mubr.msk.bf16.mxu0 %vm81_vm0, %v65_v15  ;;  %v38_v15 = vld [vmem:[%s10673_s2 + $0x48] sm:$0xff] }
  0x16   :  { %6226 = vmatmul.mubr.msk.bf16.gmra.mrb[8].mxu0 %vm81_vm0, %v66_v20 }
  0x17   :  { %6229 = vmatprep.mubr.msk.bf16.mxu0 %vm81_vm0, %v67_v21 }
  0x1e   :  { %6230 = vmatmul.mubr.msk.bf16.gmra.mrb[12].mxu0 %vm81_vm0, %v68_v24  ;;  %v43_v24 = vld [vmem:[%s10673_s2 + $0x70] sm:$0xff] }
  0xd9   :  { %v6219_v26 = vpop.f32.mrb[0].mxu0 }
  0xda   :  { %v7430_v28 = vadd.f32 %v6219_v26, %v7424_v25  ;;  %v140_v29 = vpop.f32.mrb[1].mxu0 }
  0xdb   :  { %v7436_v31 = vadd.f32 %v7424_v25, %v140_v29  ;;  %v6220_v32 = vpop.f32.mrb[2].mxu0 }
  0xdc   :  { %10788 = vst [vmem:[#allocation2_spill] sm:$0xff] %v7430_v28  ;;  %v7442_v34 = vadd.f32 %v6220_v32, %v7424_v25  ;;  %v143_v35 = vpop.f32.mrb[3].mxu0  ;;  %v7445_v36 = vadd.f32 %v7430_v28, %v31_v27 }
  0xdd   :  { %10789 = vst [vmem:[#allocation3_spill] sm:$0xff] %v7436_v31  ;;  %v7451_v38 = vadd.f32 %v7424_v25, %v143_v35  ;;  %v7454_v39 = vadd.f32 %v7436_v31, %v29_v30  ;;  %v44_v30 = vld [vmem:[%s10673_s2 + $0x78] sm:$0xff]  ;;  %v42_v35 = vld [vmem:[%s10673_s2 + $0x68] sm:$0xff] }
  0xde   :  { %10790 = vst [vmem:[#allocation4_spill] sm:$0xff] %v7442_v34  ;;  %10791 = vst [vmem:[#allocation5_spill] sm:$0xff] %v7445_v36  ;;  %v346_v40 = vsel %vm339_vm1, %v7445_v36, 0.0  ;;  %v7459_v41 = vadd.f32 %v7442_v34, %v32_v33  ;;  %v8141_v31 = vld [vmem:[%s10673_s2 + $0x88] sm:$0xff] }
  0xdf   :  { %10792 = vst [vmem:[#allocation6_spill] sm:$0xff] %v7451_v38  ;;  %10793 = vst [vmem:[#allocation7_spill] sm:$0xff] %v7454_v39  ;;  %347 = vadd.xlane.f32.xlu1 %v346_v40  ;;  %v340_v42 = vsel %vm339_vm1, %v7454_v39, 0.0  ;;  %v7464_v43 = vadd.f32 %v7451_v38, %v30_v37  ;;  %v8124_v38 = vld [vmem:[%s10673_s2 + $0x100] sm:$0xff] }
  0xe0   :  { %10794 = vst [vmem:[#allocation8_spill] sm:$0xff] %v7459_v41  ;;  %341 = vadd.xlane.f32.xlu0 %v340_v42  ;;  %v349_v46 = vsel %vm339_vm1, %v7459_v41, 0.0 }
  0xe1   :  { %10795 = vst [vmem:[#allocation9_spill] sm:$0xff] %v7464_v43  ;;  %v6223_v44 = vpop.f32.mrb[4].mxu0  ;;  %v343_v51 = vsel %vm339_vm1, %v7464_v43, 0.0 }
  0xe2   :  { %v156_v45 = vpop.f32.mrb[5].mxu0  ;;  %v7472_v48 = vadd.f32 %v6223_v44, %v7424_v25 }
  0xe3   :  { %v7475_v49 = vadd.f32 %v7424_v25, %v156_v45  ;;  %350 = vadd.xlane.f32.xlu1 %v349_v46  ;;  %v6224_v50 = vpop.f32.mrb[6].mxu0 }
  0xe4   :  { %10796 = vst [vmem:[#allocation10_spill] sm:$0xff] %v7472_v48  ;;  %v159_v52 = vpop.f32.mrb[7].mxu0  ;;  %344 = vadd.xlane.f32.xlu0 %v343_v51  ;;  %v7486_v55 = vadd.f32 %v6224_v50, %v7424_v25  ;;  %v7503_v61 = vadd.f32 %v7472_v48, %v35_v54 }
  0xe5   :  { %10797 = vst [vmem:[#allocation11_spill] sm:$0xff] %v7475_v49  ;;  %v7489_v56 = vadd.f32 %v7424_v25, %v159_v52  ;;  %v7492_v57 = vadd.f32 %v7475_v49, %v33_v47  ;;  %v7605_v52 = vld [vmem:[%s10674_s6 + $0x8] ss:$16 sps:$4 sm:$0xff]   ;;  %v8106_v49 = vld [vmem:[%s10673_s2 + $0x90] sm:$0xff] }
  0xe6   :  { %10798 = vst [vmem:[#allocation12_spill] sm:$0xff] %v7486_v55  ;;  %10802 = vst [vmem:[#allocation16_spill] sm:$0xff] %v7503_v61  ;;  %v7508_v0 = vadd.f32 %v7486_v55, %v36_v58  ;;  %v358_v6 = vsel %vm339_vm1, %v7503_v61, 0.0  ;;  %6233 = vmatprep.subr.bf16.mxu1 %v7605_v52 }
  0xe7   :  { %10799 = vst [vmem:[#allocation13_spill] sm:$0xff] %v7489_v56  ;;  %10800 = vst [vmem:[#allocation14_spill] sm:$0xff] %v7492_v57  ;;  %v352_v59 = vsel %vm339_vm1, %v7492_v57, 0.0  ;;  %v7500_v60 = vadd.f32 %v7489_v56, %v34_v53  ;;  %v7611_v53 = vld [vmem:[%s10674_s6 + $0x28] ss:$16 sps:$4 sm:$0xff]   ;;  %6234 = vmatpush3.bf16.msra.mxu1 %v7605_v52 }
  0xe8   :  { %353 = vadd.xlane.f32.xlu0 %v352_v59  ;;  %10803 = vst [vmem:[#allocation17_spill] sm:$0xff] %v7508_v0  ;;  %v361_v12 = vsel %vm339_vm1, %v7508_v0, 0.0  ;;  %6235 = vmatprep.subr.bf16.mxu1 %v7611_v53 }
  0xe9   :  { %10801 = vst [vmem:[#allocation15_spill] sm:$0xff] %v7500_v60  ;;  %v6227_v62 = vpop.f32.mrb[8].mxu0  ;;  %v355_v63 = vsel %vm339_vm1, %v7500_v60, 0.0 }
  0xea   :  { %v172_v1 = vpop.f32.mrb[9].mxu0  ;;  %356 = vadd.xlane.f32.xlu1 %v355_v63  ;;  %v7514_v3 = vadd.f32 %v6227_v62, %v7424_v25 }
  0xeb   :  { %v7517_v4 = vadd.f32 %v7424_v25, %v172_v1  ;;  %v6228_v5 = vpop.f32.mrb[10].mxu0  ;;  %6236 = vmatpush3.bf16.msra.mxu1 %v7611_v53 }
  0xec   :  { %10804 = vst [vmem:[#allocation18_spill] sm:$0xff] %v7514_v3  ;;  %v7525_v8 = vadd.f32 %v6228_v5, %v7424_v25  ;;  %v175_v9 = vpop.f32.mrb[11].mxu0  ;;  %359 = vadd.xlane.f32.xlu0 %v358_v6  ;;  %v7547_v17 = vadd.f32 %v7514_v3, %v39_v10 }
  0xed   :  { %10805 = vst [vmem:[#allocation19_spill] sm:$0xff] %v7517_v4  ;;  %v7531_v11 = vadd.f32 %v7424_v25, %v175_v9  ;;  %v7536_v13 = vadd.f32 %v7517_v4, %v37_v2 }
  0xee   :  { %10806 = vst [vmem:[#allocation20_spill] sm:$0xff] %v7525_v8  ;;  %362 = vadd.xlane.f32.xlu1 %v361_v12  ;;  %v7539_v14 = vadd.f32 %v7525_v8, %v40_v7  ;;  %10810 = vst [vmem:[#allocation24_spill] sm:$0xff] %v7547_v17  ;;  %v370_v29 = vsel %vm339_vm1, %v7547_v17, 0.0 }
  0xef   :  { %10807 = vst [vmem:[#allocation21_spill] sm:$0xff] %v7531_v11  ;;  %10808 = vst [vmem:[#allocation22_spill] sm:$0xff] %v7536_v13  ;;  %v364_v16 = vsel %vm339_vm1, %v7536_v13, 0.0  ;;  %v7552_v20 = vadd.f32 %v7531_v11, %v38_v15 }
  0xf0   :  { %10809 = vst [vmem:[#allocation23_spill] sm:$0xff] %v7539_v14  ;;  %365 = vadd.xlane.f32.xlu0 %v364_v16  ;;  %v373_v18 = vsel %vm339_vm1, %v7539_v14, 0.0 }
  0xf1   :  { %v6231_v19 = vpop.f32.mrb[12].mxu0  ;;  %10811 = vst [vmem:[#allocation25_spill] sm:$0xff] %v7552_v20  ;;  %v367_v37 = vsel %vm339_vm1, %v7552_v20, 0.0 }
  0xf2   :  { %v7555_v21 = vadd.f32 %v6231_v19, %v7424_v25  ;;  %v188_v22 = vpop.f32.mrb[13].mxu0  ;;  %374 = vadd.xlane.f32.xlu1 %v373_v18 }
  0xf3   :  { %v7564_v26 = vadd.f32 %v7424_v25, %v188_v22  ;;  %v6232_v27 = vpop.f32.mrb[14].mxu0 }
  0xf4   :  { %10812 = vst [vmem:[#allocation26_spill] sm:$0xff] %v7555_v21  ;;  %v7572_v32 = vadd.f32 %v6232_v27, %v7424_v25  ;;  %371 = vadd.xlane.f32.xlu0 %v370_v29  ;;  %v191_v33 = vpop.f32.mrb[15].mxu0  ;;  %v7586_v44 = vadd.f32 %v7555_v21, %v43_v24 }
  0xf5   :  { %10813 = vst [vmem:[#allocation27_spill] sm:$0xff] %v7564_v26  ;;  %v7580_v40 = vadd.f32 %v7424_v25, %v191_v33  ;;  %v7583_v42 = vadd.f32 %v7564_v26, %v41_v23 }
  0xf6   :  { %10814 = vst [vmem:[#allocation28_spill] sm:$0xff] %v7572_v32  ;;  %10817 = vst [vmem:[#allocation31_spill] sm:$0xff] %v7586_v44  ;;  %368 = vadd.xlane.f32.xlu1 %v367_v37  ;;  %v7589_v45 = vadd.f32 %v7572_v32, %v44_v30  ;;  %v382_v50 = vsel %vm339_vm1, %v7586_v44, 0.0 }
  0xf7   :  { %10815 = vst [vmem:[#allocation29_spill] sm:$0xff] %v7580_v40  ;;  %10816 = vst [vmem:[#allocation30_spill] sm:$0xff] %v7583_v42  ;;  %v376_v46 = vsel %vm339_vm1, %v7583_v42, 0.0  ;;  %v7594_v47 = vadd.f32 %v7580_v40, %v42_v35 }
  0xf8   :  { %10818 = vst [vmem:[#allocation32_spill] sm:$0xff] %v7589_v45  ;;  %377 = vadd.xlane.f32.xlu0 %v376_v46  ;;  %v385_v25 = vsel %vm339_vm1, %v7589_v45, 0.0 }
  0xf9   :  { %10819 = vst [vmem:[#allocation33_spill] sm:$0xff] %v7594_v47  ;;  %v379_v51 = vsel %vm339_vm1, %v7594_v47, 0.0 }
  0xfa   :  { %386 = vadd.xlane.f32.xlu1 %v385_v25 }
  0xfc   :  { %383 = vadd.xlane.f32.xlu0 %v382_v50 }
  0xfe   :  { %380 = vadd.xlane.f32.xlu1 %v379_v51 }
 0x16c   :  { %v348_v54 = vpop.xlane.xlu1 %347 }
 0x16d   :  { %v391_v58 = vmul.f32 0.03125, %v348_v54  ;;  %v342_v59 = vpop.xlane.xlu0 %341 }
 0x16e   :  { %v389_v62 = vmul.f32 0.03125, %v342_v59 }
 0x16f   :  { %v7617_v63 = vsub.f32 %v7445_v36, %v391_v58 }
 0x170   :  { %v7620_v1 = vsub.f32 %v7454_v39, %v389_v62  ;;  %v351_v2 = vpop.xlane.xlu1 %350 }
 0x171   :  { %v392_v5 = vmul.f32 0.03125, %v351_v2  ;;  %v345_v6 = vpop.xlane.xlu0 %344  ;;  %v423_v7 = vmul.f32 %v7617_v63, %v7617_v63 }
 0x172   :  { %v390_v9 = vmul.f32 0.03125, %v345_v6  ;;  %v421_v15 = vmul.f32 %v7620_v1, %v7620_v1 }
 0x173   :  { %v7625_v10 = vsub.f32 %v7459_v41, %v392_v5  ;;  %v443_v12 = vsel %vm339_vm1, %v423_v7, 0.0 }
 0x174   :  { %v7631_v16 = vsub.f32 %v7464_v43, %v390_v9  ;;  %444 = vadd.xlane.f32.xlu0 %v443_v12  ;;  %v437_v24 = vsel %vm339_vm1, %v421_v15, 0.0  ;;  %v8134_v43 = vld [vmem:[%s10673_s2 + $0x118] sm:$0xff] }
 0x175   :  { %v354_v18 = vpop.xlane.xlu0 %353  ;;  %v424_v19 = vmul.f32 %v7625_v10, %v7625_v10 }
 0x176   :  { %v422_v27 = vmul.f32 %v7631_v16, %v7631_v16  ;;  %v393_v29 = vmul.f32 0.03125, %v354_v18 }
 0x177   :  { %v357_v22 = vpop.xlane.xlu1 %356  ;;  %v446_v23 = vsel %vm339_vm1, %v424_v19, 0.0 }
 0x178   :  { %447 = vadd.xlane.f32.xlu1 %v446_v23  ;;  %438 = vadd.xlane.f32.xlu0 %v437_v24  ;;  %v394_v33 = vmul.f32 0.03125, %v357_v22  ;;  %v440_v46 = vsel %vm339_vm1, %v422_v27, 0.0  ;;  %v7641_v25 = vsub.f32 %v7492_v57, %v393_v29 }
 0x179   :  { %v360_v30 = vpop.xlane.xlu0 %359 }
 0x17a   :  { %v395_v35 = vmul.f32 0.03125, %v360_v30  ;;  %v7647_v58 = vsub.f32 %v7500_v60, %v394_v33  ;;  %v425_v6 = vmul.f32 %v7641_v25, %v7641_v25 }
 0x17b   :  { %v363_v37 = vpop.xlane.xlu1 %362 }
 0x17c   :  { %v7644_v50 = vsub.f32 %v7503_v61, %v395_v35  ;;  %v396_v51 = vmul.f32 0.03125, %v363_v37  ;;  %441 = vadd.xlane.f32.xlu1 %v440_v46  ;;  %v426_v19 = vmul.f32 %v7647_v58, %v7647_v58  ;;  %v449_v23 = vsel %vm339_vm1, %v425_v6, 0.0  ;;  %v8114_v61 = vld [vmem:[%s10673_s2 + $0x110] sm:$0xff] }
 0x17d   :  { %v366_v54 = vpop.xlane.xlu0 %365 }
 0x17e   :  { %v7650_v59 = vsub.f32 %v7508_v0, %v396_v51  ;;  %v427_v62 = vmul.f32 %v7644_v50, %v7644_v50  ;;  %v397_v12 = vmul.f32 0.03125, %v366_v54  ;;  %v452_v29 = vsel %vm339_vm1, %v426_v19, 0.0 }
 0x17f   :  { %v375_v7 = vpop.xlane.xlu1 %374 }
 0x180   :  { %v455_v2 = vsel %vm339_vm1, %v427_v62, 0.0  ;;  %v428_v5 = vmul.f32 %v7650_v59, %v7650_v59  ;;  %v7667_v24 = vsub.f32 %v7536_v13, %v397_v12  ;;  %v400_v27 = vmul.f32 0.03125, %v375_v7 }
 0x181   :  { %456 = vadd.xlane.f32.xlu0 %v455_v2  ;;  %v372_v9 = vpop.xlane.xlu0 %371 }
 0x182   :  { %v399_v15 = vmul.f32 0.03125, %v372_v9  ;;  %v458_v18 = vsel %vm339_vm1, %v428_v5, 0.0  ;;  %v7673_v35 = vsub.f32 %v7539_v14, %v400_v27  ;;  %v429_v51 = vmul.f32 %v7667_v24, %v7667_v24 }
 0x183   :  { %459 = vadd.xlane.f32.xlu1 %v458_v18  ;;  %v369_v33 = vpop.xlane.xlu1 %368 }
 0x184   :  { %v7663_v22 = vsub.f32 %v7547_v17, %v399_v15  ;;  %v398_v37 = vmul.f32 0.03125, %v369_v33  ;;  %v461_v62 = vsel %vm339_vm1, %v429_v51, 0.0  ;;  %v432_v2 = vmul.f32 %v7673_v35, %v7673_v35 }
 0x185   :  { %450 = vadd.xlane.f32.xlu0 %v449_v23  ;;  %v378_v9 = vpop.xlane.xlu0 %377 }
 0x186   :  { %v431_v30 = vmul.f32 %v7663_v22, %v7663_v22  ;;  %v7679_v54 = vsub.f32 %v7552_v20, %v398_v37  ;;  %v470_v5 = vsel %vm339_vm1, %v432_v2, 0.0  ;;  %v401_v12 = vmul.f32 0.03125, %v378_v9 }
 0x187   :  { %453 = vadd.xlane.f32.xlu1 %v452_v29  ;;  %v387_v23 = vpop.xlane.xlu1 %386 }
 0x188   :  { %v467_v46 = vsel %vm339_vm1, %v431_v30, 0.0  ;;  %v430_v6 = vmul.f32 %v7679_v54, %v7679_v54  ;;  %v7693_v18 = vsub.f32 %v7583_v42, %v401_v12  ;;  %v404_v27 = vmul.f32 0.03125, %v387_v23 }
 0x189   :  { %v384_v15 = vpop.xlane.xlu0 %383 }
 0x18a   :  { %v464_v7 = vsel %vm339_vm1, %v430_v6, 0.0  ;;  %v403_v19 = vmul.f32 0.03125, %v384_v15  ;;  %v433_v30 = vmul.f32 %v7693_v18, %v7693_v18  ;;  %v7701_v33 = vsub.f32 %v7589_v45, %v404_v27 }
 0x18b   :  { %468 = vadd.xlane.f32.xlu1 %v467_v46  ;;  %v381_v51 = vpop.xlane.xlu1 %380 }
 0x18c   :  { %v7696_v29 = vsub.f32 %v7586_v44, %v403_v19  ;;  %v473_v37 = vsel %vm339_vm1, %v433_v30, 0.0  ;;  %v436_v2 = vmul.f32 %v7701_v33, %v7701_v33 }
 0x18e   :  { %v435_v46 = vmul.f32 %v7696_v29, %v7696_v29  ;;  %v482_v6 = vsel %vm339_vm1, %v436_v2, 0.0 }
 0x18f   :  { %462 = vadd.xlane.f32.xlu1 %v461_v62 }
 0x190   :  { %v479_v62 = vsel %vm339_vm1, %v435_v46, 0.0 }
 0x193   :  { %471 = vadd.xlane.f32.xlu1 %v470_v5  ;;  %v402_v5 = vmul.f32 0.03125, %v381_v51 }
 0x197   :  { %465 = vadd.xlane.f32.xlu1 %v464_v7  ;;  %v7711_v7 = vsub.f32 %v7594_v47, %v402_v5 }
 0x199   :  { %v434_v9 = vmul.f32 %v7711_v7, %v7711_v7 }
 0x19b   :  { %738 = vrot.lane.b32.xlu0 %v7605_v52, %s7319_s22  ;;  %v476_v12 = vsel %vm339_vm1, %v434_v9, 0.0 }
 0x1a8   :  { %740 = vrot.lane.b32.xlu1 %v7611_v53, %s7319_s22 }
 0x1ba   :  { %474 = vadd.xlane.f32.xlu0 %v473_v37 }
 0x1be   :  { %480 = vadd.xlane.f32.xlu0 %v479_v62 }
 0x1c2   :  { %483 = vadd.xlane.f32.xlu0 %v482_v6 }
 0x1cc   :  { %477 = vadd.xlane.f32.xlu1 %v476_v12 }
 0x1d8   :  { %841 = vrot.lane.b32.xlu0 %v7605_v52, %s7320_s23 }
 0x1dc   :  { %944 = vrot.lane.b32.xlu0 %v7605_v52, %s7321_s24 }
 0x1dd   :  { %843 = vrot.lane.b32.xlu1 %v7611_v53, %s7320_s23 }
 0x1e1   :  { %946 = vrot.lane.b32.xlu1 %v7611_v53, %s7321_s24  ;;  %v222_v53 = vld [vmem:[%s10675_s1 + $0x18] sm:$0xff] }
 0x201   :  { %v445_v15 = vpop.xlane.xlu0 %444 }
 0x202   :  { %v487_v19 = vmul.f32 0.03125, %v445_v15  ;;  %v219_v15 = vld [vmem:[%s10675_s1] sm:$0xff] }
 0x204   :  { %v519_v23 = vadd.f32 1e-05, %v487_v19 }
 0x205   :  { %v448_v27 = vpop.xlane.xlu1 %447  ;;  %v439_v30 = vpop.xlane.xlu0 %438 }
 0x206   :  { %v488_v37 = vmul.f32 0.03125, %v448_v27  ;;  %v485_v46 = vmul.f32 0.03125, %v439_v30  ;;  %6739 = vrsqrt.f32 %v519_v23 }
 0x208   :  { %v520_v51 = vadd.f32 1e-05, %v488_v37  ;;  %v517_v62 = vadd.f32 1e-05, %v485_v46  ;;  %v221_v37 = vld [vmem:[%s10675_s1 + $0x10] sm:$0xff] }
 0x209   :  { %v442_v2 = vpop.xlane.xlu1 %441  ;;  %v503_v47 = vadd.f32 1.0, %v221_v37  ;;  %v5574_v37 = vld [vmem:[%s10675_s1 + $0x98] sm:$0xff] }
 0x20a   :  { %6741 = vrsqrt.f32 %v520_v51  ;;  %v486_v5 = vmul.f32 0.03125, %v442_v2  ;;  %v504_v2 = vadd.f32 1.0, %v222_v53 }
 0x20b   :  { %6743 = vrsqrt.f32 %v517_v62 }
 0x20c   :  { %v518_v52 = vadd.f32 1e-05, %v486_v5  ;;  %v501_v5 = vadd.f32 1.0, %v219_v15 }
 0x20e   :  { %6745 = vrsqrt.f32 %v518_v52  ;;  %v457_v6 = vpop.xlane.xlu0 %456  ;;  %v220_v52 = vld [vmem:[%s10675_s1 + $0x8] sm:$0xff] }
 0x20f   :  { %v491_v9 = vmul.f32 0.03125, %v457_v6  ;;  %v502_v53 = vadd.f32 1.0, %v220_v52  ;;  %v225_v52 = vld [vmem:[%s10675_s1 + $0x30] sm:$0xff] }
 0x210   :  { %v460_v12 = vpop.xlane.xlu1 %459  ;;  %v6740_v30 = vpop.eup %6739 }
 0x211   :  { %v523_v19 = vadd.f32 1e-05, %v491_v9  ;;  %v492_v27 = vmul.f32 0.03125, %v460_v12  ;;  %v551_v26 = vmul.f32 %v6740_v30, %v7617_v63  ;;  %v5573_v30 = vld [vmem:[%s10675_s1 + $0x90] sm:$0xff] }
 0x212   :  { %v451_v23 = vpop.xlane.xlu0 %450 }
 0x213   :  { %v524_v46 = vadd.f32 1e-05, %v492_v27  ;;  %v489_v51 = vmul.f32 0.03125, %v451_v23  ;;  %6747 = vrsqrt.f32 %v523_v19  ;;  %v567_v63 = vmul.f32 %v551_v26, %v503_v47  ;;  %v223_v47 = vld [vmem:[%s10675_s1 + $0x20] sm:$0xff] }
 0x214   :  { %v6742_v62 = vpop.eup %6741  ;;  %v454_v6 = vpop.xlane.xlu1 %453 }
 0x215   :  { %v6744_v40 = vpop.eup %6743  ;;  %v552_v9 = vmul.f32 %v6742_v62, %v7625_v10  ;;  %6749 = vrsqrt.f32 %v524_v46  ;;  %v521_v12 = vadd.f32 1e-05, %v489_v51  ;;  %v490_v32 = vmul.f32 0.03125, %v454_v6 }
 0x216   :  { %v549_v27 = vmul.f32 %v6744_v40, %v7620_v1  ;;  %v739_v23 = vpop.permute.xlu0 %738  ;;  %v5571_v40 = vld [vmem:[%s10675_s1 + $0x80] sm:$0xff]  ;;  %v7767_v6 = vadd.f32 %v5573_v30, %v567_v63  ;;  %v507_v63 = vadd.f32 1.0, %v225_v52 }
 0x217   :  { %6751 = vrsqrt.f32 %v521_v12  ;;  %v522_v15 = vadd.f32 1e-05, %v490_v32  ;;  %6253 = vmatprep.subr.bf16.mxu0 %v739_v23  ;;  %v568_v42 = vmul.f32 %v552_v9, %v504_v2  ;;  %v5572_v32 = vld [vmem:[%s10675_s1 + $0x88] sm:$0xff]  ;;  %v5575_v52 = vld [vmem:[%s10675_s1 + $0xa0] sm:$0xff] }
 0x218   :  { %v6746_v45 = vpop.eup %6745  ;;  %v469_v19 = vpop.xlane.xlu1 %468  ;;  %6254 = vmatpush3.bf16.msra.mxu0 %v739_v23  ;;  %v565_v44 = vmul.f32 %v549_v27, %v501_v5  ;;  %10823 = vst [vmem:[#allocation37_spill] sm:$0xff] %v7767_v6 }
 0x219   :  { %v550_v10 = vmul.f32 %v6746_v45, %v7631_v16  ;;  %6753 = vrsqrt.f32 %v522_v15  ;;  %v226_v45 = vld [vmem:[%s10675_s1 + $0x38] sm:$0xff]  ;;  %v495_v16 = vmul.f32 0.03125, %v469_v19  ;;  %v7755_v26 = vadd.f32 %v5574_v37, %v568_v42  ;;  %v224_v42 = vld [vmem:[%s10675_s1 + $0x28] sm:$0xff] }
 0x21a   :  { %v7760_v62 = vadd.f32 %v5571_v40, %v565_v44  ;;  %v508_v12 = vadd.f32 1.0, %v226_v45 }
 0x21b   :  { %v566_v1 = vmul.f32 %v550_v10, %v502_v53  ;;  %10820 = vst [vmem:[#allocation34_spill] sm:$0xff] %v7755_v26  ;;  %v505_v53 = vadd.f32 1.0, %v223_v47  ;;  %v527_v15 = vadd.f32 1e-05, %v495_v16  ;;  %v7779_v10 = vpack.c.bf16 %v7755_v26, %v7767_v6 }
 0x21c   :  { %v463_v46 = vpop.xlane.xlu1 %462  ;;  %10821 = vst [vmem:[#allocation35_spill] sm:$0xff] %v7760_v62 }
 0x21d   :  { %v493_v51 = vmul.f32 0.03125, %v463_v46  ;;  %v7762_v2 = vadd.f32 %v5572_v32, %v566_v1  ;;  %v6748_v5 = vpop.eup %6747  ;;  %v506_v1 = vadd.f32 1.0, %v224_v42 }
 0x21e   :  { %v555_v40 = vmul.f32 %v6748_v5, %v7644_v50 }
 0x21f   :  { %10822 = vst [vmem:[#allocation36_spill] sm:$0xff] %v7762_v2  ;;  %v6750_v9 = vpop.eup %6749  ;;  %v525_v27 = vadd.f32 1e-05, %v493_v51  ;;  %v7774_v44 = vpack.c.bf16 %v7762_v2, %v7760_v62  ;;  %v5578_v51 = vld [vmem:[%s10675_s1 + $0xb8] sm:$0xff] }
 0x220   :  { %v556_v23 = vmul.f32 %v6750_v9, %v7650_v59  ;;  %v472_v19 = vpop.xlane.xlu1 %471  ;;  %v571_v5 = vmul.f32 %v555_v40, %v507_v63  ;;  %v5576_v9 = vld [vmem:[%s10675_s1 + $0xa8] sm:$0xff]  ;;  %v230_v40 = vld [vmem:[%s10675_s1 + $0x58] sm:$0xff] }
 0x221   :  { %v6752_v37 = vpop.eup %6751  ;;  %v496_v32 = vmul.f32 0.03125, %v472_v19  ;;  %6237 = vmatprep.mubr.msk.bf16.mxu1 %vm339_vm1, %v7774_v44  ;;  %6257 = vmatprep.mubr.msk.bf16.mxu0 %vm339_vm1, %v7774_v44  ;;  %6755 = vrsqrt.f32 %v525_v27 }
 0x222   :  { %v553_v59 = vmul.f32 %v6752_v37, %v7641_v25  ;;  %6238 = vmatmul.mubr.msk.bf16.vlgmr.msra.gmra.mrb[0].mxu1 %vm339_vm1, %v7779_v10  ;;  %v572_v45 = vmul.f32 %v556_v23, %v508_v12  ;;  %6757 = vrsqrt.f32 %v527_v15 }
 0x223   :  { %v6754_v30 = vpop.eup %6753  ;;  %v528_v16 = vadd.f32 1e-05, %v496_v32 }
 0x224   :  { %v569_v46 = vmul.f32 %v553_v59, %v505_v53  ;;  %v554_v50 = vmul.f32 %v6754_v30, %v7647_v58  ;;  %v466_v47 = vpop.xlane.xlu1 %465  ;;  %v5577_v58 = vld [vmem:[%s10675_s1 + $0xb0] sm:$0xff]  ;;  %v7802_v27 = vadd.f32 %v5578_v51, %v572_v45  ;;  %v227_v59 = vld [vmem:[%s10675_s1 + $0x40] sm:$0xff] }
 0x225   :  { %6759 = vrsqrt.f32 %v528_v16  ;;  %v494_v25 = vmul.f32 0.03125, %v466_v47  ;;  %v7808_v19 = vadd.f32 %v5577_v58, %v571_v5  ;;  %v229_v30 = vld [vmem:[%s10675_s1 + $0x50] sm:$0xff]  ;;  %v512_v16 = vadd.f32 1.0, %v230_v40 }
 0x226   :  { %v570_v12 = vmul.f32 %v554_v50, %v506_v1  ;;  %10824 = vst [vmem:[#allocation38_spill] sm:$0xff] %v7802_v27  ;;  %v7804_v53 = vadd.f32 %v5575_v52, %v569_v46  ;;  %v228_v46 = vld [vmem:[%s10675_s1 + $0x48] sm:$0xff]  ;;  %v509_v50 = vadd.f32 1.0, %v227_v59  ;;  %v511_v5 = vadd.f32 1.0, %v229_v30 }
 0x227   :  { %v526_v42 = vadd.f32 1e-05, %v494_v25  ;;  %10827 = vst [vmem:[#allocation41_spill] sm:$0xff] %v7808_v19  ;;  %v7816_v63 = vpack.c.bf16 %v7802_v27, %v7808_v19  ;;  %v510_v52 = vadd.f32 1.0, %v228_v46 }
 0x228   :  { %v741_v23 = vpop.permute.xlu1 %740  ;;  %10825 = vst [vmem:[#allocation39_spill] sm:$0xff] %v7804_v53  ;;  %v7806_v15 = vadd.f32 %v5576_v9, %v570_v12 }
 0x229   :  { %6761 = vrsqrt.f32 %v526_v42  ;;  %6255 = vmatprep.subr.bf16.mxu0 %v741_v23 }
 0x22a   :  { %10826 = vst [vmem:[#allocation40_spill] sm:$0xff] %v7806_v15  ;;  %6256 = vmatpush3.bf16.msra.mxu0 %v741_v23  ;;  %v7812_v37 = vpack.c.bf16 %v7806_v15, %v7804_v53  ;;  %v5582_v23 = vld [vmem:[%s10675_s1 + $0xd8] sm:$0xff] }
 0x22b   :  { %v6756_v32 = vpop.eup %6755 }
 0x22c   :  { %6241 = vmatprep.mubr.msk.bf16.mxu1 %vm339_vm1, %v7812_v37  ;;  %v6758_v1 = vpop.eup %6757  ;;  %v557_v47 = vmul.f32 %v6756_v32, %v7667_v24  ;;  %v5579_v24 = vld [vmem:[%s10675_s1 + $0xc0] sm:$0xff] }
 0x22d   :  { %6242 = vmatmul.mubr.msk.bf16.gmra.mrb[4].mxu1 %vm339_vm1, %v7816_v63  ;;  %6258 = vmatmul.mubr.msk.bf16.vlgmr.msra.gmra.mrb[16].mxu0 %vm339_vm1, %v7779_v10  ;;  %v559_v25 = vmul.f32 %v6758_v1, %v7663_v22  ;;  %v5580_v22 = vld [vmem:[%s10675_s1 + $0xc8] sm:$0xff] }
 0x22e   :  { %6261 = vmatprep.mubr.msk.bf16.mxu0 %vm339_vm1, %v7812_v37  ;;  %v573_v58 = vmul.f32 %v557_v47, %v509_v50 }
 0x22f   :  { %v6760_v45 = vpop.eup %6759  ;;  %v575_v40 = vmul.f32 %v559_v25, %v511_v5 }
 0x230   :  { %v560_v51 = vmul.f32 %v6760_v45, %v7673_v35  ;;  %v7858_v59 = vadd.f32 %v5579_v24, %v573_v58 }
 0x232   :  { %v576_v12 = vmul.f32 %v560_v51, %v512_v16  ;;  %10829 = vst [vmem:[#allocation43_spill] sm:$0xff] %v7858_v59 }
 0x233   :  { %v6762_v9 = vpop.eup %6761 }
 0x234   :  { %v558_v42 = vmul.f32 %v6762_v9, %v7679_v54  ;;  %v5581_v54 = vld [vmem:[%s10675_s1 + $0xd0] sm:$0xff]  ;;  %v7856_v32 = vadd.f32 %v5582_v23, %v576_v12 }
 0x235   :  { %6262 = vmatmul.mubr.msk.bf16.gmra.mrb[20].mxu0 %vm339_vm1, %v7816_v63  ;;  %v7862_v30 = vadd.f32 %v5581_v54, %v575_v40 }
 0x236   :  { %v574_v35 = vmul.f32 %v558_v42, %v510_v52  ;;  %10828 = vst [vmem:[#allocation42_spill] sm:$0xff] %v7856_v32 }
 0x237   :  { %10831 = vst [vmem:[#allocation45_spill] sm:$0xff] %v7862_v30  ;;  %v7870_v16 = vpack.c.bf16 %v7856_v32, %v7862_v30 }
 0x238   :  { %v7860_v1 = vadd.f32 %v5580_v22, %v574_v35  ;;  %v6723_v22 = vld [vmem:[%s10674_s6 + $0xc] ss:$16 sps:$4 sm:$0xff]  }
 0x23a   :  { %10830 = vst [vmem:[#allocation44_spill] sm:$0xff] %v7860_v1  ;;  %v7866_v45 = vpack.c.bf16 %v7860_v1, %v7858_v59 }
 0x23c   :  { %6245 = vmatprep.mubr.msk.bf16.mxu1 %vm339_vm1, %v7866_v45  ;;  %6265 = vmatprep.mubr.msk.bf16.mxu0 %vm339_vm1, %v7866_v45 }
 0x23d   :  { %6246 = vmatmul.mubr.msk.bf16.gmra.mrb[8].mxu1 %vm339_vm1, %v7870_v16  ;;  %6266 = vmatmul.mubr.msk.bf16.gmra.mrb[24].mxu0 %vm339_vm1, %v7870_v16 }
 0x247   :  { %v475_v46 = vpop.xlane.xlu0 %474 }
 0x248   :  { %v497_v51 = vmul.f32 0.03125, %v475_v46  ;;  %v234_v46 = vld [vmem:[%s10675_s1 + $0x78] sm:$0xff] }
 0x24a   :  { %v529_v12 = vadd.f32 1e-05, %v497_v51  ;;  %v231_v51 = vld [vmem:[%s10675_s1 + $0x60] sm:$0xff] }
 0x24b   :  { %v481_v50 = vpop.xlane.xlu0 %480 }
 0x24c   :  { %v499_v25 = vmul.f32 0.03125, %v481_v50 }
 0x24e   :  { %v531_v58 = vadd.f32 1e-05, %v499_v25  ;;  %v233_v25 = vld [vmem:[%s10675_s1 + $0x70] sm:$0xff] }
 0x24f   :  { %v484_v47 = vpop.xlane.xlu0 %483 }
 0x250   :  { %v500_v5 = vmul.f32 0.03125, %v484_v47 }
 0x252   :  { %v532_v52 = vadd.f32 1e-05, %v500_v5 }
 0x253   :  { %v842_v9 = vpop.permute.xlu0 %841 }
 0x254   :  { %6273 = vmatprep.subr.bf16.mxu1 %v842_v9  ;;  %6763 = vrsqrt.f32 %v532_v52  ;;  %v516_v52 = vadd.f32 1.0, %v234_v46  ;;  %v5583_v46 = vld [vmem:[%s10675_s1 + $0xe0] sm:$0xff] }
 0x255   :  { %6274 = vmatpush3.bf16.msra.mxu1 %v842_v9  ;;  %6765 = vrsqrt.f32 %v529_v12  ;;  %v232_v12 = vld [vmem:[%s10675_s1 + $0x68] sm:$0xff] }
 0x256   :  { %6767 = vrsqrt.f32 %v531_v58  ;;  %v513_v58 = vadd.f32 1.0, %v231_v51 }
 0x257   :  { %v945_v42 = vpop.permute.xlu0 %944 }
 0x258   :  { %6293 = vmatprep.subr.bf16.mxu0 %v945_v42 }
 0x259   :  { %v478_v23 = vpop.xlane.xlu1 %477  ;;  %6294 = vmatpush3.bf16.msra.mxu0 %v945_v42 }
 0x25a   :  { %v498_v40 = vmul.f32 0.03125, %v478_v23  ;;  %v515_v23 = vadd.f32 1.0, %v233_v25 }
 0x25c   :  { %v530_v24 = vadd.f32 1e-05, %v498_v40 }
 0x25d   :  { %v844_v35 = vpop.permute.xlu1 %843 }
 0x25e   :  { %6769 = vrsqrt.f32 %v530_v24  ;;  %6275 = vmatprep.subr.bf16.mxu1 %v844_v35  ;;  %v6764_v54 = vpop.eup %6763  ;;  %v514_v24 = vadd.f32 1.0, %v232_v12 }
 0x25f   :  { %6276 = vmatpush3.bf16.msra.mxu1 %v844_v35  ;;  %v6766_v47 = vpop.eup %6765  ;;  %v564_v9 = vmul.f32 %v6764_v54, %v7701_v33  ;;  %v5586_v33 = vld [vmem:[%s10675_s1 + $0xf8] sm:$0xff] }
 0x260   :  { %6313 = vmatprep.subr.bf16.mxu1 %v6723_v22  ;;  %v6768_v5 = vpop.eup %6767  ;;  %v561_v42 = vmul.f32 %v6766_v47, %v7693_v18  ;;  %v5584_v18 = vld [vmem:[%s10675_s1 + $0xe8] sm:$0xff] }
 0x261   :  { %v947_v50 = vpop.permute.xlu1 %946  ;;  %v563_v40 = vmul.f32 %v6768_v5, %v7696_v29  ;;  %v580_v21 = vmul.f32 %v564_v9, %v516_v52 }
 0x262   :  { %6295 = vmatprep.subr.bf16.mxu0 %v947_v50  ;;  %v577_v11 = vmul.f32 %v561_v42, %v513_v58 }
 0x263   :  { %6296 = vmatpush3.bf16.msra.mxu0 %v947_v50  ;;  %v579_v54 = vmul.f32 %v563_v40, %v515_v23  ;;  %v5585_v50 = vld [vmem:[%s10675_s1 + $0xf0] sm:$0xff]  ;;  %v7911_v47 = vadd.f32 %v5586_v33, %v580_v21 }
 0x265   :  { %10832 = vst [vmem:[#allocation46_spill] sm:$0xff] %v7911_v47  ;;  %v7917_v5 = vadd.f32 %v5585_v50, %v579_v54 }
 0x267   :  { %10835 = vst [vmem:[#allocation49_spill] sm:$0xff] %v7917_v5  ;;  %v604_v52 = vpack.c.bf16 %v7911_v47, %v7917_v5  ;;  %v8150_v47 = vld [vmem:[%s10673_s2 + $0x108] sm:$0xff] }
 0x268   :  { %v6770_v35 = vpop.eup %6769 }
 0x269   :  { %v562_v8 = vmul.f32 %v6770_v35, %v7711_v7  ;;  %v7913_v7 = vadd.f32 %v5583_v46, %v577_v11 }
 0x26b   :  { %v578_v29 = vmul.f32 %v562_v8, %v514_v24  ;;  %10833 = vst [vmem:[#allocation47_spill] sm:$0xff] %v7913_v7  ;;  %v6724_v8 = vld [vmem:[%s10674_s6 + $0x2c] ss:$16 sps:$4 sm:$0xff]  }
 0x26d   :  { %v7915_v51 = vadd.f32 %v5584_v18, %v578_v29 }
 0x26f   :  { %10834 = vst [vmem:[#allocation48_spill] sm:$0xff] %v7915_v51  ;;  %v603_v25 = vpack.c.bf16 %v7915_v51, %v7913_v7 }
 0x271   :  { %6249 = vmatprep.mubr.msk.bf16.mxu1 %vm339_vm1, %v603_v25  ;;  %6269 = vmatprep.mubr.msk.bf16.mxu0 %vm339_vm1, %v603_v25 }
 0x272   :  { %6250 = vmatmul.mubr.msk.bf16.gmra.mrb[12].mxu1 %vm339_vm1, %v604_v52  ;;  %6270 = vmatmul.mubr.msk.bf16.gmra.mrb[28].mxu0 %vm339_vm1, %v604_v52 }
 0x273   :  { %6277 = vmatprep.mubr.msk.bf16.mxu1 %vm339_vm1, %v7774_v44  ;;  %6297 = vmatprep.mubr.msk.bf16.mxu0 %vm339_vm1, %v7774_v44 }
 0x27a   :  { %6278 = vmatmul.mubr.msk.bf16.vlgmr.msra.gmra.mrb[16].mxu1 %vm339_vm1, %v7779_v10  ;;  %6298 = vmatmul.mubr.msk.bf16.vlgmr.msra.gmra.mrb[32].mxu0 %vm339_vm1, %v7779_v10 }
 0x27b   :  { %6281 = vmatprep.mubr.msk.bf16.mxu1 %vm339_vm1, %v7812_v37  ;;  %6301 = vmatprep.mubr.msk.bf16.mxu0 %vm339_vm1, %v7812_v37 }
 0x27c   :  { %6314 = vmatpush3.bf16.msra.mxu1 %v6723_v22 }
 0x27d   :  { %6315 = vmatprep.subr.bf16.mxu1 %v6724_v8 }
 0x280   :  { %6316 = vmatpush3.bf16.msra.mxu1 %v6724_v8 }
 0x282   :  { %6282 = vmatmul.mubr.msk.bf16.gmra.mrb[20].mxu1 %vm339_vm1, %v7816_v63  ;;  %6302 = vmatmul.mubr.msk.bf16.gmra.mrb[36].mxu0 %vm339_vm1, %v7816_v63 }
 0x283   :  { %6285 = vmatprep.mubr.msk.bf16.mxu1 %vm339_vm1, %v7866_v45  ;;  %6305 = vmatprep.mubr.msk.bf16.mxu0 %vm339_vm1, %v7866_v45 }
 0x28a   :  { %6286 = vmatmul.mubr.msk.bf16.gmra.mrb[24].mxu1 %vm339_vm1, %v7870_v16  ;;  %6306 = vmatmul.mubr.msk.bf16.gmra.mrb[40].mxu0 %vm339_vm1, %v7870_v16 }
 0x28b   :  { %6289 = vmatprep.mubr.msk.bf16.mxu1 %vm339_vm1, %v603_v25  ;;  %6309 = vmatprep.mubr.msk.bf16.mxu0 %vm339_vm1, %v603_v25 }
 0x292   :  { %6290 = vmatmul.mubr.msk.bf16.gmra.mrb[28].mxu1 %vm339_vm1, %v604_v52  ;;  %6310 = vmatmul.mubr.msk.bf16.gmra.mrb[44].mxu0 %vm339_vm1, %v604_v52 }
 0x293   :  { %6317 = vmatprep.mubr.msk.bf16.mxu1 %vm339_vm1, %v7774_v44 }
 0x29a   :  { %6318 = vmatmul.mubr.msk.bf16.vlgmr.msra.gmra.mrb[32].mxu1 %vm339_vm1, %v7779_v10 }
 0x29b   :  { %6321 = vmatprep.mubr.msk.bf16.mxu1 %vm339_vm1, %v7812_v37 }
 0x2a2   :  { %6322 = vmatmul.mubr.msk.bf16.gmra.mrb[36].mxu1 %vm339_vm1, %v7816_v63 }
 0x2a3   :  { %6325 = vmatprep.mubr.msk.bf16.mxu1 %vm339_vm1, %v7866_v45 }
 0x2aa   :  { %6326 = vmatmul.mubr.msk.bf16.gmra.mrb[40].mxu1 %vm339_vm1, %v7870_v16 }
 0x2ab   :  { %6329 = vmatprep.mubr.msk.bf16.mxu1 %vm339_vm1, %v603_v25 }
 0x2b2   :  { %6330 = vmatmul.mubr.msk.bf16.gmra.mrb[44].mxu1 %vm339_vm1, %v604_v52 }
 0x2f5   :  { %v7972_v11 = vpop.f32.mrb[0].mxu1 }
 0x2f6   :  { %v7974_v21 = vpop.f32.mrb[1].mxu1 }
 0x2f7   :  { %v7976_v44 = vpop.f32.mrb[2].mxu1 }
 0x2f8   :  { %v7978_v10 = vpop.f32.mrb[3].mxu1  ;;  %v1159_v17 = vmul.f32 %v7976_v44, %v7976_v44 }
 0x2fa   :  { %v1181_v55 = vsel %vm339_vm1, %v1159_v17, 0.0 }
 0x300   :  { %v7980_v37 = vpop.f32.mrb[4].mxu1  ;;  %v7982_v63 = vpop.f32.mrb[16].mxu0 }
 0x301   :  { %v7984_v45 = vpop.f32.mrb[5].mxu1  ;;  %v7986_v22 = vpop.f32.mrb[17].mxu0  ;;  %v1270_v40 = vmul.f32 %v7982_v63, %v7982_v63 }
 0x302   :  { %v1268_v16 = vmul.f32 %v7986_v22, %v7986_v22  ;;  %v7990_v9 = vpop.f32.mrb[6].mxu1  ;;  %v7992_v12 = vpop.f32.mrb[18].mxu0 }
 0x303   :  { %v7994_v58 = vpop.f32.mrb[7].mxu1  ;;  %v7996_v42 = vpop.f32.mrb[19].mxu0  ;;  %v1271_v54 = vmul.f32 %v7992_v12, %v7992_v12  ;;  %v1290_v46 = vsel %vm339_vm1, %v1270_v40, 0.0 }
 0x304   :  { %v1269_v23 = vmul.f32 %v7996_v42, %v7996_v42  ;;  %v1284_v24 = vsel %vm339_vm1, %v1268_v16, 0.0 }
 0x305   :  { %1285 = vadd.xlane.f32.xlu0 %v1284_v24  ;;  %v1293_v8 = vsel %vm339_vm1, %v1271_v54, 0.0  ;;  %v1157_v54 = vmul.f32 %v7978_v10, %v7978_v10 }
 0x306   :  { %v1287_v35 = vsel %vm339_vm1, %v1269_v23, 0.0 }
 0x307   :  { %1288 = vadd.xlane.f32.xlu1 %v1287_v35 }
 0x308   :  { %v8004_v33 = vpop.f32.mrb[20].mxu0 }
 0x309   :  { %v8009_v18 = vpop.f32.mrb[21].mxu0  ;;  %1291 = vadd.xlane.f32.xlu0 %v1290_v46  ;;  %v1274_v35 = vmul.f32 %v8004_v33, %v8004_v33 }
 0x30a   :  { %v8011_v29 = vpop.f32.mrb[22].mxu0  ;;  %v1272_v52 = vmul.f32 %v8009_v18, %v8009_v18 }
 0x30b   :  { %v8013_v50 = vpop.f32.mrb[23].mxu0  ;;  %v1275_v16 = vmul.f32 %v8011_v29, %v8011_v29  ;;  %v1302_v13 = vsel %vm339_vm1, %v1274_v35, 0.0 }
 0x30c   :  { %v1273_v25 = vmul.f32 %v8013_v50, %v8013_v50  ;;  %v1296_v20 = vsel %vm339_vm1, %v1272_v52, 0.0  ;;  %v1156_v52 = vmul.f32 %v7974_v21, %v7974_v21 }
 0x30d   :  { %1294 = vadd.xlane.f32.xlu0 %v1293_v8 }
 0x30e   :  { %v1299_v23 = vsel %vm339_vm1, %v1273_v25, 0.0  ;;  %v1172_v56 = vsel %vm339_vm1, %v1156_v52, 0.0 }
 0x30f   :  { %1300 = vadd.xlane.f32.xlu1 %v1299_v23  ;;  %v1305_v23 = vsel %vm339_vm1, %v1275_v16, 0.0  ;;  %v1158_v16 = vmul.f32 %v7972_v11, %v7972_v11 }
 0x310   :  { %v8023_v40 = vpop.f32.mrb[8].mxu1  ;;  %v8025_v24 = vpop.f32.mrb[24].mxu0 }
 0x311   :  { %v8029_v46 = vpop.f32.mrb[9].mxu1  ;;  %v8032_v4 = vpop.f32.mrb[25].mxu0  ;;  %1297 = vadd.xlane.f32.xlu0 %v1296_v20  ;;  %v1175_v20 = vsel %vm339_vm1, %v1157_v54, 0.0  ;;  %v1278_v52 = vmul.f32 %v8025_v24, %v8025_v24 }
 0x312   :  { %v8036_v8 = vpop.f32.mrb[10].mxu1  ;;  %v8038_v25 = vpop.f32.mrb[26].mxu0  ;;  %v1276_v35 = vmul.f32 %v8032_v4, %v8032_v4  ;;  %v1164_v41 = vmul.f32 %v8029_v46, %v8029_v46 }
 0x313   :  { %v8041_v14 = vpop.f32.mrb[11].mxu1  ;;  %1306 = vadd.xlane.f32.xlu1 %v1305_v23  ;;  %v8043_v3 = vpop.f32.mrb[27].mxu0  ;;  %v1279_v54 = vmul.f32 %v8038_v25, %v8038_v25 }
 0x314   :  { %v1277_v23 = vmul.f32 %v8043_v3, %v8043_v3  ;;  %v1165_v7 = vmul.f32 %v8041_v14, %v8041_v14 }
 0x315   :  { %1303 = vadd.xlane.f32.xlu0 %v1302_v13  ;;  %v1178_v13 = vsel %vm339_vm1, %v1158_v16, 0.0  ;;  %v1317_v17 = vsel %vm339_vm1, %v1279_v54, 0.0  ;;  %v1160_v16 = vmul.f32 %v7984_v45, %v7984_v45 }
 0x317   :  { %1176 = vadd.xlane.f32.xlu1 %v1175_v20  ;;  %v1311_v20 = vsel %vm339_vm1, %v1277_v23, 0.0  ;;  %v1163_v23 = vmul.f32 %v7990_v9, %v7990_v9 }
 0x319   :  { %1173 = vadd.xlane.f32.xlu0 %v1172_v56  ;;  %v1308_v56 = vsel %vm339_vm1, %v1276_v35, 0.0  ;;  %v1162_v35 = vmul.f32 %v7980_v37, %v7980_v37  ;;  %v1193_v54 = vsel %vm339_vm1, %v1163_v23, 0.0 }
 0x31b   :  { %1182 = vadd.xlane.f32.xlu1 %v1181_v55  ;;  %v1161_v55 = vmul.f32 %v7994_v58, %v7994_v58 }
 0x31d   :  { %1179 = vadd.xlane.f32.xlu0 %v1178_v13  ;;  %v1314_v13 = vsel %vm339_vm1, %v1278_v52, 0.0 }
 0x31f   :  { %1312 = vadd.xlane.f32.xlu1 %v1311_v20  ;;  %v1187_v20 = vsel %vm339_vm1, %v1161_v55, 0.0 }
 0x321   :  { %1309 = vadd.xlane.f32.xlu0 %v1308_v56  ;;  %v1184_v56 = vsel %vm339_vm1, %v1160_v16, 0.0 }
 0x323   :  { %1318 = vadd.xlane.f32.xlu1 %v1317_v17  ;;  %v1190_v17 = vsel %vm339_vm1, %v1162_v35, 0.0 }
 0x325   :  { %1315 = vadd.xlane.f32.xlu0 %v1314_v13 }
 0x327   :  { %1188 = vadd.xlane.f32.xlu1 %v1187_v20 }
 0x329   :  { %1185 = vadd.xlane.f32.xlu0 %v1184_v56 }
 0x32b   :  { %1194 = vadd.xlane.f32.xlu1 %v1193_v54 }
 0x32d   :  { %1191 = vadd.xlane.f32.xlu0 %v1190_v17 }
 0x345   :  { %v8080_v52 = vpop.f32.mrb[12].mxu1  ;;  %v8082_v60 = vpop.f32.mrb[28].mxu0 }
 0x346   :  { %v8084_v13 = vpop.f32.mrb[13].mxu1  ;;  %v8086_v55 = vpop.f32.mrb[29].mxu0  ;;  %v1282_v54 = vmul.f32 %v8082_v60, %v8082_v60 }
 0x347   :  { %10836 = vst [vmem:[#allocation50_spill] sm:$0xff] %v8086_v55  ;;  %v1280_v20 = vmul.f32 %v8086_v55, %v8086_v55  ;;  %v8090_v0 = vpop.f32.mrb[14].mxu1  ;;  %v8092_v16 = vpop.f32.mrb[30].mxu0 }
 0x348   :  { %10837 = vst [vmem:[#allocation51_spill] sm:$0xff] %v8092_v16  ;;  %v8094_v23 = vpop.f32.mrb[15].mxu1  ;;  %v8096_v56 = vpop.f32.mrb[31].mxu0  ;;  %v1283_v48 = vmul.f32 %v8092_v16, %v8092_v16  ;;  %v1326_v39 = vsel %vm339_vm1, %v1282_v54, 0.0 }
 0x349   :  { %10838 = vst [vmem:[#allocation52_spill] sm:$0xff] %v8096_v56  ;;  %v1281_v35 = vmul.f32 %v8096_v56, %v8096_v56  ;;  %v1320_v17 = vsel %vm339_vm1, %v1280_v20, 0.0  ;;  %v8119_v20 = vld [vmem:[%s10673_s2 + $0x80] sm:$0xff] }
 0x34a   :  { %1321 = vadd.xlane.f32.xlu0 %v1320_v17  ;;  %v1329_v54 = vsel %vm339_vm1, %v1283_v48, 0.0  ;;  %v8171_v48 = vld [vmem:[%s10673_s2 + $0xb0] sm:$0xff] }
 0x34b   :  { %v1323_v57 = vsel %vm339_vm1, %v1281_v35, 0.0  ;;  %v8129_v35 = vld [vmem:[%s10673_s2 + $0x98] sm:$0xff] }
 0x34c   :  { %1324 = vadd.xlane.f32.xlu1 %v1323_v57  ;;  %v1382_v57 = vmul.f32 %v7972_v11, %v8106_v49  ;;  %v1380_v11 = vmul.f32 %v8119_v20, %v7974_v21  ;;  %v1383_v32 = vmul.f32 %v7976_v44, %v8129_v35  ;;  %v1196_v44 = vsel %vm339_vm1, %v1164_v41, 0.0  ;;  %v8196_v41 = vld [vmem:[%s10673_s2 + $0xb8] sm:$0xff] }
 0x34d   :  { %v6279_v17 = vpop.f32.mrb[16].mxu1  ;;  %v6299_v34 = vpop.f32.mrb[32].mxu0 }
 0x34e   :  { %v1398_v28 = vmul.f32 %v6299_v34, %v8114_v61  ;;  %v881_v36 = vpop.f32.mrb[17].mxu1  ;;  %v984_v51 = vpop.f32.mrb[33].mxu0  ;;  %1327 = vadd.xlane.f32.xlu0 %v1326_v39  ;;  %v1381_v39 = vmul.f32 %v8141_v31, %v7978_v10  ;;  %v1199_v10 = vsel %vm339_vm1, %v1165_v7, 0.0 }
 0x34f   :  { %v1396_v5 = vmul.f32 %v8124_v38, %v984_v51  ;;  %v6280_v1 = vpop.f32.mrb[18].mxu1  ;;  %v6300_v34 = vpop.f32.mrb[34].mxu0 }
 0x350   :  { %v8160_v59 = vadd.f32 %v1398_v28, %v1382_v57  ;;  %v1525_v30 = vpack.c.bf16 %v6280_v1, %v6279_v17  ;;  %v1399_v15 = vmul.f32 %v6300_v34, %v8134_v43  ;;  %1330 = vadd.xlane.f32.xlu1 %v1329_v54  ;;  %v884_v21 = vpop.f32.mrb[19].mxu1  ;;  %v987_v27 = vpop.f32.mrb[35].mxu0  ;;  %v1166_v28 = vmul.f32 %v8023_v40, %v8023_v40  ;;  %v8208_v57 = vld [vmem:[%s10673_s2 + $0x138] sm:$0xff]  ;;  %v8215_v34 = vld [vmem:[%s10673_s2 + $0xa8] sm:$0xff] }
 0x351   :  { %v8165_v53 = vadd.f32 %v1396_v5, %v1380_v11  ;;  %v1524_v51 = vpack.c.bf16 %v884_v21, %v881_v36  ;;  %v1397_v19 = vmul.f32 %v8150_v47, %v987_v27  ;;  %v8181_v5 = vld [vmem:[%s10673_s2 + $0xa0] sm:$0xff]  ;;  %v1167_v36 = vmul.f32 %v8036_v8, %v8036_v8 }
 0x352   :  { %10839 = vst [vmem:[#allocation53_spill] sm:$0xff] %v8160_v59  ;;  %v8175_v1 = vadd.f32 %v1399_v15, %v1383_v32  ;;  %1197 = vadd.xlane.f32.xlu0 %v1196_v44  ;;  %v8191_v15 = vld [vmem:[%s10673_s2 + $0x130] sm:$0xff]  ;;  %v1386_v32 = vmul.f32 %v7980_v37, %v8171_v48  ;;  %v1384_v11 = vmul.f32 %v8181_v5, %v7984_v45  ;;  %v1202_v21 = vsel %vm339_vm1, %v1166_v28, 0.0  ;;  %v8224_v44 = vld [vmem:[%s10673_s2 + $0x128] sm:$0xff] }
 0x353   :  { %10840 = vst [vmem:[#allocation54_spill] sm:$0xff] %v8165_v53  ;;  %v8185_v27 = vadd.f32 %v1397_v19, %v1381_v39  ;;  %6349 = vmatprep.subr.bf16.mxu1 %v1524_v51  ;;  %v8201_v19 = vld [vmem:[%s10673_s2 + $0x120] sm:$0xff]  ;;  %v1168_v54 = vmul.f32 %v8084_v13, %v8084_v13  ;;  %v1387_v45 = vmul.f32 %v7990_v9, %v8196_v41  ;;  %v1205_v28 = vsel %vm339_vm1, %v1167_v36, 0.0 }
 0x354   :  { %10841 = vst [vmem:[#allocation55_spill] sm:$0xff] %v8175_v1  ;;  %1200 = vadd.xlane.f32.xlu1 %v1199_v10  ;;  %6350 = vmatpush3.bf16.msra.mxu1 %v1524_v51  ;;  %v1169_v10 = vmul.f32 %v8094_v23, %v8094_v23  ;;  %v1385_v9 = vmul.f32 %v8215_v34, %v7994_v58 }
 0x355   :  { %10842 = vst [vmem:[#allocation56_spill] sm:$0xff] %v8185_v27  ;;  %v6283_v7 = vpop.f32.mrb[20].mxu1  ;;  %v6303_v17 = vpop.f32.mrb[36].mxu0  ;;  %6351 = vmatprep.subr.bf16.mxu1 %v1525_v30  ;;  %v1170_v36 = vmul.f32 %v8080_v52, %v8080_v52 }
 0x356   :  { %v1402_v37 = vmul.f32 %v6303_v17, %v8191_v15  ;;  %v897_v39 = vpop.f32.mrb[21].mxu1  ;;  %v1000_v51 = vpop.f32.mrb[37].mxu0  ;;  %1203 = vadd.xlane.f32.xlu0 %v1202_v21  ;;  %v1211_v58 = vsel %vm339_vm1, %v1169_v10, 0.0  ;;  %v8285_v10 = vld [vmem:[%s10673_s2 + $0xc8] sm:$0xff] }
 0x357   :  { %v1400_v2 = vmul.f32 %v8201_v19, %v1000_v51  ;;  %v6284_v26 = vpop.f32.mrb[22].mxu1  ;;  %v6304_v17 = vpop.f32.mrb[38].mxu0 }
 0x358   :  { %v8232_v62 = vadd.f32 %v1402_v37, %v1386_v32  ;;  %v1527_v6 = vpack.c.bf16 %v6284_v26, %v6283_v7  ;;  %v1403_v59 = vmul.f32 %v6304_v17, %v8208_v57  ;;  %1206 = vadd.xlane.f32.xlu1 %v1205_v28  ;;  %v900_v1 = vpop.f32.mrb[23].mxu1  ;;  %v1003_v27 = vpop.f32.mrb[39].mxu0  ;;  %6352 = vmatpush3.bf16.msra.mxu1 %v1525_v30  ;;  %v1208_v26 = vsel %vm339_vm1, %v1168_v54, 0.0  ;;  %v8248_v7 = vld [vmem:[%s10673_s2 + $0xd0] sm:$0xff] }
 0x359   :  { %v8237_v53 = vadd.f32 %v1400_v2, %v1384_v11  ;;  %v1526_v21 = vpack.c.bf16 %v900_v1, %v897_v39  ;;  %v1401_v51 = vmul.f32 %v8224_v44, %v1003_v27  ;;  %v1171_v30 = vmul.f32 %v8090_v0, %v8090_v0  ;;  %v8263_v1 = vld [vmem:[%s10673_s2 + $0xc0] sm:$0xff]  ;;  %v8268_v27 = vld [vmem:[%s10673_s2 + $0xd8] sm:$0xff] }
 0x35a   :  { %10843 = vst [vmem:[#allocation57_spill] sm:$0xff] %v8232_v62  ;;  %v8242_v32 = vadd.f32 %v1403_v59, %v1387_v45  ;;  %1209 = vadd.xlane.f32.xlu0 %v1208_v26  ;;  %v8258_v59 = vld [vmem:[%s10673_s2 + $0x150] sm:$0xff]  ;;  %v8273_v11 = vld [vmem:[%s10673_s2 + $0x140] sm:$0xff]  ;;  %v8278_v39 = vld [vmem:[%s10673_s2 + $0x158] sm:$0xff]  ;;  %v1390_v45 = vmul.f32 %v8023_v40, %v8248_v7  ;;  %v1214_v28 = vsel %vm339_vm1, %v1170_v36, 0.0  ;;  %v1388_v26 = vmul.f32 %v8263_v1, %v8029_v46 }
 0x35b   :  { %10844 = vst [vmem:[#allocation58_spill] sm:$0xff] %v8237_v53  ;;  %v8252_v2 = vadd.f32 %v1401_v51, %v1385_v9  ;;  %6353 = vmatprep.subr.bf16.mxu1 %v1526_v21  ;;  %v8292_v51 = vld [vmem:[%s10673_s2 + $0x148] sm:$0xff]  ;;  %v1391_v40 = vmul.f32 %v8036_v8, %v8268_v27  ;;  %v1217_v36 = vsel %vm339_vm1, %v1171_v30, 0.0  ;;  %v1389_v46 = vmul.f32 %v8285_v10, %v8041_v14  ;;  %v8325_v14 = vld [vmem:[%s10673_s2 + $0x170] sm:$0xff] }
 0x35c   :  { %10845 = vst [vmem:[#allocation59_spill] sm:$0xff] %v8242_v32  ;;  %1212 = vadd.xlane.f32.xlu1 %v1211_v58  ;;  %6354 = vmatpush3.bf16.msra.mxu1 %v1526_v21  ;;  %10853 = vst [vmem:[#allocation67_spill] sm:$0xff] %v8325_v14 }
 0x35d   :  { %10846 = vst [vmem:[#allocation60_spill] sm:$0xff] %v8252_v2  ;;  %v6287_v54 = vpop.f32.mrb[24].mxu1  ;;  %v6307_v37 = vpop.f32.mrb[40].mxu0  ;;  %6355 = vmatprep.subr.bf16.mxu1 %v1527_v6 }
 0x35e   :  { %v1406_v17 = vmul.f32 %v6307_v37, %v8258_v59  ;;  %v913_v9 = vpop.f32.mrb[25].mxu1  ;;  %v1016_v21 = vpop.f32.mrb[41].mxu0  ;;  %1215 = vadd.xlane.f32.xlu0 %v1214_v28 }
 0x35f   :  { %v1404_v58 = vmul.f32 %v8273_v11, %v1016_v21  ;;  %v6288_v32 = vpop.f32.mrb[26].mxu1  ;;  %v6308_v37 = vpop.f32.mrb[42].mxu0 }
 0x360   :  { %v8300_v62 = vadd.f32 %v1406_v17, %v1390_v45  ;;  %v8302_v2 = vpack.c.bf16 %v6288_v32, %v6287_v54  ;;  %v1407_v53 = vmul.f32 %v6308_v37, %v8278_v39  ;;  %1218 = vadd.xlane.f32.xlu1 %v1217_v36  ;;  %v916_v56 = vpop.f32.mrb[27].mxu1  ;;  %v1019_v16 = vpop.f32.mrb[43].mxu0  ;;  %6356 = vmatpush3.bf16.msra.mxu1 %v1527_v6  ;;  %v8317_v32 = vld [vmem:[%s10673_s2 + $0xf0] sm:$0xff]  ;;  %v8330_v6 = vld [vmem:[%s10673_s2 + $0xe0] sm:$0xff]  ;;  %v8345_v17 = vld [vmem:[%s10673_s2 + $0x178] sm:$0xff] }
 0x361   :  { %v8307_v8 = vadd.f32 %v1404_v58, %v1388_v26  ;;  %v8309_v28 = vpack.c.bf16 %v916_v56, %v913_v9  ;;  %v1405_v21 = vmul.f32 %v8292_v51, %v1019_v16  ;;  %v8340_v16 = vld [vmem:[%s10673_s2 + $0xf8] sm:$0xff]  ;;  %v1394_v9 = vmul.f32 %v8080_v52, %v8317_v32  ;;  %v8352_v26 = vld [vmem:[%s10673_s2 + $0xe8] sm:$0xff] }
 0x362   :  { %10847 = vst [vmem:[#allocation61_spill] sm:$0xff] %v8300_v62  ;;  %10848 = vst [vmem:[#allocation62_spill] sm:$0xff] %v8302_v2  ;;  %v8312_v30 = vadd.f32 %v1407_v53, %v1391_v40  ;;  %v8335_v53 = vld [vmem:[%s10673_s2 + $0x160] sm:$0xff]  ;;  %v8358_v36 = vld [vmem:[%s10673_s2 + $0x168] sm:$0xff]  ;;  %v1393_v55 = vmul.f32 %v8352_v26, %v8094_v23  ;;  %v1444_v23 = vmul.f32 %v8119_v20, %v7986_v22 }
 0x363   :  { %10849 = vst [vmem:[#allocation63_spill] sm:$0xff] %v8307_v8  ;;  %10850 = vst [vmem:[#allocation64_spill] sm:$0xff] %v8309_v28  ;;  %v8319_v54 = vadd.f32 %v1405_v21, %v1389_v46  ;;  %6381 = vmatprep.subr.bf16.mxu1 %v8309_v28  ;;  %v1392_v46 = vmul.f32 %v8330_v6, %v8084_v13  ;;  %v1395_v28 = vmul.f32 %v8090_v0, %v8340_v16 }
 0x364   :  { %10851 = vst [vmem:[#allocation65_spill] sm:$0xff] %v8312_v30  ;;  %10854 = vst [vmem:[#allocation68_spill] sm:$0xff] %v8335_v53 }
 0x365   :  { %10852 = vst [vmem:[#allocation66_spill] sm:$0xff] %v8319_v54  ;;  %v6291_v56 = vpop.f32.mrb[28].mxu1  ;;  %v6311_v45 = vpop.f32.mrb[44].mxu0 }
 0x366   :  { %v1410_v40 = vmul.f32 %v6311_v45, %v8325_v14  ;;  %v929_v58 = vpop.f32.mrb[29].mxu1  ;;  %v1032_v37 = vpop.f32.mrb[45].mxu0 }
 0x367   :  { %v1408_v21 = vmul.f32 %v8335_v53, %v1032_v37  ;;  %v6292_v52 = vpop.f32.mrb[30].mxu1  ;;  %v6312_v2 = vpop.f32.mrb[46].mxu0 }
 0x368   :  { %v8365_v30 = vadd.f32 %v1410_v40, %v1394_v9  ;;  %v8367_v45 = vpack.c.bf16 %v6292_v52, %v6291_v56  ;;  %v1411_v62 = vmul.f32 %v6312_v2, %v8345_v17  ;;  %v932_v54 = vpop.f32.mrb[31].mxu1  ;;  %v1035_v8 = vpop.f32.mrb[47].mxu0  ;;  %v1446_v56 = vmul.f32 %v7982_v63, %v8106_v49 }
 0x369   :  { %v8372_v14 = vadd.f32 %v1408_v21, %v1392_v46  ;;  %v8374_v13 = vpack.c.bf16 %v932_v54, %v929_v58  ;;  %v1409_v37 = vmul.f32 %v8358_v36, %v1035_v8  ;;  %v1447_v8 = vmul.f32 %v7992_v12, %v8129_v35 }
 0x36a   :  { %v8377_v53 = vadd.f32 %v1411_v62, %v1395_v28  ;;  %v1445_v49 = vmul.f32 %v8141_v31, %v7996_v42  ;;  %v1450_v12 = vmul.f32 %v8004_v33, %v8171_v48  ;;  %v1449_v33 = vmul.f32 %v8215_v34, %v8013_v50 }
 0x36b   :  { %v8379_v0 = vadd.f32 %v1409_v37, %v1393_v55 }
 0x36d   :  { %v6319_v9 = vpop.f32.mrb[32].mxu1 }
 0x36e   :  { %v1462_v2 = vmul.f32 %v6319_v9, %v8114_v61  ;;  %v1093_v40 = vpop.f32.mrb[33].mxu1 }
 0x36f   :  { %v1460_v46 = vmul.f32 %v8124_v38, %v1093_v40  ;;  %v6320_v54 = vpop.f32.mrb[34].mxu1 }
 0x370   :  { %v8389_v62 = vadd.f32 %v1462_v2, %v1446_v56  ;;  %v1463_v55 = vmul.f32 %v6320_v54, %v8134_v43  ;;  %v1096_v28 = vpop.f32.mrb[35].mxu1  ;;  %v1448_v43 = vmul.f32 %v8181_v5, %v8009_v18 }
 0x371   :  { %v8394_v63 = vadd.f32 %v1460_v46, %v1444_v23  ;;  %v1461_v61 = vmul.f32 %v8150_v47, %v1096_v28  ;;  %v1451_v47 = vmul.f32 %v8011_v29, %v8196_v41  ;;  %v1454_v29 = vmul.f32 %v8025_v24, %v8248_v7 }
 0x372   :  { %v8397_v58 = vadd.f32 %v1463_v55, %v1447_v8  ;;  %v1453_v24 = vmul.f32 %v8285_v10, %v8043_v3  ;;  %v10857_v8 = vld [vmem:[#allocation68_spill] sm:$0xff]  ;;  %v10858_v55 = vld [vmem:[#allocation51_spill] sm:$0xff] }
 0x373   :  { %v8399_v22 = vadd.f32 %v1461_v61, %v1445_v49 }
 0x375   :  { %v6323_v38 = vpop.f32.mrb[36].mxu1 }
 0x376   :  { %v1466_v20 = vmul.f32 %v6323_v38, %v8191_v15  ;;  %v1109_v35 = vpop.f32.mrb[37].mxu1  ;;  %v10859_v38 = vld [vmem:[#allocation52_spill] sm:$0xff] }
 0x377   :  { %v1464_v31 = vmul.f32 %v8201_v19, %v1109_v35  ;;  %v6324_v42 = vpop.f32.mrb[38].mxu1 }
 0x378   :  { %v8409_v21 = vadd.f32 %v1466_v20, %v1450_v12  ;;  %v1467_v52 = vmul.f32 %v6324_v42, %v8208_v57  ;;  %v1112_v37 = vpop.f32.mrb[39].mxu1  ;;  %v1452_v57 = vmul.f32 %v8263_v1, %v8032_v4 }
 0x379   :  { %v8414_v48 = vadd.f32 %v1464_v31, %v1448_v43  ;;  %v1465_v15 = vmul.f32 %v8224_v44, %v1112_v37  ;;  %v1455_v44 = vmul.f32 %v8038_v25, %v8268_v27  ;;  %v1458_v25 = vmul.f32 %v8082_v60, %v8317_v32  ;;  %v10855_v27 = vld [vmem:[#allocation67_spill] sm:$0xff] }
 0x37a   :  { %v8417_v9 = vadd.f32 %v1467_v52, %v1451_v47  ;;  %v1457_v60 = vmul.f32 %v8352_v26, %v10859_v38 }
 0x37b   :  { %v8419_v18 = vadd.f32 %v1465_v15, %v1449_v33 }
 0x37d   :  { %v6327_v5 = vpop.f32.mrb[40].mxu1 }
 0x37e   :  { %v1470_v41 = vmul.f32 %v6327_v5, %v8258_v59  ;;  %v1125_v19 = vpop.f32.mrb[41].mxu1 }
 0x37f   :  { %v1468_v50 = vmul.f32 %v8273_v11, %v1125_v19  ;;  %v6328_v34 = vpop.f32.mrb[42].mxu1 }
 0x380   :  { %v8429_v56 = vadd.f32 %v1470_v41, %v1454_v29  ;;  %v1471_v2 = vmul.f32 %v6328_v34, %v8278_v39  ;;  %v1128_v40 = vpop.f32.mrb[43].mxu1  ;;  %v10856_v39 = vld [vmem:[#allocation50_spill] sm:$0xff] }
 0x381   :  { %v8434_v7 = vadd.f32 %v1468_v50, %v1452_v57  ;;  %v1469_v59 = vmul.f32 %v8292_v51, %v1128_v40  ;;  %v1456_v54 = vmul.f32 %v8330_v6, %v10856_v39  ;;  %v1459_v51 = vmul.f32 %v10858_v55, %v8340_v16 }
 0x382   :  { %v8437_v23 = vadd.f32 %v1471_v2, %v1455_v44 }
 0x383   :  { %v8439_v4 = vadd.f32 %v1469_v59, %v1453_v24 }
 0x385   :  { %v6331_v1 = vpop.f32.mrb[44].mxu1 }
 0x386   :  { %v1474_v11 = vmul.f32 %v6331_v1, %v10855_v27  ;;  %v1141_v46 = vpop.f32.mrb[45].mxu1 }
 0x387   :  { %v1472_v3 = vmul.f32 %v10857_v8, %v1141_v46  ;;  %v6332_v10 = vpop.f32.mrb[46].mxu1 }
 0x388   :  { %v8449_v28 = vadd.f32 %v1474_v11, %v1458_v25  ;;  %v1475_v49 = vmul.f32 %v6332_v10, %v8345_v17  ;;  %v1144_v61 = vpop.f32.mrb[47].mxu1 }
 0x389   :  { %v8454_v32 = vadd.f32 %v1472_v3, %v1456_v54  ;;  %v1473_v12 = vmul.f32 %v8358_v36, %v1144_v61 }
 0x38a   :  { %v8457_v20 = vadd.f32 %v1475_v49, %v1459_v51 }
 0x38b   :  { %v8459_v6 = vadd.f32 %v1473_v12, %v1457_v60 }
 0x392   :  { %v1286_v35 = vpop.xlane.xlu0 %1285 }
 0x393   :  { %v1332_v43 = vmul.f32 0.03125, %v1286_v35 }
 0x394   :  { %v1289_v31 = vpop.xlane.xlu1 %1288 }
 0x395   :  { %v1333_v16 = vmul.f32 0.03125, %v1289_v31  ;;  %v1348_v42 = vadd.f32 1e-05, %v1332_v43 }
 0x396   :  { %v1292_v52 = vpop.xlane.xlu0 %1291 }
 0x397   :  { %v1349_v47 = vadd.f32 1e-05, %v1333_v16  ;;  %6771 = vrsqrt.f32 %v1348_v42  ;;  %v1334_v17 = vmul.f32 0.03125, %v1292_v52 }
 0x399   :  { %6773 = vrsqrt.f32 %v1349_v47  ;;  %v1350_v37 = vadd.f32 1e-05, %v1334_v17 }
 0x39a   :  { %v1295_v26 = vpop.xlane.xlu0 %1294 }
 0x39b   :  { %v1335_v33 = vmul.f32 0.03125, %v1295_v26  ;;  %6775 = vrsqrt.f32 %v1350_v37 }
 0x39c   :  { %v1301_v15 = vpop.xlane.xlu1 %1300 }
 0x39d   :  { %v1337_v5 = vmul.f32 0.03125, %v1301_v15  ;;  %v1351_v36 = vadd.f32 1e-05, %v1335_v33 }
 0x39e   :  { %v1298_v41 = vpop.xlane.xlu0 %1297 }
 0x39f   :  { %v1353_v29 = vadd.f32 1e-05, %v1337_v5  ;;  %6777 = vrsqrt.f32 %v1351_v36  ;;  %v1336_v19 = vmul.f32 0.03125, %v1298_v41 }
 0x3a0   :  { %v1307_v57 = vpop.xlane.xlu1 %1306 }
 0x3a1   :  { %v1339_v50 = vmul.f32 0.03125, %v1307_v57  ;;  %v6772_v34 = vpop.eup %6771  ;;  %6779 = vrsqrt.f32 %v1353_v29  ;;  %v1352_v44 = vadd.f32 1e-05, %v1336_v19 }
 0x3a2   :  { %v1304_v24 = vpop.xlane.xlu0 %1303  ;;  %v1492_v25 = vmul.f32 %v6772_v34, %v8394_v63 }
 0x3a3   :  { %v6774_v2 = vpop.eup %6773  ;;  %v1355_v40 = vadd.f32 1e-05, %v1339_v50  ;;  %6781 = vrsqrt.f32 %v1352_v44  ;;  %v1338_v59 = vmul.f32 0.03125, %v1304_v24 }
 0x3a4   :  { %v1177_v1 = vpop.xlane.xlu1 %1176  ;;  %v1493_v27 = vmul.f32 %v6774_v2, %v8399_v22 }
 0x3a5   :  { %v1221_v11 = vmul.f32 0.03125, %v1177_v1  ;;  %6783 = vrsqrt.f32 %v1355_v40  ;;  %v1354_v46 = vadd.f32 1e-05, %v1338_v59  ;;  %v6776_v3 = vpop.eup %6775 }
 0x3a6   :  { %v1516_v39 = vpack.c.bf16 %v1493_v27, %v1492_v25  ;;  %v1174_v8 = vpop.xlane.xlu0 %1173  ;;  %v1494_v60 = vmul.f32 %v6776_v3, %v8389_v62 }
 0x3a7   :  { %v1237_v54 = vadd.f32 1e-05, %v1221_v11  ;;  %6785 = vrsqrt.f32 %v1354_v46  ;;  %v1220_v10 = vmul.f32 0.03125, %v1174_v8  ;;  %v10860_v11 = vld [vmem:[#allocation54_spill] sm:$0xff] }
 0x3a8   :  { %v1183_v55 = vpop.xlane.xlu1 %1182  ;;  %6701 = vmatprep.subr.msk.bf16.mxu0 %vm339_vm1, %v1516_v39  ;;  %v1545_v51 = vsel %vm339_vm1, %v1516_v39, 0  ;;  %v10861_v39 = vld [vmem:[#allocation56_spill] sm:$0xff] }
 0x3a9   :  { %v1223_v49 = vmul.f32 0.03125, %v1183_v55  ;;  %6334 = vmatpush3.bf16.xpose.msra.mxu0 %v1545_v51  ;;  %v6778_v61 = vpop.eup %6777  ;;  %6787 = vrsqrt.f32 %v1237_v54  ;;  %v1236_v63 = vadd.f32 1e-05, %v1220_v10 }
 0x3aa   :  { %v1180_v38 = vpop.xlane.xlu0 %1179  ;;  %v1495_v12 = vmul.f32 %v6778_v61, %v8397_v58  ;;  %v10862_v61 = vld [vmem:[#allocation55_spill] sm:$0xff] }
 0x3ab   :  { %v1239_v22 = vadd.f32 1e-05, %v1223_v49  ;;  %v6780_v35 = vpop.eup %6779  ;;  %6789 = vrsqrt.f32 %v1236_v63  ;;  %v1222_v43 = vmul.f32 0.03125, %v1180_v38 }
 0x3ac   :  { %v1313_v31 = vpop.xlane.xlu1 %1312  ;;  %v1517_v42 = vpack.c.bf16 %v1495_v12, %v1494_v60  ;;  %v1497_v33 = vmul.f32 %v6780_v35, %v8419_v18 }
 0x3ad   :  { %v1341_v16 = vmul.f32 0.03125, %v1313_v31  ;;  %v6782_v47 = vpop.eup %6781  ;;  %6791 = vrsqrt.f32 %v1239_v22  ;;  %v1238_v52 = vadd.f32 1e-05, %v1222_v43  ;;  %v10863_v22 = vld [vmem:[#allocation53_spill] sm:$0xff] }
 0x3ae   :  { %6702 = vmatprep.subr.msk.bf16.mxu0 %vm339_vm1, %v1517_v42  ;;  %v1310_v37 = vpop.xlane.xlu0 %1309  ;;  %v1496_v26 = vmul.f32 %v6782_v47, %v8414_v48  ;;  %v1548_v5 = vsel %vm339_vm1, %v1517_v42, 0 }
 0x3af   :  { %v1357_v17 = vadd.f32 1e-05, %v1341_v16  ;;  %v6784_v62 = vpop.eup %6783  ;;  %6793 = vrsqrt.f32 %v1238_v52  ;;  %v1340_v58 = vmul.f32 0.03125, %v1310_v37 }
 0x3b0   :  { %v1319_v15 = vpop.xlane.xlu1 %1318  ;;  %v1518_v29 = vpack.c.bf16 %v1497_v33, %v1496_v26  ;;  %v1499_v18 = vmul.f32 %v6784_v62, %v8417_v9 }
 0x3b1   :  { %v1343_v36 = vmul.f32 0.03125, %v1319_v15  ;;  %6336 = vmatpush3.bf16.xpose.msra.mxu0 %v1548_v5  ;;  %v6786_v41 = vpop.eup %6785  ;;  %6795 = vrsqrt.f32 %v1357_v17  ;;  %v1356_v19 = vadd.f32 1e-05, %v1340_v58 }
 0x3b2   :  { %6703 = vmatprep.subr.msk.bf16.mxu0 %vm339_vm1, %v1518_v29  ;;  %v1316_v50 = vpop.xlane.xlu0 %1315  ;;  %v1498_v48 = vmul.f32 %v6786_v41, %v8409_v21  ;;  %v1551_v9 = vsel %vm339_vm1, %v1518_v29, 0  ;;  %v10864_v29 = vld [vmem:[#allocation58_spill] sm:$0xff]  ;;  %v10865_v41 = vld [vmem:[#allocation60_spill] sm:$0xff] }
 0x3b3   :  { %v1359_v57 = vadd.f32 1e-05, %v1343_v36  ;;  %v6788_v34 = vpop.eup %6787  ;;  %6797 = vrsqrt.f32 %v1356_v19  ;;  %v1342_v44 = vmul.f32 0.03125, %v1316_v50 }
 0x3b4   :  { %v1189_v2 = vpop.xlane.xlu1 %1188  ;;  %v1519_v24 = vpack.c.bf16 %v1499_v18, %v1498_v48  ;;  %v1429_v54 = vmul.f32 %v6788_v34, %v10861_v39  ;;  %v10867_v18 = vld [vmem:[#allocation59_spill] sm:$0xff] }
 0x3b5   :  { %v1225_v40 = vmul.f32 0.03125, %v1189_v2  ;;  %v6790_v59 = vpop.eup %6789  ;;  %6799 = vrsqrt.f32 %v1359_v57  ;;  %v1358_v1 = vadd.f32 1e-05, %v1342_v44 }
 0x3b6   :  { %v1186_v27 = vpop.xlane.xlu0 %1185  ;;  %v1428_v46 = vmul.f32 %v6790_v59, %v10860_v11  ;;  %v1554_v37 = vsel %vm339_vm1, %v1519_v24, 0 }
 0x3b7   :  { %v1241_v25 = vadd.f32 1e-05, %v1225_v40  ;;  %v6792_v8 = vpop.eup %6791  ;;  %6801 = vrsqrt.f32 %v1358_v1  ;;  %v1224_v21 = vmul.f32 0.03125, %v1186_v27 }
 0x3b8   :  { %v1195_v3 = vpop.xlane.xlu1 %1194  ;;  %v1508_v55 = vpack.c.bf16 %v1429_v54, %v1428_v46  ;;  %v1431_v63 = vmul.f32 %v6792_v8, %v10862_v61 }
 0x3b9   :  { %v1227_v10 = vmul.f32 0.03125, %v1195_v3  ;;  %6338 = vmatpush3.bf16.xpose.msra.mxu0 %v1551_v9  ;;  %v6794_v51 = vpop.eup %6793  ;;  %6803 = vrsqrt.f32 %v1241_v25  ;;  %v1240_v49 = vadd.f32 1e-05, %v1224_v21 }
 0x3ba   :  { %6704 = vmatprep.subr.msk.bf16.mxu0 %vm339_vm1, %v1519_v24  ;;  %v1430_v38 = vmul.f32 %v6794_v51, %v10863_v22  ;;  %6341 = vmatprep.mubr.msk.bf16.mxu0 %vm339_vm1, %v1508_v55  ;;  %v1192_v12 = vpop.xlane.xlu0 %1191 }
 0x3bb   :  { %v1243_v60 = vadd.f32 1e-05, %v1227_v10  ;;  %v6796_v35 = vpop.eup %6795  ;;  %6805 = vrsqrt.f32 %v1240_v49  ;;  %v1226_v43 = vmul.f32 0.03125, %v1192_v12 }
 0x3bc   :  { %v1509_v31 = vpack.c.bf16 %v1431_v63, %v1430_v38  ;;  %v1501_v52 = vmul.f32 %v6796_v35, %v8439_v4 }
 0x3bd   :  { %v6798_v16 = vpop.eup %6797  ;;  %6807 = vrsqrt.f32 %v1243_v60  ;;  %v1242_v42 = vadd.f32 1e-05, %v1226_v43 }
 0x3be   :  { %v1500_v47 = vmul.f32 %v6798_v16, %v8434_v7 }
 0x3bf   :  { %v6800_v17 = vpop.eup %6799  ;;  %6809 = vrsqrt.f32 %v1242_v42 }
 0x3c0   :  { %v1520_v26 = vpack.c.bf16 %v1501_v52, %v1500_v47  ;;  %v1503_v58 = vmul.f32 %v6800_v17, %v8437_v23 }
 0x3c1   :  { %6340 = vmatpush3.bf16.xpose.msra.mxu0 %v1554_v37  ;;  %v6802_v33 = vpop.eup %6801 }
 0x3c2   :  { %6705 = vmatprep.subr.msk.bf16.mxu0 %vm339_vm1, %v1520_v26  ;;  %v1502_v62 = vmul.f32 %v6802_v33, %v8429_v56  ;;  %v1812_v57 = vsel %vm339_vm1, %v1520_v26, 0  ;;  %v10866_v56 = vld [vmem:[#allocation57_spill] sm:$0xff] }
 0x3c3   :  { %v6804_v15 = vpop.eup %6803 }
 0x3c4   :  { %v1521_v5 = vpack.c.bf16 %v1503_v58, %v1502_v62  ;;  %v1433_v4 = vmul.f32 %v6804_v15, %v10865_v41 }
 0x3c5   :  { %v6806_v36 = vpop.eup %6805 }
 0x3c6   :  { %v1432_v7 = vmul.f32 %v6806_v36, %v10864_v29  ;;  %v1815_v2 = vsel %vm339_vm1, %v1521_v5, 0 }
 0x3c7   :  { %v6808_v19 = vpop.eup %6807 }
 0x3c8   :  { %6342 = vmatmul.mubr.msk.bf16.vlgmr.msra.gmra.mrb[48].mxu0 %vm339_vm1, %v1509_v31  ;;  %v1510_v50 = vpack.c.bf16 %v1433_v4, %v1432_v7  ;;  %v1435_v34 = vmul.f32 %v6808_v19, %v10867_v18 }
 0x3c9   :  { %6366 = vmatpush3.bf16.xpose.msra.mxu0 %v1812_v57  ;;  %v6810_v48 = vpop.eup %6809 }
 0x3ca   :  { %6706 = vmatprep.subr.msk.bf16.mxu0 %vm339_vm1, %v1521_v5  ;;  %6345 = vmatprep.mubr.msk.bf16.mxu0 %vm339_vm1, %v1510_v50  ;;  %v1434_v23 = vmul.f32 %v6810_v48, %v10866_v56  ;;  %v10869_v56 = vld [vmem:[#allocation66_spill] sm:$0xff] }
 0x3cc   :  { %v1511_v44 = vpack.c.bf16 %v1435_v34, %v1434_v23 }
 0x3d0   :  { %6346 = vmatmul.mubr.msk.bf16.gmra.mrb[52].mxu0 %vm339_vm1, %v1511_v44 }
 0x3d1   :  { %6368 = vmatpush3.bf16.xpose.msra.mxu0 %v1815_v2 }
 0x3d7   :  { %v1322_v40 = vpop.xlane.xlu0 %1321 }
 0x3d8   :  { %v1344_v24 = vmul.f32 0.03125, %v1322_v40  ;;  %v10871_v40 = vld [vmem:[#allocation65_spill] sm:$0xff] }
 0x3d9   :  { %v1325_v59 = vpop.xlane.xlu1 %1324 }
 0x3da   :  { %v1345_v1 = vmul.f32 0.03125, %v1325_v59  ;;  %v1360_v25 = vadd.f32 1e-05, %v1344_v24 }
 0x3db   :  { %v1328_v11 = vpop.xlane.xlu0 %1327 }
 0x3dc   :  { %v1361_v27 = vadd.f32 1e-05, %v1345_v1  ;;  %6811 = vrsqrt.f32 %v1360_v25  ;;  %v1346_v46 = vmul.f32 0.03125, %v1328_v11 }
 0x3dd   :  { %v1331_v39 = vpop.xlane.xlu1 %1330 }
 0x3de   :  { %6813 = vrsqrt.f32 %v1361_v27  ;;  %v1347_v54 = vmul.f32 0.03125, %v1331_v39  ;;  %v1362_v8 = vadd.f32 1e-05, %v1346_v46 }
 0x3df   :  { %v1198_v3 = vpop.xlane.xlu0 %1197 }
 0x3e0   :  { %v1363_v21 = vadd.f32 1e-05, %v1347_v54  ;;  %6815 = vrsqrt.f32 %v1362_v8  ;;  %v1228_v9 = vmul.f32 0.03125, %v1198_v3 }
 0x3e1   :  { %v1201_v10 = vpop.xlane.xlu1 %1200 }
 0x3e2   :  { %6817 = vrsqrt.f32 %v1363_v21  ;;  %v1229_v55 = vmul.f32 0.03125, %v1201_v10  ;;  %v1244_v51 = vadd.f32 1e-05, %v1228_v9 }
 0x3e3   :  { %v1204_v61 = vpop.xlane.xlu0 %1203 }
 0x3e4   :  { %v1245_v49 = vadd.f32 1e-05, %v1229_v55  ;;  %6819 = vrsqrt.f32 %v1244_v51  ;;  %v1230_v63 = vmul.f32 0.03125, %v1204_v61 }
 0x3e5   :  { %v1207_v22 = vpop.xlane.xlu1 %1206 }
 0x3e6   :  { %6821 = vrsqrt.f32 %v1245_v49  ;;  %v1231_v38 = vmul.f32 0.03125, %v1207_v22  ;;  %v6812_v60 = vpop.eup %6811  ;;  %v1246_v12 = vadd.f32 1e-05, %v1230_v63 }
 0x3e7   :  { %v1210_v31 = vpop.xlane.xlu0 %1209  ;;  %v1504_v47 = vmul.f32 %v6812_v60, %v8454_v32 }
 0x3e8   :  { %v6814_v35 = vpop.eup %6813  ;;  %v1247_v43 = vadd.f32 1e-05, %v1231_v38  ;;  %6823 = vrsqrt.f32 %v1246_v12  ;;  %v1232_v16 = vmul.f32 0.03125, %v1210_v31 }
 0x3e9   :  { %v1213_v42 = vpop.xlane.xlu1 %1212  ;;  %v1505_v52 = vmul.f32 %v6814_v35, %v8459_v6 }
 0x3ea   :  { %6825 = vrsqrt.f32 %v1247_v43  ;;  %v1233_v17 = vmul.f32 0.03125, %v1213_v42  ;;  %v6816_v37 = vpop.eup %6815  ;;  %v1248_v26 = vadd.f32 1e-05, %v1232_v16 }
 0x3eb   :  { %v1522_v33 = vpack.c.bf16 %v1505_v52, %v1504_v47  ;;  %v1216_v15 = vpop.xlane.xlu0 %1215  ;;  %v1506_v5 = vmul.f32 %v6816_v37, %v8449_v28  ;;  %v10868_v28 = vld [vmem:[#allocation63_spill] sm:$0xff] }
 0x3ec   :  { %v6818_v62 = vpop.eup %6817  ;;  %v1249_v58 = vadd.f32 1e-05, %v1233_v17  ;;  %6827 = vrsqrt.f32 %v1248_v26  ;;  %v1234_v36 = vmul.f32 0.03125, %v1216_v15 }
 0x3ed   :  { %v1219_v29 = vpop.xlane.xlu1 %1218  ;;  %6707 = vmatprep.subr.msk.bf16.mxu0 %vm339_vm1, %v1522_v33  ;;  %v1818_v7 = vsel %vm339_vm1, %v1522_v33, 0  ;;  %v1507_v32 = vmul.f32 %v6818_v62, %v8457_v20  ;;  %v10870_v20 = vld [vmem:[#allocation61_spill] sm:$0xff] }
 0x3ee   :  { %6829 = vrsqrt.f32 %v1249_v58  ;;  %v1235_v6 = vmul.f32 0.03125, %v1219_v29  ;;  %6370 = vmatpush3.bf16.xpose.msra.mxu0 %v1818_v7  ;;  %v6820_v41 = vpop.eup %6819  ;;  %v1250_v4 = vadd.f32 1e-05, %v1234_v36 }
 0x3ef   :  { %v1523_v19 = vpack.c.bf16 %v1507_v32, %v1506_v5  ;;  %v1436_v48 = vmul.f32 %v6820_v41, %v10868_v28 }
 0x3f0   :  { %v6822_v57 = vpop.eup %6821  ;;  %v1251_v50 = vadd.f32 1e-05, %v1235_v6  ;;  %6831 = vrsqrt.f32 %v1250_v4 }
 0x3f1   :  { %6708 = vmatprep.subr.msk.bf16.mxu0 %vm339_vm1, %v1523_v19  ;;  %v1437_v23 = vmul.f32 %v6822_v57, %v10869_v56  ;;  %v1821_v59 = vsel %vm339_vm1, %v1523_v19, 0 }
 0x3f2   :  { %6833 = vrsqrt.f32 %v1251_v50  ;;  %v6824_v18 = vpop.eup %6823 }
 0x3f3   :  { %v1512_v34 = vpack.c.bf16 %v1437_v23, %v1436_v48  ;;  %v1438_v2 = vmul.f32 %v6824_v18, %v10870_v20 }
 0x3f4   :  { %v6826_v44 = vpop.eup %6825 }
 0x3f5   :  { %v1439_v24 = vmul.f32 %v6826_v44, %v10871_v40  ;;  %6373 = vmatprep.mubr.msk.bf16.mxu0 %vm339_vm1, %v1512_v34 }
 0x3f6   :  { %6372 = vmatpush3.bf16.xpose.msra.mxu0 %v1821_v59  ;;  %v6828_v1 = vpop.eup %6827 }
 0x3f7   :  { %v1513_v25 = vpack.c.bf16 %v1439_v24, %v1438_v2  ;;  %v1440_v11 = vmul.f32 %v6828_v1, %v8372_v14 }
 0x3f8   :  { %v6830_v27 = vpop.eup %6829 }
 0x3f9   :  { %v1441_v46 = vmul.f32 %v6830_v27, %v8379_v0 }
 0x3fa   :  { %v6832_v39 = vpop.eup %6831 }
 0x3fb   :  { %v1514_v54 = vpack.c.bf16 %v1441_v46, %v1440_v11  ;;  %v1442_v21 = vmul.f32 %v6832_v39, %v8365_v30 }
 0x3fc   :  { %v6834_v8 = vpop.eup %6833 }
 0x3fd   :  { %6374 = vmatmul.mubr.msk.bf16.vlgmr.msra.gmra.mrb[56].mxu0 %vm339_vm1, %v1513_v25  ;;  %v1443_v3 = vmul.f32 %v6834_v8, %v8377_v53 }
 0x3fe   :  { %6377 = vmatprep.mubr.msk.bf16.mxu0 %vm339_vm1, %v1514_v54 }
 0x3ff   :  { %v1515_v9 = vpack.c.bf16 %v1443_v3, %v1442_v21 }
 0x405   :  { %6378 = vmatmul.mubr.msk.bf16.gmra.mrb[60].mxu0 %vm339_vm1, %v1515_v9 }
 0x49b   :  { %v6343_v10 = vpop.f32.mrb[48].mxu0 }
 0x49c   :  { %v1590_v55 = vpop.f32.mrb[49].mxu0  ;;  %v8519_v49 = vmul.f32 0.17677669, %v6343_v10 }
 0x49d   :  { %v8517_v14 = vmul.f32 0.17677669, %v1590_v55  ;;  %v6344_v0 = vpop.f32.mrb[50].mxu0 }
 0x49e   :  { %v1593_v51 = vpop.f32.mrb[51].mxu0  ;;  %v8525_v53 = vmul.f32 0.17677669, %v6344_v0  ;;  %v1636_v38 = vsel %vm1629_vm2, %v8519_v49, -inf }
 0x49f   :  { %v8521_v61 = vmul.f32 0.17677669, %v1593_v51  ;;  %v1630_v30 = vsel %vm1629_vm2, %v8517_v14, -inf }
 0x4a0   :  { %1631 = vmax.xlane.f32.xlu0 %v1630_v30  ;;  %v1639_v43 = vsel %vm1629_vm2, %v8525_v53, -inf }
 0x4a1   :  { %v1633_v63 = vsel %vm1629_vm2, %v8521_v61, -inf }
 0x4a2   :  { %1634 = vmax.xlane.f32.xlu1 %v1633_v63 }
 0x4a3   :  { %v6347_v22 = vpop.f32.mrb[52].mxu0 }
 0x4a4   :  { %1637 = vmax.xlane.f32.xlu0 %v1636_v38  ;;  %v1606_v60 = vpop.f32.mrb[53].mxu0  ;;  %v8535_v16 = vmul.f32 0.17677669, %v6347_v22 }
 0x4a5   :  { %v8531_v12 = vmul.f32 0.17677669, %v1606_v60  ;;  %v6348_v35 = vpop.f32.mrb[54].mxu0 }
 0x4a6   :  { %1640 = vmax.xlane.f32.xlu1 %v1639_v43  ;;  %v1609_v31 = vpop.f32.mrb[55].mxu0  ;;  %v8541_v52 = vmul.f32 0.17677669, %v6348_v35  ;;  %v1648_v37 = vsel %vm1629_vm2, %v8535_v16, -inf }
 0x4a7   :  { %v8537_v42 = vmul.f32 0.17677669, %v1609_v31  ;;  %v1642_v47 = vsel %vm1629_vm2, %v8531_v12, -inf }
 0x4a8   :  { %1643 = vmax.xlane.f32.xlu0 %v1642_v47  ;;  %v1651_v26 = vsel %vm1629_vm2, %v8541_v52, -inf }
 0x4a9   :  { %v1645_v17 = vsel %vm1629_vm2, %v8537_v42, -inf }
 0x4aa   :  { %1646 = vmax.xlane.f32.xlu1 %v1645_v17 }
 0x4ac   :  { %1649 = vmax.xlane.f32.xlu0 %v1648_v37 }
 0x4ae   :  { %1652 = vmax.xlane.f32.xlu1 %v1651_v26 }
 0x4d0   :  { %v6375_v33 = vpop.f32.mrb[56].mxu0 }
 0x4d1   :  { %v1857_v62 = vpop.f32.mrb[57].mxu0  ;;  %v8551_v36 = vmul.f32 0.17677669, %v6375_v33 }
 0x4d2   :  { %v8549_v58 = vmul.f32 0.17677669, %v1857_v62  ;;  %v6376_v15 = vpop.f32.mrb[58].mxu0 }
 0x4d3   :  { %v1860_v5 = vpop.f32.mrb[59].mxu0  ;;  %v8557_v32 = vmul.f32 0.17677669, %v6376_v15  ;;  %v1902_v4 = vsel %vm1629_vm2, %v8551_v36, -inf }
 0x4d4   :  { %v8553_v29 = vmul.f32 0.17677669, %v1860_v5  ;;  %v1896_v7 = vsel %vm1629_vm2, %v8549_v58, -inf }
 0x4d5   :  { %1897 = vmax.xlane.f32.xlu0 %v1896_v7  ;;  %v1905_v28 = vsel %vm1629_vm2, %v8557_v32, -inf }
 0x4d6   :  { %v1899_v6 = vsel %vm1629_vm2, %v8553_v29, -inf }
 0x4d7   :  { %1900 = vmax.xlane.f32.xlu1 %v1899_v6 }
 0x4d8   :  { %v6379_v41 = vpop.f32.mrb[60].mxu0 }
 0x4d9   :  { %1903 = vmax.xlane.f32.xlu0 %v1902_v4  ;;  %v1873_v19 = vpop.f32.mrb[61].mxu0  ;;  %v8567_v56 = vmul.f32 0.17677669, %v6379_v41 }
 0x4da   :  { %v8563_v57 = vmul.f32 0.17677669, %v1873_v19  ;;  %v6380_v50 = vpop.f32.mrb[62].mxu0 }
 0x4db   :  { %1906 = vmax.xlane.f32.xlu1 %v1905_v28  ;;  %v1876_v48 = vpop.f32.mrb[63].mxu0  ;;  %v8573_v34 = vmul.f32 0.17677669, %v6380_v50  ;;  %v1914_v20 = vsel %vm1629_vm2, %v8567_v56, -inf }
 0x4dc   :  { %v8569_v23 = vmul.f32 0.17677669, %v1876_v48  ;;  %v1908_v18 = vsel %vm1629_vm2, %v8563_v57, -inf }
 0x4dd   :  { %1909 = vmax.xlane.f32.xlu0 %v1908_v18  ;;  %v1917_v2 = vsel %vm1629_vm2, %v8573_v34, -inf }
 0x4de   :  { %v1911_v44 = vsel %vm1629_vm2, %v8569_v23, -inf }
 0x4df   :  { %1912 = vmax.xlane.f32.xlu1 %v1911_v44 }
 0x4e1   :  { %1915 = vmax.xlane.f32.xlu0 %v1914_v20 }
 0x4e3   :  { %1918 = vmax.xlane.f32.xlu1 %v1917_v2 }
 0x52d   :  { %v1632_v40 = vpop.xlane.xlu0 %1631 }
 0x52e   :  { %v1654_v24 = vsub.f32 %v8517_v14, %v1632_v40 }
 0x52f   :  { %v1635_v59 = vpop.xlane.xlu1 %1634 }
 0x530   :  { %v1662_v1 = vmul.f32 1.442695, %v1654_v24  ;;  %v1655_v25 = vsub.f32 %v8521_v61, %v1635_v59 }
 0x531   :  { %v1638_v27 = vpop.xlane.xlu0 %1637 }
 0x532   :  { %6835 = vpow2.f32 %v1662_v1  ;;  %v1664_v11 = vmul.f32 1.442695, %v1655_v25  ;;  %v1656_v46 = vsub.f32 %v8519_v49, %v1638_v27 }
 0x533   :  { %v1641_v39 = vpop.xlane.xlu1 %1640 }
 0x534   :  { %6837 = vpow2.f32 %v1664_v11  ;;  %v1666_v54 = vmul.f32 1.442695, %v1656_v46  ;;  %v1657_v8 = vsub.f32 %v8525_v53, %v1641_v39 }
 0x535   :  { %v1644_v21 = vpop.xlane.xlu0 %1643 }
 0x536   :  { %6839 = vpow2.f32 %v1666_v54  ;;  %v1668_v3 = vmul.f32 1.442695, %v1657_v8  ;;  %v1658_v9 = vsub.f32 %v8531_v12, %v1644_v21 }
 0x537   :  { %v1647_v10 = vpop.xlane.xlu1 %1646 }
 0x538   :  { %6841 = vpow2.f32 %v1668_v3  ;;  %v1670_v55 = vmul.f32 1.442695, %v1658_v9  ;;  %v1659_v14 = vsub.f32 %v8537_v42, %v1647_v10 }
 0x539   :  { %v1650_v0 = vpop.xlane.xlu0 %1649 }
 0x53a   :  { %6843 = vpow2.f32 %v1670_v55  ;;  %v1672_v51 = vmul.f32 1.442695, %v1659_v14  ;;  %v1660_v49 = vsub.f32 %v8535_v16, %v1650_v0 }
 0x53b   :  { %v1653_v61 = vpop.xlane.xlu1 %1652 }
 0x53c   :  { %v8588_v30 = vpop.eup %6835  ;;  %6845 = vpow2.f32 %v1672_v51  ;;  %v1674_v53 = vmul.f32 1.442695, %v1660_v49  ;;  %v1661_v63 = vsub.f32 %v8541_v52, %v1653_v61  ;;  %v7315_v51 = vld [vmem:[%s10674_s6 + $0x2c] ss:$16 sps:$4 sm:$0xff]  }
 0x53d   :  { %v1678_v22 = vsel %vm1629_vm2, %v8588_v30, 0.0  ;;  %v7316_v49 = vld [vmem:[%s10674_s6 + $0xc] ss:$16 sps:$4 sm:$0xff]  }
 0x53e   :  { %v8593_v38 = vpop.eup %6837  ;;  %6847 = vpow2.f32 %v1674_v53  ;;  %v1676_v60 = vmul.f32 1.442695, %v1661_v63  ;;  %1679 = vadd.xlane.f32.xlu0 %v1678_v22 }
 0x53f   :  { %v1681_v12 = vsel %vm1629_vm2, %v8593_v38, 0.0 }
 0x540   :  { %v8597_v35 = vpop.eup %6839  ;;  %6849 = vpow2.f32 %v1676_v60  ;;  %1682 = vadd.xlane.f32.xlu1 %v1681_v12 }
 0x541   :  { %v1684_v43 = vsel %vm1629_vm2, %v8597_v35, 0.0 }
 0x542   :  { %v8601_v31 = vpop.eup %6841  ;;  %1685 = vadd.xlane.f32.xlu0 %v1684_v43 }
 0x543   :  { %v1687_v16 = vsel %vm1629_vm2, %v8601_v31, 0.0 }
 0x544   :  { %v8605_v42 = vpop.eup %6843  ;;  %1688 = vadd.xlane.f32.xlu1 %v1687_v16 }
 0x545   :  { %v1690_v47 = vsel %vm1629_vm2, %v8605_v42, 0.0 }
 0x546   :  { %v8609_v52 = vpop.eup %6845  ;;  %1691 = vadd.xlane.f32.xlu0 %v1690_v47 }
 0x547   :  { %v1693_v17 = vsel %vm1629_vm2, %v8609_v52, 0.0 }
 0x548   :  { %v8613_v37 = vpop.eup %6847  ;;  %1694 = vadd.xlane.f32.xlu1 %v1693_v17 }
 0x549   :  { %v1696_v26 = vsel %vm1629_vm2, %v8613_v37, 0.0 }
 0x54a   :  { %v8617_v33 = vpop.eup %6849  ;;  %1697 = vadd.xlane.f32.xlu0 %v1696_v26 }
 0x54b   :  { %v1699_v62 = vsel %vm1629_vm2, %v8617_v33, 0.0 }
 0x54c   :  { %1700 = vadd.xlane.f32.xlu1 %v1699_v62 }
 0x562   :  { %v1898_v15 = vpop.xlane.xlu0 %1897 }
 0x563   :  { %v1920_v5 = vsub.f32 %v8549_v58, %v1898_v15 }
 0x564   :  { %v1901_v7 = vpop.xlane.xlu1 %1900 }
 0x565   :  { %v1928_v6 = vmul.f32 1.442695, %v1920_v5  ;;  %v1921_v41 = vsub.f32 %v8553_v29, %v1901_v7 }
 0x566   :  { %v1904_v4 = vpop.xlane.xlu0 %1903 }
 0x567   :  { %6851 = vpow2.f32 %v1928_v6  ;;  %v1930_v19 = vmul.f32 1.442695, %v1921_v41  ;;  %v1922_v50 = vsub.f32 %v8551_v36, %v1904_v4 }
 0x568   :  { %v1907_v28 = vpop.xlane.xlu1 %1906 }
 0x569   :  { %6853 = vpow2.f32 %v1930_v19  ;;  %v1932_v48 = vmul.f32 1.442695, %v1922_v50  ;;  %v1923_v18 = vsub.f32 %v8557_v32, %v1907_v28 }
 0x56a   :  { %v1910_v44 = vpop.xlane.xlu0 %1909 }
 0x56b   :  { %6855 = vpow2.f32 %v1932_v48  ;;  %v1934_v20 = vmul.f32 1.442695, %v1923_v18  ;;  %v1924_v2 = vsub.f32 %v8563_v57, %v1910_v44  ;;  %v10872_v48 = vld [vmem:[#allocation64_spill] sm:$0xff]  ;;  %v10873_v18 = vld [vmem:[#allocation62_spill] sm:$0xff] }
 0x56c   :  { %v1913_v58 = vpop.xlane.xlu1 %1912 }
 0x56d   :  { %6857 = vpow2.f32 %v1934_v20  ;;  %v1936_v40 = vmul.f32 1.442695, %v1924_v2  ;;  %v1925_v29 = vsub.f32 %v8569_v23, %v1913_v58 }
 0x56e   :  { %v1916_v24 = vpop.xlane.xlu0 %1915 }
 0x56f   :  { %6859 = vpow2.f32 %v1936_v40  ;;  %v1938_v59 = vmul.f32 1.442695, %v1925_v29  ;;  %v1926_v36 = vsub.f32 %v8567_v56, %v1916_v24 }
 0x570   :  { %v1919_v1 = vpop.xlane.xlu1 %1918 }
 0x571   :  { %v8628_v25 = vpop.eup %6851  ;;  %6861 = vpow2.f32 %v1938_v59  ;;  %v1940_v32 = vmul.f32 1.442695, %v1926_v36  ;;  %v1927_v27 = vsub.f32 %v8573_v34, %v1919_v1 }
 0x572   :  { %v1944_v57 = vsel %vm1629_vm2, %v8628_v25, 0.0 }
 0x573   :  { %v8633_v11 = vpop.eup %6853  ;;  %6863 = vpow2.f32 %v1940_v32  ;;  %v1942_v46 = vmul.f32 1.442695, %v1927_v27  ;;  %1945 = vadd.xlane.f32.xlu0 %v1944_v57 }
 0x574   :  { %v1947_v23 = vsel %vm1629_vm2, %v8633_v11, 0.0 }
 0x575   :  { %v8637_v39 = vpop.eup %6855  ;;  %6865 = vpow2.f32 %v1942_v46  ;;  %1948 = vadd.xlane.f32.xlu1 %v1947_v23 }
 0x576   :  { %v1950_v56 = vsel %vm1629_vm2, %v8637_v39, 0.0 }
 0x577   :  { %v8641_v54 = vpop.eup %6857  ;;  %1951 = vadd.xlane.f32.xlu0 %v1950_v56 }
 0x578   :  { %v1953_v34 = vsel %vm1629_vm2, %v8641_v54, 0.0 }
 0x579   :  { %v8645_v8 = vpop.eup %6859  ;;  %1954 = vadd.xlane.f32.xlu1 %v1953_v34 }
 0x57a   :  { %v1956_v21 = vsel %vm1629_vm2, %v8645_v8, 0.0 }
 0x57b   :  { %v8649_v3 = vpop.eup %6861  ;;  %1957 = vadd.xlane.f32.xlu0 %v1956_v21 }
 0x57c   :  { %v1959_v9 = vsel %vm1629_vm2, %v8649_v3, 0.0 }
 0x57d   :  { %v8653_v10 = vpop.eup %6863  ;;  %1960 = vadd.xlane.f32.xlu1 %v1959_v9 }
 0x57e   :  { %v1962_v55 = vsel %vm1629_vm2, %v8653_v10, 0.0 }
 0x57f   :  { %v8657_v14 = vpop.eup %6865  ;;  %1963 = vadd.xlane.f32.xlu0 %v1962_v55 }
 0x580   :  { %v1965_v0 = vsel %vm1629_vm2, %v8657_v14, 0.0 }
 0x581   :  { %1966 = vadd.xlane.f32.xlu1 %v1965_v0 }
 0x592   :  { %2075 = vrot.lane.b32.xlu1 %v7315_v51, %s7319_s22 }
 0x595   :  { %2073 = vrot.lane.b32.xlu0 %v7316_v49, %s7319_s22 }
 0x5cb   :  { %v1680_v61 = vpop.xlane.xlu0 %1679 }
 0x5cc   :  { %6867 = vrcp.f32 %v1680_v61 }
 0x5cd   :  { %v1683_v53 = vpop.xlane.xlu1 %1682 }
 0x5ce   :  { %6869 = vrcp.f32 %v1683_v53 }
 0x5cf   :  { %v1686_v63 = vpop.xlane.xlu0 %1685 }
 0x5d0   :  { %6871 = vrcp.f32 %v1686_v63 }
 0x5d1   :  { %v1689_v22 = vpop.xlane.xlu1 %1688 }
 0x5d2   :  { %6873 = vrcp.f32 %v1689_v22 }
 0x5d3   :  { %v1692_v60 = vpop.xlane.xlu0 %1691 }
 0x5d4   :  { %6875 = vrcp.f32 %v1692_v60 }
 0x5d5   :  { %v1695_v12 = vpop.xlane.xlu1 %1694 }
 0x5d6   :  { %v6868_v43 = vpop.eup %6867  ;;  %6877 = vrcp.f32 %v1695_v12 }
 0x5d7   :  { %v1698_v16 = vpop.xlane.xlu0 %1697  ;;  %v1710_v26 = vmul.f32 %v6868_v43, %v8588_v30 }
 0x5d8   :  { %v6870_v47 = vpop.eup %6869  ;;  %6879 = vrcp.f32 %v1698_v16 }
 0x5d9   :  { %v1701_v17 = vpop.xlane.xlu1 %1700  ;;  %v1711_v62 = vmul.f32 %v6870_v47, %v8593_v38 }
 0x5da   :  { %v6872_v15 = vpop.eup %6871  ;;  %6881 = vrcp.f32 %v1701_v17 }
 0x5db   :  { %v1718_v5 = vpack.c.bf16 %v1711_v62, %v1710_v26  ;;  %v1712_v6 = vmul.f32 %v6872_v15, %v8597_v35 }
 0x5dc   :  { %v6874_v7 = vpop.eup %6873 }
 0x5dd   :  { %v1713_v41 = vmul.f32 %v6874_v7, %v8601_v31  ;;  %6357 = vmatprep.mubr.msk.bf16.mxu1 %vm1629_vm2, %v1718_v5 }
 0x5de   :  { %v6876_v4 = vpop.eup %6875 }
 0x5df   :  { %v1719_v19 = vpack.c.bf16 %v1713_v41, %v1712_v6  ;;  %v1714_v28 = vmul.f32 %v6876_v4, %v8605_v42 }
 0x5e0   :  { %v6878_v50 = vpop.eup %6877 }
 0x5e1   :  { %6358 = vmatmul.mubr.msk.bf16.vlgmr.msra.gmra.mrb[48].mxu1 %vm1629_vm2, %v1719_v19  ;;  %v1715_v30 = vmul.f32 %v6878_v50, %v8609_v52 }
 0x5e2   :  { %v6880_v38 = vpop.eup %6879  ;;  %6382 = vmatpush3.bf16.msra.mxu1 %v10872_v48  ;;  %v10874_v48 = vld [vmem:[#allocation37_spill] sm:$0xff] }
 0x5e3   :  { %6383 = vmatprep.subr.bf16.mxu1 %v10873_v18  ;;  %v1720_v44 = vpack.c.bf16 %v1715_v30, %v1714_v28  ;;  %v1716_v31 = vmul.f32 %v6880_v38, %v8613_v37  ;;  %v6725_v28 = vld [vmem:[%s10674_s6] ss:$16 sps:$4 sm:$0xff]  }
 0x5e4   :  { %v6882_v35 = vpop.eup %6881  ;;  %6417 = vmatprep.subr.bf16.mxu0 %v6725_v28  ;;  %v6726_v30 = vld [vmem:[%s10674_s6 + $0x20] ss:$16 sps:$4 sm:$0xff]  }
 0x5e5   :  { %6361 = vmatprep.mubr.msk.bf16.mxu1 %vm1629_vm2, %v1720_v44  ;;  %v1717_v20 = vmul.f32 %v6882_v35, %v8617_v33  ;;  %6418 = vmatpush3.bf16.msra.mxu0 %v6725_v28  ;;  %v5719_v35 = vld [vmem:[%s10672_s3 + $0x2] ss:$0 sm:$0xff] }
 0x5e6   :  { %6384 = vmatpush3.bf16.msra.mxu1 %v10873_v18  ;;  %6419 = vmatprep.subr.bf16.mxu0 %v6726_v30  ;;  %v10888_v28 = vld [vmem:[#allocation46_spill] sm:$0xff] }
 0x5e7   :  { %6385 = vmatprep.subr.bf16.mxu1 %v8374_v13  ;;  %v1721_v42 = vpack.c.bf16 %v1717_v20, %v1716_v31  ;;  %v10875_v31 = vld [vmem:[#allocation35_spill] sm:$0xff] }
 0x5e9   :  { %6362 = vmatmul.mubr.msk.bf16.gmra.mrb[52].mxu1 %vm1629_vm2, %v1721_v42  ;;  %6420 = vmatpush3.bf16.msra.mxu0 %v6726_v30 }
 0x5ea   :  { %6386 = vmatpush3.bf16.msra.mxu1 %v8374_v13 }
 0x5eb   :  { %6387 = vmatprep.subr.bf16.mxu1 %v8367_v45 }
 0x5ee   :  { %6388 = vmatpush3.bf16.msra.mxu1 %v8367_v45 }
 0x600   :  { %v1946_v52 = vpop.xlane.xlu0 %1945 }
 0x601   :  { %6883 = vrcp.f32 %v1946_v52  ;;  %v10876_v52 = vld [vmem:[#allocation34_spill] sm:$0xff] }
 0x602   :  { %v1949_v2 = vpop.xlane.xlu1 %1948 }
 0x603   :  { %6885 = vrcp.f32 %v1949_v2 }
 0x604   :  { %v1952_v37 = vpop.xlane.xlu0 %1951 }
 0x605   :  { %6887 = vrcp.f32 %v1952_v37 }
 0x606   :  { %v1955_v33 = vpop.xlane.xlu1 %1954 }
 0x607   :  { %6889 = vrcp.f32 %v1955_v33  ;;  %v10877_v33 = vld [vmem:[#allocation36_spill] sm:$0xff] }
 0x608   :  { %v1958_v58 = vpop.xlane.xlu0 %1957 }
 0x609   :  { %6891 = vrcp.f32 %v1958_v58 }
 0x60a   :  { %v1961_v40 = vpop.xlane.xlu1 %1960 }
 0x60b   :  { %v6884_v29 = vpop.eup %6883  ;;  %6893 = vrcp.f32 %v1961_v40 }
 0x60c   :  { %v1964_v24 = vpop.xlane.xlu0 %1963  ;;  %v1976_v36 = vmul.f32 %v6884_v29, %v8628_v25 }
 0x60d   :  { %v6886_v59 = vpop.eup %6885  ;;  %6895 = vrcp.f32 %v1964_v24 }
 0x60e   :  { %v1967_v13 = vpop.xlane.xlu1 %1966  ;;  %v1977_v45 = vmul.f32 %v6886_v59, %v8633_v11 }
 0x60f   :  { %v6888_v1 = vpop.eup %6887  ;;  %6897 = vrcp.f32 %v1967_v13 }
 0x610   :  { %v1984_v32 = vpack.c.bf16 %v1977_v45, %v1976_v36  ;;  %v2074_v27 = vpop.permute.xlu0 %2073  ;;  %v1978_v46 = vmul.f32 %v6888_v1, %v8637_v39  ;;  %v10878_v1 = vld [vmem:[#allocation41_spill] sm:$0xff] }
 0x611   :  { %v6890_v57 = vpop.eup %6889  ;;  %6397 = vmatprep.subr.bf16.mxu1 %v2074_v27 }
 0x612   :  { %v1979_v23 = vmul.f32 %v6890_v57, %v8641_v54  ;;  %6389 = vmatprep.mubr.msk.bf16.mxu1 %vm1629_vm2, %v1984_v32  ;;  %v2076_v49 = vpop.permute.xlu1 %2075  ;;  %v10879_v57 = vld [vmem:[#allocation39_spill] sm:$0xff] }
 0x613   :  { %v6892_v56 = vpop.eup %6891 }
 0x614   :  { %v1985_v34 = vpack.c.bf16 %v1979_v23, %v1978_v46  ;;  %v1980_v25 = vmul.f32 %v6892_v56, %v8645_v8  ;;  %v10880_v56 = vld [vmem:[#allocation38_spill] sm:$0xff] }
 0x615   :  { %v6894_v21 = vpop.eup %6893 }
 0x616   :  { %6390 = vmatmul.mubr.msk.bf16.vlgmr.msra.gmra.mrb[56].mxu1 %vm1629_vm2, %v1985_v34  ;;  %v1981_v11 = vmul.f32 %v6894_v21, %v8649_v3 }
 0x617   :  { %v6896_v9 = vpop.eup %6895  ;;  %6398 = vmatpush3.bf16.msra.mxu1 %v2074_v27 }
 0x618   :  { %v1986_v55 = vpack.c.bf16 %v1981_v11, %v1980_v25  ;;  %v1982_v39 = vmul.f32 %v6896_v9, %v8653_v10  ;;  %6399 = vmatprep.subr.bf16.mxu1 %v2076_v49  ;;  %v10881_v25 = vld [vmem:[#allocation40_spill] sm:$0xff] }
 0x619   :  { %v6898_v0 = vpop.eup %6897 }
 0x61a   :  { %6393 = vmatprep.mubr.msk.bf16.mxu1 %vm1629_vm2, %v1986_v55  ;;  %v1983_v54 = vmul.f32 %v6898_v0, %v8657_v14 }
 0x61b   :  { %6400 = vmatpush3.bf16.msra.mxu1 %v2076_v49 }
 0x61c   :  { %v1987_v51 = vpack.c.bf16 %v1983_v54, %v1982_v39 }
 0x61e   :  { %6394 = vmatmul.mubr.msk.bf16.gmra.mrb[60].mxu1 %vm1629_vm2, %v1987_v51 }
 0x6b4   :  { %v6359_v61 = vpop.f32.mrb[48].mxu1 }
 0x6b5   :  { %v1768_v8 = vpop.f32.mrb[49].mxu1 }
 0x6b6   :  { %v6360_v53 = vpop.f32.mrb[50].mxu1 }
 0x6b7   :  { %v2066_v3 = vpack.c.bf16 %v6360_v53, %v6359_v61  ;;  %v1771_v63 = vpop.f32.mrb[51].mxu1  ;;  %v10882_v61 = vld [vmem:[#allocation45_spill] sm:$0xff] }
 0x6b8   :  { %v2065_v22 = vpack.c.bf16 %v1771_v63, %v1768_v8 }
 0x6ba   :  { %6401 = vmatprep.mubr.msk.bf16.mxu1 %vm339_vm1, %v2065_v22 }
 0x6bb   :  { %6402 = vmatmul.mubr.msk.bf16.vlgmr.msra.gmra.mrb[64].mxu1 %vm339_vm1, %v2066_v3  ;;  %v10883_v3 = vld [vmem:[#allocation43_spill] sm:$0xff] }
 0x6bc   :  { %v6363_v60 = vpop.f32.mrb[52].mxu1 }
 0x6bd   :  { %v1784_v10 = vpop.f32.mrb[53].mxu1 }
 0x6be   :  { %v6364_v12 = vpop.f32.mrb[54].mxu1 }
 0x6bf   :  { %v2068_v14 = vpack.c.bf16 %v6364_v12, %v6363_v60  ;;  %v1787_v43 = vpop.f32.mrb[55].mxu1  ;;  %v10884_v60 = vld [vmem:[#allocation42_spill] sm:$0xff] }
 0x6c0   :  { %v2067_v16 = vpack.c.bf16 %v1787_v43, %v1784_v10 }
 0x6c2   :  { %6405 = vmatprep.mubr.msk.bf16.mxu1 %vm339_vm1, %v2067_v16 }
 0x6c3   :  { %6406 = vmatmul.mubr.msk.bf16.gmra.mrb[68].mxu1 %vm339_vm1, %v2068_v14  ;;  %v10885_v14 = vld [vmem:[#allocation44_spill] sm:$0xff] }
 0x6e9   :  { %v6391_v47 = vpop.f32.mrb[56].mxu1 }
 0x6ea   :  { %v2034_v17 = vpop.f32.mrb[57].mxu1 }
 0x6eb   :  { %v6392_v26 = vpop.f32.mrb[58].mxu1 }
 0x6ec   :  { %v2070_v62 = vpack.c.bf16 %v6392_v26, %v6391_v47  ;;  %v2037_v15 = vpop.f32.mrb[59].mxu1 }
 0x6ed   :  { %v2069_v5 = vpack.c.bf16 %v2037_v15, %v2034_v17 }
 0x6ef   :  { %6409 = vmatprep.mubr.msk.bf16.mxu1 %vm339_vm1, %v2069_v5 }
 0x6f0   :  { %6410 = vmatmul.mubr.msk.bf16.gmra.mrb[72].mxu1 %vm339_vm1, %v2070_v62 }
 0x6f1   :  { %v6395_v7 = vpop.f32.mrb[60].mxu1 }
 0x6f2   :  { %v2050_v6 = vpop.f32.mrb[61].mxu1 }
 0x6f3   :  { %v6396_v41 = vpop.f32.mrb[62].mxu1 }
 0x6f4   :  { %v2072_v4 = vpack.c.bf16 %v6396_v41, %v6395_v7  ;;  %v2053_v19 = vpop.f32.mrb[63].mxu1  ;;  %v10886_v7 = vld [vmem:[#allocation49_spill] sm:$0xff] }
 0x6f5   :  { %v2071_v50 = vpack.c.bf16 %v2053_v19, %v2050_v6 }
 0x6f7   :  { %6413 = vmatprep.mubr.msk.bf16.mxu1 %vm339_vm1, %v2071_v50 }
 0x6f8   :  { %6414 = vmatmul.mubr.msk.bf16.gmra.mrb[76].mxu1 %vm339_vm1, %v2072_v4  ;;  %v10887_v4 = vld [vmem:[#allocation47_spill] sm:$0xff] }
 0x78e   :  { %v6403_v38 = vpop.f32.mrb[64].mxu1 }
 0x78f   :  { %v2202_v18 = vadd.f32 %v6403_v38, %v10874_v48  ;;  %v2137_v44 = vpop.f32.mrb[65].mxu1  ;;  %v10889_v48 = vld [vmem:[#allocation48_spill] sm:$0xff] }
 0x790   :  { %v2200_v20 = vadd.f32 %v2137_v44, %v10875_v31  ;;  %v6404_v42 = vpop.f32.mrb[66].mxu1 }
 0x791   :  { %v2203_v2 = vadd.f32 %v6404_v42, %v10876_v52  ;;  %v2140_v37 = vpop.f32.mrb[67].mxu1  ;;  %v2222_v40 = vadd.f32 %v5719_v35, %v2202_v18 }
 0x792   :  { %v2201_v58 = vadd.f32 %v2140_v37, %v10877_v33  ;;  %v2220_v24 = vadd.f32 %v5719_v35, %v2200_v20  ;;  %v6727_v37 = vld [vmem:[%s10674_s6 + $0x4] ss:$16 sps:$4 sm:$0xff]  }
 0x793   :  { %v2223_v29 = vadd.f32 %v5719_v35, %v2203_v2  ;;  %6437 = vmatprep.subr.bf16.mxu1 %v6727_v37  ;;  %v6728_v33 = vld [vmem:[%s10674_s6 + $0x24] ss:$16 sps:$4 sm:$0xff]  }
 0x794   :  { %v2221_v59 = vadd.f32 %v5719_v35, %v2201_v58  ;;  %6438 = vmatpush3.bf16.xpose.msra.mxu1 %v6727_v37 }
 0x795   :  { %v2237_v13 = vpack.c.bf16 %v2223_v29, %v2222_v40  ;;  %6439 = vmatprep.subr.bf16.mxu1 %v6728_v33 }
 0x796   :  { %v2236_v36 = vpack.c.bf16 %v2221_v59, %v2220_v24  ;;  %v6407_v45 = vpop.f32.mrb[68].mxu1 }
 0x797   :  { %v2206_v32 = vadd.f32 %v6407_v45, %v10878_v1  ;;  %v2153_v27 = vpop.f32.mrb[69].mxu1 }
 0x798   :  { %v2204_v46 = vadd.f32 %v2153_v27, %v10879_v57  ;;  %v6408_v23 = vpop.f32.mrb[70].mxu1  ;;  %6421 = vmatprep.mubr.msk.bf16.mxu0 %vm339_vm1, %v2236_v36 }
 0x799   :  { %v2207_v34 = vadd.f32 %v6408_v23, %v10880_v56  ;;  %v2156_v21 = vpop.f32.mrb[71].mxu1  ;;  %6422 = vmatmul.mubr.msk.bf16.vlgmr.msra.gmra.mrb[64].mxu0 %vm339_vm1, %v2237_v13  ;;  %v2226_v9 = vadd.f32 %v5719_v35, %v2206_v32 }
 0x79a   :  { %v2205_v11 = vadd.f32 %v2156_v21, %v10881_v25  ;;  %v2224_v0 = vadd.f32 %v5719_v35, %v2204_v46 }
 0x79b   :  { %v2227_v55 = vadd.f32 %v5719_v35, %v2207_v34 }
 0x79c   :  { %v2225_v39 = vadd.f32 %v5719_v35, %v2205_v11  ;;  %6440 = vmatpush3.bf16.xpose.msra.mxu1 %v6728_v33 }
 0x79d   :  { %v2239_v54 = vpack.c.bf16 %v2227_v55, %v2226_v9 }
 0x79e   :  { %v2238_v51 = vpack.c.bf16 %v2225_v39, %v2224_v0 }
 0x7a0   :  { %6425 = vmatprep.mubr.msk.bf16.mxu0 %vm339_vm1, %v2238_v51 }
 0x7a1   :  { %6426 = vmatmul.mubr.msk.bf16.gmra.mrb[68].mxu0 %vm339_vm1, %v2239_v54 }
 0x7c3   :  { %v6411_v49 = vpop.f32.mrb[72].mxu1 }
 0x7c4   :  { %v2210_v8 = vadd.f32 %v6411_v49, %v10882_v61  ;;  %v2169_v53 = vpop.f32.mrb[73].mxu1 }
 0x7c5   :  { %v2208_v63 = vadd.f32 %v2169_v53, %v10883_v3  ;;  %v6412_v22 = vpop.f32.mrb[74].mxu1 }
 0x7c6   :  { %v2211_v10 = vadd.f32 %v6412_v22, %v10884_v60  ;;  %v2172_v12 = vpop.f32.mrb[75].mxu1  ;;  %v2230_v16 = vadd.f32 %v5719_v35, %v2210_v8 }
 0x7c7   :  { %v2209_v43 = vadd.f32 %v2172_v12, %v10885_v14  ;;  %v2228_v17 = vadd.f32 %v5719_v35, %v2208_v63 }
 0x7c8   :  { %v2231_v47 = vadd.f32 %v5719_v35, %v2211_v10 }
 0x7c9   :  { %v2229_v26 = vadd.f32 %v5719_v35, %v2209_v43 }
 0x7ca   :  { %v2241_v62 = vpack.c.bf16 %v2231_v47, %v2230_v16 }
 0x7cb   :  { %v2240_v15 = vpack.c.bf16 %v2229_v26, %v2228_v17  ;;  %v6415_v5 = vpop.f32.mrb[76].mxu1 }
 0x7cc   :  { %v2214_v6 = vadd.f32 %v6415_v5, %v10886_v7  ;;  %v2185_v41 = vpop.f32.mrb[77].mxu1 }
 0x7cd   :  { %v2212_v19 = vadd.f32 %v2185_v41, %v10887_v4  ;;  %v6416_v50 = vpop.f32.mrb[78].mxu1  ;;  %6429 = vmatprep.mubr.msk.bf16.mxu0 %vm339_vm1, %v2240_v15 }
 0x7ce   :  { %v2215_v30 = vadd.f32 %v6416_v50, %v10888_v28  ;;  %v2188_v38 = vpop.f32.mrb[79].mxu1  ;;  %6430 = vmatmul.mubr.msk.bf16.gmra.mrb[72].mxu0 %vm339_vm1, %v2241_v62  ;;  %v2234_v44 = vadd.f32 %v5719_v35, %v2214_v6 }
 0x7cf   :  { %v2213_v18 = vadd.f32 %v2188_v38, %v10889_v48  ;;  %v2232_v20 = vadd.f32 %v5719_v35, %v2212_v19 }
 0x7d0   :  { %v2235_v31 = vadd.f32 %v5719_v35, %v2215_v30 }
 0x7d1   :  { %v2233_v42 = vadd.f32 %v5719_v35, %v2213_v18  ;;  %v8750_v35 = vld [vmem:[%s10672_s3 + $0x6] ss:$0 sm:$0xff] }
 0x7d2   :  { %v2243_v52 = vpack.c.bf16 %v2235_v31, %v2234_v44 }
 0x7d3   :  { %v2242_v2 = vpack.c.bf16 %v2233_v42, %v2232_v20 }
 0x7d5   :  { %6433 = vmatprep.mubr.msk.bf16.mxu0 %vm339_vm1, %v2242_v2 }
 0x7d6   :  { %6434 = vmatmul.mubr.msk.bf16.gmra.mrb[76].mxu0 %vm339_vm1, %v2243_v52 }
 0x86c   :  { %v6423_v58 = vpop.f32.mrb[64].mxu0 }
 0x86d   :  { %v2327_v40 = vadd.f32 %v6423_v58, %v8750_v35  ;;  %v2318_v29 = vpop.f32.mrb[65].mxu0 }
 0x86e   :  { %v2319_v24 = vadd.f32 %v8750_v35, %v2318_v29  ;;  %v6424_v59 = vpop.f32.mrb[66].mxu0 }
 0x86f   :  { %v5733_v13 = vmul.f32 -1.442695, %v2327_v40  ;;  %v2330_v36 = vadd.f32 %v6424_v59, %v8750_v35  ;;  %v2321_v45 = vpop.f32.mrb[67].mxu0 }
 0x870   :  { %v5731_v1 = vmul.f32 -1.442695, %v2319_v24  ;;  %v2322_v32 = vadd.f32 %v8750_v35, %v2321_v45 }
 0x871   :  { %6899 = vpow2.f32 %v5733_v13  ;;  %v5734_v27 = vmul.f32 -1.442695, %v2330_v36 }
 0x872   :  { %6901 = vpow2.f32 %v5731_v1  ;;  %v5732_v57 = vmul.f32 -1.442695, %v2322_v32 }
 0x873   :  { %6903 = vpow2.f32 %v5734_v27 }
 0x874   :  { %6905 = vpow2.f32 %v5732_v57  ;;  %v6427_v46 = vpop.f32.mrb[68].mxu0 }
 0x875   :  { %v2343_v23 = vadd.f32 %v6427_v46, %v8750_v35  ;;  %v2334_v56 = vpop.f32.mrb[69].mxu0 }
 0x876   :  { %v2335_v34 = vadd.f32 %v8750_v35, %v2334_v56  ;;  %v6428_v21 = vpop.f32.mrb[70].mxu0 }
 0x877   :  { %v5737_v25 = vmul.f32 -1.442695, %v2343_v23  ;;  %v2346_v11 = vadd.f32 %v6428_v21, %v8750_v35  ;;  %v2337_v9 = vpop.f32.mrb[71].mxu0 }
 0x878   :  { %v5735_v55 = vmul.f32 -1.442695, %v2335_v34  ;;  %v2338_v0 = vadd.f32 %v8750_v35, %v2337_v9 }
 0x879   :  { %6907 = vpow2.f32 %v5737_v25  ;;  %v5738_v39 = vmul.f32 -1.442695, %v2346_v11 }
 0x87a   :  { %6909 = vpow2.f32 %v5735_v55  ;;  %v5736_v54 = vmul.f32 -1.442695, %v2338_v0 }
 0x87b   :  { %v6900_v51 = vpop.eup %6899  ;;  %6911 = vpow2.f32 %v5738_v39 }
 0x87c   :  { %v6902_v49 = vpop.eup %6901  ;;  %v2431_v61 = vadd.f32 1.0, %v6900_v51  ;;  %6913 = vpow2.f32 %v5736_v54 }
 0x87d   :  { %v6904_v8 = vpop.eup %6903  ;;  %v2429_v53 = vadd.f32 1.0, %v6902_v49 }
 0x87e   :  { %v6906_v3 = vpop.eup %6905  ;;  %6915 = vrcp.f32 %v2431_v61  ;;  %v2432_v63 = vadd.f32 1.0, %v6904_v8 }
 0x87f   :  { %6917 = vrcp.f32 %v2429_v53  ;;  %v2430_v22 = vadd.f32 1.0, %v6906_v3 }
 0x880   :  { %6919 = vrcp.f32 %v2432_v63 }
 0x881   :  { %6921 = vrcp.f32 %v2430_v22 }
 0x883   :  { %v6908_v60 = vpop.eup %6907 }
 0x884   :  { %v6910_v10 = vpop.eup %6909  ;;  %v2435_v12 = vadd.f32 1.0, %v6908_v60 }
 0x885   :  { %v6912_v14 = vpop.eup %6911  ;;  %v2433_v43 = vadd.f32 1.0, %v6910_v10 }
 0x886   :  { %v6914_v16 = vpop.eup %6913  ;;  %6923 = vrcp.f32 %v2435_v12  ;;  %v2436_v47 = vadd.f32 1.0, %v6912_v14 }
 0x887   :  { %6925 = vrcp.f32 %v2433_v43  ;;  %v2434_v17 = vadd.f32 1.0, %v6914_v16 }
 0x888   :  { %v6916_v26 = vpop.eup %6915  ;;  %6927 = vrcp.f32 %v2436_v47 }
 0x889   :  { %v6918_v62 = vpop.eup %6917  ;;  %6929 = vrcp.f32 %v2434_v17  ;;  %v2479_v7 = vmul.f32 %v6916_v26, %v2327_v40 }
 0x88a   :  { %v6920_v15 = vpop.eup %6919  ;;  %v2477_v41 = vmul.f32 %v6918_v62, %v2319_v24 }
 0x88b   :  { %v6922_v5 = vpop.eup %6921  ;;  %v2480_v6 = vmul.f32 %v6920_v15, %v2330_v36 }
 0x88c   :  { %v2478_v4 = vmul.f32 %v6922_v5, %v2322_v32 }
 0x88d   :  { %v2494_v19 = vpack.c.bf16 %v2480_v6, %v2479_v7 }
 0x88e   :  { %v2493_v50 = vpack.c.bf16 %v2478_v4, %v2477_v41 }
 0x890   :  { %v6924_v28 = vpop.eup %6923  ;;  %6441 = vmatprep.mubr.bf16.mxu1 %v2493_v50 }
 0x891   :  { %v6926_v30 = vpop.eup %6925  ;;  %6442 = vmatmul.mubr.bf16.vlgmr.msra.gmra.mrb[80].mxu1 %v2494_v19  ;;  %v2483_v18 = vmul.f32 %v6924_v28, %v2343_v23 }
 0x892   :  { %v6928_v38 = vpop.eup %6927  ;;  %v2481_v31 = vmul.f32 %v6926_v30, %v2335_v34 }
 0x893   :  { %v6930_v48 = vpop.eup %6929  ;;  %v2484_v44 = vmul.f32 %v6928_v38, %v2346_v11 }
 0x894   :  { %v2482_v20 = vmul.f32 %v6930_v48, %v2338_v0 }
 0x895   :  { %v2496_v42 = vpack.c.bf16 %v2484_v44, %v2483_v18 }
 0x896   :  { %v2495_v52 = vpack.c.bf16 %v2482_v20, %v2481_v31  ;;  %v5589_v31 = vld [vmem:[%s10675_s1 + $0x110] sm:$0xff]  ;;  %v8774_v20 = vld [vmem:[%s10675_s1 + $0x100] sm:$0xff] }
 0x898   :  { %6445 = vmatprep.mubr.bf16.mxu1 %v2495_v52  ;;  %v2648_v52 = vmul.f32 %v5589_v31, %v5589_v31 }
 0x899   :  { %6446 = vmatmul.mubr.bf16.gmra.mrb[84].mxu1 %v2496_v42  ;;  %v8779_v42 = vld [vmem:[%s10675_s1 + $0x118] sm:$0xff] }
 0x8a1   :  { %v6431_v2 = vpop.f32.mrb[72].mxu0 }
 0x8a2   :  { %v2359_v37 = vadd.f32 %v6431_v2, %v8750_v35  ;;  %v2350_v33 = vpop.f32.mrb[73].mxu0  ;;  %v8784_v2 = vld [vmem:[%s10675_s1 + $0x108] sm:$0xff] }
 0x8a3   :  { %v2351_v58 = vadd.f32 %v8750_v35, %v2350_v33  ;;  %v6432_v40 = vpop.f32.mrb[74].mxu0  ;;  %v2649_v33 = vmul.f32 %v8779_v42, %v8779_v42 }
 0x8a4   :  { %v5741_v29 = vmul.f32 -1.442695, %v2359_v37  ;;  %v2362_v24 = vadd.f32 %v6432_v40, %v8750_v35  ;;  %v2353_v59 = vpop.f32.mrb[75].mxu0  ;;  %v2647_v40 = vmul.f32 %v8784_v2, %v8784_v2 }
 0x8a5   :  { %v5739_v13 = vmul.f32 -1.442695, %v2351_v58  ;;  %v2354_v36 = vadd.f32 %v8750_v35, %v2353_v59  ;;  %v2664_v59 = vadd.f32 1.0, %v2648_v52  ;;  %v10891_v52 = vld [vmem:[#allocation7_spill] sm:$0xff] }
 0x8a6   :  { %6931 = vpow2.f32 %v5741_v29  ;;  %v5742_v45 = vmul.f32 -1.442695, %v2362_v24 }
 0x8a7   :  { %6933 = vpow2.f32 %v5739_v13  ;;  %v5740_v1 = vmul.f32 -1.442695, %v2354_v36 }
 0x8a8   :  { %6935 = vpow2.f32 %v5742_v45 }
 0x8a9   :  { %6937 = vpow2.f32 %v5740_v1  ;;  %v6435_v32 = vpop.f32.mrb[76].mxu0  ;;  %v8814_v1 = vld [vmem:[%s10675_s1 + $0x130] sm:$0xff] }
 0x8aa   :  { %v2375_v27 = vadd.f32 %v6435_v32, %v8750_v35  ;;  %v2366_v57 = vpop.f32.mrb[77].mxu0 }
 0x8ab   :  { %v2367_v46 = vadd.f32 %v8750_v35, %v2366_v57  ;;  %v6436_v23 = vpop.f32.mrb[78].mxu0  ;;  %v2665_v57 = vadd.f32 1.0, %v2649_v33 }
 0x8ac   :  { %v5745_v56 = vmul.f32 -1.442695, %v2375_v27  ;;  %v2378_v34 = vadd.f32 %v6436_v23, %v8750_v35  ;;  %v2369_v21 = vpop.f32.mrb[79].mxu0 }
 0x8ad   :  { %v5743_v25 = vmul.f32 -1.442695, %v2367_v46  ;;  %v2370_v11 = vadd.f32 %v8750_v35, %v2369_v21 }
 0x8ae   :  { %6939 = vpow2.f32 %v5745_v56  ;;  %v5746_v9 = vmul.f32 -1.442695, %v2378_v34  ;;  %v2663_v56 = vadd.f32 1.0, %v2647_v40 }
 0x8af   :  { %6941 = vpow2.f32 %v5743_v25  ;;  %v5744_v55 = vmul.f32 -1.442695, %v2370_v11  ;;  %v2652_v25 = vmul.f32 %v8814_v1, %v8814_v1 }
 0x8b0   :  { %v6932_v0 = vpop.eup %6931  ;;  %6943 = vpow2.f32 %v5746_v9 }
 0x8b1   :  { %v6934_v39 = vpop.eup %6933  ;;  %v2439_v54 = vadd.f32 1.0, %v6932_v0  ;;  %6945 = vpow2.f32 %v5744_v55 }
 0x8b2   :  { %v6936_v51 = vpop.eup %6935  ;;  %v2437_v49 = vadd.f32 1.0, %v6934_v39 }
 0x8b3   :  { %v6938_v61 = vpop.eup %6937  ;;  %6947 = vrcp.f32 %v2439_v54  ;;  %v2440_v8 = vadd.f32 1.0, %v6936_v51  ;;  %v8849_v51 = vld [vmem:[%s10675_s1 + $0x1b0] sm:$0xff] }
 0x8b4   :  { %6949 = vrcp.f32 %v2437_v49  ;;  %v2438_v53 = vadd.f32 1.0, %v6938_v61  ;;  %v2748_v61 = vmul.f32 %v8849_v51, %v8849_v51 }
 0x8b5   :  { %6951 = vrcp.f32 %v2440_v8  ;;  %v8858_v8 = vld [vmem:[%s10675_s1 + $0x1a0] sm:$0xff] }
 0x8b6   :  { %6953 = vrcp.f32 %v2438_v53  ;;  %v8863_v53 = vld [vmem:[%s10672_s3 + $0x4] ss:$0 sm:$0xff] }
 0x8b8   :  { %v6940_v3 = vpop.eup %6939 }
 0x8b9   :  { %v6942_v35 = vpop.eup %6941  ;;  %v2443_v63 = vadd.f32 1.0, %v6940_v3  ;;  %v2668_v3 = vadd.f32 1.0, %v2652_v25 }
 0x8ba   :  { %v6944_v22 = vpop.eup %6943  ;;  %v2441_v60 = vadd.f32 1.0, %v6942_v35  ;;  %v2746_v35 = vmul.f32 %v8858_v8, %v8858_v8 }
 0x8bb   :  { %v6946_v10 = vpop.eup %6945  ;;  %6955 = vrcp.f32 %v2443_v63  ;;  %v2444_v12 = vadd.f32 1.0, %v6944_v22  ;;  %v8870_v63 = vld [vmem:[%s10675_s1 + $0x1a8] sm:$0xff] }
 0x8bc   :  { %6957 = vrcp.f32 %v2441_v60  ;;  %v2442_v14 = vadd.f32 1.0, %v6946_v10  ;;  %v2747_v60 = vmul.f32 %v8870_v63, %v8870_v63 }
 0x8bd   :  { %v6948_v43 = vpop.eup %6947  ;;  %6959 = vrcp.f32 %v2444_v12 }
 0x8be   :  { %v6950_v16 = vpop.eup %6949  ;;  %6961 = vrcp.f32 %v2442_v14  ;;  %v2487_v26 = vmul.f32 %v6948_v43, %v2359_v37  ;;  %v2646_v37 = vmul.f32 %v8774_v20, %v8774_v20  ;;  %v8877_v14 = vld [vmem:[%s10675_s1 + $0x1b8] sm:$0xff] }
 0x8bf   :  { %v6952_v47 = vpop.eup %6951  ;;  %v2485_v15 = vmul.f32 %v6950_v16, %v2351_v58  ;;  %v8793_v58 = vld [vmem:[%s10675_s1 + $0x190] sm:$0xff]  ;;  %6963 = vrsqrt.f32 %v2664_v59 }
 0x8c0   :  { %v6954_v17 = vpop.eup %6953  ;;  %v2488_v62 = vmul.f32 %v6952_v47, %v2362_v24  ;;  %v2744_v29 = vmul.f32 %v8793_v58, %v8793_v58  ;;  %v8802_v24 = vld [vmem:[%s10675_s1 + $0x180] sm:$0xff]  ;;  %v2662_v45 = vadd.f32 1.0, %v2646_v37 }
 0x8c1   :  { %v2486_v5 = vmul.f32 %v6954_v17, %v2354_v36  ;;  %v2742_v13 = vmul.f32 %v8802_v24, %v8802_v24  ;;  %v8809_v36 = vld [vmem:[%s10675_s1 + $0x198] sm:$0xff]  ;;  %v2764_v17 = vadd.f32 1.0, %v2748_v61  ;;  %v10897_v61 = vld [vmem:[#allocation6_spill] sm:$0xff] }
 0x8c2   :  { %v2498_v7 = vpack.c.bf16 %v2488_v62, %v2487_v26  ;;  %v2745_v32 = vmul.f32 %v8809_v36, %v8809_v36  ;;  %v2760_v21 = vadd.f32 1.0, %v2744_v29  ;;  %6965 = vrsqrt.f32 %v2662_v45  ;;  %v10892_v29 = vld [vmem:[#allocation2_spill] sm:$0xff] }
 0x8c3   :  { %v2497_v6 = vpack.c.bf16 %v2486_v5, %v2485_v15  ;;  %v2758_v9 = vadd.f32 1.0, %v2742_v13  ;;  %6967 = vrsqrt.f32 %v2665_v57  ;;  %v2749_v26 = vmul.f32 %v8877_v14, %v8877_v14  ;;  %v10893_v13 = vld [vmem:[#allocation8_spill] sm:$0xff]  ;;  %v10894_v57 = vld [vmem:[#allocation3_spill] sm:$0xff] }
 0x8c4   :  { %v2761_v0 = vadd.f32 1.0, %v2745_v32  ;;  %6969 = vrsqrt.f32 %v2663_v56  ;;  %v2762_v5 = vadd.f32 1.0, %v2746_v35  ;;  %v10895_v56 = vld [vmem:[#allocation9_spill] sm:$0xff] }
 0x8c5   :  { %v6956_v41 = vpop.eup %6955  ;;  %6449 = vmatprep.mubr.bf16.mxu1 %v2497_v6  ;;  %6971 = vrsqrt.f32 %v2760_v21 }
 0x8c6   :  { %v6958_v4 = vpop.eup %6957  ;;  %6450 = vmatmul.mubr.bf16.gmra.mrb[88].mxu1 %v2498_v7  ;;  %v2491_v28 = vmul.f32 %v6956_v41, %v2375_v27  ;;  %v8821_v27 = vld [vmem:[%s10675_s1 + $0x188] sm:$0xff]  ;;  %6973 = vrsqrt.f32 %v2758_v9 }
 0x8c7   :  { %v6960_v19 = vpop.eup %6959  ;;  %v2489_v38 = vmul.f32 %v6958_v4, %v2367_v46  ;;  %v8826_v46 = vld [vmem:[%s10675_s1 + $0x120] sm:$0xff]  ;;  %v2743_v23 = vmul.f32 %v8821_v27, %v8821_v27  ;;  %6975 = vrsqrt.f32 %v2761_v0 }
 0x8c8   :  { %v6962_v50 = vpop.eup %6961  ;;  %v2492_v30 = vmul.f32 %v6960_v19, %v2378_v34  ;;  %v8833_v34 = vld [vmem:[%s10675_s1 + $0x138] sm:$0xff]  ;;  %v2650_v55 = vmul.f32 %v8826_v46, %v8826_v46  ;;  %v2763_v19 = vadd.f32 1.0, %v2747_v60 }
 0x8c9   :  { %v2490_v48 = vmul.f32 %v6962_v50, %v2370_v11  ;;  %v8840_v11 = vld [vmem:[%s10675_s1 + $0x128] sm:$0xff]  ;;  %v2653_v39 = vmul.f32 %v8833_v34, %v8833_v34  ;;  %v2759_v54 = vadd.f32 1.0, %v2743_v23  ;;  %v6964_v4 = vpop.eup %6963 }
 0x8ca   :  { %v2500_v18 = vpack.c.bf16 %v2492_v30, %v2491_v28  ;;  %v2651_v49 = vmul.f32 %v8840_v11, %v8840_v11  ;;  %v2666_v22 = vadd.f32 1.0, %v2650_v55  ;;  %v10896_v55 = vld [vmem:[#allocation4_spill] sm:$0xff] }
 0x8cb   :  { %v2499_v44 = vpack.c.bf16 %v2490_v48, %v2489_v38  ;;  %v2669_v12 = vadd.f32 1.0, %v2653_v39  ;;  %6977 = vrsqrt.f32 %v2759_v54  ;;  %v10890_v38 = vld [vmem:[#allocation5_spill] sm:$0xff] }
 0x8cc   :  { %v2667_v47 = vadd.f32 1.0, %v2651_v49  ;;  %6979 = vrsqrt.f32 %v2668_v3  ;;  %v6966_v30 = vpop.eup %6965  ;;  %v2711_v3 = vmul.f32 %v8821_v27, %v10897_v61  ;;  %v9655_v61 = vld [vmem:[%s10673_s2 + $0x200] sm:$0xff] }
 0x8cd   :  { %6453 = vmatprep.mubr.bf16.mxu1 %v2499_v44  ;;  %6981 = vrsqrt.f32 %v2666_v22  ;;  %v6968_v44 = vpop.eup %6967 }
 0x8ce   :  { %6454 = vmatmul.mubr.bf16.gmra.mrb[92].mxu1 %v2500_v18  ;;  %6983 = vrsqrt.f32 %v2669_v12  ;;  %v6970_v40 = vpop.eup %6969 }
 0x8cf   :  { %6985 = vrsqrt.f32 %v2667_v47  ;;  %v6972_v32 = vpop.eup %6971 }
 0x8d0   :  { %6987 = vrsqrt.f32 %v2764_v17  ;;  %v6974_v9 = vpop.eup %6973 }
 0x8d1   :  { %6989 = vrsqrt.f32 %v2762_v5  ;;  %v6976_v49 = vpop.eup %6975  ;;  %v10899_v5 = vld [vmem:[#allocation16_spill] sm:$0xff] }
 0x8d2   :  { %6991 = vrsqrt.f32 %v2763_v19 }
 0x964   :  { %v6443_v10 = vpop.f32.mrb[80].mxu1 }
 0x965   :  { %v2560_v43 = vadd.f32 %v6443_v10, %v8863_v53  ;;  %v2551_v16 = vpop.f32.mrb[81].mxu1  ;;  %v6978_v10 = vpop.eup %6977 }
 0x966   :  { %v2552_v62 = vadd.f32 %v8863_v53, %v2551_v16  ;;  %v6444_v15 = vpop.f32.mrb[82].mxu1  ;;  %v6980_v47 = vpop.eup %6979 }
 0x967   :  { %v2616_v7 = vmul.f32 %v5589_v31, %v2560_v43  ;;  %v2563_v6 = vadd.f32 %v6444_v15, %v8863_v53  ;;  %v2554_v41 = vpop.f32.mrb[83].mxu1  ;;  %v2765_v31 = vadd.f32 1.0, %v2749_v26  ;;  %v6982_v15 = vpop.eup %6981 }
 0x968   :  { %v2614_v50 = vmul.f32 %v8774_v20, %v2552_v62  ;;  %v2555_v28 = vadd.f32 %v8863_v53, %v2554_v41  ;;  %v2712_v20 = vmul.f32 %v8793_v58, %v10892_v29 }
 0x969   :  { %v2632_v48 = vadd.f32 %v2616_v7, %v10890_v38  ;;  %v2617_v18 = vmul.f32 %v8779_v42, %v2563_v6  ;;  %v2710_v42 = vmul.f32 %v8802_v24, %v10894_v57  ;;  %6993 = vrsqrt.f32 %v2765_v31  ;;  %v10903_v38 = vld [vmem:[#allocation10_spill] sm:$0xff]  ;;  %v10905_v31 = vld [vmem:[#allocation17_spill] sm:$0xff]  ;;  %v9672_v57 = vld [vmem:[%s10673_s2 + $0x188] sm:$0xff] }
 0x96a   :  { %v2630_v37 = vadd.f32 %v2614_v50, %v10891_v52  ;;  %v2615_v33 = vmul.f32 %v8784_v2, %v2555_v28  ;;  %v2713_v2 = vmul.f32 %v8809_v36, %v10896_v55 }
 0x96b   :  { %v2696_v59 = vmul.f32 %v6964_v4, %v2632_v48  ;;  %v2633_v45 = vadd.f32 %v2617_v18, %v10893_v13  ;;  %v10901_v4 = vld [vmem:[#allocation14_spill] sm:$0xff]  ;;  %v2716_v48 = vmul.f32 %v8849_v51, %v10903_v38  ;;  %v10904_v18 = vld [vmem:[#allocation11_spill] sm:$0xff] }
 0x96c   :  { %v2694_v23 = vmul.f32 %v6966_v30, %v2630_v37  ;;  %v2631_v21 = vadd.f32 %v2615_v33, %v10895_v56  ;;  %v6447_v25 = vpop.f32.mrb[84].mxu1  ;;  %v10909_v56 = vld [vmem:[#allocation13_spill] sm:$0xff] }
 0x96d   :  { %v2697_v0 = vmul.f32 %v6968_v44, %v2633_v45  ;;  %v2576_v58 = vadd.f32 %v6447_v25, %v8863_v53  ;;  %v2567_v39 = vpop.f32.mrb[85].mxu1  ;;  %v2728_v54 = vadd.f32 %v2712_v20, %v2696_v59  ;;  %v2714_v44 = vmul.f32 %v8858_v8, %v10904_v18  ;;  %v10908_v45 = vld [vmem:[#allocation12_spill] sm:$0xff] }
 0x96e   :  { %v2695_v35 = vmul.f32 %v6970_v40, %v2631_v21  ;;  %v2568_v24 = vadd.f32 %v8863_v53, %v2567_v39  ;;  %v6448_v22 = vpop.f32.mrb[86].mxu1  ;;  %v2726_v60 = vadd.f32 %v2710_v42, %v2694_v23  ;;  %v10906_v40 = vld [vmem:[#allocation15_spill] sm:$0xff]  ;;  %v2717_v51 = vmul.f32 %v8877_v14, %v10908_v45  ;;  %v9637_v18 = vld [vmem:[%s10673_s2 + $0x190] sm:$0xff] }
 0x96f   :  { %v2620_v12 = vmul.f32 %v8814_v1, %v2576_v58  ;;  %v2579_v36 = vadd.f32 %v6448_v22, %v8863_v53  ;;  %v2570_v43 = vpop.f32.mrb[87].mxu1  ;;  %v2729_v16 = vadd.f32 %v2713_v2, %v2697_v0  ;;  %v6984_v1 = vpop.eup %6983  ;;  %v8926_v59 = vmul.f32 %v6972_v32, %v2728_v54 }
 0x970   :  { %v2618_v17 = vmul.f32 %v8826_v46, %v2568_v24  ;;  %v2571_v26 = vadd.f32 %v8863_v53, %v2570_v43  ;;  %v8906_v62 = vmul.f32 %v6974_v9, %v2726_v60  ;;  %v2727_v27 = vadd.f32 %v2711_v3, %v2695_v35  ;;  %v6986_v30 = vpop.eup %6985  ;;  %v8955_v60 = vld [vmem:[%s10675_s1 + $0x150] sm:$0xff]  ;;  %v8972_v43 = vld [vmem:[%s10675_s1 + $0x158] sm:$0xff] }
 0x971   :  { %v2636_v7 = vadd.f32 %v2620_v12, %v10899_v5  ;;  %v2621_v6 = vmul.f32 %v8833_v34, %v2579_v36  ;;  %v8910_v41 = vmul.f32 %v6976_v49, %v2729_v16  ;;  %v6988_v37 = vpop.eup %6987  ;;  %10907 = vst [vmem:[#allocation51_spill] sm:$0xff] %v8926_v59  ;;  %v2715_v21 = vmul.f32 %v8870_v63, %v10909_v56  ;;  %v8965_v12 = vld [vmem:[%s10675_s1 + $0x140] sm:$0xff] }
 0x972   :  { %10898 = vst [vmem:[#allocation67_spill] sm:$0xff] %v8906_v62  ;;  %v2634_v19 = vadd.f32 %v2618_v17, %v10901_v4  ;;  %v2619_v50 = vmul.f32 %v8840_v11, %v2571_v26  ;;  %v2928_v46 = vsel %vm339_vm1, %v8906_v62, 0.0  ;;  %v8916_v28 = vmul.f32 %v6978_v10, %v2727_v27  ;;  %v6990_v13 = vpop.eup %6989  ;;  %v8960_v10 = vld [vmem:[%s10675_s1 + $0x1d0] sm:$0xff] }
 0x973   :  { %10900 = vst [vmem:[#allocation50_spill] sm:$0xff] %v8910_v41  ;;  %v2700_v34 = vmul.f32 %v6980_v47, %v2636_v7  ;;  %v2637_v52 = vadd.f32 %v2621_v6, %v10905_v31  ;;  %2929 = vadd.xlane.f32.xlu1 %v2928_v46  ;;  %v6992_v23 = vpop.eup %6991  ;;  %v2937_v9 = vsel %vm339_vm1, %v8910_v41, 0.0  ;;  %v2934_v32 = vsel %vm339_vm1, %v8926_v59, 0.0  ;;  %v8979_v47 = vld [vmem:[%s10675_s1 + $0x148] sm:$0xff]  ;;  %v8997_v6 = vld [vmem:[%s10675_s1 + $0x1d8] sm:$0xff]  ;;  %v9009_v46 = vld [vmem:[%s10675_s1 + $0x170] sm:$0xff] }
 0x974   :  { %10902 = vst [vmem:[#allocation68_spill] sm:$0xff] %v8916_v28  ;;  %v2698_v33 = vmul.f32 %v6982_v15, %v2634_v19  ;;  %v2635_v11 = vadd.f32 %v2619_v50, %v10906_v40  ;;  %v2931_v20 = vsel %vm339_vm1, %v8916_v28, 0.0  ;;  %v6994_v39 = vpop.eup %6993  ;;  %v2752_v36 = vmul.f32 %v8960_v10, %v8960_v10  ;;  %v8988_v15 = vld [vmem:[%s10675_s1 + $0x1c0] sm:$0xff]  ;;  %v9004_v19 = vld [vmem:[%s10675_s1 + $0x1c8] sm:$0xff] }
 0x975   :  { %v2701_v42 = vmul.f32 %v6984_v1, %v2637_v52  ;;  %2932 = vadd.xlane.f32.xlu0 %v2931_v20  ;;  %v2732_v8 = vadd.f32 %v2716_v48, %v2700_v34  ;;  %v2656_v16 = vmul.f32 %v8955_v60, %v8955_v60  ;;  %v2654_v17 = vmul.f32 %v8965_v12, %v8965_v12  ;;  %v9016_v48 = vld [vmem:[%s10675_s1 + $0x1f0] sm:$0xff]  ;;  %v9021_v34 = vld [vmem:[%s10675_s1 + $0x160] sm:$0xff] }
 0x976   :  { %v2699_v25 = vmul.f32 %v6986_v30, %v2635_v11  ;;  %v2730_v2 = vadd.f32 %v2714_v44, %v2698_v33  ;;  %v2657_v26 = vmul.f32 %v8972_v43, %v8972_v43  ;;  %v2768_v27 = vadd.f32 1.0, %v2752_v36  ;;  %v9035_v11 = vld [vmem:[%s10675_s1 + $0x168] sm:$0xff] }
 0x977   :  { %2938 = vadd.xlane.f32.xlu1 %v2937_v9  ;;  %v2733_v0 = vadd.f32 %v2717_v51, %v2701_v42  ;;  %v8944_v3 = vmul.f32 %v6988_v37, %v2732_v8  ;;  %v2655_v5 = vmul.f32 %v8979_v47, %v8979_v47  ;;  %v2750_v7 = vmul.f32 %v8988_v15, %v8988_v15  ;;  %v9028_v37 = vld [vmem:[%s10675_s1 + $0x178] sm:$0xff] }
 0x978   :  { %v8936_v58 = vmul.f32 %v6990_v13, %v2730_v2  ;;  %v2731_v14 = vadd.f32 %v2715_v21, %v2699_v25  ;;  %v2672_v1 = vadd.f32 1.0, %v2656_v16  ;;  %v2753_v4 = vmul.f32 %v8997_v6, %v8997_v6  ;;  %v9053_v9 = vld [vmem:[%s10675_s1 + $0x1f8] sm:$0xff] }
 0x979   :  { %2935 = vadd.xlane.f32.xlu0 %v2934_v32  ;;  %10912 = vst [vmem:[#allocation56_spill] sm:$0xff] %v8944_v3  ;;  %v8946_v35 = vmul.f32 %v6994_v39, %v2733_v0  ;;  %v2946_v24 = vsel %vm339_vm1, %v8944_v3, 0.0  ;;  %v2670_v50 = vadd.f32 1.0, %v2654_v17  ;;  %v2751_v30 = vmul.f32 %v9004_v19, %v9004_v19  ;;  %v9060_v32 = vld [vmem:[%s10675_s1 + $0x1e8] sm:$0xff] }
 0x97a   :  { %10910 = vst [vmem:[#allocation52_spill] sm:$0xff] %v8936_v58  ;;  %v8938_v54 = vmul.f32 %v6992_v23, %v2731_v14  ;;  %v2940_v63 = vsel %vm339_vm1, %v8936_v58, 0.0  ;;  %v2673_v44 = vadd.f32 1.0, %v2657_v26  ;;  %6995 = vrsqrt.f32 %v2768_v27  ;;  %v9044_v23 = vld [vmem:[%s10675_s1 + $0x1e0] sm:$0xff]  ;;  %v9068_v16 = vld [vmem:[%s10674_s6 + $0x48] ss:$16 sps:$4 sm:$0xff]  }
 0x97b   :  { %10913 = vst [vmem:[#allocation55_spill] sm:$0xff] %v8946_v35  ;;  %v2949_v22 = vsel %vm339_vm1, %v8946_v35, 0.0  ;;  %v2756_v31 = vmul.f32 %v9016_v48, %v9016_v48  ;;  %v2671_v52 = vadd.f32 1.0, %v2655_v5  ;;  %v2766_v33 = vadd.f32 1.0, %v2750_v7  ;;  %6457 = vmatprep.subr.bf16.mxu0 %v9068_v16 }
 0x97c   :  { %10911 = vst [vmem:[#allocation54_spill] sm:$0xff] %v8938_v54  ;;  %v2943_v49 = vsel %vm339_vm1, %v8938_v54, 0.0  ;;  %6997 = vrsqrt.f32 %v2672_v1  ;;  %v2660_v40 = vmul.f32 %v9009_v46, %v9009_v46  ;;  %v2769_v20 = vadd.f32 1.0, %v2753_v4  ;;  %6458 = vmatpush3.bf16.msra.mxu0 %v9068_v16 }
 0x97d   :  { %2941 = vadd.xlane.f32.xlu0 %v2940_v63  ;;  %2944 = vadd.xlane.f32.xlu1 %v2943_v49  ;;  %6999 = vrsqrt.f32 %v2670_v50  ;;  %v2658_v13 = vmul.f32 %v9021_v34, %v9021_v34  ;;  %v2767_v51 = vadd.f32 1.0, %v2751_v30  ;;  %v2661_v42 = vmul.f32 %v9028_v37, %v9028_v37 }
 0x97e   :  { %7001 = vrsqrt.f32 %v2673_v44  ;;  %v2772_v8 = vadd.f32 1.0, %v2756_v31  ;;  %v2659_v21 = vmul.f32 %v9035_v11, %v9035_v11  ;;  %v2754_v25 = vmul.f32 %v9044_v23, %v9044_v23 }
 0x97f   :  { %7003 = vrsqrt.f32 %v2671_v52  ;;  %v2676_v2 = vadd.f32 1.0, %v2660_v40  ;;  %v2757_v0 = vmul.f32 %v9053_v9, %v9053_v9  ;;  %v2674_v14 = vadd.f32 1.0, %v2658_v13  ;;  %v10914_v40 = vld [vmem:[#allocation24_spill] sm:$0xff] }
 0x980   :  { %7005 = vrsqrt.f32 %v2766_v33  ;;  %v2755_v39 = vmul.f32 %v9060_v32, %v9060_v32  ;;  %v2677_v49 = vadd.f32 1.0, %v2661_v42  ;;  %v2675_v36 = vadd.f32 1.0, %v2659_v21 }
 0x981   :  { %2947 = vadd.xlane.f32.xlu0 %v2946_v24  ;;  %2950 = vadd.xlane.f32.xlu1 %v2949_v22  ;;  %7007 = vrsqrt.f32 %v2769_v20  ;;  %v2770_v17 = vadd.f32 1.0, %v2754_v25  ;;  %v2773_v7 = vadd.f32 1.0, %v2757_v0  ;;  %v10916_v25 = vld [vmem:[#allocation18_spill] sm:$0xff]  ;;  %v10917_v0 = vld [vmem:[#allocation23_spill] sm:$0xff] }
 0x982   :  { %7009 = vrsqrt.f32 %v2767_v51  ;;  %v2771_v44 = vadd.f32 1.0, %v2755_v39  ;;  %v10915_v51 = vld [vmem:[#allocation22_spill] sm:$0xff] }
 0x983   :  { %7011 = vrsqrt.f32 %v2772_v8 }
 0x984   :  { %7013 = vrsqrt.f32 %v2676_v2  ;;  %v9071_v5 = vpop.eup %6995 }
 0x985   :  { %7015 = vrsqrt.f32 %v2674_v14 }
 0x986   :  { %v6998_v30 = vpop.eup %6997  ;;  %7017 = vrsqrt.f32 %v2677_v49 }
 0x987   :  { %v7000_v33 = vpop.eup %6999  ;;  %7019 = vrsqrt.f32 %v2675_v36 }
 0x988   :  { %v7002_v13 = vpop.eup %7001  ;;  %7021 = vrsqrt.f32 %v2770_v17 }
 0x989   :  { %v7004_v21 = vpop.eup %7003  ;;  %7023 = vrsqrt.f32 %v2773_v7 }
 0x98a   :  { %v7006_v39 = vpop.eup %7005  ;;  %7025 = vrsqrt.f32 %v2771_v44 }
 0x98b   :  { %v7008_v17 = vpop.eup %7007 }
 0x999   :  { %v6451_v63 = vpop.f32.mrb[88].mxu1 }
 0x99a   :  { %v2592_v24 = vadd.f32 %v6451_v63, %v8863_v53  ;;  %v2583_v22 = vpop.f32.mrb[89].mxu1  ;;  %v10918_v63 = vld [vmem:[#allocation19_spill] sm:$0xff] }
 0x99b   :  { %v2584_v26 = vadd.f32 %v8863_v53, %v2583_v22  ;;  %v6452_v27 = vpop.f32.mrb[90].mxu1  ;;  %v2718_v49 = vmul.f32 %v8988_v15, %v10918_v63 }
 0x99c   :  { %v2624_v1 = vmul.f32 %v8955_v60, %v2592_v24  ;;  %v2595_v4 = vadd.f32 %v6452_v27, %v8863_v53  ;;  %v2586_v50 = vpop.f32.mrb[91].mxu1  ;;  %v10919_v24 = vld [vmem:[#allocation25_spill] sm:$0xff] }
 0x99d   :  { %v2622_v31 = vmul.f32 %v8965_v12, %v2584_v26  ;;  %v2587_v52 = vadd.f32 %v8863_v53, %v2586_v50  ;;  %v2720_v12 = vmul.f32 %v8960_v10, %v10916_v25  ;;  %v10920_v26 = vld [vmem:[#allocation20_spill] sm:$0xff]  ;;  %v10921_v50 = vld [vmem:[#allocation21_spill] sm:$0xff] }
 0x99e   :  { %v2640_v20 = vadd.f32 %v2624_v1, %v10914_v40  ;;  %v2625_v60 = vmul.f32 %v8972_v43, %v2595_v4  ;;  %v7010_v4 = vpop.eup %7009 }
 0x99f   :  { %v2638_v42 = vadd.f32 %v2622_v31, %v10915_v51  ;;  %v2623_v8 = vmul.f32 %v8979_v47, %v2587_v52  ;;  %v2721_v47 = vmul.f32 %v8997_v6, %v10920_v26  ;;  %v5777_v26 = vld [vmem:[%s10675_s1 + $0x2d8] sm:$0xff] }
 0x9a0   :  { %v2704_v2 = vmul.f32 %v6998_v30, %v2640_v20  ;;  %v2641_v14 = vadd.f32 %v2625_v60, %v10917_v0  ;;  %v2719_v30 = vmul.f32 %v9004_v19, %v10921_v50  ;;  %v10924_v0 = vld [vmem:[#allocation31_spill] sm:$0xff] }
 0x9a1   :  { %v2702_v43 = vmul.f32 %v7000_v33, %v2638_v42  ;;  %v2639_v22 = vadd.f32 %v2623_v8, %v10919_v24  ;;  %v6455_v36 = vpop.f32.mrb[92].mxu1  ;;  %v7012_v33 = vpop.eup %7011  ;;  %v10926_v24 = vld [vmem:[#allocation30_spill] sm:$0xff] }
 0x9a2   :  { %v2705_v27 = vmul.f32 %v7002_v13, %v2641_v14  ;;  %v2608_v10 = vadd.f32 %v6455_v36, %v8863_v53  ;;  %v2599_v7 = vpop.f32.mrb[93].mxu1  ;;  %v2736_v1 = vadd.f32 %v2720_v12, %v2704_v2  ;;  %v7014_v13 = vpop.eup %7013  ;;  %v10923_v12 = vld [vmem:[#allocation26_spill] sm:$0xff] }
 0x9a3   :  { %v2703_v31 = vmul.f32 %v7004_v21, %v2639_v22  ;;  %v2600_v15 = vadd.f32 %v8863_v53, %v2599_v7  ;;  %v6456_v44 = vpop.f32.mrb[94].mxu1  ;;  %v2734_v52 = vadd.f32 %v2718_v49, %v2702_v43  ;;  %v7016_v21 = vpop.eup %7015  ;;  %v2724_v2 = vmul.f32 %v9016_v48, %v10923_v12  ;;  %v10928_v48 = vld [vmem:[#allocation32_spill] sm:$0xff]  ;;  %v10930_v7 = vld [vmem:[#allocation27_spill] sm:$0xff] }
 0x9a4   :  { %v2628_v40 = vmul.f32 %v9009_v46, %v2608_v10  ;;  %v2611_v20 = vadd.f32 %v6456_v44, %v8863_v53  ;;  %v2602_v6 = vpop.f32.mrb[95].mxu1  ;;  %v2737_v60 = vadd.f32 %v2721_v47, %v2705_v27  ;;  %v7018_v43 = vpop.eup %7017 }
 0x9a5   :  { %v2626_v51 = vmul.f32 %v9021_v34, %v2600_v15  ;;  %v2603_v42 = vadd.f32 %v8863_v53, %v2602_v6  ;;  %v9099_v8 = vmul.f32 %v7006_v39, %v2734_v52  ;;  %v2735_v19 = vadd.f32 %v2719_v30, %v2703_v31  ;;  %v7020_v36 = vpop.eup %7019  ;;  %v10931_v31 = vld [vmem:[#allocation33_spill] sm:$0xff] }
 0x9a6   :  { %v2644_v14 = vadd.f32 %v2628_v40, %v10924_v0  ;;  %v2629_v46 = vmul.f32 %v9028_v37, %v2611_v20  ;;  %v9105_v49 = vmul.f32 %v7008_v17, %v2737_v60  ;;  %v9112_v39 = vmul.f32 %v9071_v5, %v2736_v1  ;;  %v7022_v10 = vpop.eup %7021  ;;  %v10932_v1 = vld [vmem:[#allocation28_spill] sm:$0xff]  ;;  %v10933_v6 = vld [vmem:[#allocation29_spill] sm:$0xff] }
 0x9a7   :  { %10922 = vst [vmem:[#allocation53_spill] sm:$0xff] %v9099_v8  ;;  %v2642_v22 = vadd.f32 %v2626_v51, %v10926_v24  ;;  %v2627_v34 = vmul.f32 %v9035_v11, %v2603_v42  ;;  %v2952_v53 = vsel %vm339_vm1, %v9099_v8, 0.0  ;;  %v9117_v17 = vmul.f32 %v7010_v4, %v2735_v19  ;;  %v7024_v5 = vpop.eup %7023 }
 0x9a8   :  { %10925 = vst [vmem:[#allocation58_spill] sm:$0xff] %v9105_v49  ;;  %10927 = vst [vmem:[#allocation60_spill] sm:$0xff] %v9112_v39  ;;  %v2708_v47 = vmul.f32 %v7014_v13, %v2644_v14  ;;  %v2645_v27 = vadd.f32 %v2629_v46, %v10928_v48  ;;  %2953 = vadd.xlane.f32.xlu0 %v2952_v53  ;;  %v2961_v37 = vsel %vm339_vm1, %v9105_v49, 0.0  ;;  %v7026_v20 = vpop.eup %7025  ;;  %v2958_v13 = vsel %vm339_vm1, %v9112_v39, 0.0 }
 0x9a9   :  { %10929 = vst [vmem:[#allocation57_spill] sm:$0xff] %v9117_v17  ;;  %v2722_v11 = vmul.f32 %v9044_v23, %v10930_v7  ;;  %v2706_v30 = vmul.f32 %v7016_v21, %v2642_v22  ;;  %v2643_v15 = vadd.f32 %v2627_v34, %v10931_v31  ;;  %2962 = vadd.xlane.f32.xlu1 %v2961_v37  ;;  %v2955_v23 = vsel %vm339_vm1, %v9117_v17, 0.0 }
 0x9aa   :  { %v2725_v44 = vmul.f32 %v9053_v9, %v10932_v1  ;;  %v2709_v52 = vmul.f32 %v7018_v43, %v2645_v27  ;;  %v2740_v40 = vadd.f32 %v2724_v2, %v2708_v47  ;;  %v2723_v60 = vmul.f32 %v9060_v32, %v10933_v6 }
 0x9ab   :  { %v2707_v4 = vmul.f32 %v7020_v36, %v2643_v15  ;;  %v2738_v51 = vadd.f32 %v2722_v11, %v2706_v30 }
 0x9ac   :  { %2959 = vadd.xlane.f32.xlu0 %v2958_v13  ;;  %v2741_v42 = vadd.f32 %v2725_v44, %v2709_v52  ;;  %v9136_v32 = vmul.f32 %v7012_v33, %v2740_v40  ;;  %v9149_v33 = vld [vmem:[%s10674_s6 + $0x68] ss:$16 sps:$4 sm:$0xff]  }
 0x9ad   :  { %2956 = vadd.xlane.f32.xlu1 %v2955_v23  ;;  %v9130_v19 = vmul.f32 %v7022_v10, %v2738_v51  ;;  %v2739_v9 = vadd.f32 %v2723_v60, %v2707_v4  ;;  %6459 = vmatprep.subr.bf16.mxu0 %v9149_v33 }
 0x9ae   :  { %v9132_v21 = vmul.f32 %v7024_v5, %v2741_v42  ;;  %10936 = vst [vmem:[#allocation66_spill] sm:$0xff] %v9136_v32  ;;  %v2970_v46 = vsel %vm339_vm1, %v9136_v32, 0.0  ;;  %6460 = vmatpush3.bf16.msra.mxu0 %v9149_v33 }
 0x9af   :  { %10934 = vst [vmem:[#allocation59_spill] sm:$0xff] %v9130_v19  ;;  %v2964_v2 = vsel %vm339_vm1, %v9130_v19, 0.0  ;;  %v9140_v14 = vmul.f32 %v7026_v20, %v2739_v9 }
 0x9b0   :  { %10935 = vst [vmem:[#allocation63_spill] sm:$0xff] %v9132_v21  ;;  %2965 = vadd.xlane.f32.xlu0 %v2964_v2  ;;  %v2973_v0 = vsel %vm339_vm1, %v9132_v21, 0.0 }
 0x9b1   :  { %10937 = vst [vmem:[#allocation61_spill] sm:$0xff] %v9140_v14  ;;  %2974 = vadd.xlane.f32.xlu1 %v2973_v0  ;;  %v2967_v43 = vsel %vm339_vm1, %v9140_v14, 0.0 }
 0x9b4   :  { %2971 = vadd.xlane.f32.xlu0 %v2970_v46 }
 0x9b5   :  { %2968 = vadd.xlane.f32.xlu1 %v2967_v43 }
 0xa00   :  { %v2930_v24 = vpop.xlane.xlu1 %2929 }
 0xa01   :  { %v2976_v53 = vmul.f32 0.03125, %v2930_v24 }
 0xa02   :  { %v2933_v22 = vpop.xlane.xlu0 %2932 }
 0xa03   :  { %v2977_v34 = vmul.f32 0.03125, %v2933_v22  ;;  %v9160_v11 = vsub.f32 %v8906_v62, %v2976_v53 }
 0xa04   :  { %v2939_v36 = vpop.xlane.xlu1 %2938 }
 0xa05   :  { %v2979_v47 = vmul.f32 0.03125, %v2939_v36  ;;  %v9154_v27 = vsub.f32 %v8916_v28, %v2977_v34  ;;  %v3008_v20 = vmul.f32 %v9160_v11, %v9160_v11  ;;  %v9665_v28 = vld [vmem:[%s10673_s2 + $0x218] sm:$0xff] }
 0xa06   :  { %v2936_v48 = vpop.xlane.xlu0 %2935 }
 0xa07   :  { %v9157_v37 = vsub.f32 %v8910_v41, %v2979_v47  ;;  %v2978_v10 = vmul.f32 0.03125, %v2936_v48  ;;  %v3009_v40 = vmul.f32 %v9154_v27, %v9154_v27  ;;  %v3024_v0 = vsel %vm339_vm1, %v3008_v20, 0.0 }
 0xa09   :  { %v9163_v30 = vsub.f32 %v8926_v59, %v2978_v10  ;;  %v3011_v31 = vmul.f32 %v9157_v37, %v9157_v37  ;;  %v3027_v2 = vsel %vm339_vm1, %v3009_v40, 0.0 }
 0xa0a   :  { %v2942_v15 = vpop.xlane.xlu0 %2941  ;;  %v2945_v5 = vpop.xlane.xlu1 %2944 }
 0xa0b   :  { %v3033_v44 = vsel %vm339_vm1, %v3011_v31, 0.0  ;;  %v3010_v52 = vmul.f32 %v9163_v30, %v9163_v30  ;;  %v2980_v60 = vmul.f32 0.03125, %v2942_v15  ;;  %v2981_v4 = vmul.f32 0.03125, %v2945_v5 }
 0xa0c   :  { %3034 = vadd.xlane.f32.xlu1 %v3033_v44 }
 0xa0d   :  { %v3030_v13 = vsel %vm339_vm1, %v3010_v52, 0.0  ;;  %v9178_v46 = vsub.f32 %v8936_v58, %v2980_v60  ;;  %v9181_v43 = vsub.f32 %v8938_v54, %v2981_v4 }
 0xa0e   :  { %v2948_v51 = vpop.xlane.xlu0 %2947  ;;  %v2951_v23 = vpop.xlane.xlu1 %2950  ;;  %3031 = vadd.xlane.f32.xlu0 %v3030_v13 }
 0xa0f   :  { %v2982_v42 = vmul.f32 0.03125, %v2948_v51  ;;  %v2983_v9 = vmul.f32 0.03125, %v2951_v23  ;;  %v3013_v48 = vmul.f32 %v9181_v43, %v9181_v43  ;;  %v3012_v10 = vmul.f32 %v9178_v46, %v9178_v46 }
 0xa10   :  { %3028 = vadd.xlane.f32.xlu1 %v3027_v2 }
 0xa11   :  { %v9184_v24 = vsub.f32 %v8944_v3, %v2982_v42  ;;  %v9187_v22 = vsub.f32 %v8946_v35, %v2983_v9  ;;  %v3039_v31 = vsel %vm339_vm1, %v3013_v48, 0.0  ;;  %v3036_v15 = vsel %vm339_vm1, %v3012_v10, 0.0  ;;  %v9645_v3 = vld [vmem:[%s10673_s2 + $0x210] sm:$0xff] }
 0xa12   :  { %3025 = vadd.xlane.f32.xlu0 %v3024_v0 }
 0xa13   :  { %v3015_v34 = vmul.f32 %v9187_v22, %v9187_v22  ;;  %v3014_v53 = vmul.f32 %v9184_v24, %v9184_v24 }
 0xa15   :  { %v3045_v36 = vsel %vm339_vm1, %v3015_v34, 0.0  ;;  %v3042_v47 = vsel %vm339_vm1, %v3014_v53, 0.0 }
 0xa16   :  { %3046 = vadd.xlane.f32.xlu1 %v3045_v36  ;;  %3043 = vadd.xlane.f32.xlu0 %v3042_v47 }
 0xa1a   :  { %3040 = vadd.xlane.f32.xlu1 %v3039_v31  ;;  %3037 = vadd.xlane.f32.xlu0 %v3036_v15 }
 0xa30   :  { %3325 = vrot.lane.b32.xlu0 %v9068_v16, %s7319_s22 }
 0xa35   :  { %v2954_v5 = vpop.xlane.xlu0 %2953 }
 0xa36   :  { %v2963_v44 = vpop.xlane.xlu1 %2962  ;;  %v2984_v52 = vmul.f32 0.03125, %v2954_v5 }
 0xa37   :  { %v2987_v4 = vmul.f32 0.03125, %v2963_v44 }
 0xa38   :  { %v9204_v60 = vsub.f32 %v9099_v8, %v2984_v52 }
 0xa39   :  { %v2960_v40 = vpop.xlane.xlu0 %2959  ;;  %v9212_v9 = vsub.f32 %v9105_v49, %v2987_v4 }
 0xa3a   :  { %v2986_v20 = vmul.f32 0.03125, %v2960_v40  ;;  %v2957_v51 = vpop.xlane.xlu1 %2956  ;;  %v3016_v34 = vmul.f32 %v9204_v60, %v9204_v60 }
 0xa3b   :  { %v2985_v2 = vmul.f32 0.03125, %v2957_v51  ;;  %v3019_v10 = vmul.f32 %v9212_v9, %v9212_v9 }
 0xa3c   :  { %v9207_v13 = vsub.f32 %v9112_v39, %v2986_v20  ;;  %v3048_v48 = vsel %vm339_vm1, %v3016_v34, 0.0 }
 0xa3d   :  { %v2966_v23 = vpop.xlane.xlu0 %2965  ;;  %v9218_v47 = vsub.f32 %v9117_v17, %v2985_v2  ;;  %v3057_v44 = vsel %vm339_vm1, %v3019_v10, 0.0 }
 0xa3e   :  { %v3018_v42 = vmul.f32 %v9207_v13, %v9207_v13  ;;  %v2988_v53 = vmul.f32 0.03125, %v2966_v23  ;;  %v2975_v5 = vpop.xlane.xlu1 %2974 }
 0xa3f   :  { %v3017_v52 = vmul.f32 %v9218_v47, %v9218_v47  ;;  %v2991_v40 = vmul.f32 0.03125, %v2975_v5 }
 0xa40   :  { %v3054_v0 = vsel %vm339_vm1, %v3018_v42, 0.0  ;;  %v9224_v31 = vsub.f32 %v9130_v19, %v2988_v53 }
 0xa41   :  { %3055 = vadd.xlane.f32.xlu1 %v3054_v0  ;;  %v2972_v36 = vpop.xlane.xlu0 %2971  ;;  %v3051_v51 = vsel %vm339_vm1, %v3017_v52, 0.0  ;;  %v9236_v23 = vsub.f32 %v9132_v21, %v2991_v40 }
 0xa42   :  { %v2990_v15 = vmul.f32 0.03125, %v2972_v36  ;;  %v3020_v4 = vmul.f32 %v9224_v31, %v9224_v31  ;;  %v2969_v36 = vpop.xlane.xlu1 %2968 }
 0xa43   :  { %v3023_v34 = vmul.f32 %v9236_v23, %v9236_v23 }
 0xa44   :  { %v9230_v20 = vsub.f32 %v9136_v32, %v2990_v15  ;;  %v3060_v42 = vsel %vm339_vm1, %v3020_v4, 0.0 }
 0xa45   :  { %3049 = vadd.xlane.f32.xlu1 %v3048_v48  ;;  %v3069_v53 = vsel %vm339_vm1, %v3023_v34, 0.0  ;;  %v2989_v48 = vmul.f32 0.03125, %v2969_v36 }
 0xa46   :  { %v3022_v2 = vmul.f32 %v9230_v20, %v9230_v20 }
 0xa47   :  { %v9252_v10 = vsub.f32 %v9140_v14, %v2989_v48 }
 0xa48   :  { %v3066_v0 = vsel %vm339_vm1, %v3022_v2, 0.0 }
 0xa49   :  { %3058 = vadd.xlane.f32.xlu1 %v3057_v44  ;;  %v3021_v15 = vmul.f32 %v9252_v10, %v9252_v10 }
 0xa4b   :  { %v3063_v5 = vsel %vm339_vm1, %v3021_v15, 0.0 }
 0xa4d   :  { %3052 = vadd.xlane.f32.xlu1 %v3051_v51 }
 0xa4f   :  { %3061 = vadd.xlane.f32.xlu0 %v3060_v42 }
 0xa53   :  { %3067 = vadd.xlane.f32.xlu0 %v3066_v0 }
 0xa57   :  { %3070 = vadd.xlane.f32.xlu0 %v3069_v53 }
 0xa5e   :  { %3327 = vrot.lane.b32.xlu1 %v9149_v33, %s7319_s22 }
 0xa6d   :  { %3428 = vrot.lane.b32.xlu0 %v9068_v16, %s7320_s23 }
 0xa71   :  { %3531 = vrot.lane.b32.xlu0 %v9068_v16, %s7321_s24 }
 0xa82   :  { %3064 = vadd.xlane.f32.xlu1 %v3063_v5 }
 0xa93   :  { %3430 = vrot.lane.b32.xlu1 %v9149_v33, %s7320_s23 }
 0xa97   :  { %3533 = vrot.lane.b32.xlu1 %v9149_v33, %s7321_s24 }
 0xa99   :  { %v3035_v44 = vpop.xlane.xlu1 %3034 }
 0xa9a   :  { %v3075_v52 = vmul.f32 0.03125, %v3035_v44 }
 0xa9b   :  { %v3032_v16 = vpop.xlane.xlu0 %3031 }
 0xa9c   :  { %v3107_v40 = vadd.f32 1e-05, %v3075_v52  ;;  %v3074_v4 = vmul.f32 0.03125, %v3032_v16  ;;  %v5752_v52 = vld [vmem:[%s10675_s1 + $0x210] sm:$0xff] }
 0xa9d   :  { %v3029_v51 = vpop.xlane.xlu1 %3028 }
 0xa9e   :  { %v3106_v42 = vadd.f32 1e-05, %v3074_v4  ;;  %v3073_v2 = vmul.f32 0.03125, %v3029_v51  ;;  %7027 = vrsqrt.f32 %v3107_v40  ;;  %v5751_v40 = vld [vmem:[%s10675_s1 + $0x208] sm:$0xff] }
 0xa9f   :  { %v3026_v0 = vpop.xlane.xlu0 %3025 }
 0xaa0   :  { %7029 = vrsqrt.f32 %v3106_v42  ;;  %v3105_v34 = vadd.f32 1e-05, %v3073_v2  ;;  %v3072_v53 = vmul.f32 0.03125, %v3026_v0  ;;  %v5753_v0 = vld [vmem:[%s10675_s1 + $0x218] sm:$0xff] }
 0xaa2   :  { %7031 = vrsqrt.f32 %v3105_v34  ;;  %v3104_v36 = vadd.f32 1e-05, %v3072_v53  ;;  %v3090_v53 = vadd.f32 1.0, %v5752_v52 }
 0xaa3   :  { %v3047_v48 = vpop.xlane.xlu1 %3046  ;;  %v3044_v15 = vpop.xlane.xlu0 %3043 }
 0xaa4   :  { %7033 = vrsqrt.f32 %v3104_v36  ;;  %v3079_v5 = vmul.f32 0.03125, %v3047_v48  ;;  %v3078_v33 = vmul.f32 0.03125, %v3044_v15  ;;  %v5750_v36 = vld [vmem:[%s10675_s1 + $0x200] sm:$0xff] }
 0xaa5   :  { %v3088_v14 = vadd.f32 1.0, %v5750_v36 }
 0xaa6   :  { %v3111_v6 = vadd.f32 1e-05, %v3079_v5  ;;  %v3110_v44 = vadd.f32 1e-05, %v3078_v33  ;;  %v3089_v33 = vadd.f32 1.0, %v5751_v40 }
 0xaa7   :  { %v3041_v16 = vpop.xlane.xlu1 %3040  ;;  %v3038_v4 = vpop.xlane.xlu0 %3037 }
 0xaa8   :  { %7035 = vrsqrt.f32 %v3111_v6  ;;  %v3077_v51 = vmul.f32 0.03125, %v3041_v16  ;;  %v3076_v42 = vmul.f32 0.03125, %v3038_v4  ;;  %v7028_v2 = vpop.eup %7027  ;;  %v3091_v4 = vadd.f32 1.0, %v5753_v0  ;;  %v5767_v0 = vld [vmem:[%s10675_s1 + $0x288] sm:$0xff] }
 0xaa9   :  { %7037 = vrsqrt.f32 %v3110_v44  ;;  %v3139_v1 = vmul.f32 %v7028_v2, %v9157_v37  ;;  %v5757_v37 = vld [vmem:[%s10675_s1 + $0x238] sm:$0xff]  ;;  %v5766_v2 = vld [vmem:[%s10675_s1 + $0x280] sm:$0xff] }
 0xaaa   :  { %v7030_v34 = vpop.eup %7029  ;;  %v3109_v48 = vadd.f32 1e-05, %v3077_v51  ;;  %v3108_v15 = vadd.f32 1e-05, %v3076_v42  ;;  %v5768_v51 = vld [vmem:[%s10675_s1 + $0x290] sm:$0xff] }
 0xaab   :  { %v3138_v5 = vmul.f32 %v7030_v34, %v9163_v30  ;;  %v3326_v6 = vpop.permute.xlu0 %3325  ;;  %v3155_v42 = vmul.f32 %v3139_v1, %v3091_v4  ;;  %v3095_v1 = vadd.f32 1.0, %v5757_v37 }
 0xaac   :  { %v7032_v16 = vpop.eup %7031  ;;  %7039 = vrsqrt.f32 %v3109_v48  ;;  %6477 = vmatprep.subr.bf16.mxu1 %v3326_v6  ;;  %v5755_v48 = vld [vmem:[%s10675_s1 + $0x228] sm:$0xff] }
 0xaad   :  { %v3137_v44 = vmul.f32 %v7032_v16, %v9154_v27  ;;  %7041 = vrsqrt.f32 %v3108_v15  ;;  %6478 = vmatpush3.bf16.msra.mxu1 %v3326_v6  ;;  %v3154_v7 = vmul.f32 %v3138_v5, %v3090_v53  ;;  %v5756_v27 = vld [vmem:[%s10675_s1 + $0x230] sm:$0xff]  ;;  %v5754_v6 = vld [vmem:[%s10675_s1 + $0x220] sm:$0xff] }
 0xaae   :  { %v7034_v52 = vpop.eup %7033 }
 0xaaf   :  { %v3153_v30 = vmul.f32 %v3137_v44, %v3089_v33  ;;  %v3136_v40 = vmul.f32 %v7034_v52, %v9160_v11  ;;  %v5769_v11 = vld [vmem:[%s10675_s1 + $0x298] sm:$0xff]  ;;  %v9295_v36 = vadd.f32 %v5768_v51, %v3154_v7  ;;  %v3094_v33 = vadd.f32 1.0, %v5756_v27 }
 0xab0   :  { %v3093_v44 = vadd.f32 1.0, %v5755_v48 }
 0xab1   :  { %v3152_v34 = vmul.f32 %v3136_v40, %v3088_v14  ;;  %10938 = vst [vmem:[#allocation65_spill] sm:$0xff] %v9295_v36  ;;  %v9306_v4 = vadd.f32 %v5767_v0, %v3153_v30  ;;  %v9308_v14 = vadd.f32 %v5769_v11, %v3155_v42  ;;  %v5771_v42 = vld [vmem:[%s10675_s1 + $0x2a8] sm:$0xff]  ;;  %v5772_v0 = vld [vmem:[%s10675_s1 + $0x2b0] sm:$0xff] }
 0xab2   :  { %v7036_v53 = vpop.eup %7035 }
 0xab3   :  { %v7038_v15 = vpop.eup %7037  ;;  %v3143_v5 = vmul.f32 %v7036_v53, %v9187_v22  ;;  %v9304_v16 = vadd.f32 %v5766_v2, %v3152_v34  ;;  %10940 = vst [vmem:[#allocation62_spill] sm:$0xff] %v9306_v4  ;;  %10941 = vst [vmem:[#allocation37_spill] sm:$0xff] %v9308_v14  ;;  %v3092_v22 = vadd.f32 1.0, %v5754_v6  ;;  %v9317_v40 = vpack.c.bf16 %v9308_v14, %v9295_v36 }
 0xab4   :  { %v3142_v7 = vmul.f32 %v7038_v15, %v9184_v24 }
 0xab5   :  { %10939 = vst [vmem:[#allocation64_spill] sm:$0xff] %v9304_v16  ;;  %v9313_v52 = vpack.c.bf16 %v9306_v4, %v9304_v16  ;;  %v3159_v27 = vmul.f32 %v3143_v5, %v3095_v1 }
 0xab6   :  { %v7040_v51 = vpop.eup %7039  ;;  %v3158_v2 = vmul.f32 %v3142_v7, %v3094_v33 }
 0xab7   :  { %v7042_v37 = vpop.eup %7041  ;;  %v3141_v30 = vmul.f32 %v7040_v51, %v9181_v43  ;;  %6461 = vmatprep.mubr.msk.bf16.mxu0 %vm339_vm1, %v9313_v52  ;;  %6481 = vmatprep.mubr.msk.bf16.mxu1 %vm339_vm1, %v9313_v52  ;;  %v5773_v43 = vld [vmem:[%s10675_s1 + $0x2b8] sm:$0xff] }
 0xab8   :  { %v3140_v24 = vmul.f32 %v7042_v37, %v9178_v46  ;;  %6462 = vmatmul.mubr.msk.bf16.vlgmr.msra.gmra.mrb[80].mxu0 %vm339_vm1, %v9317_v40  ;;  %v5770_v46 = vld [vmem:[%s10675_s1 + $0x2a0] sm:$0xff]  ;;  %v9341_v1 = vadd.f32 %v5772_v0, %v3158_v2  ;;  %v9343_v48 = vadd.f32 %v5773_v43, %v3159_v27 }
 0xab9   :  { %v3157_v11 = vmul.f32 %v3141_v30, %v3093_v44 }
 0xaba   :  { %v3156_v34 = vmul.f32 %v3140_v24, %v3092_v22  ;;  %10943 = vst [vmem:[#allocation34_spill] sm:$0xff] %v9341_v1  ;;  %10944 = vst [vmem:[#allocation36_spill] sm:$0xff] %v9343_v48  ;;  %v9353_v33 = vpack.c.bf16 %v9343_v48, %v9341_v1 }
 0xabb   :  { %v9339_v53 = vadd.f32 %v5771_v42, %v3157_v11 }
 0xabc   :  { %v9345_v15 = vadd.f32 %v5770_v46, %v3156_v34  ;;  %v5761_v34 = vld [vmem:[%s10675_s1 + $0x258] sm:$0xff] }
 0xabd   :  { %10942 = vst [vmem:[#allocation35_spill] sm:$0xff] %v9339_v53 }
 0xabe   :  { %10945 = vst [vmem:[#allocation41_spill] sm:$0xff] %v9345_v15  ;;  %v9349_v5 = vpack.c.bf16 %v9339_v53, %v9345_v15 }
 0xac0   :  { %6465 = vmatprep.mubr.msk.bf16.mxu0 %vm339_vm1, %v9349_v5 }
 0xac1   :  { %6466 = vmatmul.mubr.msk.bf16.gmra.mrb[84].mxu0 %vm339_vm1, %v9353_v33 }
 0xace   :  { %v3056_v6 = vpop.xlane.xlu1 %3055 }
 0xacf   :  { %v3082_v7 = vmul.f32 0.03125, %v3056_v6 }
 0xad1   :  { %v3114_v37 = vadd.f32 1e-05, %v3082_v7  ;;  %v5758_v7 = vld [vmem:[%s10675_s1 + $0x240] sm:$0xff] }
 0xad2   :  { %v3050_v44 = vpop.xlane.xlu1 %3049 }
 0xad3   :  { %v3080_v51 = vmul.f32 0.03125, %v3050_v44 }
 0xad5   :  { %v3112_v22 = vadd.f32 1e-05, %v3080_v51  ;;  %v5760_v51 = vld [vmem:[%s10675_s1 + $0x250] sm:$0xff] }
 0xad6   :  { %v3059_v27 = vpop.xlane.xlu1 %3058 }
 0xad7   :  { %v3083_v2 = vmul.f32 0.03125, %v3059_v27  ;;  %7043 = vrsqrt.f32 %v3112_v22  ;;  %v3099_v27 = vadd.f32 1.0, %v5761_v34 }
 0xad8   :  { %7045 = vrsqrt.f32 %v3114_v37 }
 0xad9   :  { %v3115_v30 = vadd.f32 1e-05, %v3083_v2  ;;  %v5759_v2 = vld [vmem:[%s10675_s1 + $0x248] sm:$0xff] }
 0xada   :  { %v3053_v24 = vpop.xlane.xlu1 %3052  ;;  %v3097_v21 = vadd.f32 1.0, %v5759_v2 }
 0xadb   :  { %7047 = vrsqrt.f32 %v3115_v30  ;;  %v3081_v42 = vmul.f32 0.03125, %v3053_v24  ;;  %v3096_v30 = vadd.f32 1.0, %v5758_v7 }
 0xadc   :  { %v3062_v0 = vpop.xlane.xlu0 %3061 }
 0xadd   :  { %v3113_v43 = vadd.f32 1e-05, %v3081_v42 }
 0xade   :  { %v3328_v11 = vpop.permute.xlu1 %3327 }
 0xadf   :  { %7049 = vrsqrt.f32 %v3113_v43  ;;  %6479 = vmatprep.subr.bf16.mxu1 %v3328_v11  ;;  %v3098_v43 = vadd.f32 1.0, %v5760_v51 }
 0xae0   :  { %6480 = vmatpush3.bf16.msra.mxu1 %v3328_v11  ;;  %v3068_v46 = vpop.xlane.xlu0 %3067 }
 0xae1   :  { %v7044_v6 = vpop.eup %7043 }
 0xae2   :  { %v7046_v44 = vpop.eup %7045  ;;  %v3144_v24 = vmul.f32 %v7044_v6, %v9204_v60  ;;  %v5774_v60 = vld [vmem:[%s10675_s1 + $0x2c0] sm:$0xff] }
 0xae3   :  { %6482 = vmatmul.mubr.msk.bf16.vlgmr.msra.gmra.mrb[96].mxu1 %vm339_vm1, %v9317_v40  ;;  %v3146_v11 = vmul.f32 %v7046_v44, %v9207_v13  ;;  %v5775_v13 = vld [vmem:[%s10675_s1 + $0x2c8] sm:$0xff] }
 0xae4   :  { %6485 = vmatprep.mubr.msk.bf16.mxu1 %vm339_vm1, %v9349_v5  ;;  %v3071_v22 = vpop.xlane.xlu0 %3070  ;;  %v3160_v50 = vmul.f32 %v3144_v24, %v3096_v30 }
 0xae5   :  { %v7048_v37 = vpop.eup %7047  ;;  %v3162_v7 = vmul.f32 %v3146_v11, %v3098_v43  ;;  %v6731_v11 = vld [vmem:[%s10674_s6 + $0x4c] ss:$16 sps:$4 sm:$0xff]  }
 0xae6   :  { %v3147_v42 = vmul.f32 %v7048_v37, %v9212_v9 }
 0xae8   :  { %v3429_v12 = vpop.permute.xlu0 %3428  ;;  %v3163_v32 = vmul.f32 %v3147_v42, %v3099_v27 }
 0xae9   :  { %v7050_v19 = vpop.eup %7049  ;;  %6497 = vmatprep.subr.bf16.mxu0 %v3429_v12 }
 0xaea   :  { %v3145_v34 = vmul.f32 %v7050_v19, %v9218_v47  ;;  %6498 = vmatpush3.bf16.msra.mxu0 %v3429_v12  ;;  %v5776_v19 = vld [vmem:[%s10675_s1 + $0x2d0] sm:$0xff]  ;;  %v9393_v6 = vadd.f32 %v5777_v26, %v3163_v32  ;;  %v9395_v12 = vadd.f32 %v5774_v60, %v3160_v50  ;;  %v3087_v26 = vmul.f32 0.03125, %v3071_v22  ;;  %v5762_v60 = vld [vmem:[%s10675_s1 + $0x260] sm:$0xff] }
 0xaeb   :  { %6486 = vmatmul.mubr.msk.bf16.gmra.mrb[100].mxu1 %vm339_vm1, %v9353_v33  ;;  %v9399_v51 = vadd.f32 %v5776_v19, %v3162_v7  ;;  %v3084_v50 = vmul.f32 0.03125, %v3062_v0  ;;  %v3086_v32 = vmul.f32 0.03125, %v3068_v46  ;;  %v5765_v46 = vld [vmem:[%s10675_s1 + $0x278] sm:$0xff] }
 0xaec   :  { %v3161_v9 = vmul.f32 %v3145_v34, %v3097_v21  ;;  %v3532_v47 = vpop.permute.xlu0 %3531  ;;  %10946 = vst [vmem:[#allocation39_spill] sm:$0xff] %v9393_v6  ;;  %10947 = vst [vmem:[#allocation38_spill] sm:$0xff] %v9395_v12  ;;  %v3119_v27 = vadd.f32 1e-05, %v3087_v26  ;;  %v3103_v19 = vadd.f32 1.0, %v5765_v46  ;;  %v5763_v26 = vld [vmem:[%s10675_s1 + $0x268] sm:$0xff] }
 0xaed   :  { %6517 = vmatprep.subr.bf16.mxu1 %v3532_v47  ;;  %10949 = vst [vmem:[#allocation45_spill] sm:$0xff] %v9399_v51  ;;  %v9407_v21 = vpack.c.bf16 %v9393_v6, %v9399_v51  ;;  %v3116_v2 = vadd.f32 1e-05, %v3084_v50  ;;  %v3118_v30 = vadd.f32 1e-05, %v3086_v32  ;;  %v3100_v50 = vadd.f32 1.0, %v5762_v60 }
 0xaee   :  { %v9397_v44 = vadd.f32 %v5775_v13, %v3161_v9  ;;  %6518 = vmatpush3.bf16.msra.mxu1 %v3532_v47  ;;  %7051 = vrsqrt.f32 %v3119_v27  ;;  %v5764_v9 = vld [vmem:[%s10675_s1 + $0x270] sm:$0xff]  ;;  %v5778_v46 = vld [vmem:[%s10675_s1 + $0x2e0] sm:$0xff] }
 0xaef   :  { %7053 = vrsqrt.f32 %v3116_v2  ;;  %v3102_v27 = vadd.f32 1.0, %v5764_v9 }
 0xaf0   :  { %10948 = vst [vmem:[#allocation40_spill] sm:$0xff] %v9397_v44  ;;  %v9403_v37 = vpack.c.bf16 %v9397_v44, %v9395_v12  ;;  %7055 = vrsqrt.f32 %v3118_v30  ;;  %v3101_v30 = vadd.f32 1.0, %v5763_v26 }
 0xaf2   :  { %6469 = vmatprep.mubr.msk.bf16.mxu0 %vm339_vm1, %v9403_v37  ;;  %6489 = vmatprep.mubr.msk.bf16.mxu1 %vm339_vm1, %v9403_v37 }
 0xaf3   :  { %6470 = vmatmul.mubr.msk.bf16.gmra.mrb[88].mxu0 %vm339_vm1, %v9407_v21  ;;  %6490 = vmatmul.mubr.msk.bf16.gmra.mrb[104].mxu1 %vm339_vm1, %v9407_v21 }
 0xaf8   :  { %v7052_v0 = vpop.eup %7051 }
 0xaf9   :  { %v7054_v7 = vpop.eup %7053  ;;  %v3151_v47 = vmul.f32 %v7052_v0, %v9236_v23  ;;  %v5781_v23 = vld [vmem:[%s10675_s1 + $0x2f8] sm:$0xff] }
 0xafa   :  { %v7056_v13 = vpop.eup %7055  ;;  %v3148_v32 = vmul.f32 %v7054_v7, %v9224_v31  ;;  %v5779_v31 = vld [vmem:[%s10675_s1 + $0x2e8] sm:$0xff] }
 0xafb   :  { %v3150_v2 = vmul.f32 %v7056_v13, %v9230_v20 }
 0xafd   :  { %v3166_v0 = vmul.f32 %v3150_v2, %v3102_v27 }
 0xb0f   :  { %v3065_v24 = vpop.xlane.xlu1 %3064 }
 0xb10   :  { %v3085_v42 = vmul.f32 0.03125, %v3065_v24 }
 0xb12   :  { %v3117_v43 = vadd.f32 1e-05, %v3085_v42  ;;  %v3167_v42 = vmul.f32 %v3151_v47, %v3103_v19  ;;  %v6732_v47 = vld [vmem:[%s10674_s6 + $0x6c] ss:$16 sps:$4 sm:$0xff]  }
 0xb13   :  { %v3431_v34 = vpop.permute.xlu1 %3430 }
 0xb14   :  { %7057 = vrsqrt.f32 %v3117_v43  ;;  %6499 = vmatprep.subr.bf16.mxu0 %v3431_v34  ;;  %v3164_v43 = vmul.f32 %v3148_v32, %v3100_v50  ;;  %v9448_v7 = vadd.f32 %v5781_v23, %v3167_v42 }
 0xb15   :  { %6500 = vmatpush3.bf16.msra.mxu0 %v3431_v34 }
 0xb16   :  { %6537 = vmatprep.subr.bf16.mxu0 %v6731_v11  ;;  %10950 = vst [vmem:[#allocation43_spill] sm:$0xff] %v9448_v7 }
 0xb17   :  { %v3534_v22 = vpop.permute.xlu1 %3533 }
 0xb18   :  { %6519 = vmatprep.subr.bf16.mxu1 %v3534_v22 }
 0xb19   :  { %6520 = vmatpush3.bf16.msra.mxu1 %v3534_v22  ;;  %v5780_v22 = vld [vmem:[%s10675_s1 + $0x2f0] sm:$0xff] }
 0xb1a   :  { %v9454_v13 = vadd.f32 %v5780_v22, %v3166_v0 }
 0xb1c   :  { %10953 = vst [vmem:[#allocation49_spill] sm:$0xff] %v9454_v13  ;;  %v3191_v19 = vpack.c.bf16 %v9448_v7, %v9454_v13  ;;  %v9681_v7 = vld [vmem:[%s10673_s2 + $0x208] sm:$0xff] }
 0xb1e   :  { %v7058_v24 = vpop.eup %7057 }
 0xb1f   :  { %v3149_v34 = vmul.f32 %v7058_v24, %v9252_v10  ;;  %v9450_v10 = vadd.f32 %v5778_v46, %v3164_v43 }
 0xb21   :  { %v3165_v20 = vmul.f32 %v3149_v34, %v3101_v30  ;;  %10951 = vst [vmem:[#allocation42_spill] sm:$0xff] %v9450_v10 }
 0xb23   :  { %v9452_v60 = vadd.f32 %v5779_v31, %v3165_v20 }
 0xb25   :  { %10952 = vst [vmem:[#allocation44_spill] sm:$0xff] %v9452_v60  ;;  %v3190_v9 = vpack.c.bf16 %v9452_v60, %v9450_v10 }
 0xb27   :  { %6473 = vmatprep.mubr.msk.bf16.mxu0 %vm339_vm1, %v3190_v9  ;;  %6493 = vmatprep.mubr.msk.bf16.mxu1 %vm339_vm1, %v3190_v9 }
 0xb28   :  { %6474 = vmatmul.mubr.msk.bf16.gmra.mrb[92].mxu0 %vm339_vm1, %v3191_v19  ;;  %6494 = vmatmul.mubr.msk.bf16.gmra.mrb[108].mxu1 %vm339_vm1, %v3191_v19 }
 0xb29   :  { %6501 = vmatprep.mubr.msk.bf16.mxu0 %vm339_vm1, %v9313_v52  ;;  %6521 = vmatprep.mubr.msk.bf16.mxu1 %vm339_vm1, %v9313_v52 }
 0xb30   :  { %6502 = vmatmul.mubr.msk.bf16.vlgmr.msra.gmra.mrb[96].mxu0 %vm339_vm1, %v9317_v40  ;;  %6522 = vmatmul.mubr.msk.bf16.vlgmr.msra.gmra.mrb[112].mxu1 %vm339_vm1, %v9317_v40 }
 0xb31   :  { %6505 = vmatprep.mubr.msk.bf16.mxu0 %vm339_vm1, %v9349_v5  ;;  %6525 = vmatprep.mubr.msk.bf16.mxu1 %vm339_vm1, %v9349_v5 }
 0xb32   :  { %6538 = vmatpush3.bf16.msra.mxu0 %v6731_v11 }
 0xb33   :  { %6539 = vmatprep.subr.bf16.mxu0 %v6732_v47 }
 0xb36   :  { %6540 = vmatpush3.bf16.msra.mxu0 %v6732_v47 }
 0xb38   :  { %6506 = vmatmul.mubr.msk.bf16.gmra.mrb[100].mxu0 %vm339_vm1, %v9353_v33  ;;  %6526 = vmatmul.mubr.msk.bf16.gmra.mrb[116].mxu1 %vm339_vm1, %v9353_v33 }
 0xb39   :  { %6509 = vmatprep.mubr.msk.bf16.mxu0 %vm339_vm1, %v9403_v37  ;;  %6529 = vmatprep.mubr.msk.bf16.mxu1 %vm339_vm1, %v9403_v37 }
 0xb40   :  { %6510 = vmatmul.mubr.msk.bf16.gmra.mrb[104].mxu0 %vm339_vm1, %v9407_v21  ;;  %6530 = vmatmul.mubr.msk.bf16.gmra.mrb[120].mxu1 %vm339_vm1, %v9407_v21 }
 0xb41   :  { %6513 = vmatprep.mubr.msk.bf16.mxu0 %vm339_vm1, %v3190_v9  ;;  %6533 = vmatprep.mubr.msk.bf16.mxu1 %vm339_vm1, %v3190_v9 }
 0xb48   :  { %6514 = vmatmul.mubr.msk.bf16.gmra.mrb[108].mxu0 %vm339_vm1, %v3191_v19  ;;  %6534 = vmatmul.mubr.msk.bf16.gmra.mrb[124].mxu1 %vm339_vm1, %v3191_v19 }
 0xb49   :  { %6541 = vmatprep.mubr.msk.bf16.mxu0 %vm339_vm1, %v9313_v52 }
 0xb50   :  { %6542 = vmatmul.mubr.msk.bf16.vlgmr.msra.gmra.mrb[112].mxu0 %vm339_vm1, %v9317_v40 }
 0xb51   :  { %6545 = vmatprep.mubr.msk.bf16.mxu0 %vm339_vm1, %v9349_v5 }
 0xb58   :  { %6546 = vmatmul.mubr.msk.bf16.gmra.mrb[116].mxu0 %vm339_vm1, %v9353_v33 }
 0xb59   :  { %6549 = vmatprep.mubr.msk.bf16.mxu0 %vm339_vm1, %v9403_v37 }
 0xb60   :  { %6550 = vmatmul.mubr.msk.bf16.gmra.mrb[120].mxu0 %vm339_vm1, %v9407_v21 }
 0xb61   :  { %6553 = vmatprep.mubr.msk.bf16.mxu0 %vm339_vm1, %v3190_v9 }
 0xb68   :  { %6554 = vmatmul.mubr.msk.bf16.gmra.mrb[124].mxu0 %vm339_vm1, %v3191_v19 }
 0xb8b   :  { %v9509_v52 = vpop.f32.mrb[80].mxu0 }
 0xb8c   :  { %v9511_v11 = vpop.f32.mrb[81].mxu0 }
 0xb8d   :  { %v9513_v40 = vpop.f32.mrb[82].mxu0 }
 0xb8e   :  { %v9515_v5 = vpop.f32.mrb[83].mxu0 }
 0xb94   :  { %v9517_v26 = vpop.f32.mrb[84].mxu0 }
 0xb95   :  { %v9519_v33 = vpop.f32.mrb[85].mxu0 }
 0xb96   :  { %v9521_v37 = vpop.f32.mrb[86].mxu0 }
 0xb97   :  { %v9523_v50 = vpop.f32.mrb[87].mxu0  ;;  %v3750_v58 = vmul.f32 %v9521_v37, %v9521_v37 }
 0xbb6   :  { %v9525_v21 = vpop.f32.mrb[96].mxu1 }
 0xbb7   :  { %v9527_v32 = vpop.f32.mrb[97].mxu1  ;;  %v3857_v24 = vmul.f32 %v9525_v21, %v9525_v21 }
 0xbb8   :  { %v3855_v27 = vmul.f32 %v9527_v32, %v9527_v32  ;;  %v9531_v2 = vpop.f32.mrb[98].mxu1 }
 0xbb9   :  { %v9533_v30 = vpop.f32.mrb[99].mxu1  ;;  %v3858_v23 = vmul.f32 %v9531_v2, %v9531_v2  ;;  %v3877_v46 = vsel %vm339_vm1, %v3857_v24, 0.0 }
 0xbba   :  { %v3856_v42 = vmul.f32 %v9533_v30, %v9533_v30  ;;  %v3871_v43 = vsel %vm339_vm1, %v3855_v27, 0.0 }
 0xbbb   :  { %3872 = vadd.xlane.f32.xlu0 %v3871_v43  ;;  %v3880_v47 = vsel %vm339_vm1, %v3858_v23, 0.0 }
 0xbbc   :  { %v3874_v34 = vsel %vm339_vm1, %v3856_v42, 0.0 }
 0xbbd   :  { %3875 = vadd.xlane.f32.xlu1 %v3874_v34 }
 0xbbe   :  { %v9543_v0 = vpop.f32.mrb[100].mxu1 }
 0xbbf   :  { %3878 = vadd.xlane.f32.xlu0 %v3877_v46  ;;  %v9546_v31 = vpop.f32.mrb[101].mxu1  ;;  %v3861_v42 = vmul.f32 %v9543_v0, %v9543_v0 }
 0xbc0   :  { %v9548_v20 = vpop.f32.mrb[102].mxu1  ;;  %v3859_v9 = vmul.f32 %v9546_v31, %v9546_v31 }
 0xbc1   :  { %v9550_v22 = vpop.f32.mrb[103].mxu1  ;;  %v3862_v27 = vmul.f32 %v9548_v20, %v9548_v20 }
 0xbc2   :  { %v3860_v19 = vmul.f32 %v9550_v22, %v9550_v22  ;;  %v3883_v46 = vsel %vm339_vm1, %v3859_v9, 0.0  ;;  %v3743_v9 = vmul.f32 %v9511_v11, %v9511_v11 }
 0xbc3   :  { %3881 = vadd.xlane.f32.xlu0 %v3880_v47  ;;  %v3744_v47 = vmul.f32 %v9515_v5, %v9515_v5 }
 0xbc4   :  { %v3886_v24 = vsel %vm339_vm1, %v3860_v19, 0.0  ;;  %v3759_v56 = vsel %vm339_vm1, %v3743_v9, 0.0 }
 0xbc5   :  { %3887 = vadd.xlane.f32.xlu1 %v3886_v24  ;;  %v3892_v24 = vsel %vm339_vm1, %v3862_v27, 0.0  ;;  %v3762_v39 = vsel %vm339_vm1, %v3744_v47, 0.0 }
 0xbc6   :  { %v9562_v43 = vpop.f32.mrb[88].mxu0  ;;  %v9564_v34 = vpop.f32.mrb[104].mxu1 }
 0xbc7   :  { %v9567_v17 = vpop.f32.mrb[89].mxu0  ;;  %3884 = vadd.xlane.f32.xlu0 %v3883_v46  ;;  %v9569_v23 = vpop.f32.mrb[105].mxu1  ;;  %v3889_v46 = vsel %vm339_vm1, %v3861_v42, 0.0  ;;  %v3745_v42 = vmul.f32 %v9509_v52, %v9509_v52 }
 0xbc8   :  { %v9573_v63 = vpop.f32.mrb[90].mxu0  ;;  %v9575_v19 = vpop.f32.mrb[106].mxu1  ;;  %v3863_v27 = vmul.f32 %v9569_v23, %v9569_v23 }
 0xbc9   :  { %v9578_v49 = vpop.f32.mrb[91].mxu0  ;;  %3893 = vadd.xlane.f32.xlu1 %v3892_v24  ;;  %v9580_v25 = vpop.f32.mrb[107].mxu1  ;;  %v3746_v24 = vmul.f32 %v9513_v40, %v9513_v40  ;;  %v3765_v9 = vsel %vm339_vm1, %v3745_v42, 0.0 }
 0xbca   :  { %v3864_v8 = vmul.f32 %v9580_v25, %v9580_v25 }
 0xbcb   :  { %3890 = vadd.xlane.f32.xlu0 %v3889_v46  ;;  %v3895_v46 = vsel %vm339_vm1, %v3863_v27, 0.0  ;;  %v3768_v47 = vsel %vm339_vm1, %v3746_v24, 0.0  ;;  %v3747_v27 = vmul.f32 %v9519_v33, %v9519_v33 }
 0xbcc   :  { %v3898_v54 = vsel %vm339_vm1, %v3864_v8, 0.0 }
 0xbcd   :  { %3763 = vadd.xlane.f32.xlu1 %v3762_v39  ;;  %v3866_v39 = vmul.f32 %v9575_v19, %v9575_v19 }
 0xbcf   :  { %3760 = vadd.xlane.f32.xlu0 %v3759_v56  ;;  %v3865_v56 = vmul.f32 %v9564_v34, %v9564_v34  ;;  %v3904_v8 = vsel %vm339_vm1, %v3866_v39, 0.0 }
 0xbd1   :  { %3899 = vadd.xlane.f32.xlu1 %v3898_v54  ;;  %v3748_v54 = vmul.f32 %v9523_v50, %v9523_v50 }
 0xbd3   :  { %3896 = vadd.xlane.f32.xlu0 %v3895_v46  ;;  %v3901_v46 = vsel %vm339_vm1, %v3865_v56, 0.0  ;;  %v3774_v24 = vsel %vm339_vm1, %v3748_v54, 0.0 }
 0xbd5   :  { %3769 = vadd.xlane.f32.xlu1 %v3768_v47  ;;  %v3771_v47 = vsel %vm339_vm1, %v3747_v27, 0.0 }
 0xbd7   :  { %3766 = vadd.xlane.f32.xlu0 %v3765_v9 }
 0xbd9   :  { %3905 = vadd.xlane.f32.xlu1 %v3904_v8 }
 0xbdb   :  { %3902 = vadd.xlane.f32.xlu0 %v3901_v46 }
 0xbdd   :  { %3775 = vadd.xlane.f32.xlu1 %v3774_v24  ;;  %v3749_v24 = vmul.f32 %v9517_v26, %v9517_v26 }
 0xbdf   :  { %3772 = vadd.xlane.f32.xlu0 %v3771_v47  ;;  %v3777_v62 = vsel %vm339_vm1, %v3749_v24, 0.0  ;;  %v3780_v24 = vsel %vm339_vm1, %v3750_v58, 0.0  ;;  %v9702_v58 = vld [vmem:[%s10673_s2 + $0x1b0] sm:$0xff] }
 0xbfb   :  { %v9611_v42 = vpop.f32.mrb[92].mxu0  ;;  %v9613_v9 = vpop.f32.mrb[108].mxu1 }
 0xbfc   :  { %10954 = vst [vmem:[#allocation47_spill] sm:$0xff] %v9613_v9  ;;  %v9615_v45 = vpop.f32.mrb[93].mxu0  ;;  %v9617_v39 = vpop.f32.mrb[109].mxu1  ;;  %v3869_v41 = vmul.f32 %v9613_v9, %v9613_v9 }
 0xbfd   :  { %10955 = vst [vmem:[#allocation46_spill] sm:$0xff] %v9617_v39  ;;  %v3867_v8 = vmul.f32 %v9617_v39, %v9617_v39  ;;  %v9621_v35 = vpop.f32.mrb[94].mxu0  ;;  %v9623_v56 = vpop.f32.mrb[110].mxu1 }
 0xbfe   :  { %10956 = vst [vmem:[#allocation48_spill] sm:$0xff] %v9623_v56  ;;  %v9625_v54 = vpop.f32.mrb[95].mxu0  ;;  %v9627_v46 = vpop.f32.mrb[111].mxu1  ;;  %v3870_v10 = vmul.f32 %v9623_v56, %v9623_v56 }
 0xbff   :  { %10957 = vst [vmem:[#allocation5_spill] sm:$0xff] %v9627_v46  ;;  %v3868_v27 = vmul.f32 %v9627_v46, %v9627_v46  ;;  %v3907_v47 = vsel %vm339_vm1, %v3867_v8, 0.0  ;;  %v9650_v8 = vld [vmem:[%s10673_s2 + $0x180] sm:$0xff] }
 0xc00   :  { %3908 = vadd.xlane.f32.xlu0 %v3907_v47 }
 0xc01   :  { %v3910_v38 = vsel %vm339_vm1, %v3868_v27, 0.0  ;;  %v9660_v27 = vld [vmem:[%s10673_s2 + $0x198] sm:$0xff] }
 0xc02   :  { %3911 = vadd.xlane.f32.xlu1 %v3910_v38  ;;  %v3969_v38 = vmul.f32 %v9509_v52, %v9637_v18  ;;  %v3967_v52 = vmul.f32 %v9650_v8, %v9511_v11  ;;  %v3970_v6 = vmul.f32 %v9513_v40, %v9660_v27  ;;  %v3913_v40 = vsel %vm339_vm1, %v3869_v41, 0.0  ;;  %v9727_v41 = vld [vmem:[%s10673_s2 + $0x1b8] sm:$0xff] }
 0xc03   :  { %v6503_v47 = vpop.f32.mrb[96].mxu0  ;;  %v6523_v55 = vpop.f32.mrb[112].mxu1 }
 0xc04   :  { %v3985_v29 = vmul.f32 %v6523_v55, %v9645_v3  ;;  %v3468_v59 = vpop.f32.mrb[97].mxu0  ;;  %v3571_v60 = vpop.f32.mrb[113].mxu1  ;;  %3778 = vadd.xlane.f32.xlu0 %v3777_v62  ;;  %v3968_v62 = vmul.f32 %v9672_v57, %v9515_v5  ;;  %v3916_v5 = vsel %vm339_vm1, %v3870_v10, 0.0 }
 0xc05   :  { %v3983_v13 = vmul.f32 %v9655_v61, %v3571_v60  ;;  %v6504_v44 = vpop.f32.mrb[98].mxu0  ;;  %v6524_v55 = vpop.f32.mrb[114].mxu1 }
 0xc06   :  { %v9691_v12 = vadd.f32 %v3985_v29, %v3969_v38  ;;  %v4112_v51 = vpack.c.bf16 %v6504_v44, %v6503_v47  ;;  %v3986_v53 = vmul.f32 %v6524_v55, %v9665_v28  ;;  %3781 = vadd.xlane.f32.xlu1 %v3780_v24  ;;  %v3471_v11 = vpop.f32.mrb[99].mxu0  ;;  %v3574_v48 = vpop.f32.mrb[115].mxu1  ;;  %v3751_v29 = vmul.f32 %v9567_v17, %v9567_v17  ;;  %v9739_v38 = vld [vmem:[%s10673_s2 + $0x238] sm:$0xff]  ;;  %v9746_v55 = vld [vmem:[%s10673_s2 + $0x1a8] sm:$0xff] }
 0xc07   :  { %v9696_v15 = vadd.f32 %v3983_v13, %v3967_v52  ;;  %v4111_v60 = vpack.c.bf16 %v3471_v11, %v3468_v59  ;;  %v3984_v1 = vmul.f32 %v9681_v7, %v3574_v48  ;;  %v9712_v13 = vld [vmem:[%s10673_s2 + $0x1a0] sm:$0xff]  ;;  %v3752_v59 = vmul.f32 %v9578_v49, %v9578_v49 }
 0xc08   :  { %10958 = vst [vmem:[#allocation7_spill] sm:$0xff] %v9691_v12  ;;  %v9706_v44 = vadd.f32 %v3986_v53, %v3970_v6  ;;  %3914 = vadd.xlane.f32.xlu0 %v3913_v40  ;;  %v9722_v53 = vld [vmem:[%s10673_s2 + $0x230] sm:$0xff]  ;;  %v3973_v6 = vmul.f32 %v9517_v26, %v9702_v58  ;;  %v3971_v52 = vmul.f32 %v9712_v13, %v9519_v33  ;;  %v3783_v11 = vsel %vm339_vm1, %v3751_v29, 0.0  ;;  %v9755_v40 = vld [vmem:[%s10673_s2 + $0x228] sm:$0xff] }
 0xc09   :  { %10959 = vst [vmem:[#allocation8_spill] sm:$0xff] %v9696_v15  ;;  %v9716_v48 = vadd.f32 %v3984_v1, %v3968_v62  ;;  %6573 = vmatprep.subr.bf16.mxu0 %v4111_v60  ;;  %v9732_v1 = vld [vmem:[%s10673_s2 + $0x220] sm:$0xff]  ;;  %v3753_v24 = vmul.f32 %v9562_v43, %v9562_v43  ;;  %v3974_v33 = vmul.f32 %v9521_v37, %v9727_v41  ;;  %v3786_v29 = vsel %vm339_vm1, %v3752_v59, 0.0  ;;  %v9774_v59 = vld [vmem:[%s10673_s2 + $0x1d0] sm:$0xff] }
 0xc0a   :  { %10960 = vst [vmem:[#allocation9_spill] sm:$0xff] %v9706_v44  ;;  %3917 = vadd.xlane.f32.xlu1 %v3916_v5  ;;  %6574 = vmatpush3.bf16.msra.mxu0 %v4111_v60  ;;  %v3754_v5 = vmul.f32 %v9573_v63, %v9573_v63  ;;  %v3972_v37 = vmul.f32 %v9746_v55, %v9523_v50 }
 0xc0b   :  { %10961 = vst [vmem:[#allocation16_spill] sm:$0xff] %v9716_v48  ;;  %v6507_v10 = vpop.f32.mrb[100].mxu0  ;;  %v6527_v47 = vpop.f32.mrb[116].mxu1  ;;  %6575 = vmatprep.subr.bf16.mxu0 %v4112_v51  ;;  %v3756_v50 = vmul.f32 %v9625_v54, %v9625_v54 }
 0xc0c   :  { %v3989_v26 = vmul.f32 %v6527_v47, %v9722_v53  ;;  %v3484_v62 = vpop.f32.mrb[101].mxu0  ;;  %v3587_v60 = vpop.f32.mrb[117].mxu1  ;;  %3784 = vadd.xlane.f32.xlu0 %v3783_v11 }
 0xc0d   :  { %v3987_v4 = vmul.f32 %v9732_v1, %v3587_v60  ;;  %v6508_v14 = vpop.f32.mrb[102].mxu0  ;;  %v6528_v47 = vpop.f32.mrb[118].mxu1 }
 0xc0e   :  { %v9763_v16 = vadd.f32 %v3989_v26, %v3973_v6  ;;  %v4114_v36 = vpack.c.bf16 %v6508_v14, %v6507_v10  ;;  %v3990_v12 = vmul.f32 %v6528_v47, %v9739_v38  ;;  %3787 = vadd.xlane.f32.xlu1 %v3786_v29  ;;  %v3487_v44 = vpop.f32.mrb[103].mxu0  ;;  %v3590_v48 = vpop.f32.mrb[119].mxu1  ;;  %6576 = vmatpush3.bf16.msra.mxu0 %v4112_v51  ;;  %v3789_v51 = vsel %vm339_vm1, %v3753_v24, 0.0  ;;  %v9799_v10 = vld [vmem:[%s10673_s2 + $0x1d8] sm:$0xff]  ;;  %v9818_v47 = vld [vmem:[%s10673_s2 + $0x1c8] sm:$0xff] }
 0xc0f   :  { %v9768_v15 = vadd.f32 %v3987_v4, %v3971_v52  ;;  %v4113_v11 = vpack.c.bf16 %v3487_v44, %v3484_v62  ;;  %v3988_v60 = vmul.f32 %v9755_v40, %v3590_v48  ;;  %v3755_v14 = vmul.f32 %v9615_v45, %v9615_v45  ;;  %v9784_v4 = vld [vmem:[%s10673_s2 + $0x1c0] sm:$0xff] }
 0xc10   :  { %10962 = vst [vmem:[#allocation14_spill] sm:$0xff] %v9763_v16  ;;  %v9778_v6 = vadd.f32 %v3990_v12, %v3974_v33  ;;  %3790 = vadd.xlane.f32.xlu0 %v3789_v51  ;;  %v3792_v48 = vsel %vm339_vm1, %v3754_v5, 0.0  ;;  %v9794_v12 = vld [vmem:[%s10673_s2 + $0x250] sm:$0xff]  ;;  %v9804_v52 = vld [vmem:[%s10673_s2 + $0x240] sm:$0xff]  ;;  %v3977_v24 = vmul.f32 %v9562_v43, %v9774_v59  ;;  %v9811_v33 = vld [vmem:[%s10673_s2 + $0x258] sm:$0xff]  ;;  %v3975_v5 = vmul.f32 %v9784_v4, %v9567_v17 }
 0xc11   :  { %10963 = vst [vmem:[#allocation17_spill] sm:$0xff] %v9768_v15  ;;  %v9788_v44 = vadd.f32 %v3988_v60, %v3972_v37  ;;  %6577 = vmatprep.subr.bf16.mxu0 %v4113_v11  ;;  %v3757_v29 = vmul.f32 %v9611_v42, %v9611_v42  ;;  %v3795_v37 = vsel %vm339_vm1, %v3755_v14, 0.0  ;;  %v9827_v51 = vld [vmem:[%s10673_s2 + $0x248] sm:$0xff]  ;;  %v3978_v17 = vmul.f32 %v9573_v63, %v9799_v10 }
 0xc12   :  { %10964 = vst [vmem:[#allocation15_spill] sm:$0xff] %v9778_v6  ;;  %3793 = vadd.xlane.f32.xlu1 %v3792_v48  ;;  %6578 = vmatpush3.bf16.msra.mxu0 %v4113_v11  ;;  %v3758_v48 = vmul.f32 %v9621_v35, %v9621_v35  ;;  %v3798_v14 = vsel %vm339_vm1, %v3756_v50, 0.0  ;;  %v3976_v63 = vmul.f32 %v9818_v47, %v9578_v49 }
 0xc13   :  { %10965 = vst [vmem:[#allocation24_spill] sm:$0xff] %v9788_v44  ;;  %v6511_v26 = vpop.f32.mrb[104].mxu0  ;;  %v6531_v62 = vpop.f32.mrb[120].mxu1  ;;  %6579 = vmatprep.subr.bf16.mxu0 %v4114_v36 }
 0xc14   :  { %v3993_v43 = vmul.f32 %v6531_v62, %v9794_v12  ;;  %v3500_v11 = vpop.f32.mrb[105].mxu0  ;;  %v3603_v60 = vpop.f32.mrb[121].mxu1  ;;  %3796 = vadd.xlane.f32.xlu0 %v3795_v37  ;;  %v3804_v49 = vsel %vm339_vm1, %v3758_v48, 0.0 }
 0xc15   :  { %v3991_v6 = vmul.f32 %v9804_v52, %v3603_v60  ;;  %v6512_v16 = vpop.f32.mrb[106].mxu0  ;;  %v6532_v62 = vpop.f32.mrb[122].mxu1 }
 0xc16   :  { %v9835_v44 = vadd.f32 %v3993_v43, %v3977_v24  ;;  %v9837_v15 = vpack.c.bf16 %v6512_v16, %v6511_v26  ;;  %v3994_v46 = vmul.f32 %v6532_v62, %v9811_v33  ;;  %3799 = vadd.xlane.f32.xlu1 %v3798_v14  ;;  %v3503_v56 = vpop.f32.mrb[107].mxu0  ;;  %v3606_v39 = vpop.f32.mrb[123].mxu1  ;;  %6580 = vmatpush3.bf16.msra.mxu0 %v4114_v36  ;;  %v3801_v16 = vsel %vm339_vm1, %v3757_v29, 0.0  ;;  %v9853_v24 = vld [vmem:[%s10673_s2 + $0x1f0] sm:$0xff]  ;;  %v9889_v43 = vld [vmem:[%s10673_s2 + $0x1e8] sm:$0xff] }
 0xc17   :  { %v9842_v37 = vadd.f32 %v3991_v6, %v3975_v5  ;;  %v9844_v60 = vpack.c.bf16 %v3503_v56, %v3500_v11  ;;  %v3992_v9 = vmul.f32 %v9827_v51, %v3606_v39  ;;  %v9862_v36 = vld [vmem:[%s10673_s2 + $0x270] sm:$0xff]  ;;  %v9867_v39 = vld [vmem:[%s10673_s2 + $0x1e0] sm:$0xff]  ;;  %v9877_v56 = vld [vmem:[%s10673_s2 + $0x1f8] sm:$0xff]  ;;  %v3981_v29 = vmul.f32 %v9611_v42, %v9853_v24 }
 0xc18   :  { %10966 = vst [vmem:[#allocation22_spill] sm:$0xff] %v9835_v44  ;;  %10967 = vst [vmem:[#allocation23_spill] sm:$0xff] %v9837_v15  ;;  %v9847_v50 = vadd.f32 %v3994_v46, %v3978_v17  ;;  %3802 = vadd.xlane.f32.xlu0 %v3801_v16  ;;  %v9882_v5 = vld [vmem:[%s10673_s2 + $0x278] sm:$0xff]  ;;  %v9895_v62 = vld [vmem:[%s10673_s2 + $0x268] sm:$0xff]  ;;  %v3979_v14 = vmul.f32 %v9867_v39, %v9615_v45 }
 0xc19   :  { %10968 = vst [vmem:[#allocation25_spill] sm:$0xff] %v9842_v37  ;;  %10969 = vst [vmem:[#allocation31_spill] sm:$0xff] %v9844_v60  ;;  %v9855_v26 = vadd.f32 %v3992_v9, %v3976_v63  ;;  %6605 = vmatprep.subr.bf16.mxu0 %v9844_v60  ;;  %v9872_v9 = vld [vmem:[%s10673_s2 + $0x260] sm:$0xff] }
 0xc1a   :  { %10970 = vst [vmem:[#allocation30_spill] sm:$0xff] %v9847_v50  ;;  %3805 = vadd.xlane.f32.xlu1 %v3804_v49  ;;  %10972 = vst [vmem:[#allocation33_spill] sm:$0xff] %v9872_v9  ;;  %v3982_v49 = vmul.f32 %v9621_v35, %v9877_v56 }
 0xc1b   :  { %10971 = vst [vmem:[#allocation32_spill] sm:$0xff] %v9855_v26  ;;  %v6515_v46 = vpop.f32.mrb[108].mxu0  ;;  %v6535_v6 = vpop.f32.mrb[124].mxu1  ;;  %v3980_v26 = vmul.f32 %v9889_v43, %v9625_v54  ;;  %v4031_v54 = vmul.f32 %v9650_v8, %v9527_v32 }
 0xc1c   :  { %v3997_v11 = vmul.f32 %v6535_v6, %v9862_v36  ;;  %v3516_v17 = vpop.f32.mrb[109].mxu0  ;;  %v3619_v48 = vpop.f32.mrb[125].mxu1 }
 0xc1d   :  { %v3995_v63 = vmul.f32 %v9872_v9, %v3619_v48  ;;  %v6516_v42 = vpop.f32.mrb[110].mxu0  ;;  %v6536_v16 = vpop.f32.mrb[126].mxu1 }
 0xc1e   :  { %v9902_v15 = vadd.f32 %v3997_v11, %v3981_v29  ;;  %v9904_v6 = vpack.c.bf16 %v6516_v42, %v6515_v46  ;;  %v3998_v60 = vmul.f32 %v6536_v16, %v9882_v5  ;;  %v3519_v50 = vpop.f32.mrb[111].mxu0  ;;  %v3622_v44 = vpop.f32.mrb[127].mxu1  ;;  %v4033_v46 = vmul.f32 %v9525_v21, %v9637_v18 }
 0xc1f   :  { %v9909_v37 = vadd.f32 %v3995_v63, %v3979_v14  ;;  %v9911_v45 = vpack.c.bf16 %v3519_v50, %v3516_v17  ;;  %v3996_v48 = vmul.f32 %v9895_v62, %v3622_v44  ;;  %v4034_v44 = vmul.f32 %v9531_v2, %v9660_v27 }
 0xc20   :  { %v9914_v9 = vadd.f32 %v3998_v60, %v3982_v49  ;;  %v4032_v18 = vmul.f32 %v9672_v57, %v9533_v30  ;;  %v4037_v2 = vmul.f32 %v9543_v0, %v9702_v58  ;;  %v4036_v0 = vmul.f32 %v9746_v55, %v9550_v22 }
 0xc21   :  { %v9916_v35 = vadd.f32 %v3996_v48, %v3980_v26 }
 0xc23   :  { %v6543_v29 = vpop.f32.mrb[112].mxu0 }
 0xc24   :  { %v4049_v11 = vmul.f32 %v6543_v29, %v9645_v3  ;;  %v3680_v42 = vpop.f32.mrb[113].mxu0 }
 0xc25   :  { %v4047_v14 = vmul.f32 %v9655_v61, %v3680_v42  ;;  %v6544_v50 = vpop.f32.mrb[114].mxu0 }
 0xc26   :  { %v9926_v60 = vadd.f32 %v4049_v11, %v4033_v46  ;;  %v4050_v26 = vmul.f32 %v6544_v50, %v9665_v28  ;;  %v3683_v17 = vpop.f32.mrb[115].mxu0  ;;  %v4035_v28 = vmul.f32 %v9712_v13, %v9546_v31 }
 0xc27   :  { %v9931_v21 = vadd.f32 %v4047_v14, %v4031_v54  ;;  %v4048_v3 = vmul.f32 %v9681_v7, %v3683_v17  ;;  %v4038_v7 = vmul.f32 %v9548_v20, %v9727_v41  ;;  %v4041_v20 = vmul.f32 %v9564_v34, %v9774_v59 }
 0xc28   :  { %v9934_v63 = vadd.f32 %v4050_v26, %v4034_v44  ;;  %v4040_v34 = vmul.f32 %v9818_v47, %v9580_v25  ;;  %v10975_v44 = vld [vmem:[#allocation33_spill] sm:$0xff]  ;;  %v10976_v26 = vld [vmem:[#allocation48_spill] sm:$0xff] }
 0xc29   :  { %v9936_v32 = vadd.f32 %v4048_v3, %v4032_v18 }
 0xc2b   :  { %v6547_v61 = vpop.f32.mrb[116].mxu0 }
 0xc2c   :  { %v4053_v8 = vmul.f32 %v6547_v61, %v9722_v53  ;;  %v3696_v27 = vpop.f32.mrb[117].mxu0  ;;  %v10977_v61 = vld [vmem:[#allocation5_spill] sm:$0xff] }
 0xc2d   :  { %v4051_v57 = vmul.f32 %v9732_v1, %v3696_v27  ;;  %v6548_v30 = vpop.f32.mrb[118].mxu0 }
 0xc2e   :  { %v9946_v16 = vadd.f32 %v4053_v8, %v4037_v2  ;;  %v4054_v49 = vmul.f32 %v6548_v30, %v9739_v38  ;;  %v3699_v48 = vpop.f32.mrb[119].mxu0  ;;  %v4039_v38 = vmul.f32 %v9784_v4, %v9569_v23 }
 0xc2f   :  { %v9951_v58 = vadd.f32 %v4051_v57, %v4035_v28  ;;  %v4052_v53 = vmul.f32 %v9755_v40, %v3699_v48  ;;  %v4042_v40 = vmul.f32 %v9575_v19, %v9799_v10 }
 0xc30   :  { %v9954_v29 = vadd.f32 %v4054_v49, %v4038_v7 }
 0xc31   :  { %v9956_v31 = vadd.f32 %v4052_v53, %v4036_v0 }
 0xc33   :  { %v6551_v13 = vpop.f32.mrb[120].mxu0 }
 0xc34   :  { %v4057_v41 = vmul.f32 %v6551_v13, %v9794_v12  ;;  %v3712_v1 = vpop.f32.mrb[121].mxu0 }
 0xc35   :  { %v4055_v22 = vmul.f32 %v9804_v52, %v3712_v1  ;;  %v6552_v55 = vpop.f32.mrb[122].mxu0  ;;  %v10973_v52 = vld [vmem:[#allocation47_spill] sm:$0xff] }
 0xc36   :  { %v9966_v46 = vadd.f32 %v4057_v41, %v4041_v20  ;;  %v4058_v11 = vmul.f32 %v6552_v55, %v9811_v33  ;;  %v3715_v42 = vpop.f32.mrb[123].mxu0  ;;  %v4045_v19 = vmul.f32 %v10973_v52, %v9853_v24  ;;  %v10974_v33 = vld [vmem:[#allocation46_spill] sm:$0xff]  ;;  %v4044_v24 = vmul.f32 %v9889_v43, %v10977_v61 }
 0xc37   :  { %v9971_v59 = vadd.f32 %v4055_v22, %v4039_v38  ;;  %v4056_v12 = vmul.f32 %v9827_v51, %v3715_v42  ;;  %v4043_v50 = vmul.f32 %v9867_v39, %v10974_v33  ;;  %v4046_v51 = vmul.f32 %v10976_v26, %v9877_v56 }
 0xc38   :  { %v9974_v54 = vadd.f32 %v4058_v11, %v4042_v40 }
 0xc39   :  { %v9976_v23 = vadd.f32 %v4056_v12, %v4040_v34 }
 0xc3b   :  { %v6555_v4 = vpop.f32.mrb[124].mxu0 }
 0xc3c   :  { %v4061_v10 = vmul.f32 %v6555_v4, %v9862_v36  ;;  %v3728_v14 = vpop.f32.mrb[125].mxu0 }
 0xc3d   :  { %v4059_v25 = vmul.f32 %v10975_v44, %v3728_v14  ;;  %v6556_v47 = vpop.f32.mrb[126].mxu0 }
 0xc3e   :  { %v9986_v17 = vadd.f32 %v4061_v10, %v4045_v19  ;;  %v4062_v18 = vmul.f32 %v6556_v47, %v9882_v5  ;;  %v3731_v3 = vpop.f32.mrb[127].mxu0 }
 0xc3f   :  { %v9991_v2 = vadd.f32 %v4059_v25, %v4043_v50  ;;  %v4060_v36 = vmul.f32 %v9895_v62, %v3731_v3 }
 0xc40   :  { %v9994_v8 = vadd.f32 %v4062_v18, %v4046_v51 }
 0xc41   :  { %v9996_v39 = vadd.f32 %v4060_v36, %v4044_v24 }
 0xc48   :  { %v3873_v27 = vpop.xlane.xlu0 %3872 }
 0xc49   :  { %v3919_v28 = vmul.f32 0.03125, %v3873_v27 }
 0xc4a   :  { %v3876_v57 = vpop.xlane.xlu1 %3875 }
 0xc4b   :  { %v3935_v56 = vadd.f32 1e-05, %v3919_v28  ;;  %v3920_v30 = vmul.f32 0.03125, %v3876_v57 }
 0xc4c   :  { %v3879_v7 = vpop.xlane.xlu0 %3878 }
 0xc4d   :  { %7059 = vrsqrt.f32 %v3935_v56  ;;  %v3936_v5 = vadd.f32 1e-05, %v3920_v30  ;;  %v3921_v49 = vmul.f32 0.03125, %v3879_v7 }
 0xc4f   :  { %7061 = vrsqrt.f32 %v3936_v5  ;;  %v3937_v48 = vadd.f32 1e-05, %v3921_v49 }
 0xc50   :  { %v3882_v43 = vpop.xlane.xlu0 %3881 }
 0xc51   :  { %v3922_v0 = vmul.f32 0.03125, %v3882_v43  ;;  %7063 = vrsqrt.f32 %v3937_v48 }
 0xc52   :  { %v3888_v53 = vpop.xlane.xlu1 %3887 }
 0xc53   :  { %v3938_v62 = vadd.f32 1e-05, %v3922_v0  ;;  %v3924_v13 = vmul.f32 0.03125, %v3888_v53 }
 0xc54   :  { %v3885_v20 = vpop.xlane.xlu0 %3884 }
 0xc55   :  { %7065 = vrsqrt.f32 %v3938_v62  ;;  %v3940_v41 = vadd.f32 1e-05, %v3924_v13  ;;  %v3923_v1 = vmul.f32 0.03125, %v3885_v20 }
 0xc56   :  { %v3894_v38 = vpop.xlane.xlu1 %3893 }
 0xc57   :  { %v7060_v22 = vpop.eup %7059  ;;  %7067 = vrsqrt.f32 %v3940_v41  ;;  %v3939_v55 = vadd.f32 1e-05, %v3923_v1  ;;  %v3926_v40 = vmul.f32 0.03125, %v3894_v38 }
 0xc58   :  { %v3891_v11 = vpop.xlane.xlu0 %3890  ;;  %v4079_v52 = vmul.f32 %v7060_v22, %v9931_v21 }
 0xc59   :  { %v7062_v42 = vpop.eup %7061  ;;  %7069 = vrsqrt.f32 %v3939_v55  ;;  %v3942_v34 = vadd.f32 1e-05, %v3926_v40  ;;  %v3925_v12 = vmul.f32 0.03125, %v3891_v11 }
 0xc5a   :  { %v3764_v4 = vpop.xlane.xlu1 %3763  ;;  %v4080_v19 = vmul.f32 %v7062_v42, %v9936_v32 }
 0xc5b   :  { %7071 = vrsqrt.f32 %v3942_v34  ;;  %v3941_v10 = vadd.f32 1e-05, %v3925_v12  ;;  %v3808_v14 = vmul.f32 0.03125, %v3764_v4  ;;  %v7064_v44 = vpop.eup %7063 }
 0xc5c   :  { %v3761_v33 = vpop.xlane.xlu0 %3760  ;;  %v4103_v50 = vpack.c.bf16 %v4080_v19, %v4079_v52  ;;  %v4081_v61 = vmul.f32 %v7064_v44, %v9926_v60  ;;  %v10978_v19 = vld [vmem:[#allocation8_spill] sm:$0xff] }
 0xc5d   :  { %7073 = vrsqrt.f32 %v3941_v10  ;;  %v3824_v25 = vadd.f32 1e-05, %v3808_v14  ;;  %v3807_v47 = vmul.f32 0.03125, %v3761_v33  ;;  %v10979_v14 = vld [vmem:[#allocation16_spill] sm:$0xff] }
 0xc5e   :  { %v3900_v26 = vpop.xlane.xlu1 %3899  ;;  %6709 = vmatprep.subr.msk.bf16.mxu1 %vm339_vm1, %v4103_v50  ;;  %v4132_v51 = vsel %vm339_vm1, %v4103_v50, 0 }
 0xc5f   :  { %v7066_v18 = vpop.eup %7065  ;;  %7075 = vrsqrt.f32 %v3824_v25  ;;  %v3823_v3 = vadd.f32 1e-05, %v3807_v47  ;;  %v3928_v21 = vmul.f32 0.03125, %v3900_v26  ;;  %6558 = vmatpush3.bf16.xpose.msra.mxu1 %v4132_v51 }
 0xc60   :  { %v3897_v32 = vpop.xlane.xlu0 %3896  ;;  %v4082_v24 = vmul.f32 %v7066_v18, %v9934_v63 }
 0xc61   :  { %v7068_v36 = vpop.eup %7067  ;;  %7077 = vrsqrt.f32 %v3823_v3  ;;  %v3944_v27 = vadd.f32 1e-05, %v3928_v21  ;;  %v3927_v28 = vmul.f32 0.03125, %v3897_v32 }
 0xc62   :  { %v3770_v57 = vpop.xlane.xlu1 %3769  ;;  %v4104_v56 = vpack.c.bf16 %v4082_v24, %v4081_v61  ;;  %v4084_v43 = vmul.f32 %v7068_v36, %v9956_v31  ;;  %v10980_v61 = vld [vmem:[#allocation9_spill] sm:$0xff]  ;;  %v10981_v36 = vld [vmem:[#allocation7_spill] sm:$0xff] }
 0xc63   :  { %v7070_v30 = vpop.eup %7069  ;;  %7079 = vrsqrt.f32 %v3944_v27  ;;  %v3943_v7 = vadd.f32 1e-05, %v3927_v28  ;;  %v3810_v5 = vmul.f32 0.03125, %v3770_v57 }
 0xc64   :  { %6710 = vmatprep.subr.msk.bf16.mxu1 %vm339_vm1, %v4104_v56  ;;  %v3767_v49 = vpop.xlane.xlu0 %3766  ;;  %v4083_v48 = vmul.f32 %v7070_v30, %v9951_v58  ;;  %v4135_v62 = vsel %vm339_vm1, %v4104_v56, 0 }
 0xc65   :  { %v7072_v60 = vpop.eup %7071  ;;  %7081 = vrsqrt.f32 %v3943_v7  ;;  %v3826_v63 = vadd.f32 1e-05, %v3810_v5  ;;  %v3809_v0 = vmul.f32 0.03125, %v3767_v49 }
 0xc66   :  { %v3906_v53 = vpop.xlane.xlu1 %3905  ;;  %v4105_v13 = vpack.c.bf16 %v4084_v43, %v4083_v48  ;;  %v4086_v31 = vmul.f32 %v7072_v60, %v9954_v29  ;;  %v10982_v48 = vld [vmem:[#allocation17_spill] sm:$0xff]  ;;  %v10983_v60 = vld [vmem:[#allocation24_spill] sm:$0xff] }
 0xc67   :  { %v7074_v20 = vpop.eup %7073  ;;  %7083 = vrsqrt.f32 %v3826_v63  ;;  %v3825_v41 = vadd.f32 1e-05, %v3809_v0  ;;  %v3930_v1 = vmul.f32 0.03125, %v3906_v53  ;;  %6560 = vmatpush3.bf16.xpose.msra.mxu1 %v4135_v62 }
 0xc68   :  { %6711 = vmatprep.subr.msk.bf16.mxu1 %vm339_vm1, %v4105_v13  ;;  %v3903_v38 = vpop.xlane.xlu0 %3902  ;;  %v4085_v58 = vmul.f32 %v7074_v20, %v9946_v16  ;;  %v4138_v29 = vsel %vm339_vm1, %v4105_v13, 0 }
 0xc69   :  { %v7076_v22 = vpop.eup %7075  ;;  %7085 = vrsqrt.f32 %v3825_v41  ;;  %v3946_v55 = vadd.f32 1e-05, %v3930_v1  ;;  %v3929_v40 = vmul.f32 0.03125, %v3903_v38 }
 0xc6a   :  { %v3776_v11 = vpop.xlane.xlu1 %3775  ;;  %v4106_v42 = vpack.c.bf16 %v4086_v31, %v4085_v58  ;;  %v4016_v33 = vmul.f32 %v7076_v22, %v10979_v14 }
 0xc6b   :  { %v7078_v34 = vpop.eup %7077  ;;  %7087 = vrsqrt.f32 %v3946_v55  ;;  %v3945_v12 = vadd.f32 1e-05, %v3929_v40  ;;  %v3812_v4 = vmul.f32 0.03125, %v3776_v11 }
 0xc6c   :  { %v3773_v52 = vpop.xlane.xlu0 %3772  ;;  %v4015_v10 = vmul.f32 %v7078_v34, %v10978_v19  ;;  %v4141_v56 = vsel %vm339_vm1, %v4106_v42, 0 }
 0xc6d   :  { %v7080_v50 = vpop.eup %7079  ;;  %7089 = vrsqrt.f32 %v3945_v12  ;;  %v3828_v16 = vadd.f32 1e-05, %v3812_v4  ;;  %v3811_v44 = vmul.f32 0.03125, %v3773_v52 }
 0xc6e   :  { %v4095_v25 = vpack.c.bf16 %v4016_v33, %v4015_v10  ;;  %v4088_v18 = vmul.f32 %v7080_v50, %v9976_v23 }
 0xc6f   :  { %v7082_v47 = vpop.eup %7081  ;;  %7091 = vrsqrt.f32 %v3828_v16  ;;  %v3827_v26 = vadd.f32 1e-05, %v3811_v44  ;;  %6562 = vmatpush3.bf16.xpose.msra.mxu1 %v4138_v29 }
 0xc70   :  { %6712 = vmatprep.subr.msk.bf16.mxu1 %vm339_vm1, %v4106_v42  ;;  %6565 = vmatprep.mubr.msk.bf16.mxu1 %vm339_vm1, %v4095_v25  ;;  %v4087_v51 = vmul.f32 %v7082_v47, %v9971_v59 }
 0xc71   :  { %v7084_v3 = vpop.eup %7083  ;;  %7093 = vrsqrt.f32 %v3827_v26 }
 0xc72   :  { %v4107_v21 = vpack.c.bf16 %v4088_v18, %v4087_v51  ;;  %v4018_v24 = vmul.f32 %v7084_v3, %v10980_v61 }
 0xc73   :  { %v7086_v32 = vpop.eup %7085 }
 0xc74   :  { %v4017_v27 = vmul.f32 %v7086_v32, %v10981_v36  ;;  %v4398_v0 = vsel %vm339_vm1, %v4107_v21, 0 }
 0xc75   :  { %v7088_v28 = vpop.eup %7087 }
 0xc76   :  { %v4096_v57 = vpack.c.bf16 %v4018_v24, %v4017_v27  ;;  %v4090_v23 = vmul.f32 %v7088_v28, %v9974_v54  ;;  %v10984_v28 = vld [vmem:[#allocation14_spill] sm:$0xff] }
 0xc77   :  { %v7090_v30 = vpop.eup %7089  ;;  %6564 = vmatpush3.bf16.xpose.msra.mxu1 %v4141_v56 }
 0xc78   :  { %6713 = vmatprep.subr.msk.bf16.mxu1 %vm339_vm1, %v4107_v21  ;;  %v4089_v59 = vmul.f32 %v7090_v30, %v9966_v46 }
 0xc79   :  { %v7092_v7 = vpop.eup %7091 }
 0xc7a   :  { %v4108_v5 = vpack.c.bf16 %v4090_v23, %v4089_v59  ;;  %v4020_v63 = vmul.f32 %v7092_v7, %v10983_v60 }
 0xc7b   :  { %v7094_v49 = vpop.eup %7093 }
 0xc7c   :  { %v4019_v43 = vmul.f32 %v7094_v49, %v10982_v48  ;;  %v4401_v46 = vsel %vm339_vm1, %v4108_v5, 0 }
 0xc7e   :  { %6566 = vmatmul.mubr.msk.bf16.vlgmr.msra.gmra.mrb[128].mxu1 %vm339_vm1, %v4096_v57  ;;  %v4097_v53 = vpack.c.bf16 %v4020_v63, %v4019_v43 }
 0xc7f   :  { %6590 = vmatpush3.bf16.xpose.msra.mxu1 %v4398_v0 }
 0xc80   :  { %6569 = vmatprep.mubr.msk.bf16.mxu1 %vm339_vm1, %v4097_v53  ;;  %6714 = vmatprep.subr.msk.bf16.mxu1 %vm339_vm1, %v4108_v5 }
 0xc87   :  { %6592 = vmatpush3.bf16.xpose.msra.mxu1 %v4401_v46 }
 0xc8d   :  { %v3909_v54 = vpop.xlane.xlu0 %3908 }
 0xc8e   :  { %v3931_v62 = vmul.f32 0.03125, %v3909_v54 }
 0xc8f   :  { %v3912_v13 = vpop.xlane.xlu1 %3911 }
 0xc90   :  { %v3932_v20 = vmul.f32 0.03125, %v3912_v13  ;;  %v3947_v41 = vadd.f32 1e-05, %v3931_v62 }
 0xc91   :  { %v3779_v38 = vpop.xlane.xlu0 %3778 }
 0xc92   :  { %v3948_v1 = vadd.f32 1e-05, %v3932_v20  ;;  %7095 = vrsqrt.f32 %v3947_v41  ;;  %v3813_v58 = vmul.f32 0.03125, %v3779_v38 }
 0xc93   :  { %v3782_v31 = vpop.xlane.xlu1 %3781 }
 0xc94   :  { %7097 = vrsqrt.f32 %v3948_v1  ;;  %v3814_v22 = vmul.f32 0.03125, %v3782_v31  ;;  %v3829_v55 = vadd.f32 1e-05, %v3813_v58  ;;  %v10986_v58 = vld [vmem:[#allocation25_spill] sm:$0xff] }
 0xc95   :  { %v3915_v11 = vpop.xlane.xlu0 %3914 }
 0xc96   :  { %v3830_v40 = vadd.f32 1e-05, %v3814_v22  ;;  %7099 = vrsqrt.f32 %v3829_v55  ;;  %v3933_v42 = vmul.f32 0.03125, %v3915_v11  ;;  %v10987_v22 = vld [vmem:[#allocation32_spill] sm:$0xff]  ;;  %v10988_v11 = vld [vmem:[#allocation22_spill] sm:$0xff] }
 0xc97   :  { %v3918_v34 = vpop.xlane.xlu1 %3917 }
 0xc98   :  { %7101 = vrsqrt.f32 %v3830_v40  ;;  %v3934_v12 = vmul.f32 0.03125, %v3918_v34  ;;  %v3949_v4 = vadd.f32 1e-05, %v3933_v42  ;;  %v10989_v34 = vld [vmem:[#allocation30_spill] sm:$0xff] }
 0xc99   :  { %v3785_v19 = vpop.xlane.xlu0 %3784 }
 0xc9a   :  { %v3950_v52 = vadd.f32 1e-05, %v3934_v12  ;;  %7103 = vrsqrt.f32 %v3949_v4  ;;  %v3815_v10 = vmul.f32 0.03125, %v3785_v19 }
 0xc9b   :  { %v3788_v14 = vpop.xlane.xlu1 %3787 }
 0xc9c   :  { %7105 = vrsqrt.f32 %v3950_v52  ;;  %v3816_v33 = vmul.f32 0.03125, %v3788_v14  ;;  %v7096_v50 = vpop.eup %7095  ;;  %v3831_v16 = vadd.f32 1e-05, %v3815_v10 }
 0xc9d   :  { %v3791_v25 = vpop.xlane.xlu0 %3790  ;;  %v4091_v51 = vmul.f32 %v7096_v50, %v9991_v2  ;;  %v10985_v2 = vld [vmem:[#allocation15_spill] sm:$0xff] }
 0xc9e   :  { %v7098_v44 = vpop.eup %7097  ;;  %v3832_v29 = vadd.f32 1e-05, %v3816_v33  ;;  %7107 = vrsqrt.f32 %v3831_v16  ;;  %v3817_v47 = vmul.f32 0.03125, %v3791_v25 }
 0xc9f   :  { %v3794_v26 = vpop.xlane.xlu1 %3793  ;;  %v4092_v18 = vmul.f32 %v7098_v44, %v9996_v39 }
 0xca0   :  { %7109 = vrsqrt.f32 %v3832_v29  ;;  %v3818_v3 = vmul.f32 0.03125, %v3794_v26  ;;  %v7100_v21 = vpop.eup %7099  ;;  %v3833_v32 = vadd.f32 1e-05, %v3817_v47 }
 0xca1   :  { %v4109_v61 = vpack.c.bf16 %v4092_v18, %v4091_v51  ;;  %v3797_v27 = vpop.xlane.xlu0 %3796  ;;  %v4021_v57 = vmul.f32 %v7100_v21, %v10984_v28 }
 0xca2   :  { %v7102_v24 = vpop.eup %7101  ;;  %v3834_v36 = vadd.f32 1e-05, %v3818_v3  ;;  %7111 = vrsqrt.f32 %v3833_v32  ;;  %v3819_v56 = vmul.f32 0.03125, %v3797_v27 }
 0xca3   :  { %v3800_v30 = vpop.xlane.xlu1 %3799  ;;  %6715 = vmatprep.subr.msk.bf16.mxu1 %vm339_vm1, %v4109_v61  ;;  %v4404_v59 = vsel %vm339_vm1, %v4109_v61, 0  ;;  %v4022_v23 = vmul.f32 %v7102_v24, %v10985_v2 }
 0xca4   :  { %7113 = vrsqrt.f32 %v3834_v36  ;;  %v3820_v39 = vmul.f32 0.03125, %v3800_v30  ;;  %6594 = vmatpush3.bf16.xpose.msra.mxu1 %v4404_v59  ;;  %v7104_v7 = vpop.eup %7103  ;;  %v3835_v5 = vadd.f32 1e-05, %v3819_v56 }
 0xca5   :  { %v4098_v49 = vpack.c.bf16 %v4022_v23, %v4021_v57  ;;  %v3803_v60 = vpop.xlane.xlu0 %3802  ;;  %v4093_v53 = vmul.f32 %v7104_v7, %v9986_v17 }
 0xca6   :  { %v7106_v48 = vpop.eup %7105  ;;  %v3836_v43 = vadd.f32 1e-05, %v3820_v39  ;;  %7115 = vrsqrt.f32 %v3835_v5  ;;  %v3821_v63 = vmul.f32 0.03125, %v3803_v60 }
 0xca7   :  { %v3806_v0 = vpop.xlane.xlu1 %3805  ;;  %6570 = vmatmul.mubr.msk.bf16.gmra.mrb[132].mxu1 %vm339_vm1, %v4098_v49  ;;  %v4094_v46 = vmul.f32 %v7106_v48, %v9994_v8 }
 0xca8   :  { %7117 = vrsqrt.f32 %v3836_v43  ;;  %v3822_v54 = vmul.f32 0.03125, %v3806_v0  ;;  %v7108_v62 = vpop.eup %7107  ;;  %v3837_v13 = vadd.f32 1e-05, %v3821_v63 }
 0xca9   :  { %v4110_v20 = vpack.c.bf16 %v4094_v46, %v4093_v53  ;;  %v4023_v31 = vmul.f32 %v7108_v62, %v10986_v58 }
 0xcaa   :  { %v7110_v41 = vpop.eup %7109  ;;  %v3838_v1 = vadd.f32 1e-05, %v3822_v54  ;;  %7119 = vrsqrt.f32 %v3837_v13 }
 0xcab   :  { %6716 = vmatprep.subr.msk.bf16.mxu1 %vm339_vm1, %v4110_v20  ;;  %v4407_v38 = vsel %vm339_vm1, %v4110_v20, 0  ;;  %v4024_v55 = vmul.f32 %v7110_v41, %v10987_v22 }
 0xcac   :  { %7121 = vrsqrt.f32 %v3838_v1  ;;  %6596 = vmatpush3.bf16.xpose.msra.mxu1 %v4407_v38  ;;  %v7112_v17 = vpop.eup %7111 }
 0xcad   :  { %v4099_v8 = vpack.c.bf16 %v4024_v55, %v4023_v31  ;;  %v4025_v42 = vmul.f32 %v7112_v17, %v10988_v11 }
 0xcae   :  { %v7114_v40 = vpop.eup %7113 }
 0xcaf   :  { %v4026_v12 = vmul.f32 %v7114_v40, %v10989_v34  ;;  %6597 = vmatprep.mubr.msk.bf16.mxu1 %vm339_vm1, %v4099_v8 }
 0xcb0   :  { %v7116_v4 = vpop.eup %7115 }
 0xcb1   :  { %v4100_v52 = vpack.c.bf16 %v4026_v12, %v4025_v42  ;;  %v4027_v10 = vmul.f32 %v7116_v4, %v9909_v37 }
 0xcb2   :  { %v7118_v19 = vpop.eup %7117 }
 0xcb3   :  { %6598 = vmatmul.mubr.msk.bf16.vlgmr.msra.gmra.mrb[136].mxu1 %vm339_vm1, %v4100_v52  ;;  %v4028_v14 = vmul.f32 %v7118_v19, %v9916_v35 }
 0xcb4   :  { %v7120_v33 = vpop.eup %7119 }
 0xcb5   :  { %v4101_v50 = vpack.c.bf16 %v4028_v14, %v4027_v10  ;;  %v4029_v44 = vmul.f32 %v7120_v33, %v9902_v15 }
 0xcb6   :  { %v7122_v16 = vpop.eup %7121 }
 0xcb7   :  { %6601 = vmatprep.mubr.msk.bf16.mxu1 %vm339_vm1, %v4101_v50  ;;  %v4030_v29 = vmul.f32 %v7122_v16, %v9914_v9 }
 0xcb9   :  { %v4102_v25 = vpack.c.bf16 %v4030_v29, %v4029_v44 }
 0xcbb   :  { %6602 = vmatmul.mubr.msk.bf16.gmra.mrb[140].mxu1 %vm339_vm1, %v4102_v25 }
 0xd51   :  { %v6567_v47 = vpop.f32.mrb[128].mxu1 }
 0xd52   :  { %v4177_v26 = vpop.f32.mrb[129].mxu1  ;;  %v10056_v3 = vmul.f32 0.17677669, %v6567_v47 }
 0xd53   :  { %v10054_v51 = vmul.f32 0.17677669, %v4177_v26  ;;  %v6568_v18 = vpop.f32.mrb[130].mxu1 }
 0xd54   :  { %v4180_v37 = vpop.f32.mrb[131].mxu1  ;;  %v10062_v15 = vmul.f32 0.17677669, %v6568_v18  ;;  %v4222_v32 = vsel %vm1629_vm2, %v10056_v3, -inf }
 0xd55   :  { %v10058_v35 = vmul.f32 0.17677669, %v4180_v37  ;;  %v4216_v21 = vsel %vm1629_vm2, %v10054_v51, -inf }
 0xd56   :  { %4217 = vmax.xlane.f32.xlu0 %v4216_v21  ;;  %v4225_v61 = vsel %vm1629_vm2, %v10062_v15, -inf }
 0xd57   :  { %v4219_v9 = vsel %vm1629_vm2, %v10058_v35, -inf }
 0xd58   :  { %4220 = vmax.xlane.f32.xlu1 %v4219_v9 }
 0xd5a   :  { %4223 = vmax.xlane.f32.xlu0 %v4222_v32 }
 0xd5c   :  { %4226 = vmax.xlane.f32.xlu1 %v4225_v61 }
 0xd7a   :  { %v6571_v24 = vpop.f32.mrb[132].mxu1 }
 0xd7b   :  { %v4193_v36 = vpop.f32.mrb[133].mxu1  ;;  %v10072_v56 = vmul.f32 0.17677669, %v6571_v24 }
 0xd7c   :  { %v10070_v27 = vmul.f32 0.17677669, %v4193_v36  ;;  %v6572_v28 = vpop.f32.mrb[134].mxu1 }
 0xd7d   :  { %v4196_v57 = vpop.f32.mrb[135].mxu1  ;;  %v10078_v2 = vmul.f32 0.17677669, %v6572_v28  ;;  %v4234_v39 = vsel %vm1629_vm2, %v10072_v56, -inf }
 0xd7e   :  { %v10074_v30 = vmul.f32 0.17677669, %v4196_v57  ;;  %v4228_v59 = vsel %vm1629_vm2, %v10070_v27, -inf }
 0xd7f   :  { %4229 = vmax.xlane.f32.xlu0 %v4228_v59  ;;  %v4237_v7 = vsel %vm1629_vm2, %v10078_v2, -inf }
 0xd80   :  { %v4231_v23 = vsel %vm1629_vm2, %v10074_v30, -inf }
 0xd81   :  { %4232 = vmax.xlane.f32.xlu1 %v4231_v23 }
 0xd83   :  { %4235 = vmax.xlane.f32.xlu0 %v4234_v39 }
 0xd85   :  { %4238 = vmax.xlane.f32.xlu1 %v4237_v7 }
 0xd86   :  { %v6599_v5 = vpop.f32.mrb[136].mxu1 }
 0xd87   :  { %v4443_v49 = vpop.f32.mrb[137].mxu1  ;;  %v10088_v63 = vmul.f32 0.17677669, %v6599_v5 }
 0xd88   :  { %v10086_v48 = vmul.f32 0.17677669, %v4443_v49  ;;  %v6600_v43 = vpop.f32.mrb[138].mxu1 }
 0xd89   :  { %v4446_v60 = vpop.f32.mrb[139].mxu1  ;;  %v10094_v46 = vmul.f32 0.17677669, %v6600_v43  ;;  %v4488_v13 = vsel %vm1629_vm2, %v10088_v63, -inf }
 0xd8a   :  { %v10090_v0 = vmul.f32 0.17677669, %v4446_v60  ;;  %v4482_v53 = vsel %vm1629_vm2, %v10086_v48, -inf }
 0xd8b   :  { %4483 = vmax.xlane.f32.xlu0 %v4482_v53  ;;  %v4491_v38 = vsel %vm1629_vm2, %v10094_v46, -inf }
 0xd8c   :  { %v4485_v54 = vsel %vm1629_vm2, %v10090_v0, -inf }
 0xd8d   :  { %4486 = vmax.xlane.f32.xlu1 %v4485_v54 }
 0xd8e   :  { %v6603_v62 = vpop.f32.mrb[140].mxu1 }
 0xd8f   :  { %4489 = vmax.xlane.f32.xlu0 %v4488_v13  ;;  %v4459_v20 = vpop.f32.mrb[141].mxu1  ;;  %v10104_v31 = vmul.f32 0.17677669, %v6603_v62 }
 0xd90   :  { %v10100_v41 = vmul.f32 0.17677669, %v4459_v20  ;;  %v6604_v1 = vpop.f32.mrb[142].mxu1 }
 0xd91   :  { %4492 = vmax.xlane.f32.xlu1 %v4491_v38  ;;  %v4462_v58 = vpop.f32.mrb[143].mxu1  ;;  %v10110_v17 = vmul.f32 0.17677669, %v6604_v1  ;;  %v4500_v40 = vsel %vm1629_vm2, %v10104_v31, -inf }
 0xd92   :  { %v10106_v22 = vmul.f32 0.17677669, %v4462_v58  ;;  %v4494_v55 = vsel %vm1629_vm2, %v10100_v41, -inf }
 0xd93   :  { %4495 = vmax.xlane.f32.xlu0 %v4494_v55  ;;  %v4503_v11 = vsel %vm1629_vm2, %v10110_v17, -inf }
 0xd94   :  { %v4497_v8 = vsel %vm1629_vm2, %v10106_v22, -inf }
 0xd95   :  { %4498 = vmax.xlane.f32.xlu1 %v4497_v8 }
 0xd97   :  { %4501 = vmax.xlane.f32.xlu0 %v4500_v40 }
 0xd99   :  { %4504 = vmax.xlane.f32.xlu1 %v4503_v11 }
 0xde3   :  { %v4218_v42 = vpop.xlane.xlu0 %4217 }
 0xde4   :  { %v4240_v34 = vsub.f32 %v10054_v51, %v4218_v42 }
 0xde5   :  { %v4221_v12 = vpop.xlane.xlu1 %4220 }
 0xde6   :  { %v4248_v4 = vmul.f32 1.442695, %v4240_v34  ;;  %v4241_v52 = vsub.f32 %v10058_v35, %v4221_v12 }
 0xde7   :  { %v4224_v19 = vpop.xlane.xlu0 %4223 }
 0xde8   :  { %7123 = vpow2.f32 %v4248_v4  ;;  %v4250_v10 = vmul.f32 1.442695, %v4241_v52  ;;  %v4242_v14 = vsub.f32 %v10056_v3, %v4224_v19 }
 0xde9   :  { %v4227_v33 = vpop.xlane.xlu1 %4226 }
 0xdea   :  { %7125 = vpow2.f32 %v4250_v10  ;;  %v4252_v50 = vmul.f32 1.442695, %v4242_v14  ;;  %v4243_v16 = vsub.f32 %v10062_v15, %v4227_v33 }
 0xdec   :  { %7127 = vpow2.f32 %v4252_v50  ;;  %v4254_v44 = vmul.f32 1.442695, %v4243_v16 }
 0xdee   :  { %7129 = vpow2.f32 %v4254_v44 }
 0xdf2   :  { %v10122_v29 = vpop.eup %7123 }
 0xdf3   :  { %v4264_v25 = vsel %vm1629_vm2, %v10122_v29, 0.0 }
 0xdf4   :  { %v10126_v47 = vpop.eup %7125  ;;  %4265 = vadd.xlane.f32.xlu0 %v4264_v25 }
 0xdf5   :  { %v4267_v26 = vsel %vm1629_vm2, %v10126_v47, 0.0 }
 0xdf6   :  { %v10130_v51 = vpop.eup %7127  ;;  %4268 = vadd.xlane.f32.xlu1 %v4267_v26 }
 0xdf7   :  { %v4270_v18 = vsel %vm1629_vm2, %v10130_v51, 0.0 }
 0xdf8   :  { %v10134_v37 = vpop.eup %7129  ;;  %4271 = vadd.xlane.f32.xlu0 %v4270_v18 }
 0xdf9   :  { %v4273_v3 = vsel %vm1629_vm2, %v10134_v37, 0.0 }
 0xdfa   :  { %4274 = vadd.xlane.f32.xlu1 %v4273_v3 }
 0xe0c   :  { %v4230_v35 = vpop.xlane.xlu0 %4229 }
 0xe0d   :  { %v4244_v21 = vsub.f32 %v10070_v27, %v4230_v35 }
 0xe0e   :  { %v4233_v15 = vpop.xlane.xlu1 %4232 }
 0xe0f   :  { %v4256_v9 = vmul.f32 1.442695, %v4244_v21  ;;  %v4245_v32 = vsub.f32 %v10074_v30, %v4233_v15  ;;  %v7317_v15 = vld [vmem:[%s10674_s6 + $0x6c] ss:$16 sps:$4 sm:$0xff]  }
 0xe10   :  { %v4236_v61 = vpop.xlane.xlu0 %4235 }
 0xe11   :  { %7131 = vpow2.f32 %v4256_v9  ;;  %v4258_v24 = vmul.f32 1.442695, %v4245_v32  ;;  %v4246_v36 = vsub.f32 %v10072_v56, %v4236_v61  ;;  %v7318_v9 = vld [vmem:[%s10674_s6 + $0x4c] ss:$16 sps:$4 sm:$0xff]  }
 0xe12   :  { %v4239_v28 = vpop.xlane.xlu1 %4238 }
 0xe13   :  { %7133 = vpow2.f32 %v4258_v24  ;;  %v4260_v57 = vmul.f32 1.442695, %v4246_v36  ;;  %v4247_v59 = vsub.f32 %v10078_v2, %v4239_v28 }
 0xe15   :  { %7135 = vpow2.f32 %v4260_v57  ;;  %v4262_v23 = vmul.f32 1.442695, %v4247_v59 }
 0xe17   :  { %7137 = vpow2.f32 %v4262_v23 }
 0xe18   :  { %v4484_v39 = vpop.xlane.xlu0 %4483 }
 0xe19   :  { %v4506_v27 = vsub.f32 %v10086_v48, %v4484_v39 }
 0xe1a   :  { %v4487_v7 = vpop.xlane.xlu1 %4486 }
 0xe1b   :  { %v10143_v5 = vpop.eup %7131  ;;  %v4514_v30 = vmul.f32 1.442695, %v4506_v27  ;;  %v4507_v49 = vsub.f32 %v10090_v0, %v4487_v7 }
 0xe1c   :  { %v4490_v43 = vpop.xlane.xlu0 %4489  ;;  %v4276_v56 = vsel %vm1629_vm2, %v10143_v5, 0.0 }
 0xe1d   :  { %v10148_v60 = vpop.eup %7133  ;;  %7139 = vpow2.f32 %v4514_v30  ;;  %v4516_v2 = vmul.f32 1.442695, %v4507_v49  ;;  %v4508_v53 = vsub.f32 %v10088_v63, %v4490_v43  ;;  %4277 = vadd.xlane.f32.xlu0 %v4276_v56  ;;  %v10990_v56 = vld [vmem:[#allocation31_spill] sm:$0xff] }
 0xe1e   :  { %v4493_v54 = vpop.xlane.xlu1 %4492  ;;  %v4279_v48 = vsel %vm1629_vm2, %v10148_v60, 0.0 }
 0xe1f   :  { %v10153_v62 = vpop.eup %7135  ;;  %7141 = vpow2.f32 %v4516_v2  ;;  %v4518_v13 = vmul.f32 1.442695, %v4508_v53  ;;  %v4509_v0 = vsub.f32 %v10094_v46, %v4493_v54  ;;  %4280 = vadd.xlane.f32.xlu1 %v4279_v48  ;;  %v10991_v2 = vld [vmem:[#allocation23_spill] sm:$0xff] }
 0xe20   :  { %v4496_v20 = vpop.xlane.xlu0 %4495  ;;  %v4282_v1 = vsel %vm1629_vm2, %v10153_v62, 0.0 }
 0xe21   :  { %v10158_v38 = vpop.eup %7137  ;;  %7143 = vpow2.f32 %v4518_v13  ;;  %v4520_v63 = vmul.f32 1.442695, %v4509_v0  ;;  %v4510_v58 = vsub.f32 %v10100_v41, %v4496_v20  ;;  %4283 = vadd.xlane.f32.xlu0 %v4282_v1 }
 0xe22   :  { %v4499_v55 = vpop.xlane.xlu1 %4498  ;;  %v4285_v8 = vsel %vm1629_vm2, %v10158_v38, 0.0 }
 0xe23   :  { %7145 = vpow2.f32 %v4520_v63  ;;  %v4522_v40 = vmul.f32 1.442695, %v4510_v58  ;;  %v4511_v46 = vsub.f32 %v10106_v22, %v4499_v55  ;;  %4286 = vadd.xlane.f32.xlu1 %v4285_v8 }
 0xe24   :  { %v4502_v11 = vpop.xlane.xlu0 %4501 }
 0xe25   :  { %7147 = vpow2.f32 %v4522_v40  ;;  %v4524_v42 = vmul.f32 1.442695, %v4511_v46  ;;  %v4512_v34 = vsub.f32 %v10104_v31, %v4502_v11 }
 0xe26   :  { %v4505_v12 = vpop.xlane.xlu1 %4504 }
 0xe27   :  { %v10165_v4 = vpop.eup %7139  ;;  %7149 = vpow2.f32 %v4524_v42  ;;  %v4526_v41 = vmul.f32 1.442695, %v4512_v34  ;;  %v4513_v52 = vsub.f32 %v10110_v17, %v4505_v12 }
 0xe28   :  { %v4530_v19 = vsel %vm1629_vm2, %v10165_v4, 0.0 }
 0xe29   :  { %v10170_v10 = vpop.eup %7141  ;;  %7151 = vpow2.f32 %v4526_v41  ;;  %v4528_v22 = vmul.f32 1.442695, %v4513_v52  ;;  %4531 = vadd.xlane.f32.xlu0 %v4530_v19 }
 0xe2a   :  { %v4533_v14 = vsel %vm1629_vm2, %v10170_v10, 0.0 }
 0xe2b   :  { %v10174_v33 = vpop.eup %7143  ;;  %7153 = vpow2.f32 %v4528_v22  ;;  %4534 = vadd.xlane.f32.xlu1 %v4533_v14 }
 0xe2c   :  { %v4536_v31 = vsel %vm1629_vm2, %v10174_v33, 0.0 }
 0xe2d   :  { %v10178_v50 = vpop.eup %7145  ;;  %4537 = vadd.xlane.f32.xlu0 %v4536_v31 }
 0xe2e   :  { %v4539_v17 = vsel %vm1629_vm2, %v10178_v50, 0.0 }
 0xe2f   :  { %v10182_v16 = vpop.eup %7147  ;;  %4540 = vadd.xlane.f32.xlu1 %v4539_v17 }
 0xe30   :  { %v4542_v44 = vsel %vm1629_vm2, %v10182_v16, 0.0 }
 0xe31   :  { %v10186_v25 = vpop.eup %7149  ;;  %4543 = vadd.xlane.f32.xlu0 %v4542_v44 }
 0xe32   :  { %v4545_v26 = vsel %vm1629_vm2, %v10186_v25, 0.0 }
 0xe33   :  { %v10190_v18 = vpop.eup %7151  ;;  %4546 = vadd.xlane.f32.xlu1 %v4545_v26 }
 0xe34   :  { %v4548_v3 = vsel %vm1629_vm2, %v10190_v18, 0.0 }
 0xe35   :  { %v10194_v35 = vpop.eup %7153  ;;  %4549 = vadd.xlane.f32.xlu0 %v4548_v3 }
 0xe36   :  { %v4551_v21 = vsel %vm1629_vm2, %v10194_v35, 0.0 }
 0xe37   :  { %4552 = vadd.xlane.f32.xlu1 %v4551_v21 }
 0xe48   :  { %4661 = vrot.lane.b32.xlu1 %v7317_v15, %s7319_s22 }
 0xe4b   :  { %4659 = vrot.lane.b32.xlu0 %v7318_v9, %s7319_s22 }
 0xe81   :  { %v4266_v32 = vpop.xlane.xlu0 %4265 }
 0xe82   :  { %7155 = vrcp.f32 %v4266_v32 }
 0xe83   :  { %v4269_v61 = vpop.xlane.xlu1 %4268 }
 0xe84   :  { %7157 = vrcp.f32 %v4269_v61 }
 0xe85   :  { %v4272_v24 = vpop.xlane.xlu0 %4271 }
 0xe86   :  { %7159 = vrcp.f32 %v4272_v24 }
 0xe87   :  { %v4275_v36 = vpop.xlane.xlu1 %4274 }
 0xe88   :  { %7161 = vrcp.f32 %v4275_v36 }
 0xe8c   :  { %v7156_v28 = vpop.eup %7155 }
 0xe8d   :  { %v4296_v59 = vmul.f32 %v7156_v28, %v10122_v29 }
 0xe8e   :  { %v7158_v57 = vpop.eup %7157 }
 0xe8f   :  { %v4297_v23 = vmul.f32 %v7158_v57, %v10126_v47 }
 0xe90   :  { %v7160_v39 = vpop.eup %7159 }
 0xe91   :  { %v4304_v27 = vpack.c.bf16 %v4297_v23, %v4296_v59  ;;  %v4298_v30 = vmul.f32 %v7160_v39, %v10130_v51 }
 0xe92   :  { %v7162_v7 = vpop.eup %7161 }
 0xe93   :  { %v4299_v49 = vmul.f32 %v7162_v7, %v10134_v37  ;;  %6581 = vmatprep.mubr.msk.bf16.mxu0 %vm1629_vm2, %v4304_v27 }
 0xe95   :  { %v4305_v43 = vpack.c.bf16 %v4299_v49, %v4298_v30 }
 0xe97   :  { %6582 = vmatmul.mubr.msk.bf16.vlgmr.msra.gmra.mrb[128].mxu0 %vm1629_vm2, %v4305_v43 }
 0xe98   :  { %6606 = vmatpush3.bf16.msra.mxu0 %v10990_v56 }
 0xe99   :  { %6607 = vmatprep.subr.bf16.mxu0 %v10991_v2 }
 0xe9c   :  { %6608 = vmatpush3.bf16.msra.mxu0 %v10991_v2 }
 0xe9d   :  { %6609 = vmatprep.subr.bf16.mxu0 %v9911_v45 }
 0xea0   :  { %6610 = vmatpush3.bf16.msra.mxu0 %v9911_v45 }
 0xea1   :  { %6611 = vmatprep.subr.bf16.mxu0 %v9904_v6 }
 0xea4   :  { %6612 = vmatpush3.bf16.msra.mxu0 %v9904_v6 }
 0xeaa   :  { %v4278_v29 = vpop.xlane.xlu0 %4277 }
 0xeab   :  { %7163 = vrcp.f32 %v4278_v29 }
 0xeac   :  { %v4281_v47 = vpop.xlane.xlu1 %4280 }
 0xead   :  { %7165 = vrcp.f32 %v4281_v47 }
 0xeae   :  { %v4284_v51 = vpop.xlane.xlu0 %4283 }
 0xeaf   :  { %7167 = vrcp.f32 %v4284_v51 }
 0xeb0   :  { %v4287_v37 = vpop.xlane.xlu1 %4286 }
 0xeb1   :  { %7169 = vrcp.f32 %v4287_v37 }
 0xeb5   :  { %v7164_v53 = vpop.eup %7163 }
 0xeb6   :  { %v4532_v54 = vpop.xlane.xlu0 %4531  ;;  %v4300_v0 = vmul.f32 %v7164_v53, %v10143_v5  ;;  %v6733_v53 = vld [vmem:[%s10674_s6 + $0x40] ss:$16 sps:$4 sm:$0xff]  }
 0xeb7   :  { %v7166_v48 = vpop.eup %7165  ;;  %7171 = vrcp.f32 %v4532_v54  ;;  %6641 = vmatprep.subr.bf16.mxu1 %v6733_v53  ;;  %v6734_v54 = vld [vmem:[%s10674_s6 + $0x60] ss:$16 sps:$4 sm:$0xff]  }
 0xeb8   :  { %v4535_v13 = vpop.xlane.xlu1 %4534  ;;  %v4301_v45 = vmul.f32 %v7166_v48, %v10148_v60  ;;  %6642 = vmatpush3.bf16.msra.mxu1 %v6733_v53  ;;  %v11006_v53 = vld [vmem:[#allocation43_spill] sm:$0xff] }
 0xeb9   :  { %v7168_v20 = vpop.eup %7167  ;;  %7173 = vrcp.f32 %v4535_v13  ;;  %6643 = vmatprep.subr.bf16.mxu1 %v6734_v54  ;;  %v10992_v13 = vld [vmem:[#allocation65_spill] sm:$0xff] }
 0xeba   :  { %v4538_v6 = vpop.xlane.xlu0 %4537  ;;  %v4306_v1 = vpack.c.bf16 %v4301_v45, %v4300_v0  ;;  %v4302_v55 = vmul.f32 %v7168_v20, %v10153_v62  ;;  %v5930_v20 = vld [vmem:[%s10672_s3 + $0x3] ss:$0 sm:$0xff] }
 0xebb   :  { %v7170_v63 = vpop.eup %7169  ;;  %7175 = vrcp.f32 %v4538_v6  ;;  %v10993_v6 = vld [vmem:[#allocation64_spill] sm:$0xff] }
 0xebc   :  { %v4541_v58 = vpop.xlane.xlu1 %4540  ;;  %6585 = vmatprep.mubr.msk.bf16.mxu0 %vm1629_vm2, %v4306_v1  ;;  %v4303_v8 = vmul.f32 %v7170_v63, %v10158_v38  ;;  %6644 = vmatpush3.bf16.msra.mxu1 %v6734_v54 }
 0xebd   :  { %7177 = vrcp.f32 %v4541_v58  ;;  %v10994_v58 = vld [vmem:[#allocation37_spill] sm:$0xff] }
 0xebe   :  { %v4544_v40 = vpop.xlane.xlu0 %4543  ;;  %v4307_v46 = vpack.c.bf16 %v4303_v8, %v4302_v55 }
 0xebf   :  { %7179 = vrcp.f32 %v4544_v40  ;;  %v10995_v40 = vld [vmem:[#allocation62_spill] sm:$0xff] }
 0xec0   :  { %v4547_v5 = vpop.xlane.xlu1 %4546  ;;  %6586 = vmatmul.mubr.msk.bf16.gmra.mrb[132].mxu0 %vm1629_vm2, %v4307_v46 }
 0xec1   :  { %v7172_v60 = vpop.eup %7171  ;;  %7181 = vrcp.f32 %v4547_v5 }
 0xec2   :  { %v4550_v11 = vpop.xlane.xlu0 %4549  ;;  %v4562_v12 = vmul.f32 %v7172_v60, %v10165_v4 }
 0xec3   :  { %v7174_v42 = vpop.eup %7173  ;;  %7183 = vrcp.f32 %v4550_v11 }
 0xec4   :  { %v4553_v34 = vpop.xlane.xlu1 %4552  ;;  %v4563_v41 = vmul.f32 %v7174_v42, %v10170_v10 }
 0xec5   :  { %v7176_v62 = vpop.eup %7175  ;;  %7185 = vrcp.f32 %v4553_v34 }
 0xec6   :  { %v4570_v38 = vpack.c.bf16 %v4563_v41, %v4562_v12  ;;  %v4660_v52 = vpop.permute.xlu0 %4659  ;;  %v4564_v22 = vmul.f32 %v7176_v62, %v10174_v33  ;;  %v10996_v62 = vld [vmem:[#allocation34_spill] sm:$0xff] }
 0xec7   :  { %v7178_v19 = vpop.eup %7177  ;;  %6621 = vmatprep.subr.bf16.mxu0 %v4660_v52 }
 0xec8   :  { %v4565_v14 = vmul.f32 %v7178_v19, %v10178_v50  ;;  %6613 = vmatprep.mubr.msk.bf16.mxu0 %vm1629_vm2, %v4570_v38  ;;  %v4662_v9 = vpop.permute.xlu1 %4661  ;;  %v10997_v19 = vld [vmem:[#allocation41_spill] sm:$0xff] }
 0xec9   :  { %v7180_v31 = vpop.eup %7179 }
 0xeca   :  { %v4571_v17 = vpack.c.bf16 %v4565_v14, %v4564_v22  ;;  %v4566_v4 = vmul.f32 %v7180_v31, %v10182_v16  ;;  %v10998_v31 = vld [vmem:[#allocation36_spill] sm:$0xff] }
 0xecb   :  { %v7182_v44 = vpop.eup %7181 }
 0xecc   :  { %6614 = vmatmul.mubr.msk.bf16.vlgmr.msra.gmra.mrb[136].mxu0 %vm1629_vm2, %v4571_v17  ;;  %v4567_v10 = vmul.f32 %v7182_v44, %v10186_v25 }
 0xecd   :  { %v7184_v26 = vpop.eup %7183  ;;  %6622 = vmatpush3.bf16.msra.mxu0 %v4660_v52 }
 0xece   :  { %v4572_v3 = vpack.c.bf16 %v4567_v10, %v4566_v4  ;;  %v4568_v33 = vmul.f32 %v7184_v26, %v10190_v18  ;;  %6623 = vmatprep.subr.bf16.mxu0 %v4662_v9  ;;  %v10999_v4 = vld [vmem:[#allocation35_spill] sm:$0xff] }
 0xecf   :  { %v7186_v21 = vpop.eup %7185 }
 0xed0   :  { %6617 = vmatprep.mubr.msk.bf16.mxu0 %vm1629_vm2, %v4572_v3  ;;  %v4569_v50 = vmul.f32 %v7186_v21, %v10194_v35 }
 0xed1   :  { %6624 = vmatpush3.bf16.msra.mxu0 %v4662_v9 }
 0xed2   :  { %v4573_v15 = vpack.c.bf16 %v4569_v50, %v4568_v33 }
 0xed4   :  { %6618 = vmatmul.mubr.msk.bf16.gmra.mrb[140].mxu0 %vm1629_vm2, %v4573_v15 }
 0xf6a   :  { %v6583_v32 = vpop.f32.mrb[128].mxu0 }
 0xf6b   :  { %v4354_v16 = vpop.f32.mrb[129].mxu0 }
 0xf6c   :  { %v6584_v61 = vpop.f32.mrb[130].mxu0 }
 0xf6d   :  { %v4652_v25 = vpack.c.bf16 %v6584_v61, %v6583_v32  ;;  %v4357_v24 = vpop.f32.mrb[131].mxu0  ;;  %v11000_v32 = vld [vmem:[#allocation45_spill] sm:$0xff] }
 0xf6e   :  { %v4651_v36 = vpack.c.bf16 %v4357_v24, %v4354_v16 }
 0xf70   :  { %6625 = vmatprep.mubr.msk.bf16.mxu0 %vm339_vm1, %v4651_v36 }
 0xf71   :  { %6626 = vmatmul.mubr.msk.bf16.vlgmr.msra.gmra.mrb[144].mxu0 %vm339_vm1, %v4652_v25  ;;  %v11001_v25 = vld [vmem:[#allocation38_spill] sm:$0xff] }
 0xf93   :  { %v6587_v28 = vpop.f32.mrb[132].mxu0 }
 0xf94   :  { %v4370_v18 = vpop.f32.mrb[133].mxu0 }
 0xf95   :  { %v6588_v57 = vpop.f32.mrb[134].mxu0 }
 0xf96   :  { %v4654_v35 = vpack.c.bf16 %v6588_v57, %v6587_v28  ;;  %v4373_v59 = vpop.f32.mrb[135].mxu0  ;;  %v11002_v28 = vld [vmem:[#allocation39_spill] sm:$0xff] }
 0xf97   :  { %v4653_v23 = vpack.c.bf16 %v4373_v59, %v4370_v18 }
 0xf99   :  { %6629 = vmatprep.mubr.msk.bf16.mxu0 %vm339_vm1, %v4653_v23 }
 0xf9a   :  { %6630 = vmatmul.mubr.msk.bf16.gmra.mrb[148].mxu0 %vm339_vm1, %v4654_v35  ;;  %v11003_v35 = vld [vmem:[#allocation40_spill] sm:$0xff] }
 0xf9f   :  { %v6615_v39 = vpop.f32.mrb[136].mxu0 }
 0xfa0   :  { %v4620_v27 = vpop.f32.mrb[137].mxu0 }
 0xfa1   :  { %v6616_v7 = vpop.f32.mrb[138].mxu0 }
 0xfa2   :  { %v4656_v30 = vpack.c.bf16 %v6616_v7, %v6615_v39  ;;  %v4623_v49 = vpop.f32.mrb[139].mxu0 }
 0xfa3   :  { %v4655_v43 = vpack.c.bf16 %v4623_v49, %v4620_v27 }
 0xfa5   :  { %6633 = vmatprep.mubr.msk.bf16.mxu0 %vm339_vm1, %v4655_v43 }
 0xfa6   :  { %6634 = vmatmul.mubr.msk.bf16.gmra.mrb[152].mxu0 %vm339_vm1, %v4656_v30 }
 0xfa7   :  { %v6619_v56 = vpop.f32.mrb[140].mxu0 }
 0xfa8   :  { %v4636_v2 = vpop.f32.mrb[141].mxu0 }
 0xfa9   :  { %v6620_v29 = vpop.f32.mrb[142].mxu0 }
 0xfaa   :  { %v4658_v47 = vpack.c.bf16 %v6620_v29, %v6619_v56  ;;  %v4639_v51 = vpop.f32.mrb[143].mxu0  ;;  %v11004_v56 = vld [vmem:[#allocation49_spill] sm:$0xff] }
 0xfab   :  { %v4657_v37 = vpack.c.bf16 %v4639_v51, %v4636_v2 }
 0xfad   :  { %6637 = vmatprep.mubr.msk.bf16.mxu0 %vm339_vm1, %v4657_v37 }
 0xfae   :  { %6638 = vmatmul.mubr.msk.bf16.gmra.mrb[156].mxu0 %vm339_vm1, %v4658_v47  ;;  %v11005_v47 = vld [vmem:[#allocation42_spill] sm:$0xff] }
0x1044   :  { %v6627_v48 = vpop.f32.mrb[144].mxu0 }
0x1045   :  { %v4788_v0 = vadd.f32 %v6627_v48, %v10992_v13  ;;  %v4723_v45 = vpop.f32.mrb[145].mxu0  ;;  %v11007_v13 = vld [vmem:[#allocation44_spill] sm:$0xff] }
0x1046   :  { %v4786_v1 = vadd.f32 %v4723_v45, %v10993_v6  ;;  %v6628_v63 = vpop.f32.mrb[146].mxu0 }
0x1047   :  { %v4789_v55 = vadd.f32 %v6628_v63, %v10994_v58  ;;  %v4726_v8 = vpop.f32.mrb[147].mxu0  ;;  %v4808_v5 = vadd.f32 %v5930_v20, %v4788_v0 }
0x1048   :  { %v4787_v46 = vadd.f32 %v4726_v8, %v10995_v40  ;;  %v4806_v11 = vadd.f32 %v5930_v20, %v4786_v1  ;;  %v6735_v8 = vld [vmem:[%s10674_s6 + $0x44] ss:$16 sps:$4 sm:$0xff]  }
0x1049   :  { %v4809_v60 = vadd.f32 %v5930_v20, %v4789_v55  ;;  %6661 = vmatprep.subr.bf16.mxu0 %v6735_v8  ;;  %v6736_v40 = vld [vmem:[%s10674_s6 + $0x64] ss:$16 sps:$4 sm:$0xff]  }
0x104a   :  { %v4807_v42 = vadd.f32 %v5930_v20, %v4787_v46  ;;  %6662 = vmatpush3.bf16.xpose.msra.mxu0 %v6735_v8 }
0x104b   :  { %v4823_v34 = vpack.c.bf16 %v4809_v60, %v4808_v5  ;;  %6663 = vmatprep.subr.bf16.mxu0 %v6736_v40 }
0x104c   :  { %v4822_v12 = vpack.c.bf16 %v4807_v42, %v4806_v11 }
0x104e   :  { %6645 = vmatprep.mubr.msk.bf16.mxu1 %vm339_vm1, %v4822_v12 }
0x104f   :  { %6646 = vmatmul.mubr.msk.bf16.vlgmr.msra.gmra.mrb[144].mxu1 %vm339_vm1, %v4823_v34 }
0x1052   :  { %6664 = vmatpush3.bf16.xpose.msra.mxu0 %v6736_v40 }
0x106d   :  { %v6631_v41 = vpop.f32.mrb[148].mxu0 }
0x106e   :  { %v4792_v38 = vadd.f32 %v6631_v41, %v10996_v62  ;;  %v4739_v52 = vpop.f32.mrb[149].mxu0 }
0x106f   :  { %v4790_v22 = vadd.f32 %v4739_v52, %v10997_v19  ;;  %v6632_v14 = vpop.f32.mrb[150].mxu0 }
0x1070   :  { %v4793_v17 = vadd.f32 %v6632_v14, %v10998_v31  ;;  %v4742_v44 = vpop.f32.mrb[151].mxu0  ;;  %v4812_v26 = vadd.f32 %v5930_v20, %v4792_v38 }
0x1071   :  { %v4791_v10 = vadd.f32 %v4742_v44, %v10999_v4  ;;  %v4810_v21 = vadd.f32 %v5930_v20, %v4790_v22 }
0x1072   :  { %v4813_v3 = vadd.f32 %v5930_v20, %v4793_v17 }
0x1073   :  { %v4811_v33 = vadd.f32 %v5930_v20, %v4791_v10 }
0x1074   :  { %v4825_v50 = vpack.c.bf16 %v4813_v3, %v4812_v26 }
0x1075   :  { %v4824_v15 = vpack.c.bf16 %v4811_v33, %v4810_v21 }
0x1077   :  { %6649 = vmatprep.mubr.msk.bf16.mxu1 %vm339_vm1, %v4824_v15 }
0x1078   :  { %6650 = vmatmul.mubr.msk.bf16.gmra.mrb[148].mxu1 %vm339_vm1, %v4825_v50 }
0x1079   :  { %v6635_v9 = vpop.f32.mrb[152].mxu0 }
0x107a   :  { %v4796_v16 = vadd.f32 %v6635_v9, %v11000_v32  ;;  %v4755_v61 = vpop.f32.mrb[153].mxu0 }
0x107b   :  { %v4794_v24 = vadd.f32 %v4755_v61, %v11001_v25  ;;  %v6636_v36 = vpop.f32.mrb[154].mxu0 }
0x107c   :  { %v4797_v18 = vadd.f32 %v6636_v36, %v11002_v28  ;;  %v4758_v57 = vpop.f32.mrb[155].mxu0  ;;  %v4816_v23 = vadd.f32 %v5930_v20, %v4796_v16 }
0x107d   :  { %v4795_v59 = vadd.f32 %v4758_v57, %v11003_v35  ;;  %v4814_v27 = vadd.f32 %v5930_v20, %v4794_v24 }
0x107e   :  { %v4817_v39 = vadd.f32 %v5930_v20, %v4797_v18 }
0x107f   :  { %v4815_v7 = vadd.f32 %v5930_v20, %v4795_v59 }
0x1080   :  { %v4827_v30 = vpack.c.bf16 %v4817_v39, %v4816_v23 }
0x1081   :  { %v4826_v49 = vpack.c.bf16 %v4815_v7, %v4814_v27  ;;  %v6639_v43 = vpop.f32.mrb[156].mxu0 }
0x1082   :  { %v4800_v2 = vadd.f32 %v6639_v43, %v11004_v56  ;;  %v4771_v29 = vpop.f32.mrb[157].mxu0 }
0x1083   :  { %v4798_v51 = vadd.f32 %v4771_v29, %v11005_v47  ;;  %v6640_v37 = vpop.f32.mrb[158].mxu0  ;;  %6653 = vmatprep.mubr.msk.bf16.mxu1 %vm339_vm1, %v4826_v49 }
0x1084   :  { %v4801_v54 = vadd.f32 %v6640_v37, %v11006_v53  ;;  %v4774_v48 = vpop.f32.mrb[159].mxu0  ;;  %6654 = vmatmul.mubr.msk.bf16.gmra.mrb[152].mxu1 %vm339_vm1, %v4827_v30  ;;  %v4820_v45 = vadd.f32 %v5930_v20, %v4800_v2 }
0x1085   :  { %v4799_v0 = vadd.f32 %v4774_v48, %v11007_v13  ;;  %v4818_v1 = vadd.f32 %v5930_v20, %v4798_v51 }
0x1086   :  { %v4821_v6 = vadd.f32 %v5930_v20, %v4801_v54 }
0x1087   :  { %v4819_v63 = vadd.f32 %v5930_v20, %v4799_v0  ;;  %v10287_v20 = vld [vmem:[%s10672_s3 + $0x7] ss:$0 sm:$0xff] }
0x1088   :  { %v4829_v58 = vpack.c.bf16 %v4821_v6, %v4820_v45 }
0x1089   :  { %v4828_v55 = vpack.c.bf16 %v4819_v63, %v4818_v1 }
0x108b   :  { %6657 = vmatprep.mubr.msk.bf16.mxu1 %vm339_vm1, %v4828_v55 }
0x108c   :  { %6658 = vmatmul.mubr.msk.bf16.gmra.mrb[156].mxu1 %vm339_vm1, %v4829_v58 }
0x1122   :  { %v6647_v46 = vpop.f32.mrb[144].mxu1 }
0x1123   :  { %v4913_v5 = vadd.f32 %v6647_v46, %v10287_v20  ;;  %v4904_v60 = vpop.f32.mrb[145].mxu1 }
0x1124   :  { %v4905_v11 = vadd.f32 %v10287_v20, %v4904_v60  ;;  %v6648_v42 = vpop.f32.mrb[146].mxu1 }
0x1125   :  { %v5944_v34 = vmul.f32 -1.442695, %v4913_v5  ;;  %v4916_v12 = vadd.f32 %v6648_v42, %v10287_v20  ;;  %v4907_v41 = vpop.f32.mrb[147].mxu1 }
0x1126   :  { %v5942_v62 = vmul.f32 -1.442695, %v4905_v11  ;;  %v4908_v38 = vadd.f32 %v10287_v20, %v4907_v41 }
0x1127   :  { %7187 = vpow2.f32 %v5944_v34  ;;  %v5945_v52 = vmul.f32 -1.442695, %v4916_v12 }
0x1128   :  { %7189 = vpow2.f32 %v5942_v62  ;;  %v5943_v19 = vmul.f32 -1.442695, %v4908_v38 }
0x1129   :  { %7191 = vpow2.f32 %v5945_v52 }
0x112a   :  { %7193 = vpow2.f32 %v5943_v19 }
0x1131   :  { %v7188_v22 = vpop.eup %7187 }
0x1132   :  { %v7190_v14 = vpop.eup %7189  ;;  %v5017_v31 = vadd.f32 1.0, %v7188_v22 }
0x1133   :  { %v7192_v17 = vpop.eup %7191  ;;  %v5015_v44 = vadd.f32 1.0, %v7190_v14 }
0x1134   :  { %v7194_v4 = vpop.eup %7193  ;;  %7195 = vrcp.f32 %v5017_v31  ;;  %v5018_v10 = vadd.f32 1.0, %v7192_v17 }
0x1135   :  { %7197 = vrcp.f32 %v5015_v44  ;;  %v5016_v26 = vadd.f32 1.0, %v7194_v4 }
0x1136   :  { %7199 = vrcp.f32 %v5018_v10 }
0x1137   :  { %7201 = vrcp.f32 %v5016_v26 }
0x113e   :  { %v7196_v3 = vpop.eup %7195 }
0x113f   :  { %v7198_v21 = vpop.eup %7197  ;;  %v5065_v15 = vmul.f32 %v7196_v3, %v4913_v5 }
0x1140   :  { %v7200_v33 = vpop.eup %7199  ;;  %v5063_v32 = vmul.f32 %v7198_v21, %v4905_v11 }
0x1141   :  { %v7202_v50 = vpop.eup %7201  ;;  %v5066_v9 = vmul.f32 %v7200_v33, %v4916_v12 }
0x1142   :  { %v5064_v16 = vmul.f32 %v7202_v50, %v4908_v38 }
0x1143   :  { %v5080_v61 = vpack.c.bf16 %v5066_v9, %v5065_v15 }
0x1144   :  { %v5079_v25 = vpack.c.bf16 %v5064_v16, %v5063_v32 }
0x1146   :  { %6665 = vmatprep.mubr.bf16.mxu0 %v5079_v25 }
0x1147   :  { %6666 = vmatmul.mubr.bf16.vlgmr.msra.gmra.mrb[160].mxu0 %v5080_v61 }
0x114b   :  { %v6651_v24 = vpop.f32.mrb[148].mxu1 }
0x114c   :  { %v10294_v36 = vadd.f32 %v6651_v24, %v10287_v20  ;;  %v4920_v28 = vpop.f32.mrb[149].mxu1 }
0x114d   :  { %v10297_v18 = vadd.f32 %v10287_v20, %v4920_v28  ;;  %v6652_v57 = vpop.f32.mrb[150].mxu1 }
0x114e   :  { %v5948_v35 = vmul.f32 -1.442695, %v10294_v36  ;;  %v4932_v59 = vadd.f32 %v6652_v57, %v10287_v20  ;;  %v4923_v23 = vpop.f32.mrb[151].mxu1 }
0x114f   :  { %v5946_v39 = vmul.f32 -1.442695, %v10297_v18  ;;  %v4924_v27 = vadd.f32 %v10287_v20, %v4923_v23 }
0x1150   :  { %7203 = vpow2.f32 %v5948_v35  ;;  %v5949_v7 = vmul.f32 -1.442695, %v4932_v59 }
0x1151   :  { %7205 = vpow2.f32 %v5946_v39  ;;  %v5947_v30 = vmul.f32 -1.442695, %v4924_v27 }
0x1152   :  { %7207 = vpow2.f32 %v5949_v7 }
0x1153   :  { %7209 = vpow2.f32 %v5947_v30 }
0x1157   :  { %v6655_v49 = vpop.f32.mrb[152].mxu1 }
0x1158   :  { %v10304_v43 = vadd.f32 %v6655_v49, %v10287_v20  ;;  %v4936_v56 = vpop.f32.mrb[153].mxu1 }
0x1159   :  { %v10307_v2 = vadd.f32 %v10287_v20, %v4936_v56  ;;  %v6656_v29 = vpop.f32.mrb[154].mxu1 }
0x115a   :  { %v7204_v47 = vpop.eup %7203  ;;  %v5952_v51 = vmul.f32 -1.442695, %v10304_v43  ;;  %v10311_v37 = vadd.f32 %v6656_v29, %v10287_v20  ;;  %v4939_v53 = vpop.f32.mrb[155].mxu1 }
0x115b   :  { %v7206_v54 = vpop.eup %7205  ;;  %v5021_v48 = vadd.f32 1.0, %v7204_v47  ;;  %v10314_v13 = vadd.f32 %v10287_v20, %v4939_v53  ;;  %v5950_v63 = vmul.f32 -1.442695, %v10307_v2 }
0x115c   :  { %v7208_v0 = vpop.eup %7207  ;;  %v5019_v45 = vadd.f32 1.0, %v7206_v54  ;;  %7211 = vpow2.f32 %v5952_v51  ;;  %v5953_v55 = vmul.f32 -1.442695, %v10311_v37 }
0x115d   :  { %v7210_v6 = vpop.eup %7209  ;;  %7213 = vrcp.f32 %v5021_v48  ;;  %v5022_v1 = vadd.f32 1.0, %v7208_v0  ;;  %v5951_v8 = vmul.f32 -1.442695, %v10314_v13 }
0x115e   :  { %7215 = vrcp.f32 %v5019_v45  ;;  %v5020_v58 = vadd.f32 1.0, %v7210_v6 }
0x115f   :  { %7217 = vrcp.f32 %v5022_v1  ;;  %v6659_v40 = vpop.f32.mrb[156].mxu1 }
0x1160   :  { %7219 = vrcp.f32 %v5020_v58  ;;  %v10320_v46 = vadd.f32 %v6659_v40, %v10287_v20  ;;  %v4952_v5 = vpop.f32.mrb[157].mxu1  ;;  %v5782_v58 = vld [vmem:[%s10675_s1 + $0x300] sm:$0xff]  ;;  %v5783_v40 = vld [vmem:[%s10675_s1 + $0x308] sm:$0xff] }
0x1161   :  { %7221 = vpow2.f32 %v5950_v63  ;;  %v10323_v60 = vadd.f32 %v10287_v20, %v4952_v5  ;;  %v6660_v11 = vpop.f32.mrb[158].mxu1  ;;  %v5784_v63 = vld [vmem:[%s10675_s1 + $0x310] sm:$0xff] }
0x1162   :  { %7223 = vpow2.f32 %v5953_v55  ;;  %v5956_v42 = vmul.f32 -1.442695, %v10320_v46  ;;  %v4964_v34 = vadd.f32 %v6660_v11, %v10287_v20  ;;  %v4955_v12 = vpop.f32.mrb[159].mxu1  ;;  %v5785_v55 = vld [vmem:[%s10675_s1 + $0x318] sm:$0xff]  ;;  %v5233_v11 = vmul.f32 %v5783_v40, %v5783_v40 }
0x1163   :  { %7225 = vpow2.f32 %v5951_v8  ;;  %v5954_v41 = vmul.f32 -1.442695, %v10323_v60  ;;  %v4956_v62 = vadd.f32 %v10287_v20, %v4955_v12  ;;  %v5234_v8 = vmul.f32 %v5784_v63, %v5784_v63 }
0x1164   :  { %7227 = vpow2.f32 %v5956_v42  ;;  %v5957_v38 = vmul.f32 -1.442695, %v4964_v34  ;;  %v5235_v5 = vmul.f32 %v5785_v55, %v5785_v55 }
0x1165   :  { %7229 = vpow2.f32 %v5954_v41  ;;  %v5955_v52 = vmul.f32 -1.442695, %v4956_v62  ;;  %v5250_v12 = vadd.f32 1.0, %v5234_v8 }
0x1166   :  { %v7212_v19 = vpop.eup %7211  ;;  %7231 = vpow2.f32 %v5957_v38 }
0x1167   :  { %v7214_v22 = vpop.eup %7213  ;;  %7233 = vpow2.f32 %v5955_v52  ;;  %v5025_v17 = vadd.f32 1.0, %v7212_v19  ;;  %v5799_v19 = vld [vmem:[%s10675_s1 + $0x388] sm:$0xff] }
0x1168   :  { %v7216_v14 = vpop.eup %7215  ;;  %v5069_v4 = vmul.f32 %v7214_v22, %v10294_v36  ;;  %v5251_v22 = vadd.f32 1.0, %v5235_v5 }
0x1169   :  { %v7218_v31 = vpop.eup %7217  ;;  %v5067_v3 = vmul.f32 %v7216_v14, %v10297_v18  ;;  %7235 = vrcp.f32 %v5025_v17  ;;  %v5329_v14 = vmul.f32 %v5799_v19, %v5799_v19 }
0x116a   :  { %v7220_v44 = vpop.eup %7219  ;;  %v5070_v10 = vmul.f32 %v7218_v31, %v4932_v59  ;;  %v5249_v31 = vadd.f32 1.0, %v5233_v11 }
0x116b   :  { %v7222_v26 = vpop.eup %7221  ;;  %v5068_v21 = vmul.f32 %v7220_v44, %v4924_v27 }
0x116c   :  { %v7224_v20 = vpop.eup %7223  ;;  %v5023_v33 = vadd.f32 1.0, %v7222_v26  ;;  %v5082_v50 = vpack.c.bf16 %v5070_v10, %v5069_v4  ;;  %v5345_v10 = vadd.f32 1.0, %v5329_v14  ;;  %v10370_v26 = vld [vmem:[%s10672_s3 + $0x5] ss:$0 sm:$0xff]  ;;  %v10407_v14 = vld [vmem:[%s10675_s1 + $0x3b0] sm:$0xff] }
0x116d   :  { %v7226_v15 = vpop.eup %7225  ;;  %v5026_v9 = vadd.f32 1.0, %v7224_v20  ;;  %v5081_v32 = vpack.c.bf16 %v5068_v21, %v5067_v3 }
0x116e   :  { %v7228_v16 = vpop.eup %7227  ;;  %7237 = vrcp.f32 %v5023_v33  ;;  %v5024_v61 = vadd.f32 1.0, %v7226_v15 }
0x116f   :  { %v7230_v25 = vpop.eup %7229  ;;  %7239 = vrcp.f32 %v5026_v9  ;;  %v5029_v24 = vadd.f32 1.0, %v7228_v16  ;;  %6669 = vmatprep.mubr.bf16.mxu0 %v5081_v32 }
0x1170   :  { %v7232_v36 = vpop.eup %7231  ;;  %7241 = vrcp.f32 %v5024_v61  ;;  %v5027_v28 = vadd.f32 1.0, %v7230_v25  ;;  %6670 = vmatmul.mubr.bf16.gmra.mrb[164].mxu0 %v5082_v50 }
0x1171   :  { %v7234_v18 = vpop.eup %7233  ;;  %7243 = vrcp.f32 %v5029_v24  ;;  %v5030_v57 = vadd.f32 1.0, %v7232_v36  ;;  %v11008_v36 = vld [vmem:[#allocation51_spill] sm:$0xff] }
0x1172   :  { %7245 = vrcp.f32 %v5027_v28  ;;  %v5028_v35 = vadd.f32 1.0, %v7234_v18 }
0x1173   :  { %7247 = vrcp.f32 %v5030_v57  ;;  %v7236_v59 = vpop.eup %7235 }
0x1174   :  { %7249 = vrcp.f32 %v5028_v35  ;;  %v5073_v7 = vmul.f32 %v7236_v59, %v10304_v43  ;;  %v11009_v35 = vld [vmem:[#allocation67_spill] sm:$0xff] }
0x1175   :  { %7251 = vrsqrt.f32 %v5250_v12  ;;  %v5788_v12 = vld [vmem:[%s10675_s1 + $0x330] sm:$0xff] }
0x1178   :  { %v7238_v23 = vpop.eup %7237 }
0x1179   :  { %v7240_v39 = vpop.eup %7239  ;;  %v5071_v56 = vmul.f32 %v7238_v23, %v10307_v2  ;;  %v6737_v2 = vld [vmem:[%s10676_s5] sm:$0xff]  }
0x117a   :  { %v7242_v27 = vpop.eup %7241  ;;  %v5074_v30 = vmul.f32 %v7240_v39, %v10311_v37  ;;  %6681 = vmatprep.subr.bf16.mxu1 %v6737_v2 }
0x117b   :  { %v7244_v49 = vpop.eup %7243  ;;  %v5072_v29 = vmul.f32 %v7242_v27, %v10314_v13  ;;  %v6738_v13 = vld [vmem:[%s10676_s5 + $0x8] sm:$0xff]   ;;  %6682 = vmatpush3.bf16.msra.mxu1 %v6737_v2  ;;  %v11010_v27 = vld [vmem:[#allocation2_spill] sm:$0xff] }
0x117c   :  { %v7246_v47 = vpop.eup %7245  ;;  %v5084_v51 = vpack.c.bf16 %v5074_v30, %v5073_v7  ;;  %v5077_v0 = vmul.f32 %v7244_v49, %v10320_v46  ;;  %6683 = vmatprep.subr.bf16.mxu1 %v6738_v13  ;;  %v5232_v46 = vmul.f32 %v5782_v58, %v5782_v58  ;;  %v11011_v49 = vld [vmem:[#allocation50_spill] sm:$0xff] }
0x117d   :  { %v7248_v53 = vpop.eup %7247  ;;  %v5083_v54 = vpack.c.bf16 %v5072_v29, %v5071_v56  ;;  %v5075_v6 = vmul.f32 %v7246_v47, %v10323_v60  ;;  %v5800_v60 = vld [vmem:[%s10675_s1 + $0x390] sm:$0xff]  ;;  %v11012_v47 = vld [vmem:[#allocation3_spill] sm:$0xff]  ;;  %v11015_v2 = vld [vmem:[#allocation6_spill] sm:$0xff] }
0x117e   :  { %v7250_v48 = vpop.eup %7249  ;;  %v5078_v45 = vmul.f32 %v7248_v53, %v4964_v34  ;;  %v5330_v42 = vmul.f32 %v5800_v60, %v5800_v60  ;;  %v5798_v34 = vld [vmem:[%s10675_s1 + $0x380] sm:$0xff]  ;;  %v5248_v38 = vadd.f32 1.0, %v5232_v46  ;;  %v5298_v7 = vmul.f32 %v5800_v60, %v11010_v27 }
0x117f   :  { %v5076_v1 = vmul.f32 %v7250_v48, %v4956_v62  ;;  %6673 = vmatprep.mubr.bf16.mxu0 %v5083_v54  ;;  %6684 = vmatpush3.bf16.msra.mxu1 %v6738_v13  ;;  %v5328_v41 = vmul.f32 %v5798_v34, %v5798_v34  ;;  %v5801_v62 = vld [vmem:[%s10675_s1 + $0x398] sm:$0xff]  ;;  %v7252_v16 = vpop.eup %7251  ;;  %v11013_v54 = vld [vmem:[#allocation68_spill] sm:$0xff]  ;;  %v5297_v13 = vmul.f32 %v5799_v19, %v11015_v2 }
0x1180   :  { %6674 = vmatmul.mubr.bf16.gmra.mrb[168].mxu0 %v5084_v51  ;;  %v5086_v43 = vpack.c.bf16 %v5078_v45, %v5077_v0  ;;  %v5331_v52 = vmul.f32 %v5801_v62, %v5801_v62  ;;  %v5346_v17 = vadd.f32 1.0, %v5330_v42  ;;  %7253 = vrsqrt.f32 %v5248_v38  ;;  %v11014_v45 = vld [vmem:[#allocation4_spill] sm:$0xff] }
0x1181   :  { %v5085_v37 = vpack.c.bf16 %v5076_v1, %v5075_v6  ;;  %v5344_v44 = vadd.f32 1.0, %v5328_v41  ;;  %7255 = vrsqrt.f32 %v5251_v22  ;;  %v5296_v51 = vmul.f32 %v5798_v34, %v11012_v47  ;;  %v5786_v41 = vld [vmem:[%s10675_s1 + $0x320] sm:$0xff]  ;;  %v10476_v47 = vld [vmem:[%s10675_s1 + $0x3c8] sm:$0xff]  ;;  %v10494_v2 = vld [vmem:[%s10675_s1 + $0x3f0] sm:$0xff] }
0x1182   :  { %v5347_v4 = vadd.f32 1.0, %v5331_v52  ;;  %7257 = vrsqrt.f32 %v5249_v31  ;;  %v5299_v6 = vmul.f32 %v5801_v62, %v11014_v45  ;;  %v10395_v62 = vld [vmem:[%s10675_s1 + $0x338] sm:$0xff]  ;;  %v5238_v38 = vmul.f32 %v5788_v12, %v5788_v12  ;;  %v10400_v52 = vld [vmem:[%s10675_s1 + $0x328] sm:$0xff] }
0x1183   :  { %6677 = vmatprep.mubr.bf16.mxu0 %v5085_v37  ;;  %7259 = vrsqrt.f32 %v5346_v17  ;;  %v5236_v19 = vmul.f32 %v5786_v41, %v5786_v41  ;;  %v5239_v22 = vmul.f32 %v10395_v62, %v10395_v62  ;;  %v5237_v31 = vmul.f32 %v10400_v52, %v10400_v52 }
0x1184   :  { %7261 = vrsqrt.f32 %v5344_v44  ;;  %v5334_v17 = vmul.f32 %v10407_v14, %v10407_v14  ;;  %v10416_v44 = vld [vmem:[%s10675_s1 + $0x3a0] sm:$0xff] }
0x1185   :  { %7263 = vrsqrt.f32 %v5347_v4  ;;  %v5254_v4 = vadd.f32 1.0, %v5238_v38 }
0x1186   :  { %7265 = vrsqrt.f32 %v5345_v10  ;;  %v5332_v10 = vmul.f32 %v10416_v44, %v10416_v44 }
0x1187   :  { %7267 = vrsqrt.f32 %v5254_v4 }
0x1188   :  { %6678 = vmatmul.mubr.bf16.gmra.mrb[172].mxu0 %v5086_v43 }
0x118a   :  { %v7254_v24 = vpop.eup %7253 }
0x118b   :  { %v7256_v57 = vpop.eup %7255 }
0x118c   :  { %v7258_v39 = vpop.eup %7257 }
0x118d   :  { %v7260_v29 = vpop.eup %7259 }
0x118e   :  { %v7262_v0 = vpop.eup %7261 }
0x118f   :  { %v7264_v37 = vpop.eup %7263 }
0x121a   :  { %v6667_v3 = vpop.f32.mrb[160].mxu0 }
0x121b   :  { %v5146_v21 = vadd.f32 %v6667_v3, %v10370_v26  ;;  %v5137_v20 = vpop.f32.mrb[161].mxu0  ;;  %v10423_v3 = vld [vmem:[%s10675_s1 + $0x3b8] sm:$0xff] }
0x121c   :  { %v5138_v33 = vadd.f32 %v10370_v26, %v5137_v20  ;;  %v6668_v50 = vpop.f32.mrb[162].mxu0  ;;  %v5335_v20 = vmul.f32 %v10423_v3, %v10423_v3 }
0x121d   :  { %v5202_v15 = vmul.f32 %v5784_v63, %v5146_v21  ;;  %v5149_v9 = vadd.f32 %v6668_v50, %v10370_v26  ;;  %v5140_v32 = vpop.f32.mrb[163].mxu0  ;;  %v5252_v21 = vadd.f32 1.0, %v5236_v19  ;;  %v5255_v50 = vadd.f32 1.0, %v5239_v22 }
0x121e   :  { %v5200_v61 = vmul.f32 %v5782_v58, %v5138_v33  ;;  %v5141_v25 = vadd.f32 %v10370_v26, %v5140_v32  ;;  %v10430_v33 = vld [vmem:[%s10675_s1 + $0x3a8] sm:$0xff]  ;;  %v5253_v32 = vadd.f32 1.0, %v5237_v31 }
0x121f   :  { %v5218_v28 = vadd.f32 %v5202_v15, %v11008_v36  ;;  %v5203_v18 = vmul.f32 %v5785_v55, %v5149_v9  ;;  %v7266_v55 = vpop.eup %7265  ;;  %v5333_v15 = vmul.f32 %v10430_v33, %v10430_v33  ;;  %v10437_v9 = vld [vmem:[%s10675_s1 + $0x3d0] sm:$0xff]  ;;  %7269 = vrsqrt.f32 %v5252_v21  ;;  %v11019_v31 = vld [vmem:[#allocation11_spill] sm:$0xff] }
0x1220   :  { %v5216_v59 = vadd.f32 %v5200_v61, %v11009_v35  ;;  %v5201_v23 = vmul.f32 %v5783_v40, %v5141_v25  ;;  %v5338_v61 = vmul.f32 %v10437_v9, %v10437_v9  ;;  %v5348_v25 = vadd.f32 1.0, %v5332_v10  ;;  %v11020_v10 = vld [vmem:[#allocation55_spill] sm:$0xff] }
0x1221   :  { %v5282_v30 = vmul.f32 %v7252_v16, %v5218_v28  ;;  %v5219_v56 = vadd.f32 %v5203_v18, %v11011_v49  ;;  %v5350_v16 = vadd.f32 1.0, %v5334_v17  ;;  %v5351_v36 = vadd.f32 1.0, %v5335_v20  ;;  %v10515_v20 = vld [vmem:[%s10675_s1 + $0x370] sm:$0xff] }
0x1222   :  { %v5280_v53 = vmul.f32 %v7254_v24, %v5216_v59  ;;  %v5217_v48 = vadd.f32 %v5201_v23, %v11013_v54  ;;  %v10444_v24 = vld [vmem:[%s10675_s1 + $0x3c0] sm:$0xff]  ;;  %7271 = vrsqrt.f32 %v5255_v50  ;;  %v5349_v18 = vadd.f32 1.0, %v5333_v15  ;;  %v10458_v23 = vld [vmem:[%s10675_s1 + $0x350] sm:$0xff] }
0x1223   :  { %v5314_v1 = vadd.f32 %v5298_v7, %v5282_v30  ;;  %v5283_v43 = vmul.f32 %v7256_v57, %v5219_v56  ;;  %v5336_v28 = vmul.f32 %v10444_v24, %v10444_v24  ;;  %v10451_v57 = vld [vmem:[%s10675_s1 + $0x3d8] sm:$0xff]  ;;  %7273 = vrsqrt.f32 %v5253_v32  ;;  %v10463_v7 = vld [vmem:[%s10675_s1 + $0x340] sm:$0xff] }
0x1224   :  { %v5312_v63 = vadd.f32 %v5296_v51, %v5280_v53  ;;  %v5281_v58 = vmul.f32 %v7258_v39, %v5217_v48  ;;  %7275 = vrsqrt.f32 %v5350_v16  ;;  %v5354_v35 = vadd.f32 1.0, %v5338_v61  ;;  %v10469_v56 = vld [vmem:[%s10675_s1 + $0x358] sm:$0xff]  ;;  %v10484_v48 = vld [vmem:[%s10675_s1 + $0x348] sm:$0xff] }
0x1225   :  { %v5315_v8 = vadd.f32 %v5299_v6, %v5283_v43  ;;  %v5378_v46 = vmul.f32 %v7260_v29, %v5314_v1  ;;  %v5339_v59 = vmul.f32 %v10451_v57, %v10451_v57  ;;  %7277 = vrsqrt.f32 %v5348_v25 }
0x1226   :  { %v5313_v40 = vadd.f32 %v5297_v13, %v5281_v58  ;;  %v5376_v60 = vmul.f32 %v7262_v0, %v5312_v63  ;;  %7279 = vrsqrt.f32 %v5351_v36  ;;  %v5352_v39 = vadd.f32 1.0, %v5336_v28  ;;  %v11023_v36 = vld [vmem:[#allocation13_spill] sm:$0xff] }
0x1227   :  { %v5379_v5 = vmul.f32 %v7264_v37, %v5315_v8  ;;  %7281 = vrsqrt.f32 %v5349_v18  ;;  %v10471_v29 = vadd.f32 1.0, %v5339_v59  ;;  %v5242_v54 = vmul.f32 %v10458_v23, %v10458_v23  ;;  %v7268_v37 = vpop.eup %7267 }
0x1228   :  { %v5377_v11 = vmul.f32 %v7266_v55, %v5313_v40  ;;  %7283 = vrsqrt.f32 %v5354_v35  ;;  %v5337_v0 = vmul.f32 %v10476_v47, %v10476_v47  ;;  %v5240_v43 = vmul.f32 %v10463_v7, %v10463_v7  ;;  %v11016_v40 = vld [vmem:[#allocation56_spill] sm:$0xff] }
0x1229   :  { %v5393_v42 = vpack.c.bf16 %v5379_v5, %v5378_v46  ;;  %7285 = vrsqrt.f32 %v5352_v39  ;;  %v5243_v58 = vmul.f32 %v10469_v56, %v10469_v56  ;;  %v7270_v55 = vpop.eup %7269  ;;  %v5342_v8 = vmul.f32 %v10494_v2, %v10494_v2 }
0x122a   :  { %v5392_v34 = vpack.c.bf16 %v5377_v11, %v5376_v60  ;;  %v5241_v60 = vmul.f32 %v10484_v48, %v10484_v48  ;;  %v5258_v19 = vadd.f32 1.0, %v5242_v54  ;;  %v5300_v17 = vmul.f32 %v10416_v44, %v11019_v31  ;;  %v10523_v44 = vld [vmem:[%s10675_s1 + $0x360] sm:$0xff] }
0x122b   :  { %v5259_v61 = vadd.f32 1.0, %v5243_v58  ;;  %v5301_v28 = vmul.f32 %v10430_v33, %v11023_v36  ;;  %v11024_v36 = vld [vmem:[#allocation60_spill] sm:$0xff] }
0x122c   :  { %6685 = vmatprep.mubr.msk.bf16.mxu1 %vm339_vm1, %v5392_v34  ;;  %v7272_v11 = vpop.eup %7271  ;;  %v5257_v59 = vadd.f32 1.0, %v5241_v60  ;;  %7287 = vrsqrt.f32 %v5258_v19 }
0x122d   :  { %6686 = vmatmul.mubr.msk.bf16.vlgmr.msra.gmra.mrb[160].mxu1 %vm339_vm1, %v5393_v42  ;;  %v11017_v42 = vld [vmem:[#allocation10_spill] sm:$0xff]  ;;  %v7274_v22 = vpop.eup %7273 }
0x122e   :  { %v5302_v34 = vmul.f32 %v10407_v14, %v11017_v42  ;;  %v7276_v50 = vpop.eup %7275  ;;  %v11021_v14 = vld [vmem:[#allocation12_spill] sm:$0xff]  ;;  %v10567_v42 = vld [vmem:[%s10675_s1 + $0x3e8] sm:$0xff] }
0x122f   :  { %v5303_v15 = vmul.f32 %v10423_v3, %v11021_v14  ;;  %v7278_v25 = vpop.eup %7277  ;;  %v10530_v3 = vld [vmem:[%s10675_s1 + $0x378] sm:$0xff] }
0x1230   :  { %v7280_v39 = vpop.eup %7279 }
0x1231   :  { %v7282_v33 = vpop.eup %7281 }
0x1243   :  { %v6671_v27 = vpop.f32.mrb[164].mxu0 }
0x1244   :  { %v5162_v30 = vadd.f32 %v6671_v27, %v10370_v26  ;;  %v5153_v49 = vpop.f32.mrb[165].mxu0 }
0x1245   :  { %v5154_v51 = vadd.f32 %v10370_v26, %v5153_v49  ;;  %v6672_v53 = vpop.f32.mrb[166].mxu0  ;;  %v5246_v49 = vmul.f32 %v10515_v20, %v10515_v20 }
0x1246   :  { %v5206_v45 = vmul.f32 %v5788_v12, %v5162_v30  ;;  %v5165_v6 = vadd.f32 %v6672_v53, %v10370_v26  ;;  %v5156_v1 = vpop.f32.mrb[167].mxu0  ;;  %v11018_v12 = vld [vmem:[#allocation52_spill] sm:$0xff]  ;;  %v5353_v53 = vadd.f32 1.0, %v5337_v0 }
0x1247   :  { %v5204_v13 = vmul.f32 %v5786_v41, %v5154_v51  ;;  %v5157_v63 = vadd.f32 %v10370_v26, %v5156_v1  ;;  %v10537_v51 = vld [vmem:[%s10675_s1 + $0x368] sm:$0xff]  ;;  %v5358_v1 = vadd.f32 1.0, %v5342_v8  ;;  %v5262_v60 = vadd.f32 1.0, %v5246_v49 }
0x1248   :  { %v5222_v46 = vadd.f32 %v5206_v45, %v11016_v40  ;;  %v5207_v5 = vmul.f32 %v10395_v62, %v5165_v6  ;;  %v5256_v62 = vadd.f32 1.0, %v5240_v43  ;;  %v5244_v45 = vmul.f32 %v10523_v44, %v10523_v44  ;;  %v10541_v6 = vpop.eup %7283  ;;  %v10559_v40 = vld [vmem:[%s10675_s1 + $0x3f8] sm:$0xff] }
0x1249   :  { %v5220_v41 = vadd.f32 %v5204_v13, %v11018_v12  ;;  %v5205_v38 = vmul.f32 %v10400_v52, %v5157_v63  ;;  %v11022_v52 = vld [vmem:[#allocation54_spill] sm:$0xff]  ;;  %v5245_v58 = vmul.f32 %v10537_v51, %v10537_v51 }
0x124a   :  { %v5286_v4 = vmul.f32 %v7268_v37, %v5222_v46  ;;  %v5223_v21 = vadd.f32 %v5207_v5, %v11020_v10  ;;  %7289 = vrsqrt.f32 %v5256_v62  ;;  %v5247_v37 = vmul.f32 %v10530_v3, %v10530_v3  ;;  %v10548_v13 = vld [vmem:[%s10675_s1 + $0x3e0] sm:$0xff] }
0x124b   :  { %v5284_v32 = vmul.f32 %v7270_v55, %v5220_v41  ;;  %v5221_v16 = vadd.f32 %v5205_v38, %v11022_v52  ;;  %7291 = vrsqrt.f32 %v5259_v61  ;;  %v10552_v55 = vpop.eup %7285  ;;  %v5340_v8 = vmul.f32 %v10548_v13, %v10548_v13 }
0x124c   :  { %v5318_v18 = vadd.f32 %v5302_v34, %v5286_v4  ;;  %v5287_v35 = vmul.f32 %v7272_v11, %v5223_v21  ;;  %7293 = vrsqrt.f32 %v5257_v59  ;;  %v5343_v11 = vmul.f32 %v10559_v40, %v10559_v40 }
0x124d   :  { %v5316_v27 = vadd.f32 %v5300_v17, %v5284_v32  ;;  %v5285_v30 = vmul.f32 %v7274_v22, %v5221_v16  ;;  %7295 = vrsqrt.f32 %v10471_v29  ;;  %v5260_v12 = vadd.f32 1.0, %v5244_v45  ;;  %v7288_v32 = vpop.eup %7287 }
0x124e   :  { %v5319_v54 = vadd.f32 %v5303_v15, %v5287_v35  ;;  %v5382_v0 = vmul.f32 %v7276_v50, %v5318_v18  ;;  %7297 = vrsqrt.f32 %v5353_v53  ;;  %v5341_v41 = vmul.f32 %v10567_v42, %v10567_v42  ;;  %v11025_v35 = vld [vmem:[#allocation53_spill] sm:$0xff] }
0x124f   :  { %v5317_v43 = vadd.f32 %v5301_v28, %v5285_v30  ;;  %v5380_v46 = vmul.f32 %v7278_v25, %v5316_v27  ;;  %v5263_v22 = vadd.f32 1.0, %v5247_v37  ;;  %7299 = vrsqrt.f32 %v5358_v1  ;;  %v11026_v30 = vld [vmem:[#allocation18_spill] sm:$0xff]  ;;  %v11029_v1 = vld [vmem:[#allocation57_spill] sm:$0xff] }
0x1250   :  { %v5383_v63 = vmul.f32 %v7280_v39, %v5319_v54  ;;  %v5261_v17 = vadd.f32 1.0, %v5245_v58  ;;  %v5356_v4 = vadd.f32 1.0, %v5340_v8  ;;  %7301 = vrsqrt.f32 %v5262_v60  ;;  %v11028_v54 = vld [vmem:[#allocation19_spill] sm:$0xff]  ;;  %v11031_v60 = vld [vmem:[#allocation21_spill] sm:$0xff] }
0x1251   :  { %v5381_v5 = vmul.f32 %v7282_v33, %v5317_v43  ;;  %v5359_v62 = vadd.f32 1.0, %v5343_v11  ;;  %7303 = vrsqrt.f32 %v5260_v12  ;;  %v5357_v52 = vadd.f32 1.0, %v5341_v41  ;;  %v11027_v33 = vld [vmem:[#allocation58_spill] sm:$0xff] }
0x1252   :  { %v5395_v34 = vpack.c.bf16 %v5383_v63, %v5382_v0  ;;  %7305 = vrsqrt.f32 %v5263_v22  ;;  %v5306_v49 = vmul.f32 %v10437_v9, %v11026_v30  ;;  %v5304_v45 = vmul.f32 %v10444_v24, %v11028_v54  ;;  %v11030_v63 = vld [vmem:[#allocation20_spill] sm:$0xff] }
0x1253   :  { %v6675_v38 = vpop.f32.mrb[168].mxu0  ;;  %v5394_v19 = vpack.c.bf16 %v5381_v5, %v5380_v46  ;;  %7307 = vrsqrt.f32 %v5261_v17  ;;  %v5305_v11 = vmul.f32 %v10476_v47, %v11031_v60  ;;  %v11032_v47 = vld [vmem:[#allocation66_spill] sm:$0xff] }
0x1254   :  { %v5178_v29 = vadd.f32 %v6675_v38, %v10370_v26  ;;  %v5169_v31 = vpop.f32.mrb[169].mxu0  ;;  %v7290_v25 = vpop.eup %7289  ;;  %7309 = vrsqrt.f32 %v5356_v4 }
0x1255   :  { %v5170_v10 = vadd.f32 %v10370_v26, %v5169_v31  ;;  %v6676_v21 = vpop.f32.mrb[170].mxu0  ;;  %6689 = vmatprep.mubr.msk.bf16.mxu1 %vm339_vm1, %v5394_v19  ;;  %7311 = vrsqrt.f32 %v5359_v62 }
0x1256   :  { %v5210_v50 = vmul.f32 %v10458_v23, %v5178_v29  ;;  %v5181_v14 = vadd.f32 %v6676_v21, %v10370_v26  ;;  %v5172_v15 = vpop.f32.mrb[171].mxu0  ;;  %6690 = vmatmul.mubr.msk.bf16.gmra.mrb[164].mxu1 %vm339_vm1, %v5395_v34  ;;  %v7292_v23 = vpop.eup %7291  ;;  %7313 = vrsqrt.f32 %v5357_v52  ;;  %v11033_v52 = vld [vmem:[#allocation59_spill] sm:$0xff] }
0x1257   :  { %v5208_v16 = vmul.f32 %v10463_v7, %v5170_v10  ;;  %v5173_v61 = vadd.f32 %v10370_v26, %v5172_v15  ;;  %v7294_v27 = vpop.eup %7293 }
0x1258   :  { %v5226_v28 = vadd.f32 %v5210_v50, %v11024_v36  ;;  %v5211_v18 = vmul.f32 %v10469_v56, %v5181_v14  ;;  %v7296_v0 = vpop.eup %7295 }
0x1259   :  { %v5224_v59 = vadd.f32 %v5208_v16, %v11025_v35  ;;  %v5209_v39 = vmul.f32 %v10484_v48, %v5173_v61  ;;  %v5307_v48 = vmul.f32 %v10451_v57, %v11030_v63  ;;  %v7298_v5 = vpop.eup %7297 }
0x125a   :  { %v5290_v7 = vmul.f32 %v7288_v32, %v5226_v28  ;;  %v5227_v53 = vadd.f32 %v5211_v18, %v11027_v33  ;;  %v7300_v38 = vpop.eup %7299  ;;  %v11035_v18 = vld [vmem:[#allocation63_spill] sm:$0xff] }
0x125b   :  { %v5288_v56 = vmul.f32 %v7290_v25, %v5224_v59  ;;  %v5225_v43 = vadd.f32 %v5209_v39, %v11029_v1  ;;  %v6679_v37 = vpop.f32.mrb[172].mxu0  ;;  %v7302_v31 = vpop.eup %7301  ;;  %v11036_v59 = vld [vmem:[#allocation27_spill] sm:$0xff] }
0x125c   :  { %v5322_v58 = vadd.f32 %v5306_v49, %v5290_v7  ;;  %v5291_v8 = vmul.f32 %v7292_v23, %v5227_v53  ;;  %v5194_v9 = vadd.f32 %v6679_v37, %v10370_v26  ;;  %v5185_v46 = vpop.f32.mrb[173].mxu0  ;;  %v7304_v21 = vpop.eup %7303  ;;  %v11038_v7 = vld [vmem:[#allocation28_spill] sm:$0xff] }
0x125d   :  { %v5320_v34 = vadd.f32 %v5304_v45, %v5288_v56  ;;  %v5289_v24 = vmul.f32 %v7294_v27, %v5225_v43  ;;  %v5186_v12 = vadd.f32 %v10370_v26, %v5185_v46  ;;  %v6680_v41 = vpop.f32.mrb[174].mxu0  ;;  %v7306_v32 = vpop.eup %7305  ;;  %v11037_v27 = vld [vmem:[#allocation61_spill] sm:$0xff] }
0x125e   :  { %v5323_v19 = vadd.f32 %v5307_v48, %v5291_v8  ;;  %v5214_v22 = vmul.f32 %v10515_v20, %v5194_v9  ;;  %v5197_v57 = vadd.f32 %v6680_v41, %v10370_v26  ;;  %v5188_v29 = vpop.f32.mrb[175].mxu0  ;;  %v5386_v14 = vmul.f32 %v10541_v6, %v5322_v58  ;;  %v7308_v36 = vpop.eup %7307 }
0x125f   :  { %v5321_v17 = vadd.f32 %v5305_v11, %v5289_v24  ;;  %v5212_v4 = vmul.f32 %v10523_v44, %v5186_v12  ;;  %v5189_v10 = vadd.f32 %v10370_v26, %v5188_v29  ;;  %v5384_v61 = vmul.f32 %v10552_v55, %v5320_v34  ;;  %v11034_v44 = vld [vmem:[#allocation26_spill] sm:$0xff] }
0x1260   :  { %v5230_v62 = vadd.f32 %v5214_v22, %v11032_v47  ;;  %v5215_v50 = vmul.f32 %v10530_v3, %v5197_v57  ;;  %v5387_v15 = vmul.f32 %v7296_v0, %v5323_v19  ;;  %v5310_v26 = vmul.f32 %v10494_v2, %v11034_v44  ;;  %v7310_v3 = vpop.eup %7309  ;;  %v11039_v2 = vld [vmem:[#allocation29_spill] sm:$0xff] }
0x1261   :  { %v5228_v20 = vadd.f32 %v5212_v4, %v11033_v52  ;;  %v5213_v16 = vmul.f32 %v10537_v51, %v5189_v10  ;;  %v5385_v25 = vmul.f32 %v7298_v5, %v5321_v17  ;;  %v5308_v6 = vmul.f32 %v10548_v13, %v11036_v59  ;;  %v7312_v51 = vpop.eup %7311 }
0x1262   :  { %v5294_v28 = vmul.f32 %v7302_v31, %v5230_v62  ;;  %v5231_v23 = vadd.f32 %v5215_v50, %v11035_v18  ;;  %v5397_v35 = vpack.c.bf16 %v5387_v15, %v5386_v14  ;;  %v5311_v55 = vmul.f32 %v10559_v40, %v11038_v7  ;;  %v7314_v54 = vpop.eup %7313 }
0x1263   :  { %v5292_v39 = vmul.f32 %v7304_v21, %v5228_v20  ;;  %v5229_v30 = vadd.f32 %v5213_v16, %v11037_v27  ;;  %v5396_v49 = vpack.c.bf16 %v5385_v25, %v5384_v61  ;;  %v5309_v45 = vmul.f32 %v10567_v42, %v11039_v2  ;;  %v5961_v42 = vld [vmem:[%s10672_s3 + $0x1] ss:$0 sm:$0xff] }
0x1264   :  { %v5326_v33 = vadd.f32 %v5310_v26, %v5294_v28  ;;  %v5295_v53 = vmul.f32 %v7306_v32, %v5231_v23 }
0x1265   :  { %v5324_v56 = vadd.f32 %v5308_v6, %v5292_v39  ;;  %v5293_v1 = vmul.f32 %v7308_v36, %v5229_v30  ;;  %6693 = vmatprep.mubr.msk.bf16.mxu1 %vm339_vm1, %v5396_v49 }
0x1266   :  { %v5327_v43 = vadd.f32 %v5311_v55, %v5295_v53  ;;  %6694 = vmatmul.mubr.msk.bf16.gmra.mrb[168].mxu1 %vm339_vm1, %v5397_v35  ;;  %v5390_v37 = vmul.f32 %v7300_v38, %v5326_v33 }
0x1267   :  { %v5325_v13 = vadd.f32 %v5309_v45, %v5293_v1  ;;  %v5388_v63 = vmul.f32 %v7310_v3, %v5324_v56 }
0x1268   :  { %v5391_v0 = vmul.f32 %v7312_v51, %v5327_v43 }
0x1269   :  { %v5389_v48 = vmul.f32 %v7314_v54, %v5325_v13 }
0x126a   :  { %v5399_v58 = vpack.c.bf16 %v5391_v0, %v5390_v37 }
0x126b   :  { %v5398_v40 = vpack.c.bf16 %v5389_v48, %v5388_v63 }
0x126d   :  { %6697 = vmatprep.mubr.msk.bf16.mxu1 %vm339_vm1, %v5398_v40 }
0x126e   :  { %6698 = vmatmul.mubr.msk.bf16.gmra.mrb[172].mxu1 %vm339_vm1, %v5399_v58 }
0x1300   :  { %v6687_v8 = vpop.f32.mrb[160].mxu1 }
0x1301   :  { %v5487_v9 = vadd.f32 %v6687_v8, %v5961_v42  ;;  %v5478_v46 = vpop.f32.mrb[161].mxu1 }
0x1302   :  { %v5479_v5 = vadd.f32 %v5961_v42, %v5478_v46  ;;  %v6688_v60 = vpop.f32.mrb[162].mxu1 }
0x1303   :  { %5543 = vst [vmem:[%s10677_s7 + $0x10] sm:$0xff] %v5487_v9  ;;  %v5490_v11 = vadd.f32 %v6688_v60, %v5961_v42  ;;  %v5481_v34 = vpop.f32.mrb[163].mxu1 }
0x1304   :  { %5541 = vst [vmem:[%s10677_s7] sm:$0xff] %v5479_v5  ;;  %v5482_v24 = vadd.f32 %v5961_v42, %v5481_v34 }
0x1305   :  { %5544 = vst [vmem:[%s10677_s7 + $0x18] sm:$0xff] %v5490_v11 }
0x1306   :  { %5542 = vst [vmem:[%s10677_s7 + $0x8] sm:$0xff] %v5482_v24 }
0x1329   :  { %v6691_v12 = vpop.f32.mrb[164].mxu1 }
0x132a   :  { %v5503_v41 = vadd.f32 %v6691_v12, %v5961_v42  ;;  %v5494_v38 = vpop.f32.mrb[165].mxu1 }
0x132b   :  { %v5495_v19 = vadd.f32 %v5961_v42, %v5494_v38  ;;  %v6692_v22 = vpop.f32.mrb[166].mxu1 }
0x132c   :  { %5547 = vst [vmem:[%s10677_s7 + $0x30] sm:$0xff] %v5503_v41  ;;  %v5506_v57 = vadd.f32 %v6692_v22, %v5961_v42  ;;  %v5497_v29 = vpop.f32.mrb[167].mxu1 }
0x132d   :  { %5545 = vst [vmem:[%s10677_s7 + $0x20] sm:$0xff] %v5495_v19  ;;  %v5498_v31 = vadd.f32 %v5961_v42, %v5497_v29 }
0x132e   :  { %5548 = vst [vmem:[%s10677_s7 + $0x38] sm:$0xff] %v5506_v57 }
0x132f   :  { %5546 = vst [vmem:[%s10677_s7 + $0x28] sm:$0xff] %v5498_v31 }
0x1339   :  { %v6695_v17 = vpop.f32.mrb[168].mxu1 }
0x133a   :  { %v5519_v4 = vadd.f32 %v6695_v17, %v5961_v42  ;;  %v5510_v10 = vpop.f32.mrb[169].mxu1 }
0x133b   :  { %v5511_v21 = vadd.f32 %v5961_v42, %v5510_v10  ;;  %v6696_v47 = vpop.f32.mrb[170].mxu1 }
0x133c   :  { %5551 = vst [vmem:[%s10677_s7 + $0x50] sm:$0xff] %v5519_v4  ;;  %v5522_v62 = vadd.f32 %v6696_v47, %v5961_v42  ;;  %v5513_v50 = vpop.f32.mrb[171].mxu1 }
0x133d   :  { %5549 = vst [vmem:[%s10677_s7 + $0x40] sm:$0xff] %v5511_v21  ;;  %v5514_v14 = vadd.f32 %v5961_v42, %v5513_v50 }
0x133e   :  { %5552 = vst [vmem:[%s10677_s7 + $0x58] sm:$0xff] %v5522_v62 }
0x133f   :  { %5550 = vst [vmem:[%s10677_s7 + $0x48] sm:$0xff] %v5514_v14 }
0x1341   :  { %v6699_v15 = vpop.f32.mrb[172].mxu1 }
0x1342   :  { %v5535_v32 = vadd.f32 %v6699_v15, %v5961_v42  ;;  %v5526_v52 = vpop.f32.mrb[173].mxu1 }
0x1343   :  { %v5527_v20 = vadd.f32 %v5961_v42, %v5526_v52  ;;  %v6700_v16 = vpop.f32.mrb[174].mxu1 }
0x1344   :  { %5555 = vst [vmem:[%s10677_s7 + $0x70] sm:$0xff] %v5535_v32  ;;  %v5538_v61 = vadd.f32 %v6700_v16, %v5961_v42  ;;  %v5529_v25 = vpop.f32.mrb[175].mxu1 }
0x1345   :  { %5553 = vst [vmem:[%s10677_s7 + $0x60] sm:$0xff] %v5527_v20  ;;  %v5530_v36 = vadd.f32 %v5961_v42, %v5529_v25 }
0x1346   :  { %5556 = vst [vmem:[%s10677_s7 + $0x78] sm:$0xff] %v5538_v61 }
0x1347   :  { %5554 = vst [vmem:[%s10677_s7 + $0x68] sm:$0xff] %v5530_v36 }

</bundles_post_ra>
